<compile_context>
chip_gen: v5e
topology: v5e:2x2
jax: 0.10.0
libtpu: 0.0.40
codegen_flags: <defaults>
</compile_context>

<pallas_src>
import functools

import jax
import jax.numpy as jnp
from jax import lax
from jax.experimental import pallas as pl
from jax.experimental.pallas import tpu as pltpu

_EPS = 1e-5
_PW = 8          # width of the W-side halo (sublane aligned -> aligned stores)
_LANES = 128


def _ceil_to(x, m):
    return ((x + m - 1) // m) * m


# --------------------------------------------------------------------------- #
# in-kernel helpers
# --------------------------------------------------------------------------- #
def _fill_padded(pad_ref, interior, hin, win):
    """Write `interior` (hin, win, c) into pad_ref (hin+2, win+2*_PW, c),
    zeroing only the halo strips (no full-buffer zero fill)."""
    c = interior.shape[-1]
    zrow = jnp.zeros((win + 2 * _PW, c), pad_ref.dtype)
    pad_ref[0, :, :] = zrow                          # top halo row
    pad_ref[hin + 1, :, :] = zrow                    # bottom halo row
    zcol = jnp.zeros((hin + 2, _PW, c), pad_ref.dtype)
    pad_ref[:, 0:_PW, :] = zcol                      # left halo columns
    pad_ref[:, win + _PW:win + 2 * _PW, :] = zcol    # right halo columns
    pad_ref[1:hin + 1, _PW:win + _PW, :] = interior.astype(pad_ref.dtype)


def _taps(xpad, hout, wout, stride, cin):
    """9 shifted/strided views of a spatially padded value, each (rows, cin)."""
    rows = hout * wout
    out = []
    for kh in range(3):
        for kw in range(3):
            p = xpad[kh:kh + (hout - 1) * stride + 1:stride,
                     (_PW - 1 + kw):(_PW - 1 + kw) + (wout - 1) * stride + 1:stride,
                     :]
            out.append(p.reshape(rows, cin))
    return out


def _sums(x, cp):
    """Per-channel (sum, sum-of-squares) of a (rows, cp) f32 value."""
    s = jnp.sum(x, axis=0, keepdims=True).reshape(1, 1, cp)
    q = jnp.sum(x * x, axis=0, keepdims=True).reshape(1, 1, cp)
    return s, q


# --------------------------------------------------------------------------- #
# pass 1: conv1 (stride, single K=9*Cin dot) + shortcut BN partial stats
# --------------------------------------------------------------------------- #
def _make_pass1(H, W, Cin, Cp, stride, use_proj):
    Hout = (H - 1) // stride + 1
    Wout = (W - 1) // stride + 1
    rows = Hout * Wout

    def kernel(*refs):
        if use_proj:
            (x_ref, w1_ref, ws_ref,
             h1_ref, h1s_ref, h1q_ref, ss_ref, sq_ref, xpad_ref) = refs
        else:
            x_ref, w1_ref, h1_ref, h1s_ref, h1q_ref, xpad_ref = refs

        xv = x_ref[...].reshape(H, W, Cin)
        _fill_padded(xpad_ref, xv, H, W)
        xp = xpad_ref[...]

        # conv1: 9 taps folded into one (rows, 9*Cin) patch -> single MXU dot
        patch = jnp.concatenate(_taps(xp, Hout, Wout, stride, Cin), axis=-1)
        h1 = jnp.dot(patch, w1_ref[...], preferred_element_type=jnp.float32)
        h1_ref[...] = h1.reshape(1, rows, Cp).astype(h1_ref.dtype)   # bf16 store
        h1s_ref[...], h1q_ref[...] = _sums(h1, Cp)

        if use_proj:
            # shortcut 1x1 projection: only its BN stats are emitted; the
            # (cheap) projection itself is recomputed in pass 3 from x.
            xs = xv[0:(Hout - 1) * stride + 1:stride,
                    0:(Wout - 1) * stride + 1:stride, :].reshape(rows, Cin)
            sc = jnp.dot(xs, ws_ref[...], preferred_element_type=jnp.float32)
            ss_ref[...], sq_ref[...] = _sums(sc, Cp)

    return kernel


# --------------------------------------------------------------------------- #
# pass 2: folded BN1 + ReLU + conv2 (bf16 im2col, one K=9*Cp dot) + BN2 stats
# --------------------------------------------------------------------------- #
def _make_pass2(Hout, Wout, Cp):
    rows = Hout * Wout

    def kernel(h1_ref, sc1_ref, sh1_ref, w2_ref,
               h2_ref, h2s_ref, h2q_ref, pad_ref, col_ref):
        # BN1 folded to scale/shift (2 VPU ops) fused with ReLU, in f32
        h1 = h1_ref[...].reshape(rows, Cp).astype(jnp.float32)
        h1n = jnp.maximum(h1 * sc1_ref[...] + sh1_ref[...], 0.0)

        # bf16 spatial halo buffer, then bf16 im2col with 128-aligned stores
        _fill_padded(pad_ref, h1n.reshape(Hout, Wout, Cp), Hout, Wout)
        xp = pad_ref[...]
        for t, tap in enumerate(_taps(xp, Hout, Wout, 1, Cp)):
            col_ref[:, t * Cp:(t + 1) * Cp] = tap

        # one K = 9*Cp bf16 MXU contraction, f32 accumulate
        h2 = jnp.dot(col_ref[...], w2_ref[...],
                     preferred_element_type=jnp.float32)
        h2_ref[...] = h2.reshape(1, rows, Cp).astype(h2_ref.dtype)   # bf16 store
        h2s_ref[...], h2q_ref[...] = _sums(h2, Cp)

    return kernel


# --------------------------------------------------------------------------- #
# pass 3: folded BN2 + recomputed shortcut + folded shortcut-BN + add + ReLU
# --------------------------------------------------------------------------- #
def _make_pass3(H, W, Cin, Cp, stride):
    Hout = (H - 1) // stride + 1
    Wout = (W - 1) // stride + 1
    rows = Hout * Wout

    def kernel(h2_ref, x_ref, ws_ref, sc2_ref, sh2_ref, scs_ref, shs_ref,
               o_ref):
        h2 = h2_ref[...].reshape(rows, Cp).astype(jnp.float32)
        xv = x_ref[...].reshape(H, W, Cin)
        xs = xv[0:(Hout - 1) * stride + 1:stride,
                0:(Wout - 1) * stride + 1:stride, :].reshape(rows, Cin)
        # 1x1 projection (ws == I in the identity-shortcut case): tiny K=Cin dot
        sc = jnp.dot(xs, ws_ref[...], preferred_element_type=jnp.float32)
        out = jnp.maximum(h2 * sc2_ref[...] + sh2_ref[...]
                          + sc * scs_ref[...] + shs_ref[...], 0.0)
        o_ref[...] = out.reshape(1, rows, Cp)

    return kernel


# --------------------------------------------------------------------------- #
# weight packing
# --------------------------------------------------------------------------- #
def _pack_w1(w, cp):
    """(3,3,cin,cout) -> (9*cin, cp) f32, tap-major (matches the concat order)."""
    _, _, cin, cout = w.shape
    wp = jnp.pad(w, ((0, 0), (0, 0), (0, 0), (0, cp - cout)))
    return wp.reshape(9 * cin, cp).astype(jnp.float32)


def _pack_w2(w, cp):
    """(3,3,cin,cout) -> (9*cp, cp) bf16, BOTH channel dims padded to cp so the
    contraction dim matches the (rows, 9*cp) im2col patch."""
    _, _, cin, cout = w.shape
    wp = jnp.pad(w, ((0, 0), (0, 0), (0, cp - cin), (0, cp - cout)))
    return wp.reshape(9 * cp, cp).astype(jnp.bfloat16)


# --------------------------------------------------------------------------- #
# wrapper
# --------------------------------------------------------------------------- #
@functools.partial(jax.jit, static_argnames=("stride",))
def residual_block(x_nhwc, params, stride=1):
    """x_nhwc: (N, H, W, Cin) f32 -> (N, Hout, Wout, Cout) f32."""
    N, H, W, Cin = x_nhwc.shape
    Cout = params["w1"].shape[-1]
    Cp = _ceil_to(Cout, _LANES)
    Hout = (H - 1) // stride + 1
    Wout = (W - 1) // stride + 1
    rows = Hout * Wout
    use_proj = (stride != 1) or (Cin != Cout)
    f32, bf16 = jnp.float32, jnp.bfloat16

    def pad_c(v):                                   # (1,Cout)/(Cout,) -> (1,Cp)
        return jnp.pad(v.reshape(1, Cout), ((0, 0), (0, Cp - Cout)))

    w1p = _pack_w1(params["w1"], Cp)
    w2p = _pack_w2(params["w2"], Cp)
    g1, b1 = pad_c(params["g1"]), pad_c(params["b1"])
    g2, b2 = pad_c(params["g2"]), pad_c(params["b2"])
    if use_proj:
        wsp = jnp.pad(params["ws"].reshape(Cin, Cout),
                      ((0, 0), (0, Cp - Cout))).astype(f32)
        gs, bs = pad_c(params["gs"]), pad_c(params["bs"])
    else:
        wsp = jnp.eye(Cin, Cp, dtype=f32)           # identity projection

    # NOTE: tune per generation (v7x has only 64 MiB physical VMEM).
    cparams = pltpu.CompilerParams(dimension_semantics=("parallel",),
                                   vmem_limit_bytes=64 * 1024 * 1024)

    act_bf = jax.ShapeDtypeStruct((N, rows, Cp), bf16)    # inter-pass in bf16
    act_f32 = jax.ShapeDtypeStruct((N, rows, Cp), f32)
    vec = jax.ShapeDtypeStruct((N, 1, Cp), f32)
    tile_act = pl.BlockSpec((1, rows, Cp), lambda n: (n, 0, 0))
    tile_vec = pl.BlockSpec((1, 1, Cp), lambda n: (n, 0, 0))
    tile_x = pl.BlockSpec((1, H, W, Cin), lambda n: (n, 0, 0, 0))

    def rep(shape):                                 # whole array, grid-invariant
        return pl.BlockSpec(shape, lambda n, _r=len(shape): (0,) * _r)

    # ---- pass 1 ------------------------------------------------------------
    p1_kernel = _make_pass1(H, W, Cin, Cp, stride, use_proj)
    p1_scratch = [pltpu.VMEM((H + 2, W + 2 * _PW, Cin), f32)]
    if use_proj:
        h1_raw, h1_sum, h1_sq, s_sum, s_sq = pl.pallas_call(
            p1_kernel,
            grid=(N,),
            in_specs=[tile_x, rep(w1p.shape), rep(wsp.shape)],
            out_specs=(tile_act, tile_vec, tile_vec, tile_vec, tile_vec),
            out_shape=(act_bf, vec, vec, vec, vec),
            scratch_shapes=p1_scratch,
            compiler_params=cparams,
        )(x_nhwc, w1p, wsp)
    else:
        h1_raw, h1_sum, h1_sq = pl.pallas_call(
            p1_kernel,
            grid=(N,),
            in_specs=[tile_x, rep(w1p.shape)],
            out_specs=(tile_act, tile_vec, tile_vec),
            out_shape=(act_bf, vec, vec),
            scratch_shapes=p1_scratch,
            compiler_params=cparams,
        )(x_nhwc, w1p)

    # ---- fold BN affines (tiny (1,Cp) math, f32) ----------------------------
    cnt = N * rows

    def fold(psum, psq, g, b):
        mean = jnp.sum(psum, axis=0) / cnt
        var = jnp.maximum(jnp.sum(psq, axis=0) / cnt - mean * mean, 0.0)
        scale = g * lax.rsqrt(var + _EPS)
        return scale, b - mean * scale

    sc1, sh1 = fold(h1_sum, h1_sq, g1, b1)
    if use_proj:
        scS, shS = fold(s_sum, s_sq, gs, bs)
    else:
        scS, shS = jnp.ones((1, Cp), f32), jnp.zeros((1, Cp), f32)

    # ---- pass 2 ------------------------------------------------------------
    h2_raw, h2_sum, h2_sq = pl.pallas_call(
        _make_pass2(Hout, Wout, Cp),
        grid=(N,),
        in_specs=[tile_act, rep((1, Cp)), rep((1, Cp)), rep(w2p.shape)],
        out_specs=(tile_act, tile_vec, tile_vec),
        out_shape=(act_bf, vec, vec),
        scratch_shapes=[pltpu.VMEM((Hout + 2, Wout + 2 * _PW, Cp), bf16),
                        pltpu.VMEM((rows, 9 * Cp), bf16)],
        compiler_params=cparams,
    )(h1_raw, sc1, sh1, w2p)

    sc2, sh2 = fold(h2_sum, h2_sq, g2, b2)

    # ---- pass 3 ------------------------------------------------------------
    out_p = pl.pallas_call(
        _make_pass3(H, W, Cin, Cp, stride),
        grid=(N,),
        in_specs=[tile_act, tile_x, rep(wsp.shape), rep((1, Cp)),
                  rep((1, Cp)), rep((1, Cp)), rep((1, Cp))],
        out_specs=tile_act,
        out_shape=act_f32,
        compiler_params=cparams,
    )(h2_raw, x_nhwc, wsp, sc2, sh2, scS, shS)

    if Cp == Cout:                                  # avoid the extra slice pass
        return out_p.reshape(N, Hout, Wout, Cout)
    return out_p[:, :, :Cout].reshape(N, Hout, Wout, Cout)


# --------------------------------------------------------------------------- #
# pure-JAX reference (training-mode BN, matches the PyTorch module)
# --------------------------------------------------------------------------- #
def reference(x_nhwc, p, stride):
    def conv(x, w, s, pad):
        return lax.conv_general_dilated(
            x, w, (s, s), pad, dimension_numbers=("NHWC", "HWIO", "NHWC"))

    def bn(x, g, b):
        mu = x.mean(axis=(0, 1, 2), keepdims=True)
        var = jnp.square(x - mu).mean(axis=(0, 1, 2), keepdims=True)
        return (x - mu) * lax.rsqrt(var + _EPS) * g + b

    Cin = x_nhwc.shape[-1]
    Cout = p["w1"].shape[-1]
    h = jax.nn.relu(bn(conv(x_nhwc, p["w1"], stride, ((1, 1), (1, 1))),
                       p["g1"], p["b1"]))
    h = bn(conv(h, p["w2"], 1, ((1, 1), (1, 1))), p["g2"], p["b2"])
    if stride != 1 or Cin != Cout:
        sc = bn(conv(x_nhwc, p["ws"], stride, ((0, 0), (0, 0))),
                p["gs"], p["bs"])
    else:
        sc = x_nhwc
    return jax.nn.relu(h + sc)


if __name__ == "__main__":
    key = jax.random.PRNGKey(0)
    ks = jax.random.split(key, 10)

    # ResidualBlock(in=4, out=8, stride=1) -> projection shortcut path.
    N, Cin, H, W = 2, 4, 16, 16
    Cout, stride = 8, 1

    x_nchw = jax.random.normal(ks[0], (N, Cin, H, W), jnp.float32)
    x_nhwc = jnp.transpose(x_nchw, (0, 2, 3, 1))

    params = dict(
        w1=0.2 * jax.random.normal(ks[1], (3, 3, Cin, Cout), jnp.float32),
        g1=1.0 + 0.1 * jax.random.normal(ks[2], (1, Cout), jnp.float32),
        b1=0.1 * jax.random.normal(ks[3], (1, Cout), jnp.float32),
        w2=0.2 * jax.random.normal(ks[4], (3, 3, Cout, Cout), jnp.float32),
        g2=1.0 + 0.1 * jax.random.normal(ks[5], (1, Cout), jnp.float32),
        b2=0.1 * jax.random.normal(ks[6], (1, Cout), jnp.float32),
        ws=0.2 * jax.random.normal(ks[7], (1, 1, Cin, Cout), jnp.float32),
        gs=1.0 + 0.1 * jax.random.normal(ks[8], (1, Cout), jnp.float32),
        bs=0.1 * jax.random.normal(ks[9], (1, Cout), jnp.float32),
    )

    out = residual_block(x_nhwc, params, stride=stride)
    out = jax.block_until_ready(out)

    ref = reference(x_nhwc, params, stride)
    assert out.shape == ref.shape, (out.shape, ref.shape)
    err = float(jnp.max(jnp.abs(out - ref)))
    if err > 5e-2:
        raise AssertionError(f"kernel/reference mismatch, max abs err = {err}")

    print("KERNEL_OK")
</pallas_src>

<mosaic_0001>
module attributes {stable_mosaic.version = 11 : i64} {
  func.func @kernel(%arg0: i32, %arg1: memref<1x16x16x4xf32, #tpu.memory_space<vmem>>, %arg2: memref<36x128xf32, #tpu.memory_space<vmem>>, %arg3: memref<4x128xf32, #tpu.memory_space<vmem>>, %arg4: memref<1x256x128xbf16, #tpu.memory_space<vmem>>, %arg5: memref<1x1x128xf32, #tpu.memory_space<vmem>>, %arg6: memref<1x1x128xf32, #tpu.memory_space<vmem>>, %arg7: memref<1x1x128xf32, #tpu.memory_space<vmem>>, %arg8: memref<1x1x128xf32, #tpu.memory_space<vmem>>, %arg9: memref<18x32x4xf32, #tpu.memory_space<vmem>>) attributes {dimension_semantics = [#tpu.dimension_semantics<parallel>], iteration_bounds = array<i64: 2>, scalar_prefetch = 0 : i64, scratch_operands = 1 : i64, tpu.core_type = #tpu.core_type<tc>, window_params = [{transform_indices = @transform_0, window_bounds = array<i64: 1, 16, 16, 4>}, {pipeline_mode = #tpu.pipeline_mode<synchronous>, transform_indices = @transform_1, window_bounds = array<i64: 36, 128>}, {pipeline_mode = #tpu.pipeline_mode<synchronous>, transform_indices = @transform_2, window_bounds = array<i64: 4, 128>}, {transform_indices = @transform_3, window_bounds = array<i64: 1, 256, 128>}, {transform_indices = @transform_4, window_bounds = array<i64: 1, 1, 128>}, {transform_indices = @transform_5, window_bounds = array<i64: 1, 1, 128>}, {transform_indices = @transform_6, window_bounds = array<i64: 1, 1, 128>}, {transform_indices = @transform_7, window_bounds = array<i64: 1, 1, 128>}]} {
    %c0 = arith.constant 0 : index
    %c0_0 = arith.constant 0 : index
    %c0_1 = arith.constant 0 : index
    %c0_2 = arith.constant 0 : index
    %0 = vector.load %arg1[%c0, %c0_0, %c0_1, %c0_2] : memref<1x16x16x4xf32, #tpu.memory_space<vmem>>, vector<1x16x16x4xf32>
    %1 = vector.shape_cast %0 : vector<1x16x16x4xf32> to vector<16x16x4xf32>
    %cst = arith.constant 0.000000e+00 : f32
    %2 = vector.broadcast %cst : f32 to vector<32x4xf32>
    %c0_3 = arith.constant 0 : index
    %c0_4 = arith.constant 0 : index
    %c0_5 = arith.constant 0 : index
    %3 = vector.load %arg9[%c0_3, %c0_4, %c0_5] : memref<18x32x4xf32, #tpu.memory_space<vmem>>, vector<1x32x4xf32>
    %4 = vector.shape_cast %3 : vector<1x32x4xf32> to vector<32x4xf32>
    %5 = vector.shape_cast %2 : vector<32x4xf32> to vector<1x32x4xf32>
    tpu.vector_store %arg9[%c0_3, %c0_4, %c0_5], %5 {strides = array<i32>} : memref<18x32x4xf32, #tpu.memory_space<vmem>>, vector<1x32x4xf32>,
    %c17 = arith.constant 17 : index
    %c0_6 = arith.constant 0 : index
    %c0_7 = arith.constant 0 : index
    %6 = vector.load %arg9[%c17, %c0_6, %c0_7] : memref<18x32x4xf32, #tpu.memory_space<vmem>>, vector<1x32x4xf32>
    %7 = vector.shape_cast %6 : vector<1x32x4xf32> to vector<32x4xf32>
    %8 = vector.shape_cast %2 : vector<32x4xf32> to vector<1x32x4xf32>
    tpu.vector_store %arg9[%c17, %c0_6, %c0_7], %8 {strides = array<i32>} : memref<18x32x4xf32, #tpu.memory_space<vmem>>, vector<1x32x4xf32>,
    %cst_8 = arith.constant 0.000000e+00 : f32
    %9 = vector.broadcast %cst_8 : f32 to vector<18x8x4xf32>
    %c0_9 = arith.constant 0 : index
    %c0_10 = arith.constant 0 : index
    %c0_11 = arith.constant 0 : index
    %10 = vector.load %arg9[%c0_9, %c0_10, %c0_11] : memref<18x32x4xf32, #tpu.memory_space<vmem>>, vector<18x8x4xf32>
    tpu.vector_store %arg9[%c0_9, %c0_10, %c0_11], %9 {strides = array<i32>} : memref<18x32x4xf32, #tpu.memory_space<vmem>>, vector<18x8x4xf32>,
    %c0_12 = arith.constant 0 : index
    %c24 = arith.constant 24 : index
    %c0_13 = arith.constant 0 : index
    %11 = vector.load %arg9[%c0_12, %c24, %c0_13] : memref<18x32x4xf32, #tpu.memory_space<vmem>>, vector<18x8x4xf32>
    tpu.vector_store %arg9[%c0_12, %c24, %c0_13], %9 {strides = array<i32>} : memref<18x32x4xf32, #tpu.memory_space<vmem>>, vector<18x8x4xf32>,
    %c1 = arith.constant 1 : index
    %c8 = arith.constant 8 : index
    %c0_14 = arith.constant 0 : index
    %12 = vector.load %arg9[%c1, %c8, %c0_14] : memref<18x32x4xf32, #tpu.memory_space<vmem>>, vector<16x16x4xf32>
    tpu.vector_store %arg9[%c1, %c8, %c0_14], %1 {strides = array<i32>} : memref<18x32x4xf32, #tpu.memory_space<vmem>>, vector<16x16x4xf32>,
    %c0_15 = arith.constant 0 : index
    %c0_16 = arith.constant 0 : index
    %c0_17 = arith.constant 0 : index
    %13 = vector.load %arg9[%c0_15, %c0_16, %c0_17] : memref<18x32x4xf32, #tpu.memory_space<vmem>>, vector<18x32x4xf32>
    %14 = vector.extract_strided_slice %13 {offsets = [0, 7, 0], sizes = [16, 16, 4], strides = [1, 1, 1]} : vector<18x32x4xf32> to vector<16x16x4xf32>
    %15 = vector.shape_cast %14 : vector<16x16x4xf32> to vector<256x4xf32>
    %16 = vector.extract_strided_slice %13 {offsets = [0, 8, 0], sizes = [16, 16, 4], strides = [1, 1, 1]} : vector<18x32x4xf32> to vector<16x16x4xf32>
    %17 = vector.shape_cast %16 : vector<16x16x4xf32> to vector<256x4xf32>
    %18 = vector.extract_strided_slice %13 {offsets = [0, 9, 0], sizes = [16, 16, 4], strides = [1, 1, 1]} : vector<18x32x4xf32> to vector<16x16x4xf32>
    %19 = vector.shape_cast %18 : vector<16x16x4xf32> to vector<256x4xf32>
    %20 = vector.extract_strided_slice %13 {offsets = [1, 7, 0], sizes = [16, 16, 4], strides = [1, 1, 1]} : vector<18x32x4xf32> to vector<16x16x4xf32>
    %21 = vector.shape_cast %20 : vector<16x16x4xf32> to vector<256x4xf32>
    %22 = vector.extract_strided_slice %13 {offsets = [1, 8, 0], sizes = [16, 16, 4], strides = [1, 1, 1]} : vector<18x32x4xf32> to vector<16x16x4xf32>
    %23 = vector.shape_cast %22 : vector<16x16x4xf32> to vector<256x4xf32>
    %24 = vector.extract_strided_slice %13 {offsets = [1, 9, 0], sizes = [16, 16, 4], strides = [1, 1, 1]} : vector<18x32x4xf32> to vector<16x16x4xf32>
    %25 = vector.shape_cast %24 : vector<16x16x4xf32> to vector<256x4xf32>
    %26 = vector.extract_strided_slice %13 {offsets = [2, 7, 0], sizes = [16, 16, 4], strides = [1, 1, 1]} : vector<18x32x4xf32> to vector<16x16x4xf32>
    %27 = vector.shape_cast %26 : vector<16x16x4xf32> to vector<256x4xf32>
    %28 = vector.extract_strided_slice %13 {offsets = [2, 8, 0], sizes = [16, 16, 4], strides = [1, 1, 1]} : vector<18x32x4xf32> to vector<16x16x4xf32>
    %29 = vector.shape_cast %28 : vector<16x16x4xf32> to vector<256x4xf32>
    %30 = vector.extract_strided_slice %13 {offsets = [2, 9, 0], sizes = [16, 16, 4], strides = [1, 1, 1]} : vector<18x32x4xf32> to vector<16x16x4xf32>
    %31 = vector.shape_cast %30 : vector<16x16x4xf32> to vector<256x4xf32>
    %32 = tpu.concatenate %15, %17, %19, %21, %23, %25, %27, %29, %31 in 1 : vector<256x4xf32>, vector<256x4xf32>, vector<256x4xf32>, vector<256x4xf32>, vector<256x4xf32>, vector<256x4xf32>, vector<256x4xf32>, vector<256x4xf32>, vector<256x4xf32> -> vector<256x36xf32>
    %c0_18 = arith.constant 0 : index
    %c0_19 = arith.constant 0 : index
    %33 = vector.load %arg2[%c0_18, %c0_19] : memref<36x128xf32, #tpu.memory_space<vmem>>, vector<36x128xf32>
    %cst_20 = arith.constant dense<0.000000e+00> : vector<256x128xf32>
    %34 = tpu.matmul %32, %33, %cst_20 {dimension_numbers = #tpu.dot_dimension_numbers<[1], [0], [0], [1], [0, 0, 1, 1], [], []>} : vector<256x36xf32>, vector<36x128xf32>, vector<256x128xf32> -> vector<256x128xf32>
    %35 = vector.shape_cast %34 : vector<256x128xf32> to vector<1x256x128xf32>
    %36 = arith.truncf %35 : vector<1x256x128xf32> to vector<1x256x128xbf16>
    %c0_21 = arith.constant 0 : index
    %c0_22 = arith.constant 0 : index
    %c0_23 = arith.constant 0 : index
    %37 = vector.load %arg4[%c0_21, %c0_22, %c0_23] : memref<1x256x128xbf16, #tpu.memory_space<vmem>>, vector<1x256x128xbf16>
    tpu.vector_store %arg4[%c0_21, %c0_22, %c0_23], %36 {strides = array<i32>} : memref<1x256x128xbf16, #tpu.memory_space<vmem>>, vector<1x256x128xbf16>,
    %cst_24 = arith.constant dense<0.000000e+00> : vector<128xf32>
    %38 = vector.multi_reduction <add>, %34, %cst_24 [0] : vector<256x128xf32> to vector<128xf32>
    %39 = vector.shape_cast %38 : vector<128xf32> to vector<1x128xf32>
    %40 = vector.shape_cast %39 : vector<1x128xf32> to vector<1x1x128xf32>
    %41 = arith.mulf %34, %34 : vector<256x128xf32>
    %cst_25 = arith.constant dense<0.000000e+00> : vector<128xf32>
    %42 = vector.multi_reduction <add>, %41, %cst_25 [0] : vector<256x128xf32> to vector<128xf32>
    %43 = vector.shape_cast %42 : vector<128xf32> to vector<1x128xf32>
    %44 = vector.shape_cast %43 : vector<1x128xf32> to vector<1x1x128xf32>
    %c0_26 = arith.constant 0 : index
    %c0_27 = arith.constant 0 : index
    %c0_28 = arith.constant 0 : index
    %45 = vector.load %arg5[%c0_26, %c0_27, %c0_28] : memref<1x1x128xf32, #tpu.memory_space<vmem>>, vector<1x1x128xf32>
    tpu.vector_store %arg5[%c0_26, %c0_27, %c0_28], %40 {strides = array<i32>} : memref<1x1x128xf32, #tpu.memory_space<vmem>>, vector<1x1x128xf32>,
    %c0_29 = arith.constant 0 : index
    %c0_30 = arith.constant 0 : index
    %c0_31 = arith.constant 0 : index
    %46 = vector.load %arg6[%c0_29, %c0_30, %c0_31] : memref<1x1x128xf32, #tpu.memory_space<vmem>>, vector<1x1x128xf32>
    tpu.vector_store %arg6[%c0_29, %c0_30, %c0_31], %44 {strides = array<i32>} : memref<1x1x128xf32, #tpu.memory_space<vmem>>, vector<1x1x128xf32>,
    %47 = vector.shape_cast %1 : vector<16x16x4xf32> to vector<256x4xf32>
    %c0_32 = arith.constant 0 : index
    %c0_33 = arith.constant 0 : index
    %48 = vector.load %arg3[%c0_32, %c0_33] : memref<4x128xf32, #tpu.memory_space<vmem>>, vector<4x128xf32>
    %cst_34 = arith.constant dense<0.000000e+00> : vector<256x128xf32>
    %49 = tpu.matmul %47, %48, %cst_34 {dimension_numbers = #tpu.dot_dimension_numbers<[1], [0], [0], [1], [0, 0, 1, 1], [], []>} : vector<256x4xf32>, vector<4x128xf32>, vector<256x128xf32> -> vector<256x128xf32>
    %cst_35 = arith.constant dense<0.000000e+00> : vector<128xf32>
    %50 = vector.multi_reduction <add>, %49, %cst_35 [0] : vector<256x128xf32> to vector<128xf32>
    %51 = vector.shape_cast %50 : vector<128xf32> to vector<1x128xf32>
    %52 = vector.shape_cast %51 : vector<1x128xf32> to vector<1x1x128xf32>
    %53 = arith.mulf %49, %49 : vector<256x128xf32>
    %cst_36 = arith.constant dense<0.000000e+00> : vector<128xf32>
    %54 = vector.multi_reduction <add>, %53, %cst_36 [0] : vector<256x128xf32> to vector<128xf32>
    %55 = vector.shape_cast %54 : vector<128xf32> to vector<1x128xf32>
    %56 = vector.shape_cast %55 : vector<1x128xf32> to vector<1x1x128xf32>
    %c0_37 = arith.constant 0 : index
    %c0_38 = arith.constant 0 : index
    %c0_39 = arith.constant 0 : index
    %57 = vector.load %arg7[%c0_37, %c0_38, %c0_39] : memref<1x1x128xf32, #tpu.memory_space<vmem>>, vector<1x1x128xf32>
    tpu.vector_store %arg7[%c0_37, %c0_38, %c0_39], %52 {strides = array<i32>} : memref<1x1x128xf32, #tpu.memory_space<vmem>>, vector<1x1x128xf32>,
    %c0_40 = arith.constant 0 : index
    %c0_41 = arith.constant 0 : index
    %c0_42 = arith.constant 0 : index
    %58 = vector.load %arg8[%c0_40, %c0_41, %c0_42] : memref<1x1x128xf32, #tpu.memory_space<vmem>>, vector<1x1x128xf32>
    tpu.vector_store %arg8[%c0_40, %c0_41, %c0_42], %56 {strides = array<i32>} : memref<1x1x128xf32, #tpu.memory_space<vmem>>, vector<1x1x128xf32>,
    return
  }
  func.func @transform_0(%arg0: i32) -> (i32, i32, i32, i32) {
    %c0_i32 = arith.constant 0 : i32
    %c0_i32_0 = arith.constant 0 : i32
    %c0_i32_1 = arith.constant 0 : i32
    %c0_i32_2 = arith.constant 0 : i32
    return %arg0, %c0_i32, %c0_i32_0, %c0_i32_1 : i32, i32, i32, i32
  }
  func.func @transform_1(%arg0: i32) -> (i32, i32) {
    %c0_i32 = arith.constant 0 : i32
    %c0_i32_0 = arith.constant 0 : i32
    %c0_i32_1 = arith.constant 0 : i32
    return %c0_i32, %c0_i32_0 : i32, i32
  }
  func.func @transform_2(%arg0: i32) -> (i32, i32) {
    %c0_i32 = arith.constant 0 : i32
    %c0_i32_0 = arith.constant 0 : i32
    %c0_i32_1 = arith.constant 0 : i32
    return %c0_i32, %c0_i32_0 : i32, i32
  }
  func.func @transform_3(%arg0: i32) -> (i32, i32, i32) {
    %c0_i32 = arith.constant 0 : i32
    %c0_i32_0 = arith.constant 0 : i32
    %c0_i32_1 = arith.constant 0 : i32
    return %arg0, %c0_i32, %c0_i32_0 : i32, i32, i32
  }
  func.func @transform_4(%arg0: i32) -> (i32, i32, i32) {
    %c0_i32 = arith.constant 0 : i32
    %c0_i32_0 = arith.constant 0 : i32
    %c0_i32_1 = arith.constant 0 : i32
    return %arg0, %c0_i32, %c0_i32_0 : i32, i32, i32
  }
  func.func @transform_5(%arg0: i32) -> (i32, i32, i32) {
    %c0_i32 = arith.constant 0 : i32
    %c0_i32_0 = arith.constant 0 : i32
    %c0_i32_1 = arith.constant 0 : i32
    return %arg0, %c0_i32, %c0_i32_0 : i32, i32, i32
  }
  func.func @transform_6(%arg0: i32) -> (i32, i32, i32) {
    %c0_i32 = arith.constant 0 : i32
    %c0_i32_0 = arith.constant 0 : i32
    %c0_i32_1 = arith.constant 0 : i32
    return %arg0, %c0_i32, %c0_i32_0 : i32, i32, i32
  }
  func.func @transform_7(%arg0: i32) -> (i32, i32, i32) {
    %c0_i32 = arith.constant 0 : i32
    %c0_i32_0 = arith.constant 0 : i32
    %c0_i32_1 = arith.constant 0 : i32
    return %arg0, %c0_i32, %c0_i32_0 : i32, i32, i32
  }
}

module attributes {stable_mosaic.version = 11 : i64} {
  func.func @kernel(%arg0: i32, %arg1: memref<1x256x128xbf16, #tpu.memory_space<vmem>>, %arg2: memref<1x128xf32, #tpu.memory_space<vmem>>, %arg3: memref<1x128xf32, #tpu.memory_space<vmem>>, %arg4: memref<1152x128xbf16, #tpu.memory_space<vmem>>, %arg5: memref<1x256x128xbf16, #tpu.memory_space<vmem>>, %arg6: memref<1x1x128xf32, #tpu.memory_space<vmem>>, %arg7: memref<1x1x128xf32, #tpu.memory_space<vmem>>, %arg8: memref<18x32x128xbf16, #tpu.memory_space<vmem>>, %arg9: memref<256x1152xbf16, #tpu.memory_space<vmem>>) attributes {dimension_semantics = [#tpu.dimension_semantics<parallel>], iteration_bounds = array<i64: 2>, scalar_prefetch = 0 : i64, scratch_operands = 2 : i64, tpu.core_type = #tpu.core_type<tc>, window_params = [{transform_indices = @transform_0, window_bounds = array<i64: 1, 256, 128>}, {pipeline_mode = #tpu.pipeline_mode<synchronous>, transform_indices = @transform_1, window_bounds = array<i64: 1, 128>}, {pipeline_mode = #tpu.pipeline_mode<synchronous>, transform_indices = @transform_2, window_bounds = array<i64: 1, 128>}, {pipeline_mode = #tpu.pipeline_mode<synchronous>, transform_indices = @transform_3, window_bounds = array<i64: 1152, 128>}, {transform_indices = @transform_4, window_bounds = array<i64: 1, 256, 128>}, {transform_indices = @transform_5, window_bounds = array<i64: 1, 1, 128>}, {transform_indices = @transform_6, window_bounds = array<i64: 1, 1, 128>}]} {
    %c0 = arith.constant 0 : index
    %c0_0 = arith.constant 0 : index
    %c0_1 = arith.constant 0 : index
    %0 = vector.load %arg1[%c0, %c0_0, %c0_1] : memref<1x256x128xbf16, #tpu.memory_space<vmem>>, vector<1x256x128xbf16>
    %1 = vector.shape_cast %0 : vector<1x256x128xbf16> to vector<256x128xbf16>
    %2 = arith.extf %1 : vector<256x128xbf16> to vector<256x128xf32>
    %c0_2 = arith.constant 0 : index
    %c0_3 = arith.constant 0 : index
    %3 = vector.load %arg2[%c0_2, %c0_3] : memref<1x128xf32, #tpu.memory_space<vmem>>, vector<1x128xf32>
    %4 = vector.broadcast %3 : vector<1x128xf32> to vector<256x128xf32>
    %5 = arith.mulf %2, %4 : vector<256x128xf32>
    %c0_4 = arith.constant 0 : index
    %c0_5 = arith.constant 0 : index
    %6 = vector.load %arg3[%c0_4, %c0_5] : memref<1x128xf32, #tpu.memory_space<vmem>>, vector<1x128xf32>
    %7 = vector.broadcast %6 : vector<1x128xf32> to vector<256x128xf32>
    %8 = arith.addf %5, %7 : vector<256x128xf32>
    %cst = arith.constant 0.000000e+00 : f32
    %9 = vector.broadcast %cst : f32 to vector<256x128xf32>
    %10 = arith.maximumf %8, %9 : vector<256x128xf32>
    %11 = vector.shape_cast %10 : vector<256x128xf32> to vector<16x16x128xf32>
    %cst_6 = arith.constant 0.000000e+00 : bf16
    %12 = vector.broadcast %cst_6 : bf16 to vector<32x128xbf16>
    %c0_7 = arith.constant 0 : index
    %c0_8 = arith.constant 0 : index
    %c0_9 = arith.constant 0 : index
    %13 = vector.load %arg8[%c0_7, %c0_8, %c0_9] : memref<18x32x128xbf16, #tpu.memory_space<vmem>>, vector<1x32x128xbf16>
    %14 = vector.shape_cast %13 : vector<1x32x128xbf16> to vector<32x128xbf16>
    %15 = vector.shape_cast %12 : vector<32x128xbf16> to vector<1x32x128xbf16>
    tpu.vector_store %arg8[%c0_7, %c0_8, %c0_9], %15 {strides = array<i32>} : memref<18x32x128xbf16, #tpu.memory_space<vmem>>, vector<1x32x128xbf16>,
    %c17 = arith.constant 17 : index
    %c0_10 = arith.constant 0 : index
    %c0_11 = arith.constant 0 : index
    %16 = vector.load %arg8[%c17, %c0_10, %c0_11] : memref<18x32x128xbf16, #tpu.memory_space<vmem>>, vector<1x32x128xbf16>
    %17 = vector.shape_cast %16 : vector<1x32x128xbf16> to vector<32x128xbf16>
    %18 = vector.shape_cast %12 : vector<32x128xbf16> to vector<1x32x128xbf16>
    tpu.vector_store %arg8[%c17, %c0_10, %c0_11], %18 {strides = array<i32>} : memref<18x32x128xbf16, #tpu.memory_space<vmem>>, vector<1x32x128xbf16>,
    %cst_12 = arith.constant 0.000000e+00 : bf16
    %19 = vector.broadcast %cst_12 : bf16 to vector<18x8x128xbf16>
    %c0_13 = arith.constant 0 : index
    %c0_14 = arith.constant 0 : index
    %c0_15 = arith.constant 0 : index
    %20 = vector.load %arg8[%c0_13, %c0_14, %c0_15] : memref<18x32x128xbf16, #tpu.memory_space<vmem>>, vector<18x8x128xbf16>
    tpu.vector_store %arg8[%c0_13, %c0_14, %c0_15], %19 {strides = array<i32>} : memref<18x32x128xbf16, #tpu.memory_space<vmem>>, vector<18x8x128xbf16>,
    %c0_16 = arith.constant 0 : index
    %c24 = arith.constant 24 : index
    %c0_17 = arith.constant 0 : index
    %21 = vector.load %arg8[%c0_16, %c24, %c0_17] : memref<18x32x128xbf16, #tpu.memory_space<vmem>>, vector<18x8x128xbf16>
    tpu.vector_store %arg8[%c0_16, %c24, %c0_17], %19 {strides = array<i32>} : memref<18x32x128xbf16, #tpu.memory_space<vmem>>, vector<18x8x128xbf16>,
    %22 = arith.truncf %11 : vector<16x16x128xf32> to vector<16x16x128xbf16>
    %c1 = arith.constant 1 : index
    %c8 = arith.constant 8 : index
    %c0_18 = arith.constant 0 : index
    %23 = vector.load %arg8[%c1, %c8, %c0_18] : memref<18x32x128xbf16, #tpu.memory_space<vmem>>, vector<16x16x128xbf16>
    tpu.vector_store %arg8[%c1, %c8, %c0_18], %22 {strides = array<i32>} : memref<18x32x128xbf16, #tpu.memory_space<vmem>>, vector<16x16x128xbf16>,
    %c0_19 = arith.constant 0 : index
    %c0_20 = arith.constant 0 : index
    %c0_21 = arith.constant 0 : index
    %24 = vector.load %arg8[%c0_19, %c0_20, %c0_21] : memref<18x32x128xbf16, #tpu.memory_space<vmem>>, vector<18x32x128xbf16>
    %25 = vector.extract_strided_slice %24 {offsets = [0, 7, 0], sizes = [16, 16, 128], strides = [1, 1, 1]} : vector<18x32x128xbf16> to vector<16x16x128xbf16>
    %26 = vector.shape_cast %25 : vector<16x16x128xbf16> to vector<256x128xbf16>
    %27 = vector.extract_strided_slice %24 {offsets = [0, 8, 0], sizes = [16, 16, 128], strides = [1, 1, 1]} : vector<18x32x128xbf16> to vector<16x16x128xbf16>
    %28 = vector.shape_cast %27 : vector<16x16x128xbf16> to vector<256x128xbf16>
    %29 = vector.extract_strided_slice %24 {offsets = [0, 9, 0], sizes = [16, 16, 128], strides = [1, 1, 1]} : vector<18x32x128xbf16> to vector<16x16x128xbf16>
    %30 = vector.shape_cast %29 : vector<16x16x128xbf16> to vector<256x128xbf16>
    %31 = vector.extract_strided_slice %24 {offsets = [1, 7, 0], sizes = [16, 16, 128], strides = [1, 1, 1]} : vector<18x32x128xbf16> to vector<16x16x128xbf16>
    %32 = vector.shape_cast %31 : vector<16x16x128xbf16> to vector<256x128xbf16>
    %33 = vector.extract_strided_slice %24 {offsets = [1, 8, 0], sizes = [16, 16, 128], strides = [1, 1, 1]} : vector<18x32x128xbf16> to vector<16x16x128xbf16>
    %34 = vector.shape_cast %33 : vector<16x16x128xbf16> to vector<256x128xbf16>
    %35 = vector.extract_strided_slice %24 {offsets = [1, 9, 0], sizes = [16, 16, 128], strides = [1, 1, 1]} : vector<18x32x128xbf16> to vector<16x16x128xbf16>
    %36 = vector.shape_cast %35 : vector<16x16x128xbf16> to vector<256x128xbf16>
    %37 = vector.extract_strided_slice %24 {offsets = [2, 7, 0], sizes = [16, 16, 128], strides = [1, 1, 1]} : vector<18x32x128xbf16> to vector<16x16x128xbf16>
    %38 = vector.shape_cast %37 : vector<16x16x128xbf16> to vector<256x128xbf16>
    %39 = vector.extract_strided_slice %24 {offsets = [2, 8, 0], sizes = [16, 16, 128], strides = [1, 1, 1]} : vector<18x32x128xbf16> to vector<16x16x128xbf16>
    %40 = vector.shape_cast %39 : vector<16x16x128xbf16> to vector<256x128xbf16>
    %41 = vector.extract_strided_slice %24 {offsets = [2, 9, 0], sizes = [16, 16, 128], strides = [1, 1, 1]} : vector<18x32x128xbf16> to vector<16x16x128xbf16>
    %42 = vector.shape_cast %41 : vector<16x16x128xbf16> to vector<256x128xbf16>
    %c0_22 = arith.constant 0 : index
    %c0_23 = arith.constant 0 : index
    %43 = vector.load %arg9[%c0_22, %c0_23] : memref<256x1152xbf16, #tpu.memory_space<vmem>>, vector<256x128xbf16>
    tpu.vector_store %arg9[%c0_22, %c0_23], %26 {strides = array<i32>} : memref<256x1152xbf16, #tpu.memory_space<vmem>>, vector<256x128xbf16>,
    %c0_24 = arith.constant 0 : index
    %c128 = arith.constant 128 : index
    %44 = vector.load %arg9[%c0_24, %c128] : memref<256x1152xbf16, #tpu.memory_space<vmem>>, vector<256x128xbf16>
    tpu.vector_store %arg9[%c0_24, %c128], %28 {strides = array<i32>} : memref<256x1152xbf16, #tpu.memory_space<vmem>>, vector<256x128xbf16>,
    %c0_25 = arith.constant 0 : index
    %c256 = arith.constant 256 : index
    %45 = vector.load %arg9[%c0_25, %c256] : memref<256x1152xbf16, #tpu.memory_space<vmem>>, vector<256x128xbf16>
    tpu.vector_store %arg9[%c0_25, %c256], %30 {strides = array<i32>} : memref<256x1152xbf16, #tpu.memory_space<vmem>>, vector<256x128xbf16>,
    %c0_26 = arith.constant 0 : index
    %c384 = arith.constant 384 : index
    %46 = vector.load %arg9[%c0_26, %c384] : memref<256x1152xbf16, #tpu.memory_space<vmem>>, vector<256x128xbf16>
    tpu.vector_store %arg9[%c0_26, %c384], %32 {strides = array<i32>} : memref<256x1152xbf16, #tpu.memory_space<vmem>>, vector<256x128xbf16>,
    %c0_27 = arith.constant 0 : index
    %c512 = arith.constant 512 : index
    %47 = vector.load %arg9[%c0_27, %c512] : memref<256x1152xbf16, #tpu.memory_space<vmem>>, vector<256x128xbf16>
    tpu.vector_store %arg9[%c0_27, %c512], %34 {strides = array<i32>} : memref<256x1152xbf16, #tpu.memory_space<vmem>>, vector<256x128xbf16>,
    %c0_28 = arith.constant 0 : index
    %c640 = arith.constant 640 : index
    %48 = vector.load %arg9[%c0_28, %c640] : memref<256x1152xbf16, #tpu.memory_space<vmem>>, vector<256x128xbf16>
    tpu.vector_store %arg9[%c0_28, %c640], %36 {strides = array<i32>} : memref<256x1152xbf16, #tpu.memory_space<vmem>>, vector<256x128xbf16>,
    %c0_29 = arith.constant 0 : index
    %c768 = arith.constant 768 : index
    %49 = vector.load %arg9[%c0_29, %c768] : memref<256x1152xbf16, #tpu.memory_space<vmem>>, vector<256x128xbf16>
    tpu.vector_store %arg9[%c0_29, %c768], %38 {strides = array<i32>} : memref<256x1152xbf16, #tpu.memory_space<vmem>>, vector<256x128xbf16>,
    %c0_30 = arith.constant 0 : index
    %c896 = arith.constant 896 : index
    %50 = vector.load %arg9[%c0_30, %c896] : memref<256x1152xbf16, #tpu.memory_space<vmem>>, vector<256x128xbf16>
    tpu.vector_store %arg9[%c0_30, %c896], %40 {strides = array<i32>} : memref<256x1152xbf16, #tpu.memory_space<vmem>>, vector<256x128xbf16>,
    %c0_31 = arith.constant 0 : index
    %c1024 = arith.constant 1024 : index
    %51 = vector.load %arg9[%c0_31, %c1024] : memref<256x1152xbf16, #tpu.memory_space<vmem>>, vector<256x128xbf16>
    tpu.vector_store %arg9[%c0_31, %c1024], %42 {strides = array<i32>} : memref<256x1152xbf16, #tpu.memory_space<vmem>>, vector<256x128xbf16>,
    %c0_32 = arith.constant 0 : index
    %c0_33 = arith.constant 0 : index
    %52 = vector.load %arg9[%c0_32, %c0_33] : memref<256x1152xbf16, #tpu.memory_space<vmem>>, vector<256x1152xbf16>
    %c0_34 = arith.constant 0 : index
    %c0_35 = arith.constant 0 : index
    %53 = vector.load %arg4[%c0_34, %c0_35] : memref<1152x128xbf16, #tpu.memory_space<vmem>>, vector<1152x128xbf16>
    %cst_36 = arith.constant dense<0.000000e+00> : vector<256x128xf32>
    %54 = tpu.matmul %52, %53, %cst_36 {dimension_numbers = #tpu.dot_dimension_numbers<[1], [0], [0], [1], [0, 0, 1, 1], [], []>} : vector<256x1152xbf16>, vector<1152x128xbf16>, vector<256x128xf32> -> vector<256x128xf32>
    %55 = vector.shape_cast %54 : vector<256x128xf32> to vector<1x256x128xf32>
    %56 = arith.truncf %55 : vector<1x256x128xf32> to vector<1x256x128xbf16>
    %c0_37 = arith.constant 0 : index
    %c0_38 = arith.constant 0 : index
    %c0_39 = arith.constant 0 : index
    %57 = vector.load %arg5[%c0_37, %c0_38, %c0_39] : memref<1x256x128xbf16, #tpu.memory_space<vmem>>, vector<1x256x128xbf16>
    tpu.vector_store %arg5[%c0_37, %c0_38, %c0_39], %56 {strides = array<i32>} : memref<1x256x128xbf16, #tpu.memory_space<vmem>>, vector<1x256x128xbf16>,
    %cst_40 = arith.constant dense<0.000000e+00> : vector<128xf32>
    %58 = vector.multi_reduction <add>, %54, %cst_40 [0] : vector<256x128xf32> to vector<128xf32>
    %59 = vector.shape_cast %58 : vector<128xf32> to vector<1x128xf32>
    %60 = vector.shape_cast %59 : vector<1x128xf32> to vector<1x1x128xf32>
    %61 = arith.mulf %54, %54 : vector<256x128xf32>
    %cst_41 = arith.constant dense<0.000000e+00> : vector<128xf32>
    %62 = vector.multi_reduction <add>, %61, %cst_41 [0] : vector<256x128xf32> to vector<128xf32>
    %63 = vector.shape_cast %62 : vector<128xf32> to vector<1x128xf32>
    %64 = vector.shape_cast %63 : vector<1x128xf32> to vector<1x1x128xf32>
    %c0_42 = arith.constant 0 : index
    %c0_43 = arith.constant 0 : index
    %c0_44 = arith.constant 0 : index
    %65 = vector.load %arg6[%c0_42, %c0_43, %c0_44] : memref<1x1x128xf32, #tpu.memory_space<vmem>>, vector<1x1x128xf32>
    tpu.vector_store %arg6[%c0_42, %c0_43, %c0_44], %60 {strides = array<i32>} : memref<1x1x128xf32, #tpu.memory_space<vmem>>, vector<1x1x128xf32>,
    %c0_45 = arith.constant 0 : index
    %c0_46 = arith.constant 0 : index
    %c0_47 = arith.constant 0 : index
    %66 = vector.load %arg7[%c0_45, %c0_46, %c0_47] : memref<1x1x128xf32, #tpu.memory_space<vmem>>, vector<1x1x128xf32>
    tpu.vector_store %arg7[%c0_45, %c0_46, %c0_47], %64 {strides = array<i32>} : memref<1x1x128xf32, #tpu.memory_space<vmem>>, vector<1x1x128xf32>,
    return
  }
  func.func @transform_0(%arg0: i32) -> (i32, i32, i32) {
    %c0_i32 = arith.constant 0 : i32
    %c0_i32_0 = arith.constant 0 : i32
    %c0_i32_1 = arith.constant 0 : i32
    return %arg0, %c0_i32, %c0_i32_0 : i32, i32, i32
  }
  func.func @transform_1(%arg0: i32) -> (i32, i32) {
    %c0_i32 = arith.constant 0 : i32
    %c0_i32_0 = arith.constant 0 : i32
    %c0_i32_1 = arith.constant 0 : i32
    return %c0_i32, %c0_i32_0 : i32, i32
  }
  func.func @transform_2(%arg0: i32) -> (i32, i32) {
    %c0_i32 = arith.constant 0 : i32
    %c0_i32_0 = arith.constant 0 : i32
    %c0_i32_1 = arith.constant 0 : i32
    return %c0_i32, %c0_i32_0 : i32, i32
  }
  func.func @transform_3(%arg0: i32) -> (i32, i32) {
    %c0_i32 = arith.constant 0 : i32
    %c0_i32_0 = arith.constant 0 : i32
    %c0_i32_1 = arith.constant 0 : i32
    return %c0_i32, %c0_i32_0 : i32, i32
  }
  func.func @transform_4(%arg0: i32) -> (i32, i32, i32) {
    %c0_i32 = arith.constant 0 : i32
    %c0_i32_0 = arith.constant 0 : i32
    %c0_i32_1 = arith.constant 0 : i32
    return %arg0, %c0_i32, %c0_i32_0 : i32, i32, i32
  }
  func.func @transform_5(%arg0: i32) -> (i32, i32, i32) {
    %c0_i32 = arith.constant 0 : i32
    %c0_i32_0 = arith.constant 0 : i32
    %c0_i32_1 = arith.constant 0 : i32
    return %arg0, %c0_i32, %c0_i32_0 : i32, i32, i32
  }
  func.func @transform_6(%arg0: i32) -> (i32, i32, i32) {
    %c0_i32 = arith.constant 0 : i32
    %c0_i32_0 = arith.constant 0 : i32
    %c0_i32_1 = arith.constant 0 : i32
    return %arg0, %c0_i32, %c0_i32_0 : i32, i32, i32
  }
}

module attributes {stable_mosaic.version = 11 : i64} {
  func.func @kernel(%arg0: i32, %arg1: memref<1x256x128xbf16, #tpu.memory_space<vmem>>, %arg2: memref<1x16x16x4xf32, #tpu.memory_space<vmem>>, %arg3: memref<4x128xf32, #tpu.memory_space<vmem>>, %arg4: memref<1x128xf32, #tpu.memory_space<vmem>>, %arg5: memref<1x128xf32, #tpu.memory_space<vmem>>, %arg6: memref<1x128xf32, #tpu.memory_space<vmem>>, %arg7: memref<1x128xf32, #tpu.memory_space<vmem>>, %arg8: memref<1x256x128xf32, #tpu.memory_space<vmem>>) attributes {dimension_semantics = [#tpu.dimension_semantics<parallel>], iteration_bounds = array<i64: 2>, scalar_prefetch = 0 : i64, scratch_operands = 0 : i64, tpu.core_type = #tpu.core_type<tc>, window_params = [{transform_indices = @transform_0, window_bounds = array<i64: 1, 256, 128>}, {transform_indices = @transform_1, window_bounds = array<i64: 1, 16, 16, 4>}, {pipeline_mode = #tpu.pipeline_mode<synchronous>, transform_indices = @transform_2, window_bounds = array<i64: 4, 128>}, {pipeline_mode = #tpu.pipeline_mode<synchronous>, transform_indices = @transform_3, window_bounds = array<i64: 1, 128>}, {pipeline_mode = #tpu.pipeline_mode<synchronous>, transform_indices = @transform_4, window_bounds = array<i64: 1, 128>}, {pipeline_mode = #tpu.pipeline_mode<synchronous>, transform_indices = @transform_5, window_bounds = array<i64: 1, 128>}, {pipeline_mode = #tpu.pipeline_mode<synchronous>, transform_indices = @transform_6, window_bounds = array<i64: 1, 128>}, {transform_indices = @transform_7, window_bounds = array<i64: 1, 256, 128>}]} {
    %c0 = arith.constant 0 : index
    %c0_0 = arith.constant 0 : index
    %c0_1 = arith.constant 0 : index
    %0 = vector.load %arg1[%c0, %c0_0, %c0_1] : memref<1x256x128xbf16, #tpu.memory_space<vmem>>, vector<1x256x128xbf16>
    %1 = vector.shape_cast %0 : vector<1x256x128xbf16> to vector<256x128xbf16>
    %2 = arith.extf %1 : vector<256x128xbf16> to vector<256x128xf32>
    %c0_2 = arith.constant 0 : index
    %c0_3 = arith.constant 0 : index
    %c0_4 = arith.constant 0 : index
    %c0_5 = arith.constant 0 : index
    %3 = vector.load %arg2[%c0_2, %c0_3, %c0_4, %c0_5] : memref<1x16x16x4xf32, #tpu.memory_space<vmem>>, vector<1x16x16x4xf32>
    %4 = vector.shape_cast %3 : vector<1x16x16x4xf32> to vector<16x16x4xf32>
    %5 = vector.shape_cast %4 : vector<16x16x4xf32> to vector<256x4xf32>
    %c0_6 = arith.constant 0 : index
    %c0_7 = arith.constant 0 : index
    %6 = vector.load %arg3[%c0_6, %c0_7] : memref<4x128xf32, #tpu.memory_space<vmem>>, vector<4x128xf32>
    %cst = arith.constant dense<0.000000e+00> : vector<256x128xf32>
    %7 = tpu.matmul %5, %6, %cst {dimension_numbers = #tpu.dot_dimension_numbers<[1], [0], [0], [1], [0, 0, 1, 1], [], []>} : vector<256x4xf32>, vector<4x128xf32>, vector<256x128xf32> -> vector<256x128xf32>
    %c0_8 = arith.constant 0 : index
    %c0_9 = arith.constant 0 : index
    %8 = vector.load %arg4[%c0_8, %c0_9] : memref<1x128xf32, #tpu.memory_space<vmem>>, vector<1x128xf32>
    %9 = vector.broadcast %8 : vector<1x128xf32> to vector<256x128xf32>
    %10 = arith.mulf %2, %9 : vector<256x128xf32>
    %c0_10 = arith.constant 0 : index
    %c0_11 = arith.constant 0 : index
    %11 = vector.load %arg5[%c0_10, %c0_11] : memref<1x128xf32, #tpu.memory_space<vmem>>, vector<1x128xf32>
    %12 = vector.broadcast %11 : vector<1x128xf32> to vector<256x128xf32>
    %13 = arith.addf %10, %12 : vector<256x128xf32>
    %c0_12 = arith.constant 0 : index
    %c0_13 = arith.constant 0 : index
    %14 = vector.load %arg6[%c0_12, %c0_13] : memref<1x128xf32, #tpu.memory_space<vmem>>, vector<1x128xf32>
    %15 = vector.broadcast %14 : vector<1x128xf32> to vector<256x128xf32>
    %16 = arith.mulf %7, %15 : vector<256x128xf32>
    %17 = arith.addf %13, %16 : vector<256x128xf32>
    %c0_14 = arith.constant 0 : index
    %c0_15 = arith.constant 0 : index
    %18 = vector.load %arg7[%c0_14, %c0_15] : memref<1x128xf32, #tpu.memory_space<vmem>>, vector<1x128xf32>
    %19 = vector.broadcast %18 : vector<1x128xf32> to vector<256x128xf32>
    %20 = arith.addf %17, %19 : vector<256x128xf32>
    %cst_16 = arith.constant 0.000000e+00 : f32
    %21 = vector.broadcast %cst_16 : f32 to vector<256x128xf32>
    %22 = arith.maximumf %20, %21 : vector<256x128xf32>
    %23 = vector.shape_cast %22 : vector<256x128xf32> to vector<1x256x128xf32>
    %c0_17 = arith.constant 0 : index
    %c0_18 = arith.constant 0 : index
    %c0_19 = arith.constant 0 : index
    %24 = vector.load %arg8[%c0_17, %c0_18, %c0_19] : memref<1x256x128xf32, #tpu.memory_space<vmem>>, vector<1x256x128xf32>
    tpu.vector_store %arg8[%c0_17, %c0_18, %c0_19], %23 {strides = array<i32>} : memref<1x256x128xf32, #tpu.memory_space<vmem>>, vector<1x256x128xf32>,
    return
  }
  func.func @transform_0(%arg0: i32) -> (i32, i32, i32) {
    %c0_i32 = arith.constant 0 : i32
    %c0_i32_0 = arith.constant 0 : i32
    %c0_i32_1 = arith.constant 0 : i32
    return %arg0, %c0_i32, %c0_i32_0 : i32, i32, i32
  }
  func.func @transform_1(%arg0: i32) -> (i32, i32, i32, i32) {
    %c0_i32 = arith.constant 0 : i32
    %c0_i32_0 = arith.constant 0 : i32
    %c0_i32_1 = arith.constant 0 : i32
    %c0_i32_2 = arith.constant 0 : i32
    return %arg0, %c0_i32, %c0_i32_0, %c0_i32_1 : i32, i32, i32, i32
  }
  func.func @transform_2(%arg0: i32) -> (i32, i32) {
    %c0_i32 = arith.constant 0 : i32
    %c0_i32_0 = arith.constant 0 : i32
    %c0_i32_1 = arith.constant 0 : i32
    return %c0_i32, %c0_i32_0 : i32, i32
  }
  func.func @transform_3(%arg0: i32) -> (i32, i32) {
    %c0_i32 = arith.constant 0 : i32
    %c0_i32_0 = arith.constant 0 : i32
    %c0_i32_1 = arith.constant 0 : i32
    return %c0_i32, %c0_i32_0 : i32, i32
  }
  func.func @transform_4(%arg0: i32) -> (i32, i32) {
    %c0_i32 = arith.constant 0 : i32
    %c0_i32_0 = arith.constant 0 : i32
    %c0_i32_1 = arith.constant 0 : i32
    return %c0_i32, %c0_i32_0 : i32, i32
  }
  func.func @transform_5(%arg0: i32) -> (i32, i32) {
    %c0_i32 = arith.constant 0 : i32
    %c0_i32_0 = arith.constant 0 : i32
    %c0_i32_1 = arith.constant 0 : i32
    return %c0_i32, %c0_i32_0 : i32, i32
  }
  func.func @transform_6(%arg0: i32) -> (i32, i32) {
    %c0_i32 = arith.constant 0 : i32
    %c0_i32_0 = arith.constant 0 : i32
    %c0_i32_1 = arith.constant 0 : i32
    return %c0_i32, %c0_i32_0 : i32, i32
  }
  func.func @transform_7(%arg0: i32) -> (i32, i32, i32) {
    %c0_i32 = arith.constant 0 : i32
    %c0_i32_0 = arith.constant 0 : i32
    %c0_i32_1 = arith.constant 0 : i32
    return %arg0, %c0_i32, %c0_i32_0 : i32, i32, i32
  }
}

</mosaic_0001>

<bundles_post_ra>
// kernel: residual_block.5
= control target key start
LH: loop header
LB: loop body
LE: loop exit
PB: predicated region body
PF: predicated region fallthrough
CT: control target
= control target key end

     0   :  { %s1108_s24 = smov 0   ;;  %s1453_s0 = inlined_call_operand.vmem [shape: bf16[2,256,128], index: 0, kind: input, shape index: {}]   ;;  %s1454_s1 = inlined_call_operand.vmem [shape: f32[2,16,16,4], index: 1, kind: input, shape index: {}]   ;;  %s1455_s2 = inlined_call_operand.vmem [shape: f32[4,128], index: 2, kind: input, shape index: {}]   ;;  %s1456_s3 = inlined_call_operand.vmem [shape: f32[1,128], index: 3, kind: input, shape index: {}]   ;;  %s1457_s4 = inlined_call_operand.vmem [shape: f32[1,128], index: 4, kind: input, shape index: {}]   ;;  %s1458_s5 = inlined_call_operand.vmem [shape: f32[1,128], index: 5, kind: input, shape index: {}]   ;;  %s1459_s6 = inlined_call_operand.vmem [shape: f32[1,128], index: 6, kind: input, shape index: {}]   ;;  %s1460_s7 = inlined_call_operand.vmem [shape: f32[2,256,128], index: 7, kind: output, shape index: {}]  }
   0x1 LB: > { %s917_s25 = sadd.s32 4294967295, %s1066_s24   ;;  %p921_p0 = scmp.ge.s32.totalorder %s1066_s24, 1  ;;  %s1066_s24 = sphi %s1108_s24, %s17_s24  }
   0x2   : > { %p247_p1 = scmp.lt.s32.totalorder %s1066_s24, 3 }
   0x4   : > { %p248_p2 = pnand %p921_p0, %p247_p1 }
   0x5   : > { %p284_p3 = scmp.lt.s32.totalorder (!%p248_p2), %s917_s25, 1 }
   0x6   : > { %251 = sbr.rel (%p248_p2) target bundleno = 213 (0xd5), region = 48 }
   0xb   : > { %v395_v0 = vld [vmem:[%s1455_s2] sm:$0xf]  ;;  %vm493_vm0 = vcmask 1043456   ;;  %s1462_s25 = smov (!%p284_p3, %s917_s25), 1  ;;  %vm396_vm1 = vcmask 31744  }
   0xc   : > { %1046 = vmatpush.msk.msra.mxu2 %vm493_vm0, %v395_v0  ;;  %1047 = vmatpush.msk.msra.mxu3 %vm493_vm0, %v395_v0  ;;  %s964_s28 = sshll.u32 %s1462_s25, 8  ;;  %s963_s9 = sshll.u32 %s1462_s25, 7  ;;  %v1204_v36 = vld [vmem:[%s1456_s3] ss:$0 sm:$0xff] }
   0xd   : > { %928 = vmatpush.msk.msra.mxu0 %vm493_vm0, %v395_v0  ;;  %1045 = vmatpush.msk.msra.mxu1 %vm493_vm0, %v395_v0  ;;  %s1127_s8 = scalar_lea.vmem %s1454_s1, %s964_s28  ;;  %s1197_s12 = scalar_lea.vmem %s1453_s0, %s963_s9  ;;  %v1212_v41 = vld [vmem:[%s1457_s4] ss:$0 sm:$0xff] }
   0xe   : > { %v379_v1 = vld [vmem:[%s1127_s8 + $0x80] sm:$0xff]  ;;  %v380_v5 = vld [vmem:[%s1127_s8 + $0x88] sm:$0xff]  ;;  %v381_v9 = vld [vmem:[%s1127_s8 + $0x90] sm:$0xff]  ;;  %s1248_s23 = scalar_lea.vmem %s1460_s7, %s964_s28 }
   0xf   : > { %v387_v2 = vld [vmem:[%s1127_s8 + $0xc0] sm:$0xff]  ;;  %945 = vmatmul.msk.f32.vlgmr.msra.gmra.mxu2 %vm396_vm1, %v379_v1  ;;  %v388_v6 = vld [vmem:[%s1127_s8 + $0xc8] sm:$0xff]  ;;  %v389_v10 = vld [vmem:[%s1127_s8 + $0xd0] sm:$0xff] }
  0x10   : > { %v363_v3 = vld [vmem:[%s1127_s8] sm:$0xff]  ;;  %953 = vmatmul.msk.f32.vlgmr.msra.gmra.mxu3 %vm396_vm1, %v387_v2  ;;  %v364_v7 = vld [vmem:[%s1127_s8 + $0x8] sm:$0xff]  ;;  %v365_v11 = vld [vmem:[%s1127_s8 + $0x10] sm:$0xff] }
  0x11   : > { %v371_v4 = vld [vmem:[%s1127_s8 + $0x40] sm:$0xff]  ;;  %929 = vmatmul.msk.f32.vlgmr.msra.gmra.mxu0 %vm396_vm1, %v363_v3  ;;  %v372_v8 = vld [vmem:[%s1127_s8 + $0x48] sm:$0xff]  ;;  %v373_v12 = vld [vmem:[%s1127_s8 + $0x50] sm:$0xff] }
  0x12   : > { %937 = vmatmul.msk.f32.vlgmr.msra.gmra.mxu1 %vm396_vm1, %v371_v4  ;;  %v382_v13 = vld [vmem:[%s1127_s8 + $0x98] sm:$0xff]  ;;  %v383_v17 = vld [vmem:[%s1127_s8 + $0xa0] sm:$0xff]  ;;  %v384_v21 = vld [vmem:[%s1127_s8 + $0xa8] sm:$0xff] }
  0x13   : > { %v390_v14 = vld [vmem:[%s1127_s8 + $0xd8] sm:$0xff]  ;;  %v391_v18 = vld [vmem:[%s1127_s8 + $0xe0] sm:$0xff]  ;;  %v392_v22 = vld [vmem:[%s1127_s8 + $0xe8] sm:$0xff] }
  0x14   : > { %v366_v15 = vld [vmem:[%s1127_s8 + $0x18] sm:$0xff]  ;;  %v367_v19 = vld [vmem:[%s1127_s8 + $0x20] sm:$0xff]  ;;  %v368_v23 = vld [vmem:[%s1127_s8 + $0x28] sm:$0xff] }
  0x15   : > { %v374_v16 = vld [vmem:[%s1127_s8 + $0x58] sm:$0xff]  ;;  %v375_v20 = vld [vmem:[%s1127_s8 + $0x60] sm:$0xff]  ;;  %v376_v24 = vld [vmem:[%s1127_s8 + $0x68] sm:$0xff] }
  0x16   : > { %v385_v25 = vld [vmem:[%s1127_s8 + $0xb0] sm:$0xff]  ;;  %v386_v29 = vld [vmem:[%s1127_s8 + $0xb8] sm:$0xff]  ;;  %v967_v33 = vld [vmem:[%s1197_s12] sm:$0xff]  }
  0x17   : > { %946 = vmatmul.msk.f32.gmra.mxu2 %vm396_vm1, %v380_v5  ;;  %v393_v26 = vld [vmem:[%s1127_s8 + $0xf0] sm:$0xff]  ;;  %v394_v30 = vld [vmem:[%s1127_s8 + $0xf8] sm:$0xff]  ;;  %v1033_v34 = vld [vmem:[%s1197_s12 + $0x20] sm:$0xff]   ;;  %v968_v35 = vunpack.c.l.bf16 %v967_v33  ;;  %v969_v48 = vunpack.c.h.bf16 %v967_v33 }
  0x18   : > { %954 = vmatmul.msk.f32.gmra.mxu3 %vm396_vm1, %v388_v6  ;;  %v369_v27 = vld [vmem:[%s1127_s8 + $0x30] sm:$0xff]  ;;  %v370_v31 = vld [vmem:[%s1127_s8 + $0x38] sm:$0xff]  ;;  %v984_v37 = vunpack.c.l.bf16 %v1033_v34  ;;  %v1037_v38 = vld [vmem:[%s1197_s12 + $0x40] sm:$0xff]   ;;  %v985_v49 = vunpack.c.h.bf16 %v1033_v34 }
  0x19   : > { %930 = vmatmul.msk.f32.gmra.mxu0 %vm396_vm1, %v364_v7  ;;  %v377_v28 = vld [vmem:[%s1127_s8 + $0x70] sm:$0xff]  ;;  %v378_v32 = vld [vmem:[%s1127_s8 + $0x78] sm:$0xff]  ;;  %v1041_v39 = vld [vmem:[%s1197_s12 + $0x60] sm:$0xff]   ;;  %v614_v40 = vmul.f32 %v1204_v36, %v968_v35  ;;  %v1000_v43 = vunpack.c.l.bf16 %v1037_v38  ;;  %v615_v59 = vmul.f32 %v1204_v36, %v969_v48  ;;  %v1001_v1 = vunpack.c.h.bf16 %v1037_v38 }
  0x1a   : > { %938 = vmatmul.msk.f32.gmra.mxu1 %vm396_vm1, %v372_v8  ;;  %v622_v42 = vmul.f32 %v1204_v36, %v984_v37  ;;  %v1016_v44 = vunpack.c.l.bf16 %v1041_v39  ;;  %v1218_v45 = vld [vmem:[%s1458_s5] ss:$0 sm:$0xff]  ;;  %v623_v60 = vmul.f32 %v1204_v36, %v985_v49  ;;  %v1234_v61 = vld [vmem:[%s1197_s12 + $0x8] sm:$0xff]   ;;  %v1017_v2 = vunpack.c.h.bf16 %v1041_v39 }
  0x1b   : > { %v650_v46 = vadd.f32 %v1212_v41, %v614_v40  ;;  %v630_v52 = vmul.f32 %v1204_v36, %v1000_v43  ;;  %v1228_v55 = vld [vmem:[%s1459_s6] ss:$0 sm:$0xff]  ;;  %v1237_v62 = vld [vmem:[%s1197_s12 + $0x28] sm:$0xff]  }
  0x1c   : > { %v658_v47 = vadd.f32 %v1212_v41, %v622_v42  ;;  %v638_v53 = vmul.f32 %v1204_v36, %v1016_v44 }
  0x1d   : > { %v666_v63 = vadd.f32 %v1212_v41, %v630_v52  ;;  %v973_v52 = vunpack.c.h.bf16 %v1234_v61 }
  0x1e   : > { %v674_v0 = vadd.f32 %v1212_v41, %v638_v53  ;;  %v989_v53 = vunpack.c.h.bf16 %v1237_v62 }
  0x1f   : > { %947 = vmatmul.msk.f32.gmra.mxu2 %vm396_vm1, %v381_v9  ;;  %v972_v9 = vunpack.c.l.bf16 %v1234_v61 }
  0x20   : > { %955 = vmatmul.msk.f32.gmra.mxu3 %vm396_vm1, %v389_v10  ;;  %v988_v10 = vunpack.c.l.bf16 %v1237_v62 }
  0x21   : > { %931 = vmatmul.msk.f32.gmra.mxu0 %vm396_vm1, %v365_v11  ;;  %v1255_v11 = vld [vmem:[%s1197_s12 + $0x48] sm:$0xff]  }
  0x22   : > { %939 = vmatmul.msk.f32.gmra.mxu1 %vm396_vm1, %v373_v12  ;;  %v1258_v12 = vld [vmem:[%s1197_s12 + $0x68] sm:$0xff]  }
  0x27   : > { %948 = vmatmul.msk.f32.gmra.mxu2 %vm396_vm1, %v382_v13 }
  0x28   : > { %956 = vmatmul.msk.f32.gmra.mxu3 %vm396_vm1, %v390_v14 }
  0x29   : > { %932 = vmatmul.msk.f32.gmra.mxu0 %vm396_vm1, %v366_v15  ;;  %v651_v15 = vadd.f32 %v1212_v41, %v615_v59 }
  0x2a   : > { %940 = vmatmul.msk.f32.gmra.mxu1 %vm396_vm1, %v374_v16  ;;  %v659_v16 = vadd.f32 %v1212_v41, %v623_v60 }
  0x2f   : > { %949 = vmatmul.msk.f32.gmra.mxu2 %vm396_vm1, %v383_v17 }
  0x30   : > { %957 = vmatmul.msk.f32.gmra.mxu3 %vm396_vm1, %v391_v18 }
  0x31   : > { %933 = vmatmul.msk.f32.gmra.mxu0 %vm396_vm1, %v367_v19 }
  0x32   : > { %941 = vmatmul.msk.f32.gmra.mxu1 %vm396_vm1, %v375_v20 }
  0x37   : > { %950 = vmatmul.msk.f32.gmra.mxu2 %vm396_vm1, %v384_v21  ;;  %v631_v21 = vmul.f32 %v1204_v36, %v1001_v1 }
  0x38   : > { %958 = vmatmul.msk.f32.gmra.mxu3 %vm396_vm1, %v392_v22  ;;  %v639_v22 = vmul.f32 %v1204_v36, %v1017_v2 }
  0x39   : > { %934 = vmatmul.msk.f32.gmra.mxu0 %vm396_vm1, %v368_v23  ;;  %v667_v35 = vadd.f32 %v1212_v41, %v631_v21  ;;  %v1314_v21 = vld [vmem:[%s1197_s12 + $0x50] sm:$0xff]  }
  0x3a   : > { %942 = vmatmul.msk.f32.gmra.mxu1 %vm396_vm1, %v376_v24  ;;  %v675_v37 = vadd.f32 %v1212_v41, %v639_v22 }
  0x3f   : > { %951 = vmatmul.msk.f32.gmra.mxu2 %vm396_vm1, %v385_v25  ;;  %v1004_v25 = vunpack.c.l.bf16 %v1255_v11 }
  0x40   : > { %959 = vmatmul.msk.f32.gmra.mxu3 %vm396_vm1, %v393_v26  ;;  %v1020_v26 = vunpack.c.l.bf16 %v1258_v12 }
  0x41   : > { %935 = vmatmul.msk.f32.gmra.mxu0 %vm396_vm1, %v369_v27  ;;  %v632_v43 = vmul.f32 %v1204_v36, %v1004_v25 }
  0x42   : > { %943 = vmatmul.msk.f32.gmra.mxu1 %vm396_vm1, %v377_v28  ;;  %v640_v44 = vmul.f32 %v1204_v36, %v1020_v26 }
  0x43   : > { %v668_v61 = vadd.f32 %v1212_v41, %v632_v43 }
  0x44   : > { %v676_v62 = vadd.f32 %v1212_v41, %v640_v44 }
  0x47   : > { %952 = vmatmul.msk.f32.gmra.mxu2 %vm396_vm1, %v386_v29  ;;  %v616_v29 = vmul.f32 %v1204_v36, %v972_v9  ;;  %v1005_v9 = vunpack.c.h.bf16 %v1255_v11  ;;  %v1317_v11 = vld [vmem:[%s1197_s12 + $0x70] sm:$0xff]  }
  0x48   : > { %960 = vmatmul.msk.f32.gmra.mxu3 %vm396_vm1, %v394_v30  ;;  %v624_v30 = vmul.f32 %v1204_v36, %v988_v10  ;;  %v1021_v10 = vunpack.c.h.bf16 %v1258_v12 }
  0x49   : > { %936 = vmatmul.msk.f32.gmra.mxu0 %vm396_vm1, %v370_v31  ;;  %v652_v48 = vadd.f32 %v1212_v41, %v616_v29  ;;  %v633_v29 = vmul.f32 %v1204_v36, %v1005_v9 }
  0x4a   : > { %944 = vmatmul.msk.f32.gmra.mxu1 %vm396_vm1, %v378_v32  ;;  %v660_v49 = vadd.f32 %v1212_v41, %v624_v30  ;;  %v641_v30 = vmul.f32 %v1204_v36, %v1021_v10 }
  0x8e   : > { %v514_v50 = vpop.f32.mrf.mxu0 }
  0x8f   : > { %v538_v51 = vpop.f32.mrf.mxu1  ;;  %v686_v54 = vmul.f32 %v1218_v45, %v514_v50 }
  0x90   : > { %v694_v56 = vmul.f32 %v1218_v45, %v538_v51 }
  0x91   : > { %v718_v57 = vadd.f32 %v686_v54, %v650_v46 }
  0x92   : > { %v726_v58 = vadd.f32 %v694_v56, %v658_v47  ;;  %v562_v5 = vpop.f32.mrf.mxu2 }
  0x93   : > { %v754_v3 = vadd.f32 %v1228_v55, %v718_v57  ;;  %v586_v6 = vpop.f32.mrf.mxu3  ;;  %v702_v7 = vmul.f32 %v1218_v45, %v562_v5  ;;  %v1299_v5 = vld [vmem:[%s1197_s12 + $0x10] sm:$0xff]  }
  0x94   : > { %v762_v4 = vadd.f32 %v1228_v55, %v726_v58  ;;  %v710_v8 = vmul.f32 %v1218_v45, %v586_v6  ;;  %v1302_v6 = vld [vmem:[%s1197_s12 + $0x30] sm:$0xff]  }
  0x95   : > { %v786_v13 = vmax.f32 %v754_v3, 0.0  ;;  %v734_v17 = vadd.f32 %v702_v7, %v666_v63  ;;  %v617_v3 = vmul.f32 %v1204_v36, %v973_v52 }
  0x96   : > { %v794_v14 = vmax.f32 %v762_v4, 0.0  ;;  %v742_v18 = vadd.f32 %v710_v8, %v674_v0  ;;  %v517_v19 = vpop.f32.mrf.mxu0  ;;  %v625_v4 = vmul.f32 %v1204_v36, %v989_v53 }
  0x97   : > { %v541_v20 = vpop.f32.mrf.mxu1  ;;  %818 = vst [vmem:[%s1248_s23] sm:$0xff] %v786_v13  ;;  %v687_v23 = vmul.f32 %v1218_v45, %v517_v19  ;;  %v770_v27 = vadd.f32 %v1228_v55, %v734_v17  ;;  %v976_v19 = vunpack.c.l.bf16 %v1299_v5 }
  0x98   : > { %v695_v24 = vmul.f32 %v1218_v45, %v541_v20  ;;  %826 = vst [vmem:[%s1248_s23 + $0x40] sm:$0xff] %v794_v14  ;;  %v778_v28 = vadd.f32 %v1228_v55, %v742_v18  ;;  %v992_v20 = vunpack.c.l.bf16 %v1302_v6 }
  0x99   : > { %v719_v31 = vadd.f32 %v687_v23, %v651_v15  ;;  %v802_v33 = vmax.f32 %v770_v27, 0.0  ;;  %v653_v23 = vadd.f32 %v1212_v41, %v617_v3 }
  0x9a   : > { %v727_v32 = vadd.f32 %v695_v24, %v659_v16  ;;  %v810_v34 = vmax.f32 %v778_v28, 0.0  ;;  %v565_v40 = vpop.f32.mrf.mxu2  ;;  %v661_v24 = vadd.f32 %v1212_v41, %v625_v4 }
  0x9b   : > { %v755_v38 = vadd.f32 %v1228_v55, %v719_v31  ;;  %v589_v42 = vpop.f32.mrf.mxu3  ;;  %834 = vst [vmem:[%s1248_s23 + $0x80] sm:$0xff] %v802_v33  ;;  %v703_v46 = vmul.f32 %v1218_v45, %v565_v40  ;;  %v1008_v33 = vunpack.c.l.bf16 %v1314_v21 }
  0x9c   : > { %v763_v39 = vadd.f32 %v1228_v55, %v727_v32  ;;  %v711_v47 = vmul.f32 %v1218_v45, %v589_v42  ;;  %842 = vst [vmem:[%s1248_s23 + $0xc0] sm:$0xff] %v810_v34  ;;  %v1024_v34 = vunpack.c.l.bf16 %v1317_v11 }
  0x9d   : > { %v787_v50 = vmax.f32 %v755_v38, 0.0  ;;  %v735_v54 = vadd.f32 %v703_v46, %v667_v35  ;;  %v618_v38 = vmul.f32 %v1204_v36, %v976_v19  ;;  %v669_v46 = vadd.f32 %v1212_v41, %v633_v29  ;;  %v1374_v29 = vld [vmem:[%s1197_s12 + $0x58] sm:$0xff]  }
  0x9e   : > { %v795_v51 = vmax.f32 %v763_v39, 0.0  ;;  %v743_v56 = vadd.f32 %v711_v47, %v675_v37  ;;  %v520_v57 = vpop.f32.mrf.mxu0  ;;  %v626_v39 = vmul.f32 %v1204_v36, %v992_v20  ;;  %v677_v47 = vadd.f32 %v1212_v41, %v641_v30 }
  0x9f   : > { %v544_v58 = vpop.f32.mrf.mxu1  ;;  %819 = vst [vmem:[%s1248_s23 + $0x8] sm:$0xff] %v787_v50  ;;  %v688_v59 = vmul.f32 %v1218_v45, %v520_v57  ;;  %v771_v63 = vadd.f32 %v1228_v55, %v735_v54  ;;  %v634_v52 = vmul.f32 %v1204_v36, %v1008_v33  ;;  %v642_v53 = vmul.f32 %v1204_v36, %v1024_v34 }
  0xa0   : > { %v696_v60 = vmul.f32 %v1218_v45, %v544_v58  ;;  %827 = vst [vmem:[%s1248_s23 + $0x48] sm:$0xff] %v795_v51  ;;  %v779_v0 = vadd.f32 %v1228_v55, %v743_v56  ;;  %v654_v57 = vadd.f32 %v1212_v41, %v618_v38  ;;  %v662_v58 = vadd.f32 %v1212_v41, %v626_v39 }
  0xa1   : > { %v720_v1 = vadd.f32 %v688_v59, %v652_v48  ;;  %v803_v7 = vmax.f32 %v771_v63, 0.0  ;;  %v977_v63 = vunpack.c.h.bf16 %v1299_v5  ;;  %v670_v5 = vadd.f32 %v1212_v41, %v634_v52 }
  0xa2   : > { %v728_v2 = vadd.f32 %v696_v60, %v660_v49  ;;  %v811_v8 = vmax.f32 %v779_v0, 0.0  ;;  %v568_v15 = vpop.f32.mrf.mxu2  ;;  %v993_v0 = vunpack.c.h.bf16 %v1302_v6  ;;  %v678_v6 = vadd.f32 %v1212_v41, %v642_v53 }
  0xa3   : > { %v756_v13 = vadd.f32 %v1228_v55, %v720_v1  ;;  %v592_v16 = vpop.f32.mrf.mxu3  ;;  %835 = vst [vmem:[%s1248_s23 + $0x88] sm:$0xff] %v803_v7  ;;  %v704_v17 = vmul.f32 %v1218_v45, %v568_v15  ;;  %v1359_v15 = vld [vmem:[%s1197_s12 + $0x18] sm:$0xff]   ;;  %v1009_v19 = vunpack.c.h.bf16 %v1314_v21  ;;  %v1025_v20 = vunpack.c.h.bf16 %v1317_v11 }
  0xa4   : > { %v764_v14 = vadd.f32 %v1228_v55, %v728_v2  ;;  %v712_v18 = vmul.f32 %v1218_v45, %v592_v16  ;;  %843 = vst [vmem:[%s1248_s23 + $0xc8] sm:$0xff] %v811_v8  ;;  %v1362_v16 = vld [vmem:[%s1197_s12 + $0x38] sm:$0xff]  }
  0xa5   : > { %v788_v12 = vmax.f32 %v756_v13, 0.0  ;;  %v736_v25 = vadd.f32 %v704_v17, %v668_v61  ;;  %v619_v13 = vmul.f32 %v1204_v36, %v977_v63  ;;  %v1377_v21 = vld [vmem:[%s1197_s12 + $0x78] sm:$0xff]   ;;  %v635_v38 = vmul.f32 %v1204_v36, %v1009_v19 }
  0xa6   : > { %v796_v22 = vmax.f32 %v764_v14, 0.0  ;;  %v744_v26 = vadd.f32 %v712_v18, %v676_v62  ;;  %v523_v27 = vpop.f32.mrf.mxu0  ;;  %v627_v14 = vmul.f32 %v1204_v36, %v993_v0  ;;  %v643_v39 = vmul.f32 %v1204_v36, %v1025_v20 }
  0xa7   : > { %v547_v28 = vpop.f32.mrf.mxu1  ;;  %820 = vst [vmem:[%s1248_s23 + $0x10] sm:$0xff] %v788_v12  ;;  %v689_v31 = vmul.f32 %v1218_v45, %v523_v27  ;;  %v772_v35 = vadd.f32 %v1228_v55, %v736_v25  ;;  %v980_v27 = vunpack.c.l.bf16 %v1359_v15 }
  0xa8   : > { %v697_v32 = vmul.f32 %v1218_v45, %v547_v28  ;;  %828 = vst [vmem:[%s1248_s23 + $0x50] sm:$0xff] %v796_v22  ;;  %v780_v37 = vadd.f32 %v1228_v55, %v744_v26  ;;  %v996_v28 = vunpack.c.l.bf16 %v1362_v16 }
  0xa9   : > { %v721_v40 = vadd.f32 %v689_v31, %v653_v23  ;;  %v804_v43 = vmax.f32 %v772_v35, 0.0  ;;  %v655_v31 = vadd.f32 %v1212_v41, %v619_v13 }
  0xaa   : > { %v729_v42 = vadd.f32 %v697_v32, %v661_v24  ;;  %v812_v44 = vmax.f32 %v780_v37, 0.0  ;;  %v571_v50 = vpop.f32.mrf.mxu2  ;;  %v663_v32 = vadd.f32 %v1212_v41, %v627_v14 }
  0xab   : > { %v757_v48 = vadd.f32 %v1228_v55, %v721_v40  ;;  %v595_v51 = vpop.f32.mrf.mxu3  ;;  %836 = vst [vmem:[%s1248_s23 + $0x90] sm:$0xff] %v804_v43  ;;  %v705_v54 = vmul.f32 %v1218_v45, %v571_v50  ;;  %v1012_v43 = vunpack.c.l.bf16 %v1374_v29 }
  0xac   : > { %v765_v49 = vadd.f32 %v1228_v55, %v729_v42  ;;  %v713_v56 = vmul.f32 %v1218_v45, %v595_v51  ;;  %844 = vst [vmem:[%s1248_s23 + $0xd0] sm:$0xff] %v812_v44  ;;  %v1028_v44 = vunpack.c.l.bf16 %v1377_v21 }
  0xad   : > { %v789_v59 = vmax.f32 %v757_v48, 0.0  ;;  %v737_v61 = vadd.f32 %v705_v54, %v669_v46  ;;  %v620_v48 = vmul.f32 %v1204_v36, %v980_v27  ;;  %v671_v54 = vadd.f32 %v1212_v41, %v635_v38 }
  0xae   : > { %v797_v60 = vmax.f32 %v765_v49, 0.0  ;;  %v745_v62 = vadd.f32 %v713_v56, %v677_v47  ;;  %v526_v1 = vpop.f32.mrf.mxu0  ;;  %v628_v49 = vmul.f32 %v1204_v36, %v996_v28  ;;  %v679_v56 = vadd.f32 %v1212_v41, %v643_v39 }
  0xaf   : > { %v550_v2 = vpop.f32.mrf.mxu1  ;;  %821 = vst [vmem:[%s1248_s23 + $0x18] sm:$0xff] %v789_v59  ;;  %v690_v3 = vmul.f32 %v1218_v45, %v526_v1  ;;  %v773_v7 = vadd.f32 %v1228_v55, %v737_v61  ;;  %v636_v63 = vmul.f32 %v1204_v36, %v1012_v43  ;;  %v644_v0 = vmul.f32 %v1204_v36, %v1028_v44 }
  0xb0   : > { %v698_v4 = vmul.f32 %v1218_v45, %v550_v2  ;;  %829 = vst [vmem:[%s1248_s23 + $0x58] sm:$0xff] %v797_v60  ;;  %v781_v8 = vadd.f32 %v1228_v55, %v745_v62  ;;  %v656_v1 = vadd.f32 %v1212_v41, %v620_v48  ;;  %v664_v2 = vadd.f32 %v1212_v41, %v628_v49 }
  0xb1   : > { %v722_v9 = vadd.f32 %v690_v3, %v654_v57  ;;  %v805_v17 = vmax.f32 %v773_v7, 0.0  ;;  %v981_v7 = vunpack.c.h.bf16 %v1359_v15  ;;  %v672_v19 = vadd.f32 %v1212_v41, %v636_v63 }
  0xb2   : > { %v730_v10 = vadd.f32 %v698_v4, %v662_v58  ;;  %v813_v18 = vmax.f32 %v781_v8, 0.0  ;;  %v574_v23 = vpop.f32.mrf.mxu2  ;;  %v997_v8 = vunpack.c.h.bf16 %v1362_v16  ;;  %v680_v15 = vadd.f32 %v1212_v41, %v644_v0 }
  0xb3   : > { %v758_v12 = vadd.f32 %v1228_v55, %v722_v9  ;;  %v598_v24 = vpop.f32.mrf.mxu3  ;;  %837 = vst [vmem:[%s1248_s23 + $0x98] sm:$0xff] %v805_v17  ;;  %v706_v25 = vmul.f32 %v1218_v45, %v574_v23 }
  0xb4   : > { %v766_v22 = vadd.f32 %v1228_v55, %v730_v10  ;;  %v714_v26 = vmul.f32 %v1218_v45, %v598_v24  ;;  %845 = vst [vmem:[%s1248_s23 + $0xd8] sm:$0xff] %v813_v18 }
  0xb5   : > { %v790_v11 = vmax.f32 %v758_v12, 0.0  ;;  %v738_v33 = vadd.f32 %v706_v25, %v670_v5  ;;  %v621_v12 = vmul.f32 %v1204_v36, %v981_v7  ;;  %v1013_v25 = vunpack.c.h.bf16 %v1374_v29 }
  0xb6   : > { %v798_v30 = vmax.f32 %v766_v22, 0.0  ;;  %v746_v34 = vadd.f32 %v714_v26, %v678_v6  ;;  %v529_v35 = vpop.f32.mrf.mxu0  ;;  %v629_v22 = vmul.f32 %v1204_v36, %v997_v8  ;;  %v1029_v26 = vunpack.c.h.bf16 %v1377_v21 }
  0xb7   : > { %v553_v37 = vpop.f32.mrf.mxu1  ;;  %822 = vst [vmem:[%s1248_s23 + $0x20] sm:$0xff] %v790_v11  ;;  %v691_v40 = vmul.f32 %v1218_v45, %v529_v35  ;;  %v774_v46 = vadd.f32 %v1228_v55, %v738_v33  ;;  %v657_v29 = vadd.f32 %v1212_v41, %v621_v12 }
  0xb8   : > { %v699_v42 = vmul.f32 %v1218_v45, %v553_v37  ;;  %830 = vst [vmem:[%s1248_s23 + $0x60] sm:$0xff] %v798_v30  ;;  %v782_v47 = vadd.f32 %v1228_v55, %v746_v34  ;;  %v665_v21 = vadd.f32 %v1212_v41, %v629_v22 }
  0xb9   : > { %v723_v50 = vadd.f32 %v691_v40, %v655_v31  ;;  %v806_v52 = vmax.f32 %v774_v46, 0.0  ;;  %v637_v40 = vmul.f32 %v1204_v36, %v1013_v25 }
  0xba   : > { %v731_v51 = vadd.f32 %v699_v42, %v663_v32  ;;  %v814_v53 = vmax.f32 %v782_v47, 0.0  ;;  %v577_v59 = vpop.f32.mrf.mxu2  ;;  %v645_v42 = vmul.f32 %v1204_v36, %v1029_v26 }
  0xbb   : > { %v759_v57 = vadd.f32 %v1228_v55, %v723_v50  ;;  %v601_v60 = vpop.f32.mrf.mxu3  ;;  %838 = vst [vmem:[%s1248_s23 + $0xa0] sm:$0xff] %v806_v52  ;;  %v707_v61 = vmul.f32 %v1218_v45, %v577_v59  ;;  %v673_v36 = vadd.f32 %v1212_v41, %v637_v40 }
  0xbc   : > { %v767_v58 = vadd.f32 %v1228_v55, %v731_v51  ;;  %v715_v62 = vmul.f32 %v1218_v45, %v601_v60  ;;  %846 = vst [vmem:[%s1248_s23 + $0xe0] sm:$0xff] %v814_v53  ;;  %v681_v52 = vadd.f32 %v1212_v41, %v645_v42 }
  0xbd   : > { %v791_v3 = vmax.f32 %v759_v57, 0.0  ;;  %v739_v5 = vadd.f32 %v707_v61, %v671_v54 }
  0xbe   : > { %v799_v4 = vmax.f32 %v767_v58, 0.0  ;;  %v747_v6 = vadd.f32 %v715_v62, %v679_v56  ;;  %v532_v9 = vpop.f32.mrf.mxu0 }
  0xbf   : > { %v556_v10 = vpop.f32.mrf.mxu1  ;;  %823 = vst [vmem:[%s1248_s23 + $0x28] sm:$0xff] %v791_v3  ;;  %v692_v13 = vmul.f32 %v1218_v45, %v532_v9  ;;  %v775_v17 = vadd.f32 %v1228_v55, %v739_v5 }
  0xc0   : > { %v700_v14 = vmul.f32 %v1218_v45, %v556_v10  ;;  %831 = vst [vmem:[%s1248_s23 + $0x68] sm:$0xff] %v799_v4  ;;  %v783_v18 = vadd.f32 %v1228_v55, %v747_v6 }
  0xc1   : > { %v724_v16 = vadd.f32 %v692_v13, %v656_v1  ;;  %v807_v23 = vmax.f32 %v775_v17, 0.0 }
  0xc2   : > { %v732_v20 = vadd.f32 %v700_v14, %v664_v2  ;;  %v815_v24 = vmax.f32 %v783_v18, 0.0  ;;  %v580_v11 = vpop.f32.mrf.mxu2 }
  0xc3   : > { %v760_v27 = vadd.f32 %v1228_v55, %v724_v16  ;;  %v604_v30 = vpop.f32.mrf.mxu3  ;;  %839 = vst [vmem:[%s1248_s23 + $0xa8] sm:$0xff] %v807_v23  ;;  %v708_v31 = vmul.f32 %v1218_v45, %v580_v11 }
  0xc4   : > { %v768_v28 = vadd.f32 %v1228_v55, %v732_v20  ;;  %v716_v32 = vmul.f32 %v1218_v45, %v604_v30  ;;  %847 = vst [vmem:[%s1248_s23 + $0xe8] sm:$0xff] %v815_v24 }
  0xc5   : > { %v792_v33 = vmax.f32 %v760_v27, 0.0  ;;  %v740_v35 = vadd.f32 %v708_v31, %v672_v19 }
  0xc6   : > { %v800_v34 = vmax.f32 %v768_v28, 0.0  ;;  %v748_v37 = vadd.f32 %v716_v32, %v680_v15  ;;  %v535_v38 = vpop.f32.mrf.mxu0 }
  0xc7   : > { %v559_v39 = vpop.f32.mrf.mxu1  ;;  %824 = vst [vmem:[%s1248_s23 + $0x30] sm:$0xff] %v792_v33  ;;  %v693_v43 = vmul.f32 %v1218_v45, %v535_v38  ;;  %v776_v46 = vadd.f32 %v1228_v55, %v740_v35 }
  0xc8   : > { %v701_v44 = vmul.f32 %v1218_v45, %v559_v39  ;;  %832 = vst [vmem:[%s1248_s23 + $0x70] sm:$0xff] %v800_v34  ;;  %v784_v47 = vadd.f32 %v1228_v55, %v748_v37 }
  0xc9   : > { %v725_v48 = vadd.f32 %v693_v43, %v657_v29  ;;  %v808_v50 = vmax.f32 %v776_v46, 0.0 }
  0xca   : > { %v733_v49 = vadd.f32 %v701_v44, %v665_v21  ;;  %v816_v51 = vmax.f32 %v784_v47, 0.0  ;;  %v583_v56 = vpop.f32.mrf.mxu2 }
  0xcb   : > { %v761_v53 = vadd.f32 %v1228_v55, %v725_v48  ;;  %v607_v57 = vpop.f32.mrf.mxu3  ;;  %840 = vst [vmem:[%s1248_s23 + $0xb0] sm:$0xff] %v808_v50  ;;  %v709_v58 = vmul.f32 %v1218_v45, %v583_v56 }
  0xcc   : > { %v769_v54 = vadd.f32 %v1228_v55, %v733_v49  ;;  %v717_v59 = vmul.f32 %v1218_v45, %v607_v57  ;;  %848 = vst [vmem:[%s1248_s23 + $0xf0] sm:$0xff] %v816_v51 }
  0xcd   : > { %v793_v60 = vmax.f32 %v761_v53, 0.0  ;;  %v741_v0 = vadd.f32 %v709_v58, %v673_v36 }
  0xce   : > { %v801_v63 = vmax.f32 %v769_v54, 0.0  ;;  %v749_v61 = vadd.f32 %v717_v59, %v681_v52 }
  0xcf   : > { %825 = vst [vmem:[%s1248_s23 + $0x38] sm:$0xff] %v793_v60  ;;  %v777_v41 = vadd.f32 %v1228_v55, %v741_v0 }
  0xd0   : > { %833 = vst [vmem:[%s1248_s23 + $0x78] sm:$0xff] %v801_v63  ;;  %v785_v62 = vadd.f32 %v1228_v55, %v749_v61 }
  0xd1   : > { %v809_v1 = vmax.f32 %v777_v41, 0.0 }
  0xd2   : > { %v817_v2 = vmax.f32 %v785_v62, 0.0 }
  0xd3   : > { %841 = vst [vmem:[%s1248_s23 + $0xb8] sm:$0xff] %v809_v1 }
  0xd4   : > { %849 = vst [vmem:[%s1248_s23 + $0xf8] sm:$0xff] %v817_v2 }
  0xd5 PF: > { %s17_s24 = sadd.s32 1, %s1066_s24  }
  0xd6   : > { %p14_p4 = scmp.ge.s32.totalorder %s17_s24, 4  }
  0xd8   :  { %16 = sbr.rel (!%p14_p4) target bundleno = 1 (0x1), region = 81 }

// kernel: residual_block.3
= control target key start
LH: loop header
LB: loop body
LE: loop exit
PB: predicated region body
PF: predicated region fallthrough
CT: control target
= control target key end

     0   :  { %s2960_s24 = smov 0   ;;  %s5088_s0 = inlined_call_operand.vmem [shape: f32[2,16,16,4], index: 0, kind: input, shape index: {}]   ;;  %s5089_s1 = inlined_call_operand.vmem [shape: f32[36,128], index: 1, kind: input, shape index: {}]   ;;  %s5090_s2 = inlined_call_operand.vmem [shape: f32[4,128], index: 2, kind: input, shape index: {}]   ;;  %s5091_s3 = inlined_call_operand.vmem [shape: bf16[2,256,128], index: 3, kind: output, shape index: {0}]   ;;  %s5092_s4 = inlined_call_operand.vmem [shape: f32[2,1,128], index: 4, kind: output, shape index: {1}]   ;;  %s5093_s5 = inlined_call_operand.vmem [shape: f32[2,1,128], index: 5, kind: output, shape index: {2}]   ;;  %s5094_s6 = inlined_call_operand.vmem [shape: f32[2,1,128], index: 6, kind: output, shape index: {3}]   ;;  %s5095_s7 = inlined_call_operand.vmem [shape: f32[2,1,128], index: 7, kind: output, shape index: {4}]  }
   0x1 LB: > { %s2679_s25 = sadd.s32 4294967295, %s2909_s24   ;;  %p2683_p0 = scmp.ge.s32.totalorder %s2909_s24, 1  ;;  %s2909_s24 = sphi %s2960_s24, %s18_s24  }
   0x2   : > { %p246_p1 = scmp.lt.s32.totalorder %s2909_s24, 3 }
   0x4   : > { %p247_p2 = pnand %p2683_p0, %p246_p1 }
   0x6   : > { %250 = sbr.rel (%p247_p2) target bundleno = 1009 (0x3f1), region = 32 }
   0xb   : > { %vm344_vm0 = vcmask 31744   ;;  %v2911_v0 = vmov 0.0   ;;  %s2912_s26 = smov 4   ;;  %p290_p3 = scmp.lt.s32.totalorder %s2679_s25, 1  ;;  %vm672_vm1 = vcmask 1046528   ;;  %vm543_vm2 = vcmask 1040384  }
   0xc   : > { %346 = vst.msk [vmem:[#allocation2 + $0x8] sm:$0xff] %vm344_vm0, %v2911_v0  ;;  %s2913_s8 = smov 8   ;;  %s2914_s9 = smov 12   ;;  %vm1581_vm3 = vcmask 64512   ;;  %vm1614_vm4 = vcmask 97280   ;;  %vm1647_vm5 = vcmask 130048  }
   0xd   : > { %345 = vst.msk [vmem:[#allocation2] sm:$0xff] %vm344_vm0, %v2911_v0  ;;  %s5579_s25 = smov (!%p290_p3, %s2679_s25), 1  ;;  %s2915_s10 = smov 16   ;;  %vm1680_vm6 = vcmask 162816   ;;  %vm1914_vm7 = vcmask 1043456   ;;  %vm1713_vm8 = vcmask 195584  }
   0xe   : > { %347 = vst.msk [vmem:[#allocation2 + $0x10] sm:$0xff] %vm344_vm0, %v2911_v0  ;;  %s2756_s27 = sshll.u32 %s5579_s25, 8  ;;  %s2916_s11 = smov 20   ;;  %vm1746_vm9 = vcmask 228352   ;;  %vm1779_vm10 = vcmask 261120   ;;  %vm1817_vm11 = vcmask 293888  }
   0xf   : > { %348 = vst.msk [vmem:[#allocation2 + $0x18] sm:$0xff] %vm344_vm0, %v2911_v0  ;;  %s3021_s30 = scalar_lea.vmem %s5088_s0, %s2756_s27  ;;  %s2917_s12 = smov 24  }
  0x10   : > { %350 = vst.msk [vmem:[#allocation2 + $0x220] sm:$0xff] %vm344_vm0, %v2911_v0  ;;  %v3027_v3 = vld [vmem:[%s3021_s30 + $0x10] sm:$0xff]  ;;  %v3036_v4 = vld [vmem:[%s3021_s30] sm:$0xff]  ;;  %v3040_v5 = vld [vmem:[%s3021_s30 + $0x18] sm:$0xff]  ;;  %s2918_s13 = smov 32   ;;  %s2919_s14 = smov 28  }
  0x11   : > { %351 = vst.msk [vmem:[#allocation2 + $0x228] sm:$0xff] %vm344_vm0, %v2911_v0  ;;  %v3044_v6 = vld [vmem:[%s3021_s30 + $0x8] sm:$0xff]  ;;  %v3049_v7 = vld [vmem:[%s3021_s30 + $0x20] sm:$0xff]  ;;  %v3054_v8 = vld [vmem:[%s3021_s30 + $0x30] sm:$0xff]  ;;  %s2757_s29 = sshll.u32 %s5579_s25, 7  ;;  %s311_s15 = scalar_lea.vmem %s5095_s7, %s5579_s25 }
  0x12   : > { %352 = vst.msk [vmem:[#allocation2 + $0x230] sm:$0xff] %vm344_vm0, %v2911_v0  ;;  %v3061_v10 = vld [vmem:[%s3021_s30 + $0x28] sm:$0xff]  ;;  %v3068_v11 = vld [vmem:[%s3021_s30 + $0x38] sm:$0xff]  ;;  %v3078_v13 = vld [vmem:[%s3021_s30 + $0x40] sm:$0xff]  ;;  %s302_s18 = scalar_lea.vmem %s5092_s4, %s5579_s25  ;;  %s305_s21 = scalar_lea.vmem %s5093_s5, %s5579_s25 }
  0x13   : > { %v2975_v1 = vld [vmem:[#allocation2 + $0x8] sm:$0xff]  ;;  %353 = vst.msk [vmem:[#allocation2 + $0x238] sm:$0xff] %vm344_vm0, %v2911_v0  ;;  %v3083_v14 = vld [vmem:[%s3021_s30 + $0x50] sm:$0xff]  ;;  %v3090_v16 = vld [vmem:[%s3021_s30 + $0x60] sm:$0xff] }
  0x14   : > { %5209 = vst [vmem:[#allocation3_spill] sm:$0xff] %v2975_v1  ;;  %781 = vrot.lane.b32.xlu0 %v2975_v1, %s2912_s26  ;;  %v3073_v12 = vld [vmem:[%s3021_s30 + $0x48] sm:$0xff]  ;;  %v3099_v18 = vld [vmem:[%s3021_s30 + $0x58] sm:$0xff]  ;;  %v3120_v22 = vld [vmem:[%s3021_s30 + $0x70] sm:$0xff]  ;;  %v673_v48 = vrot.slane %v2975_v1, 1 }
  0x15   : > { %355 = vst.msk [vmem:[#allocation2 + $0x20] sm:$0xff] %vm344_vm0, %v2911_v0  ;;  %v2994_v2 = vld [vmem:[#allocation2 + $0x10] sm:$0xff]  ;;  %v3104_v19 = vld [vmem:[%s3021_s30 + $0x68] sm:$0xff]  ;;  %v3111_v21 = vld [vmem:[%s3021_s30 + $0x78] sm:$0xff] }
  0x16   : > { %356 = vst.msk [vmem:[#allocation2 + $0x40] sm:$0xff] %vm344_vm0, %v2911_v0  ;;  %v3125_v23 = vld [vmem:[%s3021_s30 + $0x80] sm:$0xff]  ;;  %v3136_v25 = vld [vmem:[%s3021_s30 + $0x90] sm:$0xff]  ;;  %v3139_v26 = vld [vmem:[%s3021_s30 + $0x88] sm:$0xff]  ;;  %v674_v49 = vrot.slane %v2994_v2, 1 }
  0x17   : > { %357 = vst.msk [vmem:[#allocation2 + $0x60] sm:$0xff] %vm344_vm0, %v2911_v0  ;;  %v3152_v29 = vld [vmem:[%s3021_s30 + $0x98] sm:$0xff]  ;;  %v3163_v31 = vld [vmem:[%s3021_s30 + $0xa8] sm:$0xff]  ;;  %v3166_v32 = vld [vmem:[%s3021_s30 + $0xa0] sm:$0xff] }
  0x18   : > { %358 = vst.msk [vmem:[#allocation2 + $0x80] sm:$0xff] %vm344_vm0, %v2911_v0  ;;  %v3179_v35 = vld [vmem:[%s3021_s30 + $0xb0] sm:$0xff]  ;;  %v3190_v37 = vld [vmem:[%s3021_s30 + $0xc0] sm:$0xff]  ;;  %v3193_v38 = vld [vmem:[%s3021_s30 + $0xb8] sm:$0xff]  ;;  %v675_v54 = vsel %vm672_vm1, %v673_v48, %v674_v49 }
  0x19   : > { %359 = vst.msk [vmem:[#allocation2 + $0xa0] sm:$0xff] %vm344_vm0, %v2911_v0  ;;  %v3206_v41 = vld [vmem:[%s3021_s30 + $0xc8] sm:$0xff]  ;;  %v3217_v43 = vld [vmem:[%s3021_s30 + $0xd8] sm:$0xff]  ;;  %v3220_v44 = vld [vmem:[%s3021_s30 + $0xd0] sm:$0xff] }
  0x1a   : > { %360 = vst.msk [vmem:[#allocation2 + $0xc0] sm:$0xff] %vm344_vm0, %v2911_v0  ;;  %v3233_v47 = vld [vmem:[%s3021_s30 + $0xe0] sm:$0xff]  ;;  %v3246_v51 = vld [vmem:[%s3021_s30 + $0xe8] sm:$0xff] }
  0x1b   : > { %361 = vst.msk [vmem:[#allocation2 + $0xe0] sm:$0xff] %vm344_vm0, %v2911_v0 }
  0x1c   : > { %362 = vst.msk [vmem:[#allocation2 + $0x100] sm:$0xff] %vm344_vm0, %v2911_v0  ;;  %783 = vrot.lane.b32.xlu0 %v2994_v2, %s2912_s26 }
  0x1d   : > { %363 = vst.msk [vmem:[#allocation2 + $0x120] sm:$0xff] %vm344_vm0, %v2911_v0 }
  0x1e   : > { %364 = vst.msk [vmem:[#allocation2 + $0x140] sm:$0xff] %vm344_vm0, %v2911_v0 }
  0x1f   : > { %365 = vst.msk [vmem:[#allocation2 + $0x160] sm:$0xff] %vm344_vm0, %v2911_v0 }
  0x20   : > { %366 = vst.msk [vmem:[#allocation2 + $0x180] sm:$0xff] %vm344_vm0, %v2911_v0 }
  0x21   : > { %367 = vst.msk [vmem:[#allocation2 + $0x1a0] sm:$0xff] %vm344_vm0, %v2911_v0 }
  0x22   : > { %368 = vst.msk [vmem:[#allocation2 + $0x1c0] sm:$0xff] %vm344_vm0, %v2911_v0 }
  0x23   : > { %369 = vst.msk [vmem:[#allocation2 + $0x1e0] sm:$0xff] %vm344_vm0, %v2911_v0 }
  0x24   : > { %370 = vst.msk [vmem:[#allocation2 + $0x200] sm:$0xff] %vm344_vm0, %v2911_v0 }
  0x25   : > { %373 = vst.msk [vmem:[#allocation2 + $0x38] sm:$0xff] %vm344_vm0, %v2911_v0 }
  0x26   : > { %374 = vst.msk [vmem:[#allocation2 + $0x58] sm:$0xff] %vm344_vm0, %v2911_v0 }
  0x27   : > { %375 = vst.msk [vmem:[#allocation2 + $0x78] sm:$0xff] %vm344_vm0, %v2911_v0 }
  0x28   : > { %376 = vst.msk [vmem:[#allocation2 + $0x98] sm:$0xff] %vm344_vm0, %v2911_v0 }
  0x29   : > { %377 = vst.msk [vmem:[#allocation2 + $0xb8] sm:$0xff] %vm344_vm0, %v2911_v0 }
  0x2a   : > { %378 = vst.msk [vmem:[#allocation2 + $0xd8] sm:$0xff] %vm344_vm0, %v2911_v0 }
  0x2b   : > { %379 = vst.msk [vmem:[#allocation2 + $0xf8] sm:$0xff] %vm344_vm0, %v2911_v0 }
  0x2c   : > { %380 = vst.msk [vmem:[#allocation2 + $0x118] sm:$0xff] %vm344_vm0, %v2911_v0 }
  0x2d   : > { %381 = vst.msk [vmem:[#allocation2 + $0x138] sm:$0xff] %vm344_vm0, %v2911_v0 }
  0x2e   : > { %382 = vst.msk [vmem:[#allocation2 + $0x158] sm:$0xff] %vm344_vm0, %v2911_v0 }
  0x2f   : > { %383 = vst.msk [vmem:[#allocation2 + $0x178] sm:$0xff] %vm344_vm0, %v2911_v0 }
  0x30   : > { %384 = vst.msk [vmem:[#allocation2 + $0x198] sm:$0xff] %vm344_vm0, %v2911_v0 }
  0x31   : > { %385 = vst.msk [vmem:[#allocation2 + $0x1b8] sm:$0xff] %vm344_vm0, %v2911_v0 }
  0x32   : > { %386 = vst.msk [vmem:[#allocation2 + $0x1d8] sm:$0xff] %vm344_vm0, %v2911_v0 }
  0x33   : > { %5210 = vst [vmem:[#allocation4_spill] sm:$0xff] %v3027_v3 }
  0x34   : > { %387 = vst.msk [vmem:[#allocation2 + $0x1f8] sm:$0xff] %vm344_vm0, %v2911_v0 }
  0x35   : > { %388 = vst.msk [vmem:[#allocation2 + $0x218] sm:$0xff] %vm344_vm0, %v2911_v0 }
  0x36   : > { %393 = vst.msk [vmem:[#allocation2 + $0x48] sm:$0xff] %vm344_vm0, %v3027_v3  ;;  %v458_v3 = vld [vmem:[#allocation2 + $0x118] sm:$0xff] }
  0x37   : > { %354 = vst.msk [vmem:[#allocation2] sm:$0xff] %vm344_vm0, %v2911_v0 }
  0x38   : > { %371 = vst.msk [vmem:[#allocation2 + $0x220] sm:$0xff] %vm344_vm0, %v2911_v0 }
  0x39   : > { %5211 = vst [vmem:[#allocation5_spill] sm:$0xff] %v3036_v4 }
  0x3a   : > { %372 = vst.msk [vmem:[#allocation2 + $0x18] sm:$0xff] %vm344_vm0, %v2911_v0 }
  0x3b   : > { %5212 = vst [vmem:[#allocation6_spill] sm:$0xff] %v3040_v5 }
  0x3c   : > { %389 = vst.msk [vmem:[#allocation2 + $0x238] sm:$0xff] %vm344_vm0, %v2911_v0 }
  0x3d   : > { %5213 = vst [vmem:[#allocation7_spill] sm:$0xff] %v3044_v6  ;;  %v3056_v9 = vld [vmem:[#allocation2 + $0x48] sm:$0xff] }
  0x3e   : > { %391 = vst.msk [vmem:[#allocation2 + $0x28] sm:$0xff] %vm344_vm0, %v3036_v4  ;;  %789 = vrot.lane.b32.xlu2 %v3056_v9, %s2912_s26 }
  0x3f   : > { %5214 = vst [vmem:[#allocation8_spill] sm:$0xff] %v3049_v7 }
  0x40   : > { %394 = vst.msk [vmem:[#allocation2 + $0x50] sm:$0xff] %vm344_vm0, %v3040_v5 }
  0x41   : > { %5215 = vst [vmem:[#allocation9_spill] sm:$0xff] %v3054_v8  ;;  %v426_v0 = vld [vmem:[#allocation2 + $0x18] sm:$0xff] }
  0x42   : > { %392 = vst.msk [vmem:[#allocation2 + $0x30] sm:$0xff] %vm344_vm0, %v3044_v6  ;;  %v676_v48 = vrot.slane %v426_v0, 1 }
  0x43   : > { %5216 = vst [vmem:[#allocation10_spill] sm:$0xff] %v3061_v10 }
  0x44   : > { %395 = vst.msk [vmem:[#allocation2 + $0x68] sm:$0xff] %vm344_vm0, %v3049_v7  ;;  %v454_v7 = vld [vmem:[#allocation2 + $0xf8] sm:$0xff] }
  0x45   : > { %5217 = vst [vmem:[#allocation11_spill] sm:$0xff] %v3068_v11  ;;  %v3085_v15 = vld [vmem:[#allocation2 + $0x28] sm:$0xff] }
  0x46   : > { %397 = vst.msk [vmem:[#allocation2 + $0x88] sm:$0xff] %vm344_vm0, %v3054_v8  ;;  %785 = vrot.lane.b32.xlu1 %v3085_v15, %s2912_s26  ;;  %v446_v8 = vld [vmem:[#allocation2 + $0xb8] sm:$0xff] }
  0x47   : > { %5218 = vst [vmem:[#allocation12_spill] sm:$0xff] %v3073_v12  ;;  %v3094_v17 = vld [vmem:[#allocation2 + $0x50] sm:$0xff] }
  0x48   : > { %396 = vst.msk [vmem:[#allocation2 + $0x70] sm:$0xff] %vm344_vm0, %v3061_v10  ;;  %791 = vrot.lane.b32.xlu2 %v3094_v17, %s2912_s26  ;;  %v684_v0 = vrot.slane %v3094_v17, 1 }
  0x49   : > { %5219 = vst [vmem:[#allocation13_spill] sm:$0xff] %v3078_v13  ;;  %v3127_v24 = vld [vmem:[#allocation2 + $0x30] sm:$0xff] }
  0x4a   : > { %398 = vst.msk [vmem:[#allocation2 + $0x90] sm:$0xff] %vm344_vm0, %v3068_v11 }
  0x4b   : > { %5220 = vst [vmem:[#allocation14_spill] sm:$0xff] %v3083_v14  ;;  %v3106_v20 = vld [vmem:[#allocation2 + $0x68] sm:$0xff] }
  0x4c   : > { %400 = vst.msk [vmem:[#allocation2 + $0xb0] sm:$0xff] %vm344_vm0, %v3073_v12  ;;  %793 = vrot.lane.b32.xlu0 %v3106_v20, %s2912_s26  ;;  %v434_v12 = vld [vmem:[#allocation2 + $0x58] sm:$0xff] }
  0x4d   : > { %5221 = vst [vmem:[#allocation15_spill] sm:$0xff] %v3090_v16  ;;  %v3143_v27 = vld [vmem:[#allocation2 + $0x88] sm:$0xff] }
  0x4e   : > { %399 = vst.msk [vmem:[#allocation2 + $0xa8] sm:$0xff] %vm344_vm0, %v3078_v13  ;;  %787 = vrot.lane.b32.xlu1 %v3127_v24, %s2912_s26  ;;  %v442_v13 = vld [vmem:[#allocation2 + $0x98] sm:$0xff] }
  0x4f   : > { %5222 = vst [vmem:[#allocation16_spill] sm:$0xff] %v3099_v18  ;;  %v3160_v30 = vld [vmem:[#allocation2 + $0x70] sm:$0xff] }
  0x50   : > { %401 = vst.msk [vmem:[#allocation2 + $0xc8] sm:$0xff] %vm344_vm0, %v3083_v14  ;;  %797 = vrot.lane.b32.xlu2 %v3143_v27, %s2912_s26 }
  0x51   : > { %5223 = vst [vmem:[#allocation17_spill] sm:$0xff] %v3104_v19  ;;  %v3145_v28 = vld [vmem:[#allocation2 + $0x90] sm:$0xff] }
  0x52   : > { %403 = vst.msk [vmem:[#allocation2 + $0xe8] sm:$0xff] %vm344_vm0, %v3090_v16  ;;  %v683_v16 = vrot.slane %v3056_v9, 1 }
  0x53   : > { %5224 = vst [vmem:[#allocation18_spill] sm:$0xff] %v3111_v21  ;;  %v3170_v33 = vld [vmem:[#allocation2 + $0xb0] sm:$0xff] }
  0x54   : > { %402 = vst.msk [vmem:[#allocation2 + $0xd0] sm:$0xff] %vm344_vm0, %v3099_v18  ;;  %799 = vrot.lane.b32.xlu0 %v3145_v28, %s2912_s26  ;;  %v547_v18 = vrot.slane %v2994_v2, 7 }
  0x55   : > { %5225 = vst [vmem:[#allocation19_spill] sm:$0xff] %v3120_v22  ;;  %v3187_v36 = vld [vmem:[#allocation2 + $0xa8] sm:$0xff] }
  0x56   : > { %404 = vst.msk [vmem:[#allocation2 + $0xf0] sm:$0xff] %vm344_vm0, %v3104_v19  ;;  %795 = vrot.lane.b32.xlu1 %v3160_v30, %s2912_s26  ;;  %v679_v19 = vrot.slane %v3127_v24, 1 }
  0x57   : > { %5226 = vst [vmem:[#allocation20_spill] sm:$0xff] %v3125_v23  ;;  %v3172_v34 = vld [vmem:[#allocation2 + $0xc8] sm:$0xff] }
  0x58   : > { %406 = vst.msk [vmem:[#allocation2 + $0x110] sm:$0xff] %vm344_vm0, %v3111_v21  ;;  %803 = vrot.lane.b32.xlu2 %v3170_v33, %s2912_s26  ;;  %v677_v21 = vsel %vm672_vm1, %v674_v49, %v676_v48  ;;  %v438_v48 = vld [vmem:[#allocation2 + $0x78] sm:$0xff] }
  0x59   : > { %405 = vst.msk [vmem:[#allocation2 + $0x108] sm:$0xff] %vm344_vm0, %v3120_v22  ;;  %v3197_v39 = vld [vmem:[#allocation2 + $0xe8] sm:$0xff]  ;;  %v430_v22 = vld [vmem:[#allocation2 + $0x38] sm:$0xff] }
  0x5a   : > { %407 = vst.msk [vmem:[#allocation2 + $0x128] sm:$0xff] %vm344_vm0, %v3125_v23 }
  0x5b   : > { %5227 = vst [vmem:[#allocation21_spill] sm:$0xff] %v3136_v25  ;;  %v3214_v42 = vld [vmem:[#allocation2 + $0xd0] sm:$0xff] }
  0x5c   : > { %5228 = vst [vmem:[#allocation22_spill] sm:$0xff] %v3139_v26  ;;  %805 = vrot.lane.b32.xlu0 %v3172_v34, %s2912_s26 }
  0x5d   : > { %409 = vst.msk [vmem:[#allocation2 + $0x148] sm:$0xff] %vm344_vm0, %v3136_v25  ;;  %v3199_v40 = vld [vmem:[#allocation2 + $0xf0] sm:$0xff] }
  0x5e   : > { %408 = vst.msk [vmem:[#allocation2 + $0x130] sm:$0xff] %vm344_vm0, %v3139_v26  ;;  %801 = vrot.lane.b32.xlu1 %v3187_v36, %s2912_s26  ;;  %v466_v26 = vld [vmem:[#allocation2 + $0x158] sm:$0xff] }
  0x5f   : > { %5229 = vst [vmem:[#allocation23_spill] sm:$0xff] %v3152_v29  ;;  %v3224_v45 = vld [vmem:[#allocation2 + $0x110] sm:$0xff] }
  0x60   : > { %410 = vst.msk [vmem:[#allocation2 + $0x150] sm:$0xff] %vm344_vm0, %v3152_v29  ;;  %809 = vrot.lane.b32.xlu2 %v3197_v39, %s2912_s26  ;;  %v3243_v50 = vld [vmem:[#allocation2 + $0x108] sm:$0xff] }
  0x61   : > { %5230 = vst [vmem:[#allocation24_spill] sm:$0xff] %v3163_v31  ;;  %v3226_v46 = vld [vmem:[#allocation2 + $0x128] sm:$0xff] }
  0x62   : > { %5231 = vst [vmem:[#allocation25_spill] sm:$0xff] %v3166_v32 }
  0x63   : > { %412 = vst.msk [vmem:[#allocation2 + $0x170] sm:$0xff] %vm344_vm0, %v3163_v31  ;;  %v701_v31 = vrot.slane %v446_v8, 1 }
  0x64   : > { %411 = vst.msk [vmem:[#allocation2 + $0x168] sm:$0xff] %vm344_vm0, %v3166_v32  ;;  %811 = vrot.lane.b32.xlu0 %v3199_v40, %s2912_s26  ;;  %v3250_v52 = vld [vmem:[#allocation2 + $0x148] sm:$0xff]  ;;  %v462_v32 = vld [vmem:[#allocation2 + $0x138] sm:$0xff] }
  0x65   : > { %5232 = vst [vmem:[#allocation26_spill] sm:$0xff] %v3179_v35  ;;  %v3261_v55 = vld [vmem:[#allocation2 + $0x130] sm:$0xff] }
  0x66   : > { %413 = vst.msk [vmem:[#allocation2 + $0x188] sm:$0xff] %vm344_vm0, %v3179_v35  ;;  %807 = vrot.lane.b32.xlu1 %v3214_v42, %s2912_s26 }
  0x67   : > { %5233 = vst [vmem:[#allocation27_spill] sm:$0xff] %v3190_v37  ;;  %v3252_v53 = vld [vmem:[#allocation2 + $0x150] sm:$0xff] }
  0x68   : > { %5234 = vst [vmem:[#allocation28_spill] sm:$0xff] %v3193_v38  ;;  %815 = vrot.lane.b32.xlu2 %v3224_v45, %s2912_s26 }
  0x69   : > { %415 = vst.msk [vmem:[#allocation2 + $0x1a8] sm:$0xff] %vm344_vm0, %v3190_v37  ;;  %v699_v37 = vrot.slane %v3170_v33, 1 }
  0x6a   : > { %414 = vst.msk [vmem:[#allocation2 + $0x190] sm:$0xff] %vm344_vm0, %v3193_v38  ;;  %v3265_v56 = vld [vmem:[#allocation2 + $0x170] sm:$0xff]  ;;  %v450_v38 = vld [vmem:[#allocation2 + $0xd8] sm:$0xff] }
  0x6b   : > { %5235 = vst [vmem:[#allocation29_spill] sm:$0xff] %v3206_v41  ;;  %v3273_v58 = vld [vmem:[#allocation2 + $0x168] sm:$0xff] }
  0x6c   : > { %416 = vst.msk [vmem:[#allocation2 + $0x1b0] sm:$0xff] %vm344_vm0, %v3206_v41  ;;  %817 = vrot.lane.b32.xlu0 %v3226_v46, %s2912_s26 }
  0x6d   : > { %5236 = vst [vmem:[#allocation30_spill] sm:$0xff] %v3217_v43  ;;  %v3267_v57 = vld [vmem:[#allocation2 + $0x188] sm:$0xff] }
  0x6e   : > { %5237 = vst [vmem:[#allocation31_spill] sm:$0xff] %v3220_v44  ;;  %813 = vrot.lane.b32.xlu1 %v3243_v50, %s2912_s26 }
  0x6f   : > { %418 = vst.msk [vmem:[#allocation2 + $0x1d0] sm:$0xff] %vm344_vm0, %v3217_v43  ;;  %v691_v43 = vrot.slane %v438_v48, 1  ;;  %v698_v48 = vrot.slane %v3187_v36, 1 }
  0x70   : > { %417 = vst.msk [vmem:[#allocation2 + $0x1c8] sm:$0xff] %vm344_vm0, %v3220_v44  ;;  %821 = vrot.lane.b32.xlu2 %v3250_v52, %s2912_s26  ;;  %v3277_v59 = vld [vmem:[#allocation2 + $0x1a8] sm:$0xff] }
  0x71   : > { %5238 = vst [vmem:[#allocation32_spill] sm:$0xff] %v3233_v47  ;;  %v3285_v61 = vld [vmem:[#allocation2 + $0x190] sm:$0xff] }
  0x72   : > { %419 = vst.msk [vmem:[#allocation2 + $0x1e8] sm:$0xff] %vm344_vm0, %v3233_v47 }
  0x73   : > { %5239 = vst [vmem:[#allocation33_spill] sm:$0xff] %v3246_v51  ;;  %v3279_v60 = vld [vmem:[#allocation2 + $0x1b0] sm:$0xff] }
  0x74   : > { %420 = vst.msk [vmem:[#allocation2 + $0x1f0] sm:$0xff] %vm344_vm0, %v3246_v51  ;;  %823 = vrot.lane.b32.xlu0 %v3252_v53, %s2912_s26  ;;  %v681_v51 = vrot.slane %v430_v22, 1  ;;  %v678_v22 = vrot.slane %v3085_v15, 1 }
  0x76   : > { %819 = vrot.lane.b32.xlu1 %v3261_v55, %s2912_s26  ;;  %v3289_v62 = vld [vmem:[#allocation2 + $0x1d0] sm:$0xff]  ;;  %v3313_v49 = vsel %vm672_vm1, %v679_v19, %v681_v51  ;;  %v689_v51 = vrot.slane %v3160_v30, 1  ;;  %v3332_v14 = vsel %vm672_vm1, %v678_v22, %v679_v19  ;;  %v694_v19 = vrot.slane %v3145_v28, 1 }
  0x77   : > { %v3297_v23 = vld [vmem:[#allocation2 + $0x1c8] sm:$0xff]  ;;  %v696_v22 = vrot.slane %v442_v13, 1  ;;  %v693_v13 = vrot.slane %v3143_v27, 1 }
  0x78   : > { %827 = vrot.lane.b32.xlu2 %v3265_v56, %s2912_s26 }
  0x79   : > { %v3291_v63 = vld [vmem:[#allocation2 + $0x1e8] sm:$0xff] }
  0x7b   : > { %v3307_v47 = vld [vmem:[#allocation2 + $0x1f0] sm:$0xff] }
  0x7c   : > { %829 = vrot.lane.b32.xlu0 %v3267_v57, %s2912_s26 }
  0x7e   : > { %825 = vrot.lane.b32.xlu1 %v3273_v58, %s2912_s26 }
  0x80   : > { %833 = vrot.lane.b32.xlu2 %v3277_v59, %s2912_s26 }
  0x84   : > { %835 = vrot.lane.b32.xlu0 %v3279_v60, %s2912_s26 }
  0x86   : > { %831 = vrot.lane.b32.xlu1 %v3285_v61, %s2912_s26  ;;  %v3365_v11 = vpop.permute.xlu0 %781 }
  0x87   : > { %5243 = vst [vmem:[#allocation37_spill] sm:$0xff] %v3365_v11 }
  0x88   : > { %839 = vrot.lane.b32.xlu2 %v3289_v62, %s2912_s26 }
  0x8c   : > { %841 = vrot.lane.b32.xlu0 %v3291_v63, %s2912_s26 }
  0x8e   : > { %837 = vrot.lane.b32.xlu1 %v3297_v23, %s2912_s26 }
  0x90   : > { %877 = vrot.lane.b32.xlu2 %v675_v54, %s2913_s8  ;;  %v3316_v54 = vsel %vm672_vm1, %v683_v16, %v684_v0  ;;  %v688_v16 = vrot.slane %v3106_v20, 1 }
  0x92   : > { %v3339_v41 = vsel %vm672_vm1, %v688_v16, %v689_v51 }
  0x94   : > { %879 = vrot.lane.b32.xlu0 %v677_v21, %s2913_s8  ;;  %v5109_v21 = vrot.slane %v2975_v1, 7  ;;  %v470_v1 = vld [vmem:[#allocation2 + $0x178] sm:$0xff] }
  0x96   : > { %843 = vrot.lane.b32.xlu1 %v3307_v47, %s2912_s26  ;;  %v3327_v2 = vsel %vm543_vm2, %v5109_v21, %v547_v18  ;;  %v3342_v18 = vsel %vm672_vm1, %v689_v51, %v691_v43  ;;  %v686_v21 = vrot.slane %v434_v12, 1  ;;  %v3359_v12 = vsel %vm672_vm1, %v694_v19, %v696_v22 }
  0x97   : > { %5240 = vst [vmem:[#allocation34_spill] sm:$0xff] %v3327_v2  ;;  %v3362_v51 = vsel %vm672_vm1, %v698_v48, %v699_v37  ;;  %v706_v22 = vrot.slane %v450_v38, 1  ;;  %v3390_v38 = vpop.permute.xlu0 %783 }
  0x98   : > { %883 = vrot.lane.b32.xlu2 %v3313_v49, %s2913_s8  ;;  %v3334_v44 = vpop.permute.xlu2 %789  ;;  %v3352_v16 = vsel %vm672_vm1, %v684_v0, %v686_v21  ;;  %v703_v0 = vrot.slane %v3172_v34, 1  ;;  %v704_v21 = vrot.slane %v3214_v42, 1  ;;  %5245 = vst [vmem:[#allocation39_spill] sm:$0xff] %v3390_v38  ;;  %v474_v38 = vld [vmem:[#allocation2 + $0x198] sm:$0xff] }
  0x99   : > { %5241 = vst [vmem:[#allocation35_spill] sm:$0xff] %v3334_v44 }
  0x9a   : > { %v3381_v35 = vsel %vm672_vm1, %v703_v0, %v704_v21  ;;  %v3384_v10 = vsel %vm672_vm1, %v704_v21, %v706_v22  ;;  %v714_v0 = vrot.slane %v3224_v45, 1  ;;  %v3396_v21 = vsel %vm672_vm1, %v699_v37, %v701_v31 }
  0x9b   : > { %v718_v31 = vrot.slane %v3226_v46, 1  ;;  %v719_v37 = vrot.slane %v3261_v55, 1 }
  0x9c   : > { %885 = vrot.lane.b32.xlu0 %v3316_v54, %s2913_s8 }
  0x9d   : > { %v3427_v25 = vsel %vm672_vm1, %v718_v31, %v719_v37  ;;  %v729_v31 = vrot.slane %v3265_v56, 1 }
  0x9e   : > { %881 = vrot.lane.b32.xlu1 %v3332_v14, %s2913_s8  ;;  %5250 = vst [vmem:[#allocation44_spill] sm:$0xff] %v3427_v25 }
  0xa0   : > { %889 = vrot.lane.b32.xlu2 %v3339_v41, %s2913_s8 }
  0xa2   : > { %v3354_v43 = vpop.permute.xlu2 %791 }
  0xa3   : > { %5242 = vst [vmem:[#allocation36_spill] sm:$0xff] %v3354_v43  ;;  %v3374_v43 = vsel %vm672_vm1, %v693_v13, %v694_v19  ;;  %v709_v19 = vrot.slane %v3199_v40, 1  ;;  %v711_v13 = vrot.slane %v454_v7, 1  ;;  %v708_v7 = vrot.slane %v3197_v39, 1 }
  0xa4   : > { %891 = vrot.lane.b32.xlu0 %v3342_v18, %s2913_s8 }
  0xa5   : > { %v3403_v22 = vsel %vm672_vm1, %v709_v19, %v711_v13  ;;  %v721_v13 = vrot.slane %v462_v32, 1 }
  0xa6   : > { %887 = vrot.lane.b32.xlu1 %v3352_v16, %s2913_s8 }
  0xa7   : > { %v3430_v6 = vsel %vm672_vm1, %v719_v37, %v721_v13 }
  0xa8   : > { %895 = vrot.lane.b32.xlu2 %v3359_v12, %s2913_s8  ;;  %5251 = vst [vmem:[#allocation45_spill] sm:$0xff] %v3430_v6 }
  0xaa   : > { %v3376_v48 = vpop.permute.xlu2 %797 }
  0xab   : > { %5244 = vst [vmem:[#allocation38_spill] sm:$0xff] %v3376_v48  ;;  %v713_v48 = vrot.slane %v3243_v50, 1 }
  0xac   : > { %897 = vrot.lane.b32.xlu0 %v3362_v51, %s2913_s8 }
  0xad   : > { %v3406_v44 = vsel %vm672_vm1, %v713_v48, %v714_v0 }
  0xae   : > { %893 = vrot.lane.b32.xlu1 %v3374_v43, %s2913_s8 }
  0xb0   : > { %901 = vrot.lane.b32.xlu2 %v3381_v35, %s2913_s8 }
  0xb2   : > { %v3398_v8 = vpop.permute.xlu2 %803 }
  0xb3   : > { %5246 = vst [vmem:[#allocation40_spill] sm:$0xff] %v3398_v8  ;;  %v3418_v8 = vsel %vm672_vm1, %v708_v7, %v709_v19  ;;  %v724_v19 = vrot.slane %v3252_v53, 1  ;;  %v726_v7 = vrot.slane %v466_v26, 1  ;;  %v723_v26 = vrot.slane %v3250_v52, 1 }
  0xb4   : > { %903 = vrot.lane.b32.xlu0 %v3384_v10, %s2913_s8 }
  0xb5   : > { %v3451_v4 = vsel %vm672_vm1, %v724_v19, %v726_v7  ;;  %v736_v7 = vrot.slane %v474_v38, 1 }
  0xb6   : > { %899 = vrot.lane.b32.xlu1 %v3396_v21, %s2913_s8  ;;  %5256 = vst [vmem:[#allocation50_spill] sm:$0xff] %v3451_v4 }
  0xb8   : > { %v3409_v5 = vpop.permute.xlu1 %785  ;;  %907 = vrot.lane.b32.xlu2 %v3403_v22, %s2913_s8 }
  0xb9   : > { %5247 = vst [vmem:[#allocation41_spill] sm:$0xff] %v3409_v5  ;;  %v716_v5 = vrot.slane %v458_v3, 1 }
  0xba   : > { %v3420_v48 = vpop.permute.xlu2 %809 }
  0xbb   : > { %5248 = vst [vmem:[#allocation42_spill] sm:$0xff] %v3420_v48  ;;  %v3442_v37 = vsel %vm672_vm1, %v714_v0, %v716_v5  ;;  %v733_v5 = vrot.slane %v3267_v57, 1  ;;  %v734_v0 = vrot.slane %v3285_v61, 1 }
  0xbc   : > { %909 = vrot.lane.b32.xlu0 %v3406_v44, %s2913_s8  ;;  %5253 = vst [vmem:[#allocation47_spill] sm:$0xff] %v3442_v37 }
  0xbd   : > { %v3478_v48 = vsel %vm672_vm1, %v734_v0, %v736_v7 }
  0xbe   : > { %v3422_v29 = vpop.permute.xlu0 %793  ;;  %905 = vrot.lane.b32.xlu1 %v3418_v8, %s2913_s8  ;;  %5263 = vst [vmem:[#allocation57_spill] sm:$0xff] %v3478_v48 }
  0xbf   : > { %5249 = vst [vmem:[#allocation43_spill] sm:$0xff] %v3422_v29  ;;  %v728_v29 = vrot.slane %v3273_v58, 1 }
  0xc0   : > { %v3432_v32 = vpop.permute.xlu1 %787  ;;  %913 = vrot.lane.b32.xlu2 %v3427_v25, %s2913_s8 }
  0xc1   : > { %5252 = vst [vmem:[#allocation46_spill] sm:$0xff] %v3432_v32  ;;  %v3454_v2 = vsel %vm672_vm1, %v728_v29, %v729_v31 }
  0xc2   : > { %v3444_v3 = vpop.permute.xlu2 %815  ;;  %5257 = vst [vmem:[#allocation51_spill] sm:$0xff] %v3454_v2 }
  0xc3   : > { %5254 = vst [vmem:[#allocation48_spill] sm:$0xff] %v3444_v3 }
  0xc4   : > { %915 = vrot.lane.b32.xlu0 %v3430_v6, %s2913_s8 }
  0xc6   : > { %v3446_v13 = vpop.permute.xlu0 %799  ;;  %911 = vrot.lane.b32.xlu1 %v3442_v37, %s2913_s8 }
  0xc7   : > { %5255 = vst [vmem:[#allocation49_spill] sm:$0xff] %v3446_v13  ;;  %v3466_v13 = vsel %vm672_vm1, %v723_v26, %v724_v19  ;;  %v739_v19 = vrot.slane %v3279_v60, 1 }
  0xc8   : > { %v3457_v11 = vpop.permute.xlu1 %795  ;;  %919 = vrot.lane.b32.xlu2 %v3451_v4, %s2913_s8  ;;  %5259 = vst [vmem:[#allocation53_spill] sm:$0xff] %v3466_v13  ;;  %v478_v4 = vld [vmem:[#allocation2 + $0x1b8] sm:$0xff] }
  0xc9   : > { %5258 = vst [vmem:[#allocation52_spill] sm:$0xff] %v3457_v11  ;;  %v3475_v11 = vsel %vm672_vm1, %v733_v5, %v734_v0  ;;  %v741_v26 = vrot.slane %v478_v4, 1  ;;  %v744_v5 = vrot.slane %v3289_v62, 1  ;;  %v738_v4 = vrot.slane %v3277_v59, 1 }
  0xca   : > { %v3468_v29 = vpop.permute.xlu2 %821  ;;  %5262 = vst [vmem:[#allocation56_spill] sm:$0xff] %v3475_v11 }
  0xcb   : > { %5260 = vst [vmem:[#allocation54_spill] sm:$0xff] %v3468_v29 }
  0xcc   : > { %921 = vrot.lane.b32.xlu0 %v3454_v2, %s2913_s8  ;;  %v731_v2 = vrot.slane %v470_v1, 1 }
  0xce   : > { %v3470_v3 = vpop.permute.xlu0 %805  ;;  %917 = vrot.lane.b32.xlu1 %v3466_v13, %s2913_s8  ;;  %v3490_v0 = vsel %vm672_vm1, %v729_v31, %v731_v2  ;;  %v748_v2 = vrot.slane %v3291_v63, 1  ;;  %v749_v31 = vrot.slane %v3307_v47, 1  ;;  %v447_v13 = vld [vmem:[#allocation2 + $0xc0] sm:$0xff] }
  0xcf   : > { %5261 = vst [vmem:[#allocation55_spill] sm:$0xff] %v3470_v3  ;;  %v743_v3 = vrot.slane %v3297_v23, 1 }
  0xd0   : > { %v3480_v38 = vpop.permute.xlu1 %801  ;;  %925 = vrot.lane.b32.xlu2 %v3475_v11, %s2913_s8  ;;  %5265 = vst [vmem:[#allocation59_spill] sm:$0xff] %v3490_v0 }
  0xd1   : > { %5264 = vst [vmem:[#allocation58_spill] sm:$0xff] %v3480_v38  ;;  %v3499_v38 = vsel %vm672_vm1, %v739_v19, %v741_v26  ;;  %v3502_v29 = vsel %vm672_vm1, %v743_v3, %v744_v5 }
  0xd2   : > { %v3492_v1 = vpop.permute.xlu2 %827  ;;  %5268 = vst [vmem:[#allocation62_spill] sm:$0xff] %v3499_v38 }
  0xd3   : > { %5266 = vst [vmem:[#allocation60_spill] sm:$0xff] %v3492_v1  ;;  %v3514_v1 = vsel %vm672_vm1, %v738_v4, %v739_v19 }
  0xd4   : > { %927 = vrot.lane.b32.xlu0 %v3478_v48, %s2913_s8  ;;  %5269 = vst [vmem:[#allocation63_spill] sm:$0xff] %v3502_v29  ;;  %v486_v48 = vld [vmem:[#allocation2 + $0x1f8] sm:$0xff] }
  0xd5   : > { %v751_v26 = vrot.slane %v486_v48, 1  ;;  %5271 = vst [vmem:[#allocation65_spill] sm:$0xff] %v3514_v1  ;;  %v431_v48 = vld [vmem:[#allocation2 + $0x40] sm:$0xff] }
  0xd6   : > { %v3494_v7 = vpop.permute.xlu0 %811  ;;  %923 = vrot.lane.b32.xlu1 %v3490_v0, %s2913_s8 }
  0xd7   : > { %5267 = vst [vmem:[#allocation61_spill] sm:$0xff] %v3494_v7  ;;  %v482_v7 = vld [vmem:[#allocation2 + $0x1d8] sm:$0xff] }
  0xd8   : > { %v3505_v11 = vpop.permute.xlu1 %807  ;;  %931 = vrot.lane.b32.xlu2 %v3499_v38, %s2913_s8  ;;  %v3523_v38 = vsel %vm672_vm1, %v748_v2, %v749_v31 }
  0xd9   : > { %5270 = vst [vmem:[#allocation64_spill] sm:$0xff] %v3505_v11  ;;  %v746_v11 = vrot.slane %v482_v7, 1  ;;  %v555_v7 = vrot.slane %v3056_v9, 7 }
  0xda   : > { %v3516_v3 = vpop.permute.xlu2 %833  ;;  %5274 = vst [vmem:[#allocation68_spill] sm:$0xff] %v3523_v38 }
  0xdb   : > { %5272 = vst [vmem:[#allocation66_spill] sm:$0xff] %v3516_v3  ;;  %v3535_v19 = vsel %vm672_vm1, %v744_v5, %v746_v11  ;;  %v550_v3 = vrot.slane %v3085_v15, 7 }
  0xdc   : > { %933 = vrot.lane.b32.xlu0 %v3502_v29, %s2913_s8  ;;  %v3526_v29 = vsel %vm672_vm1, %v749_v31, %v751_v26  ;;  %5277 = vst [vmem:[#allocation71_spill] sm:$0xff] %v3535_v19  ;;  %v552_v31 = vrot.slane %v3127_v24, 7  ;;  %v554_v26 = vrot.slane %v431_v48, 7 }
  0xdd   : > { %5275 = vst [vmem:[#allocation69_spill] sm:$0xff] %v3526_v29 }
  0xde   : > { %v3518_v0 = vpop.permute.xlu0 %817  ;;  %929 = vrot.lane.b32.xlu1 %v3514_v1, %s2913_s8  ;;  %v3550_v11 = vsel %vm543_vm2, %v550_v3, %v552_v31  ;;  %v562_v31 = vrot.slane %v3160_v30, 7 }
  0xdf   : > { %5273 = vst [vmem:[#allocation67_spill] sm:$0xff] %v3518_v0  ;;  %v427_v0 = vld [vmem:[#allocation2 + $0x20] sm:$0xff] }
  0xe0   : > { %v3528_v32 = vpop.permute.xlu1 %813  ;;  %937 = vrot.lane.b32.xlu2 %v3523_v38, %s2913_s8  ;;  %5280 = vst [vmem:[#allocation74_spill] sm:$0xff] %v3550_v11 }
  0xe1   : > { %5276 = vst [vmem:[#allocation70_spill] sm:$0xff] %v3528_v32 }
  0xe2   : > { %v3537_v4 = vpop.permute.xlu2 %839 }
  0xe3   : > { %5278 = vst [vmem:[#allocation72_spill] sm:$0xff] %v3537_v4  ;;  %v549_v4 = vrot.slane %v427_v0, 7 }
  0xe4   : > { %939 = vrot.lane.b32.xlu0 %v3526_v29, %s2913_s8  ;;  %v3547_v29 = vsel %vm543_vm2, %v554_v26, %v555_v7 }
  0xe6   : > { %v3539_v2 = vpop.permute.xlu0 %823  ;;  %935 = vrot.lane.b32.xlu1 %v3535_v19, %s2913_s8  ;;  %v560_v19 = vrot.slane %v3106_v20, 7 }
  0xe7   : > { %5279 = vst [vmem:[#allocation73_spill] sm:$0xff] %v3539_v2  ;;  %v435_v2 = vld [vmem:[#allocation2 + $0x60] sm:$0xff] }
  0xe8   : > { %v3552_v5 = vpop.permute.xlu1 %819  ;;  %975 = vrot.lane.b32.xlu2 %v3550_v11, %s2914_s9  ;;  %v559_v26 = vrot.slane %v435_v2, 7  ;;  %v3573_v1 = vsel %vm543_vm2, %v560_v19, %v562_v31  ;;  %v557_v2 = vrot.slane %v3094_v17, 7  ;;  %v567_v31 = vrot.slane %v3145_v28, 7 }
  0xe9   : > { %5281 = vst [vmem:[#allocation75_spill] sm:$0xff] %v3552_v5  ;;  %v3565_v5 = vsel %vm543_vm2, %v549_v4, %v550_v3 }
  0xea   : > { %v3558_v48 = vpop.permute.xlu2 %877  ;;  %5284 = vst [vmem:[#allocation78_spill] sm:$0xff] %v3565_v5  ;;  %v3570_v0 = vsel %vm543_vm2, %v559_v26, %v560_v19  ;;  %v565_v26 = vrot.slane %v3143_v27, 7  ;;  %v570_v19 = vrot.slane %v3187_v36, 7 }
  0xeb   : > { %5282 = vst [vmem:[#allocation76_spill] sm:$0xff] %v3558_v48  ;;  %v439_v48 = vld [vmem:[#allocation2 + $0x80] sm:$0xff] }
  0xec   : > { %977 = vrot.lane.b32.xlu0 %v3547_v29, %s2914_s9  ;;  %v3595_v11 = vsel %vm543_vm2, %v565_v26, %v567_v31  ;;  %v564_v6 = vrot.slane %v439_v48, 7  ;;  %v575_v31 = vrot.slane %v3172_v34, 7 }
  0xed   : > { %5288 = vst [vmem:[#allocation82_spill] sm:$0xff] %v3595_v11 }
  0xee   : > { %v3560_v38 = vpop.permute.xlu0 %829  ;;  %973 = vrot.lane.b32.xlu1 %v3565_v5, %s2914_s9  ;;  %v3590_v5 = vsel %vm543_vm2, %v555_v7, %v557_v2  ;;  %v574_v2 = vrot.slane %v447_v13, 7  ;;  %v3613_v25 = vsel %vm543_vm2, %v564_v6, %v565_v26  ;;  %v572_v13 = vrot.slane %v3170_v33, 7 }
  0xef   : > { %5283 = vst [vmem:[#allocation77_spill] sm:$0xff] %v3560_v38  ;;  %v443_v38 = vld [vmem:[#allocation2 + $0xa0] sm:$0xff] }
  0xf0   : > { %v3575_v32 = vpop.permute.xlu1 %825  ;;  %981 = vrot.lane.b32.xlu2 %v3570_v0, %s2914_s9  ;;  %5293 = vst [vmem:[#allocation87_spill] sm:$0xff] %v3613_v25  ;;  %v3618_v48 = vsel %vm543_vm2, %v574_v2, %v575_v31  ;;  %v580_v2 = vrot.slane %v3197_v39, 7 }
  0xf1   : > { %5285 = vst [vmem:[#allocation79_spill] sm:$0xff] %v3575_v32  ;;  %v569_v32 = vrot.slane %v443_v38, 7 }
  0xf2   : > { %v3582_v3 = vpop.permute.xlu2 %883  ;;  %5294 = vst [vmem:[#allocation88_spill] sm:$0xff] %v3618_v48 }
  0xf3   : > { %5286 = vst [vmem:[#allocation80_spill] sm:$0xff] %v3582_v3  ;;  %v3598_v3 = vsel %vm543_vm2, %v569_v32, %v570_v19  ;;  %v577_v32 = vrot.slane %v3214_v42, 7 }
  0xf4   : > { %983 = vrot.lane.b32.xlu0 %v3573_v1, %s2914_s9  ;;  %5289 = vst [vmem:[#allocation83_spill] sm:$0xff] %v3598_v3 }
  0xf6   : > { %v3584_v4 = vpop.permute.xlu0 %835  ;;  %979 = vrot.lane.b32.xlu1 %v3590_v5, %s2914_s9 }
  0xf7   : > { %5287 = vst [vmem:[#allocation81_spill] sm:$0xff] %v3584_v4 }
  0xf8   : > { %v3600_v4 = vpop.permute.xlu1 %831  ;;  %987 = vrot.lane.b32.xlu2 %v3595_v11, %s2914_s9  ;;  %v451_v11 = vld [vmem:[#allocation2 + $0xe0] sm:$0xff] }
  0xf9   : > { %5290 = vst [vmem:[#allocation84_spill] sm:$0xff] %v3600_v4  ;;  %v3621_v4 = vsel %vm543_vm2, %v575_v31, %v577_v32  ;;  %v585_v31 = vrot.slane %v3243_v50, 7  ;;  %v582_v32 = vrot.slane %v3199_v40, 7 }
  0xfa   : > { %v3606_v38 = vpop.permute.xlu2 %889  ;;  %5295 = vst [vmem:[#allocation89_spill] sm:$0xff] %v3621_v4 }
  0xfb   : > { %5291 = vst [vmem:[#allocation85_spill] sm:$0xff] %v3606_v38 }
  0xfc   : > { %989 = vrot.lane.b32.xlu0 %v3598_v3, %s2914_s9  ;;  %v3638_v3 = vsel %vm543_vm2, %v570_v19, %v572_v13 }
  0xfd   : > { %5299 = vst [vmem:[#allocation93_spill] sm:$0xff] %v3638_v3 }
  0xfe   : > { %v3608_v7 = vpop.permute.xlu0 %841  ;;  %985 = vrot.lane.b32.xlu1 %v3613_v25, %s2914_s9  ;;  %v459_v25 = vld [vmem:[#allocation2 + $0x120] sm:$0xff] }
  0xff   : > { %5292 = vst [vmem:[#allocation86_spill] sm:$0xff] %v3608_v7  ;;  %v455_v7 = vld [vmem:[#allocation2 + $0x100] sm:$0xff]  ;;  %v589_v13 = vrot.slane %v459_v25, 7  ;;  %v587_v25 = vrot.slane %v3224_v45, 7 }
 0x100   : > { %v3623_v38 = vpop.permute.xlu1 %837  ;;  %993 = vrot.lane.b32.xlu2 %v3618_v48, %s2914_s9  ;;  %v3643_v48 = vsel %vm543_vm2, %v580_v2, %v582_v32  ;;  %v592_v32 = vrot.slane %v3261_v55, 7 }
 0x101   : > { %5296 = vst [vmem:[#allocation90_spill] sm:$0xff] %v3623_v38  ;;  %v584_v38 = vrot.slane %v455_v7, 7 }
 0x102   : > { %v3630_v6 = vpop.permute.xlu2 %895  ;;  %5300 = vst [vmem:[#allocation94_spill] sm:$0xff] %v3643_v48 }
 0x103   : > { %5297 = vst [vmem:[#allocation91_spill] sm:$0xff] %v3630_v6  ;;  %v3646_v6 = vsel %vm543_vm2, %v584_v38, %v585_v31  ;;  %v590_v38 = vrot.slane %v3226_v46, 7 }
 0x104   : > { %995 = vrot.lane.b32.xlu0 %v3621_v4, %s2914_s9  ;;  %5301 = vst [vmem:[#allocation95_spill] sm:$0xff] %v3646_v6  ;;  %v579_v4 = vrot.slane %v451_v11, 7 }
 0x106   : > { %v3632_v26 = vpop.permute.xlu0 %879  ;;  %991 = vrot.lane.b32.xlu1 %v3638_v3, %s2914_s9  ;;  %v3661_v11 = vsel %vm543_vm2, %v579_v4, %v580_v2  ;;  %v3679_v4 = vld [vmem:[%s3021_s30 + $0xf0] sm:$0xff]  ;;  %v3682_v2 = vld [vmem:[%s3021_s30 + $0xf8] sm:$0xff]  ;;  %v463_v3 = vld [vmem:[#allocation2 + $0x140] sm:$0xff] }
 0x107   : > { %5298 = vst [vmem:[#allocation92_spill] sm:$0xff] %v3632_v26 }
 0x108   : > { %v3648_v26 = vpop.permute.xlu1 %843  ;;  %999 = vrot.lane.b32.xlu2 %v3643_v48, %s2914_s9  ;;  %5305 = vst [vmem:[#allocation99_spill] sm:$0xff] %v3661_v11  ;;  %v594_v48 = vrot.slane %v463_v3, 7 }
 0x109   : > { %5302 = vst [vmem:[#allocation96_spill] sm:$0xff] %v3648_v26  ;;  %v3666_v26 = vsel %vm543_vm2, %v589_v13, %v590_v38 }
 0x10a   : > { %v3654_v19 = vpop.permute.xlu2 %901  ;;  %5306 = vst [vmem:[#allocation100_spill] sm:$0xff] %v3666_v26 }
 0x10b   : > { %5303 = vst [vmem:[#allocation97_spill] sm:$0xff] %v3654_v19 }
 0x10c   : > { %1001 = vrot.lane.b32.xlu0 %v3646_v6, %s2914_s9  ;;  %v3669_v6 = vsel %vm543_vm2, %v590_v38, %v592_v32  ;;  %5309 = vst [vmem:[#allocation103_spill] sm:$0xff] %v3679_v4  ;;  %v595_v38 = vrot.slane %v3250_v52, 7  ;;  %v600_v32 = vrot.slane %v3273_v58, 7 }
 0x10d   : > { %5307 = vst [vmem:[#allocation101_spill] sm:$0xff] %v3669_v6 }
 0x10e   : > { %v3656_v7 = vpop.permute.xlu0 %885  ;;  %997 = vrot.lane.b32.xlu1 %v3661_v11, %s2914_s9  ;;  %5310 = vst [vmem:[#allocation104_spill] sm:$0xff] %v3682_v2 }
 0x10f   : > { %5304 = vst [vmem:[#allocation98_spill] sm:$0xff] %v3656_v7  ;;  %v467_v7 = vld [vmem:[#allocation2 + $0x160] sm:$0xff] }
 0x110   : > { %v3671_v19 = vpop.permute.xlu1 %881  ;;  %1005 = vrot.lane.b32.xlu2 %v3666_v26, %s2914_s9  ;;  %421 = vst.msk [vmem:[#allocation2 + $0x208] sm:$0xff] %vm344_vm0, %v3679_v4  ;;  %v597_v26 = vrot.slane %v3252_v53, 7 }
 0x111   : > { %5308 = vst [vmem:[#allocation102_spill] sm:$0xff] %v3671_v19  ;;  %v599_v19 = vrot.slane %v467_v7, 7  ;;  %v471_v7 = vld [vmem:[#allocation2 + $0x180] sm:$0xff] }
 0x112   : > { %v3684_v13 = vpop.permute.xlu2 %907  ;;  %422 = vst.msk [vmem:[#allocation2 + $0x210] sm:$0xff] %vm344_vm0, %v3682_v2  ;;  %v604_v2 = vrot.slane %v471_v7, 7  ;;  %v602_v7 = vrot.slane %v3265_v56, 7 }
 0x113   : > { %5311 = vst [vmem:[#allocation105_spill] sm:$0xff] %v3684_v13  ;;  %v3704_v4 = vsel %vm543_vm2, %v599_v19, %v600_v32  ;;  %v607_v19 = vrot.slane %v3285_v61, 7 }
 0x114   : > { %1007 = vrot.lane.b32.xlu0 %v3669_v6, %s2914_s9  ;;  %v3696_v6 = vsel %vm543_vm2, %v585_v31, %v587_v25  ;;  %5315 = vst [vmem:[#allocation109_spill] sm:$0xff] %v3704_v4 }
 0x115   : > { %5313 = vst [vmem:[#allocation107_spill] sm:$0xff] %v3696_v6 }
 0x116   : > { %v3686_v11 = vpop.permute.xlu0 %891  ;;  %1003 = vrot.lane.b32.xlu1 %v3696_v6, %s2914_s9  ;;  %v3719_v6 = vsel %vm543_vm2, %v594_v48, %v595_v38 }
 0x117   : > { %5312 = vst [vmem:[#allocation106_spill] sm:$0xff] %v3686_v11  ;;  %v3701_v11 = vsel %vm543_vm2, %v595_v38, %v597_v26  ;;  %v605_v26 = vrot.slane %v3267_v57, 7 }
 0x118   : > { %5314 = vst [vmem:[#allocation108_spill] sm:$0xff] %v3701_v11  ;;  %v3706_v13 = vpop.permute.xlu1 %887  ;;  %1011 = vrot.lane.b32.xlu2 %v3701_v11, %s2914_s9  ;;  %v475_v11 = vld [vmem:[#allocation2 + $0x1a0] sm:$0xff] }
 0x119   : > { %5316 = vst [vmem:[#allocation110_spill] sm:$0xff] %v3706_v13  ;;  %v3724_v3 = vsel %vm543_vm2, %v604_v2, %v605_v26  ;;  %v3727_v13 = vsel %vm543_vm2, %v605_v26, %v607_v19  ;;  %v610_v2 = vrot.slane %v3277_v59, 7  ;;  %v615_v26 = vrot.slane %v3297_v23, 7 }
 0x11a   : > { %v3712_v31 = vpop.permute.xlu2 %913  ;;  %5319 = vst [vmem:[#allocation113_spill] sm:$0xff] %v3719_v6  ;;  %v612_v19 = vrot.slane %v3279_v60, 7 }
 0x11b   : > { %5317 = vst [vmem:[#allocation111_spill] sm:$0xff] %v3712_v31 }
 0x11c   : > { %1013 = vrot.lane.b32.xlu0 %v3704_v4, %s2914_s9  ;;  %5320 = vst [vmem:[#allocation114_spill] sm:$0xff] %v3724_v3  ;;  %v3744_v4 = vsel %vm543_vm2, %v600_v32, %v602_v7 }
 0x11d   : > { %5321 = vst [vmem:[#allocation115_spill] sm:$0xff] %v3727_v13 }
 0x11e   : > { %v3714_v25 = vpop.permute.xlu0 %897  ;;  %1009 = vrot.lane.b32.xlu1 %v3719_v6, %s2914_s9  ;;  %5325 = vst [vmem:[#allocation119_spill] sm:$0xff] %v3744_v4  ;;  %v483_v6 = vld [vmem:[#allocation2 + $0x1e0] sm:$0xff] }
 0x11f   : > { %5318 = vst [vmem:[#allocation112_spill] sm:$0xff] %v3714_v25  ;;  %v479_v25 = vld [vmem:[#allocation2 + $0x1c0] sm:$0xff]  ;;  %v619_v7 = vrot.slane %v483_v6, 7 }
 0x120   : > { %v3729_v31 = vpop.permute.xlu1 %893  ;;  %1017 = vrot.lane.b32.xlu2 %v3724_v3, %s2914_s9 }
 0x121   : > { %5322 = vst [vmem:[#allocation116_spill] sm:$0xff] %v3729_v31  ;;  %v614_v31 = vrot.slane %v479_v25, 7 }
 0x122   : > { %v3736_v48 = vpop.permute.xlu2 %919 }
 0x123   : > { %5323 = vst [vmem:[#allocation117_spill] sm:$0xff] %v3736_v48  ;;  %v3752_v48 = vsel %vm543_vm2, %v614_v31, %v615_v26  ;;  %v622_v31 = vrot.slane %v3307_v47, 7 }
 0x124   : > { %1019 = vrot.lane.b32.xlu0 %v3727_v13, %s2914_s9  ;;  %v3749_v13 = vsel %vm543_vm2, %v610_v2, %v612_v19  ;;  %5327 = vst [vmem:[#allocation121_spill] sm:$0xff] %v3752_v48  ;;  %v620_v19 = vrot.slane %v3291_v63, 7 }
 0x125   : > { %5326 = vst [vmem:[#allocation120_spill] sm:$0xff] %v3749_v13 }
 0x126   : > { %v3738_v38 = vpop.permute.xlu0 %903  ;;  %1015 = vrot.lane.b32.xlu1 %v3744_v4, %s2914_s9 }
 0x127   : > { %5324 = vst [vmem:[#allocation118_spill] sm:$0xff] %v3738_v38  ;;  %v609_v38 = vrot.slane %v475_v11, 7  ;;  %v3771_v11 = vld [vmem:[#allocation2 + $0x208] sm:$0xff] }
 0x128   : > { %v3754_v3 = vpop.permute.xlu1 %899  ;;  %1023 = vrot.lane.b32.xlu2 %v3749_v13, %s2914_s9  ;;  %v617_v13 = vrot.slane %v3289_v62, 7 }
 0x129   : > { %5328 = vst [vmem:[#allocation122_spill] sm:$0xff] %v3754_v3  ;;  %v3767_v4 = vsel %vm543_vm2, %v609_v38, %v610_v2  ;;  %v3773_v3 = vld [vmem:[#allocation2 + $0x210] sm:$0xff]  ;;  %v757_v38 = vrot.slane %v3771_v11, 7 }
 0x12a   : > { %v3760_v32 = vpop.permute.xlu2 %925  ;;  %5331 = vst [vmem:[#allocation125_spill] sm:$0xff] %v3767_v4  ;;  %v759_v2 = vrot.slane %v3773_v3, 7 }
 0x12b   : > { %5329 = vst [vmem:[#allocation123_spill] sm:$0xff] %v3760_v32  ;;  %v3779_v32 = vsel %vm543_vm2, %v620_v19, %v622_v31  ;;  %v3795_v31 = vsel %vm543_vm2, %v615_v26, %v617_v13 }
 0x12c   : > { %1025 = vrot.lane.b32.xlu0 %v3752_v48, %s2914_s9  ;;  %v3776_v48 = vsel %vm543_vm2, %v619_v7, %v620_v19  ;;  %5333 = vst [vmem:[#allocation127_spill] sm:$0xff] %v3779_v32  ;;  %v487_v19 = vld [vmem:[#allocation2 + $0x200] sm:$0xff] }
 0x12d   : > { %5332 = vst [vmem:[#allocation126_spill] sm:$0xff] %v3776_v48 }
 0x12e   : > { %v3762_v25 = vpop.permute.xlu0 %909  ;;  %1021 = vrot.lane.b32.xlu1 %v3767_v4, %s2914_s9  ;;  %v756_v4 = vrot.slane %v487_v19, 7 }
 0x12f   : > { %5330 = vst [vmem:[#allocation124_spill] sm:$0xff] %v3762_v25 }
 0x130   : > { %v3781_v6 = vpop.permute.xlu1 %905  ;;  %1029 = vrot.lane.b32.xlu2 %v3776_v48, %s2914_s9  ;;  %v3800_v48 = vsel %vm543_vm2, %v757_v38, %v759_v2 }
 0x131   : > { %5335 = vst [vmem:[#allocation129_spill] sm:$0xff] %v3800_v48 }
 0x132   : > { %v3790_v25 = vpop.permute.xlu2 %931 }
 0x133   : > { %5334 = vst [vmem:[#allocation128_spill] sm:$0xff] %v3790_v25  ;;  %v3809_v25 = vsel %vm543_vm2, %v756_v4, %v757_v38 }
 0x134   : > { %1031 = vrot.lane.b32.xlu0 %v3779_v32, %s2914_s9  ;;  %5336 = vst [vmem:[#allocation130_spill] sm:$0xff] %v3809_v25 }
 0x136   : > { %v3792_v7 = vpop.permute.xlu0 %915  ;;  %1027 = vrot.lane.b32.xlu1 %v3795_v31, %s2914_s9 }
 0x138   : > { %v3802_v32 = vpop.permute.xlu1 %911  ;;  %1035 = vrot.lane.b32.xlu2 %v3800_v48, %s2914_s9 }
 0x13a   : > { %v3811_v13 = vpop.permute.xlu2 %937 }
 0x13b   : > { %5337 = vst [vmem:[#allocation131_spill] sm:$0xff] %v3811_v13 }
 0x13c   : > { %1069 = vrot.lane.b32.xlu0 %v3085_v15, %s2915_s10 }
 0x13e   : > { %v3813_v26 = vpop.permute.xlu0 %921  ;;  %1033 = vrot.lane.b32.xlu1 %v3809_v25, %s2914_s9  ;;  %v5376_v25 = vld [vmem:[#allocation45_spill] sm:$0xff]  ;;  %s4652_s9 = scalar_lea.vmem %s5091_s3, %s2757_s29 }
 0x13f   : > { %5338 = vst [vmem:[#allocation132_spill] sm:$0xff] %v3813_v26 }
 0x140   : > { %v3817_v2 = vpop.permute.xlu1 %917  ;;  %1073 = vrot.lane.b32.xlu2 %v3056_v9, %s2915_s10 }
 0x141   : > { %5339 = vst [vmem:[#allocation133_spill] sm:$0xff] %v3817_v2 }
 0x142   : > { %v3823_v19 = vpop.permute.xlu2 %975 }
 0x144   : > { %1075 = vrot.lane.b32.xlu0 %v3094_v17, %s2915_s10 }
 0x146   : > { %v3825_v15 = vpop.permute.xlu0 %927  ;;  %1071 = vrot.lane.b32.xlu1 %v3127_v24, %s2915_s10 }
 0x147   : > { %5340 = vst [vmem:[#allocation134_spill] sm:$0xff] %v3825_v15 }
 0x148   : > { %v3829_v4 = vpop.permute.xlu1 %923  ;;  %1079 = vrot.lane.b32.xlu2 %v3160_v30, %s2915_s10 }
 0x149   : > { %5341 = vst [vmem:[#allocation135_spill] sm:$0xff] %v3829_v4 }
 0x14a   : > { %v3835_v38 = vpop.permute.xlu2 %981 }
 0x14c   : > { %1081 = vrot.lane.b32.xlu0 %v3143_v27, %s2915_s10 }
 0x14e   : > { %v3837_v9 = vpop.permute.xlu0 %933  ;;  %1077 = vrot.lane.b32.xlu1 %v3106_v20, %s2915_s10 }
 0x14f   : > { %5342 = vst [vmem:[#allocation136_spill] sm:$0xff] %v3837_v9 }
 0x150   : > { %v3841_v17 = vpop.permute.xlu1 %929  ;;  %1085 = vrot.lane.b32.xlu2 %v3187_v36, %s2915_s10 }
 0x151   : > { %5343 = vst [vmem:[#allocation137_spill] sm:$0xff] %v3841_v17 }
 0x152   : > { %v3847_v24 = vpop.permute.xlu2 %987 }
 0x154   : > { %1087 = vrot.lane.b32.xlu0 %v3170_v33, %s2915_s10 }
 0x156   : > { %v3849_v30 = vpop.permute.xlu0 %939  ;;  %1083 = vrot.lane.b32.xlu1 %v3145_v28, %s2915_s10 }
 0x157   : > { %5344 = vst [vmem:[#allocation138_spill] sm:$0xff] %v3849_v30 }
 0x158   : > { %v3853_v27 = vpop.permute.xlu1 %935  ;;  %1091 = vrot.lane.b32.xlu2 %v3214_v42, %s2915_s10 }
 0x159   : > { %5345 = vst [vmem:[#allocation139_spill] sm:$0xff] %v3853_v27 }
 0x15a   : > { %v3859_v20 = vpop.permute.xlu2 %993 }
 0x15b   : > { %5346 = vst [vmem:[#allocation140_spill] sm:$0xff] %v3859_v20  ;;  %v2877_v20 = vld [vmem:[#allocation2 + $0x50] sm:$0xff] }
 0x15c   : > { %1093 = vrot.lane.b32.xlu0 %v3197_v39, %s2915_s10 }
 0x15e   : > { %v3861_v36 = vpop.permute.xlu0 %977  ;;  %1089 = vrot.lane.b32.xlu1 %v3172_v34, %s2915_s10 }
 0x160   : > { %v3865_v33 = vpop.permute.xlu1 %973  ;;  %1097 = vrot.lane.b32.xlu2 %v3243_v50, %s2915_s10 }
 0x162   : > { %v3871_v28 = vpop.permute.xlu2 %999 }
 0x164   : > { %1099 = vrot.lane.b32.xlu0 %v3224_v45, %s2915_s10 }
 0x166   : > { %v3873_v42 = vpop.permute.xlu0 %983  ;;  %1095 = vrot.lane.b32.xlu1 %v3199_v40, %s2915_s10 }
 0x168   : > { %v3877_v39 = vpop.permute.xlu1 %979  ;;  %1103 = vrot.lane.b32.xlu2 %v3261_v55, %s2915_s10 }
 0x16a   : > { %v3883_v34 = vpop.permute.xlu2 %1005 }
 0x16c   : > { %1105 = vrot.lane.b32.xlu0 %v3250_v52, %s2915_s10 }
 0x16e   : > { %v3885_v50 = vpop.permute.xlu0 %989  ;;  %1101 = vrot.lane.b32.xlu1 %v3226_v46, %s2915_s10 }
 0x16f   : > { %5347 = vst [vmem:[#allocation141_spill] sm:$0xff] %v3885_v50  ;;  %v5378_v50 = vld [vmem:[#allocation87_spill] sm:$0xff] }
 0x170   : > { %v3889_v45 = vpop.permute.xlu1 %985  ;;  %1109 = vrot.lane.b32.xlu2 %v3273_v58, %s2915_s10 }
 0x172   : > { %v3895_v40 = vpop.permute.xlu2 %1011 }
 0x174   : > { %1111 = vrot.lane.b32.xlu0 %v3265_v56, %s2915_s10 }
 0x176   : > { %v3897_v55 = vpop.permute.xlu0 %995  ;;  %1107 = vrot.lane.b32.xlu1 %v3252_v53, %s2915_s10 }
 0x177   : > { %5348 = vst [vmem:[#allocation142_spill] sm:$0xff] %v3897_v55  ;;  %v2876_v55 = vld [vmem:[#allocation2 + $0x48] sm:$0xff] }
 0x178   : > { %v3901_v30 = vpop.permute.xlu1 %991  ;;  %1115 = vrot.lane.b32.xlu2 %v3285_v61, %s2915_s10 }
 0x179   : > { %5349 = vst [vmem:[#allocation143_spill] sm:$0xff] %v3901_v30 }
 0x17a   : > { %v3907_v46 = vpop.permute.xlu2 %1017 }
 0x17b   : > { %5350 = vst [vmem:[#allocation144_spill] sm:$0xff] %v3907_v46  ;;  %v5372_v46 = vld [vmem:[#allocation44_spill] sm:$0xff] }
 0x17c   : > { %1117 = vrot.lane.b32.xlu0 %v3277_v59, %s2915_s10 }
 0x17e   : > { %v3909_v13 = vpop.permute.xlu0 %1001  ;;  %1113 = vrot.lane.b32.xlu1 %v3267_v57, %s2915_s10 }
 0x180   : > { %v3913_v56 = vpop.permute.xlu1 %997  ;;  %1121 = vrot.lane.b32.xlu2 %v3297_v23, %s2915_s10 }
 0x181   : > { %5351 = vst [vmem:[#allocation145_spill] sm:$0xff] %v3913_v56 }
 0x182   : > { %v3919_v27 = vpop.permute.xlu2 %1023 }
 0x183   : > { %5352 = vst [vmem:[#allocation146_spill] sm:$0xff] %v3919_v27 }
 0x184   : > { %1123 = vrot.lane.b32.xlu0 %v3289_v62, %s2915_s10 }
 0x186   : > { %v3921_v61 = vpop.permute.xlu0 %1007  ;;  %1119 = vrot.lane.b32.xlu1 %v3279_v60, %s2915_s10 }
 0x188   : > { %v3925_v59 = vpop.permute.xlu1 %1003  ;;  %1127 = vrot.lane.b32.xlu2 %v3307_v47, %s2915_s10 }
 0x18a   : > { %v3931_v57 = vpop.permute.xlu2 %1029 }
 0x18b   : > { %5353 = vst [vmem:[#allocation147_spill] sm:$0xff] %v3931_v57 }
 0x18c   : > { %1129 = vrot.lane.b32.xlu0 %v3771_v11, %s2915_s10 }
 0x18e   : > { %v3933_v23 = vpop.permute.xlu0 %1013  ;;  %1125 = vrot.lane.b32.xlu1 %v3291_v63, %s2915_s10 }
 0x18f   : > { %5354 = vst [vmem:[#allocation148_spill] sm:$0xff] %v3933_v23 }
 0x190   : > { %v3937_v62 = vpop.permute.xlu1 %1009  ;;  %1165 = vrot.lane.b32.xlu2 %v3332_v14, %s2916_s11 }
 0x192   : > { %v3943_v47 = vpop.permute.xlu2 %1035 }
 0x193   : > { %5355 = vst [vmem:[#allocation149_spill] sm:$0xff] %v3943_v47 }
 0x194   : > { %1167 = vrot.lane.b32.xlu0 %v3313_v49, %s2916_s11 }
 0x196   : > { %v3945_v60 = vpop.permute.xlu0 %1019  ;;  %1131 = vrot.lane.b32.xlu1 %v3773_v3, %s2915_s10 }
 0x197   : > { %5356 = vst [vmem:[#allocation150_spill] sm:$0xff] %v3945_v60 }
 0x198   : > { %v3949_v11 = vpop.permute.xlu1 %1015  ;;  %1171 = vrot.lane.b32.xlu2 %v3352_v16, %s2916_s11 }
 0x199   : > { %5357 = vst [vmem:[#allocation151_spill] sm:$0xff] %v3949_v11  ;;  %v2880_v11 = vld [vmem:[#allocation2 + $0x88] sm:$0xff] }
 0x19a   : > { %v3955_v63 = vpop.permute.xlu2 %1073 }
 0x19c   : > { %1173 = vrot.lane.b32.xlu0 %v3339_v41, %s2916_s11 }
 0x19e   : > { %v3957_v14 = vpop.permute.xlu0 %1025  ;;  %1169 = vrot.lane.b32.xlu1 %v3316_v54, %s2916_s11 }
 0x19f   : > { %5358 = vst [vmem:[#allocation152_spill] sm:$0xff] %v3957_v14 }
 0x1a0   : > { %v3961_v49 = vpop.permute.xlu1 %1021  ;;  %1177 = vrot.lane.b32.xlu2 %v3374_v43, %s2916_s11 }
 0x1a1   : > { %5359 = vst [vmem:[#allocation153_spill] sm:$0xff] %v3961_v49 }
 0x1a2   : > { %v3967_v3 = vpop.permute.xlu2 %1079 }
 0x1a4   : > { %1179 = vrot.lane.b32.xlu0 %v3359_v12, %s2916_s11 }
 0x1a6   : > { %v3969_v47 = vpop.permute.xlu0 %1031  ;;  %1175 = vrot.lane.b32.xlu1 %v3342_v18, %s2916_s11 }
 0x1a7   : > { %5360 = vst [vmem:[#allocation154_spill] sm:$0xff] %v3969_v47 }
 0x1a8   : > { %v3973_v57 = vpop.permute.xlu1 %1027  ;;  %1183 = vrot.lane.b32.xlu2 %v3396_v21, %s2916_s11 }
 0x1a9   : > { %5361 = vst [vmem:[#allocation155_spill] sm:$0xff] %v3973_v57 }
 0x1aa   : > { %v3979_v9 = vpop.permute.xlu2 %1085 }
 0x1ab   : > { %5362 = vst [vmem:[#allocation156_spill] sm:$0xff] %v3979_v9 }
 0x1ac   : > { %1185 = vrot.lane.b32.xlu0 %v3381_v35, %s2916_s11 }
 0x1ae   : > { %v3981_v14 = vpop.permute.xlu0 %1069  ;;  %1181 = vrot.lane.b32.xlu1 %v3362_v51, %s2916_s11 }
 0x1b0   : > { %v3985_v17 = vpop.permute.xlu1 %1033  ;;  %1189 = vrot.lane.b32.xlu2 %v3418_v8, %s2916_s11 }
 0x1b1   : > { %5363 = vst [vmem:[#allocation157_spill] sm:$0xff] %v3985_v17 }
 0x1b2   : > { %v3991_v47 = vpop.permute.xlu2 %1091 }
 0x1b3   : > { %5364 = vst [vmem:[#allocation158_spill] sm:$0xff] %v3991_v47 }
 0x1b4   : > { %1191 = vrot.lane.b32.xlu0 %v3403_v22, %s2916_s11 }
 0x1b6   : > { %v1076_v57 = vpop.permute.xlu0 %1075  ;;  %1187 = vrot.lane.b32.xlu1 %v3384_v10, %s2916_s11 }
 0x1b8   : > { %v3995_v56 = vpop.permute.xlu1 %1071  ;;  %1195 = vrot.lane.b32.xlu2 %v3442_v37, %s2916_s11 }
 0x1ba   : > { %v4001_v17 = vpop.permute.xlu2 %1097 }
 0x1bc   : > { %1261 = vrot.lane.b32.xlu0 %v3547_v29, %s2917_s12 }
 0x1be   : > { %v4003_v27 = vpop.permute.xlu0 %1081  ;;  %1193 = vrot.lane.b32.xlu1 %v3406_v44, %s2916_s11 }
 0x1c0   : > { %v4007_v15 = vpop.permute.xlu1 %1077  ;;  %1453 = vrot.lane.b32.xlu2 %v3316_v54, %s2918_s13 }
 0x1c2   : > { %v4013_v49 = vpop.permute.xlu2 %1103 }
 0x1c4   : > { %1263 = vrot.lane.b32.xlu0 %v3590_v5, %s2917_s12 }
 0x1c6   : > { %v4015_v47 = vpop.permute.xlu0 %1087  ;;  %1357 = vrot.lane.b32.xlu1 %v2876_v55, %s2919_s14 }
 0x1c7   : > { %5365 = vst [vmem:[#allocation159_spill] sm:$0xff] %v4015_v47  ;;  %v2878_v47 = vld [vmem:[#allocation2 + $0x68] sm:$0xff] }
 0x1c8   : > { %v4018_v60 = vpop.permute.xlu1 %1083  ;;  %1455 = vrot.lane.b32.xlu2 %v3352_v16, %s2918_s13 }
 0x1ca   : > { %v4024_v54 = vpop.permute.xlu2 %1109 }
 0x1cb   : > { %5366 = vst [vmem:[#allocation160_spill] sm:$0xff] %v4024_v54  ;;  %v5382_v54 = vld [vmem:[#allocation80_spill] sm:$0xff] }
 0x1cc   : > { %1265 = vrot.lane.b32.xlu0 %v3570_v0, %s2917_s12 }
 0x1ce   : > { %v4026_v4 = vpop.permute.xlu0 %1093  ;;  %1359 = vrot.lane.b32.xlu1 %v2877_v20, %s2919_s14  ;;  %v5370_v20 = vld [vmem:[#allocation113_spill] sm:$0xff] }
 0x1cf   : > { %5367 = vst [vmem:[#allocation161_spill] sm:$0xff] %v4026_v4  ;;  %v2879_v4 = vld [vmem:[#allocation2 + $0x70] sm:$0xff] }
 0x1d0   : > { %v4029_v48 = vpop.permute.xlu1 %1089  ;;  %1457 = vrot.lane.b32.xlu2 %v3339_v41, %s2918_s13 }
 0x1d1   : > { %5368 = vst [vmem:[#allocation162_spill] sm:$0xff] %v4029_v48 }
 0x1d2   : > { %v4035_v55 = vpop.permute.xlu2 %1115 }
 0x1d3   : > { %5369 = vst [vmem:[#allocation163_spill] sm:$0xff] %v4035_v55 }
 0x1d4   : > { %1267 = vrot.lane.b32.xlu0 %v3573_v1, %s2917_s12 }
 0x1d6   : > { %v4037_v16 = vpop.permute.xlu0 %1099  ;;  %1361 = vrot.lane.b32.xlu1 %v2878_v47, %s2919_s14  ;;  %v5373_v47 = vld [vmem:[#allocation53_spill] sm:$0xff] }
 0x1d8   : > { %v4040_v30 = vpop.permute.xlu1 %1095  ;;  %1363 = vrot.lane.b32.xlu2 %v2879_v4, %s2919_s14 }
 0x1da   : > { %v4045_v48 = vpop.permute.xlu2 %1121 }
 0x1db   : > { %5371 = vst [vmem:[#allocation164_spill] sm:$0xff] %v4045_v48 }
 0x1dc   : > { %1293 = vrot.lane.b32.xlu0 %v5370_v20, %s2917_s12 }
 0x1de   : > { %v4047_v41 = vpop.permute.xlu0 %1105  ;;  %1197 = vrot.lane.b32.xlu1 %v5372_v46, %s2916_s11 }
 0x1e0   : > { %v4051_v55 = vpop.permute.xlu1 %1101  ;;  %1389 = vrot.lane.b32.xlu2 %v3250_v52, %s2919_s14 }
 0x1e2   : > { %v4057_v26 = vpop.permute.xlu2 %1127 }
 0x1e3   : > { %5374 = vst [vmem:[#allocation53_spill] sm:$0xff] %v4057_v26  ;;  %v5379_v26 = vld [vmem:[#allocation46_spill] sm:$0xff] }
 0x1e4   : > { %1485 = vrot.lane.b32.xlu0 %v5373_v47, %s2918_s13 }
 0x1e6   : > { %v4059_v4 = vpop.permute.xlu0 %1111  ;;  %1459 = vrot.lane.b32.xlu1 %v3342_v18, %s2918_s13 }
 0x1e7   : > { %5375 = vst [vmem:[#allocation165_spill] sm:$0xff] %v4059_v4  ;;  %v5380_v4 = vld [vmem:[#allocation74_spill] sm:$0xff] }
 0x1e8   : > { %v4063_v48 = vpop.permute.xlu1 %1107  ;;  %1199 = vrot.lane.b32.xlu2 %v5376_v25, %s2916_s11  ;;  %v1552_v46 = vsel %vm344_vm0, %v5380_v4, %v5379_v26 }
 0x1e9   : > { %v1585_v25 = vsel %vm1581_vm3, %v1552_v46, %v5382_v54  ;;  %v5384_v46 = vld [vmem:[#allocation108_spill] sm:$0xff] }
 0x1ea   : > { %v4068_v9 = vpop.permute.xlu2 %1165 }
 0x1ec   : > { %1365 = vrot.lane.b32.xlu0 %v2880_v11, %s2919_s14  ;;  %v1618_v11 = vsel %vm1614_vm4, %v1585_v25, %v3877_v39 }
 0x1ee   : > { %v4070_v52 = vpop.permute.xlu0 %1117  ;;  %1269 = vrot.lane.b32.xlu1 %v5378_v50, %s2917_s12  ;;  %v2882_v50 = vld [vmem:[#allocation2 + $0xa8] sm:$0xff] }
 0x1ef   : > { %5377 = vst [vmem:[#allocation166_spill] sm:$0xff] %v4070_v52  ;;  %v1651_v52 = vsel %vm1647_vm5, %v1618_v11, %v1076_v57  ;;  %v5388_v57 = vld [vmem:[#allocation50_spill] sm:$0xff] }
 0x1f0   : > { %v4077_v18 = vpop.permute.xlu1 %1113  ;;  %1461 = vrot.lane.b32.xlu2 %v3374_v43, %s2918_s13 }
 0x1f1   : > { %5381 = vst [vmem:[#allocation46_spill] sm:$0xff] %v4077_v18 }
 0x1f2   : > { %v1172_v26 = vpop.permute.xlu2 %1171 }
 0x1f3   : > { %v4091_v18 = vsel %vm1680_vm6, %v1651_v52, %v1172_v26  ;;  %v5390_v52 = vld [vmem:[#allocation109_spill] sm:$0xff] }
 0x1f4   : > { %1391 = vrot.lane.b32.xlu0 %v3252_v53, %s2919_s14  ;;  %v5386_v53 = vld [vmem:[#allocation82_spill] sm:$0xff] }
 0x1f6   : > { %v4088_v4 = vpop.permute.xlu0 %1123  ;;  %1295 = vrot.lane.b32.xlu1 %v5384_v46, %s2917_s12 }
 0x1f7   : > { %5383 = vst [vmem:[#allocation74_spill] sm:$0xff] %v4088_v4 }
 0x1f8   : > { %v4095_v43 = vpop.permute.xlu1 %1119  ;;  %1271 = vrot.lane.b32.xlu2 %v5386_v53, %s2917_s12 }
 0x1f9   : > { %5385 = vst [vmem:[#allocation80_spill] sm:$0xff] %v4095_v43 }
 0x1fa   : > { %v4101_v25 = vpop.permute.xlu2 %1177 }
 0x1fc   : > { %1201 = vrot.lane.b32.xlu0 %v5373_v47, %s2916_s11  ;;  %v2881_v47 = vld [vmem:[#allocation2 + $0x90] sm:$0xff] }
 0x1fe   : > { %v4103_v39 = vpop.permute.xlu0 %1129  ;;  %1487 = vrot.lane.b32.xlu1 %v5388_v57, %s2918_s13 }
 0x1ff   : > { %5387 = vst [vmem:[#allocation167_spill] sm:$0xff] %v4103_v39  ;;  %v5393_v39 = vld [vmem:[#allocation51_spill] sm:$0xff] }
 0x200   : > { %v4107_v54 = vpop.permute.xlu1 %1125  ;;  %1297 = vrot.lane.b32.xlu2 %v5390_v52, %s2917_s12 }
 0x201   : > { %5389 = vst [vmem:[#allocation50_spill] sm:$0xff] %v4107_v54  ;;  %v5394_v54 = vld [vmem:[#allocation83_spill] sm:$0xff] }
 0x202   : > { %v4113_v11 = vpop.permute.xlu2 %1183 }
 0x203   : > { %5391 = vst [vmem:[#allocation168_spill] sm:$0xff] %v4113_v11  ;;  %v5397_v11 = vld [vmem:[#allocation94_spill] sm:$0xff] }
 0x204   : > { %1463 = vrot.lane.b32.xlu0 %v3359_v12, %s2918_s13  ;;  %v5396_v12 = vld [vmem:[#allocation61_spill] sm:$0xff] }
 0x205   : > { %v1564_v52 = vsel %vm344_vm0, %v5397_v11, %v5396_v12 }
 0x206   : > { %v4115_v26 = vpop.permute.xlu0 %1167  ;;  %1367 = vrot.lane.b32.xlu1 %v2881_v47, %s2919_s14 }
 0x208   : > { %v4118_v4 = vpop.permute.xlu1 %1131  ;;  %1489 = vrot.lane.b32.xlu2 %v5393_v39, %s2918_s13 }
 0x209   : > { %5392 = vst [vmem:[#allocation169_spill] sm:$0xff] %v4118_v4  ;;  %v5398_v4 = vld [vmem:[#allocation105_spill] sm:$0xff] }
 0x20a   : > { %v4124_v43 = vpop.permute.xlu2 %1189  ;;  %v1597_v46 = vsel %vm1581_vm3, %v1564_v52, %v5398_v4 }
 0x20b   : > { %5395 = vst [vmem:[#allocation51_spill] sm:$0xff] %v4124_v43  ;;  %v1816_v43 = vld [vmem:[%s5089_s1 + $0x20] sm:$0xf]  ;;  %v1630_v12 = vsel %vm1614_vm4, %v1597_v46, %v3925_v59  ;;  %v1813_v59 = vld [vmem:[%s5089_s1 + $0x8] sm:$0xff]  ;;  %v2883_v46 = vld [vmem:[#allocation2 + $0x170] sm:$0xff] }
 0x20c   : > { %1273 = vrot.lane.b32.xlu0 %v5394_v54, %s2917_s12  ;;  %v5399_v54 = vld [vmem:[#allocation119_spill] sm:$0xff]  ;;  %2688 = vmatpush.msk.msra.mxu0 %vm1914_vm7, %v1816_v43 }
 0x20d   : > { %2853 = vmatpush.msk.msra.mxu2 %vm1914_vm7, %v1816_v43  ;;  %v5402_v43 = vld [vmem:[#allocation59_spill] sm:$0xff] }
 0x20e   : > { %v4126_v53 = vpop.permute.xlu0 %1173  ;;  %1393 = vrot.lane.b32.xlu1 %v3273_v58, %s2919_s14  ;;  %v1815_v58 = vld [vmem:[%s5089_s1 + $0x18] sm:$0xff] }
 0x20f   : > { %1930 = vmatpush.msra.mxu0 %v1815_v58  ;;  %2854 = vmatpush.msra.mxu2 %v1815_v58  ;;  %v1812_v58 = vld [vmem:[%s5089_s1] sm:$0xff] }
 0x210   : > { %v4133_v47 = vpop.permute.xlu1 %1169  ;;  %1369 = vrot.lane.b32.xlu2 %v2882_v50, %s2919_s14  ;;  %v1663_v50 = vsel %vm1647_vm5, %v1630_v12, %v4037_v16 }
 0x212   : > { %v1196_v4 = vpop.permute.xlu2 %1195 }
 0x213   : > { %v4158_v23 = vsel %vm1680_vm6, %v1663_v50, %v1196_v4  ;;  %v5405_v50 = vld [vmem:[#allocation89_spill] sm:$0xff] }
 0x214   : > { %1299 = vrot.lane.b32.xlu0 %v5399_v54, %s2917_s12  ;;  %v1814_v54 = vld [vmem:[%s5089_s1 + $0x10] sm:$0xff]  ;;  %5401 = vst [vmem:[#allocation94_spill] sm:$0xff] %v4158_v23  ;;  %v5407_v23 = vld [vmem:[#allocation118_spill] sm:$0xff] }
 0x215   : > { %1931 = vmatpush.msra.mxu0 %v1814_v54  ;;  %2855 = vmatpush.msra.mxu2 %v1814_v54  ;;  %v5404_v54 = vld [vmem:[#allocation64_spill] sm:$0xff] }
 0x216   : > { %v4152_v52 = vpop.permute.xlu0 %1179  ;;  %1203 = vrot.lane.b32.xlu1 %v5388_v57, %s2916_s11  ;;  %v1562_v4 = vsel %vm344_vm0, %v5405_v50, %v5404_v54 }
 0x217   : > { %5400 = vst [vmem:[#allocation61_spill] sm:$0xff] %v4152_v52  ;;  %1932 = vmatpush.msra.mxu0 %v1813_v59  ;;  %2856 = vmatpush.msra.mxu2 %v1813_v59  ;;  %v1595_v2 = vsel %vm1581_vm3, %v1562_v4, %v5407_v23  ;;  %v2884_v59 = vld [vmem:[#allocation2 + $0xb0] sm:$0xff]  ;;  %v2885_v4 = vld [vmem:[#allocation2 + $0x188] sm:$0xff] }
 0x218   : > { %v4165_v16 = vpop.permute.xlu1 %1175  ;;  %1395 = vrot.lane.b32.xlu2 %v2883_v46, %s2919_s14 }
 0x219   : > { %1933 = vmatpush.msra.mxu0 %v1812_v58  ;;  %2857 = vmatpush.msra.mxu2 %v1812_v58  ;;  %v1628_v58 = vsel %vm1614_vm4, %v1595_v2, %v3871_v28 }
 0x21a   : > { %v1454_v57 = vpop.permute.xlu2 %1453 }
 0x21c   : > { %1491 = vrot.lane.b32.xlu0 %v5402_v43, %s2918_s13 }
 0x21e   : > { %v4173_v12 = vpop.permute.xlu0 %1185  ;;  %1465 = vrot.lane.b32.xlu1 %v3362_v51, %s2918_s13  ;;  %v1661_v51 = vsel %vm1647_vm5, %v1628_v58, %v4040_v30  ;;  %v5412_v58 = vld [vmem:[#allocation99_spill] sm:$0xff] }
 0x21f   : > { %5403 = vst [vmem:[#allocation105_spill] sm:$0xff] %v4173_v12 }
 0x220   : > { %v4180_v46 = vpop.permute.xlu1 %1181  ;;  %1205 = vrot.lane.b32.xlu2 %v5393_v39, %s2916_s11  ;;  %v423_v39 = vld [vmem:[#allocation2] sm:$0xff] }
 0x221   : > { %5406 = vst [vmem:[#allocation59_spill] sm:$0xff] %v4180_v46  ;;  %v5409_v46 = vld [vmem:[#allocation93_spill] sm:$0xff]  ;;  %v544_v28 = vrot.slane %v423_v39, 7 }
 0x222   : > { %v1456_v12 = vpop.permute.xlu2 %1455 }
 0x224   : > { %1371 = vrot.lane.b32.xlu0 %v2884_v59, %s2919_s14  ;;  %v5411_v59 = vld [vmem:[#allocation42_spill] sm:$0xff] }
 0x226   : > { %v1192_v20 = vpop.permute.xlu0 %1191  ;;  %1275 = vrot.lane.b32.xlu1 %v5409_v46, %s2917_s12 }
 0x227   : > { %v4192_v54 = vsel %vm1680_vm6, %v1661_v51, %v1192_v20  ;;  %v1563_v20 = vsel %vm344_vm0, %v5412_v58, %v5411_v59  ;;  %v5416_v59 = vld [vmem:[#allocation88_spill] sm:$0xff] }
 0x228   : > { %5408 = vst [vmem:[#allocation64_spill] sm:$0xff] %v4192_v54  ;;  %v4196_v23 = vpop.permute.xlu1 %1187  ;;  %1467 = vrot.lane.b32.xlu2 %v3396_v21, %s2918_s13  ;;  %v1596_v51 = vsel %vm1581_vm3, %v1563_v20, %v3781_v6  ;;  %v5413_v54 = vld [vmem:[#allocation114_spill] sm:$0xff]  ;;  %v5417_v6 = vld [vmem:[#allocation37_spill] sm:$0xff] }
 0x229   : > { %5410 = vst [vmem:[#allocation89_spill] sm:$0xff] %v4196_v23  ;;  %v1629_v21 = vsel %vm1614_vm4, %v1596_v51, %v3909_v13  ;;  %v5414_v23 = vld [vmem:[#allocation3_spill] sm:$0xff]  ;;  %v5419_v51 = vld [vmem:[#allocation56_spill] sm:$0xff] }
 0x22a   : > { %v4201_v2 = vpop.permute.xlu2 %1457  ;;  %v5415_v46 = vrot.slane %v5414_v23, 7  ;;  %v1662_v39 = vsel %vm1647_vm5, %v1629_v21, %v4001_v17 }
 0x22c   : > { %1397 = vrot.lane.b32.xlu0 %v2885_v4, %s2919_s14  ;;  %v546_v4 = vsel %vm543_vm2, %v544_v28, %v5415_v46  ;;  %v5418_v46 = vld [vmem:[#allocation76_spill] sm:$0xff] }
 0x22d   : > { %v1549_v13 = vsel %vm344_vm0, %v546_v4, %v5417_v6  ;;  %v2203_v6 = vld [vmem:[%s5090_s2] sm:$0xf] }
 0x22e   : > { %v1262_v30 = vpop.permute.xlu0 %1261  ;;  %1301 = vrot.lane.b32.xlu1 %v5413_v54, %s2917_s12  ;;  %v1582_v28 = vsel %vm1581_vm3, %v1549_v13, %v5418_v46  ;;  %v5422_v13 = vld [vmem:[#allocation34_spill] sm:$0xff]  ;;  %2721 = vmatpush.msk.msra.mxu1 %vm1914_vm7, %v2203_v6 }
 0x22f   : > { %v1615_v17 = vsel %vm1614_vm4, %v1582_v28, %v3865_v33  ;;  %v5420_v33 = vld [vmem:[#allocation115_spill] sm:$0xff]  ;;  %2858 = vmatpush.msk.msra.mxu3 %vm1914_vm7, %v2203_v6 }
 0x230   : > { %v1194_v37 = vpop.permute.xlu1 %1193  ;;  %1277 = vrot.lane.b32.xlu2 %v5416_v59, %s2917_s12 }
 0x231   : > { %v4218_v52 = vsel %vm1680_vm6, %v1662_v39, %v1194_v37  ;;  %v1648_v37 = vsel %vm1647_vm5, %v1615_v17, %v3981_v14  ;;  %v5423_v17 = vld [vmem:[#allocation92_spill] sm:$0xff] }
 0x232   : > { %v4226_v20 = vpop.permute.xlu2 %1363 }
 0x234   : > { %1207 = vrot.lane.b32.xlu0 %v5402_v43, %s2916_s11  ;;  %v1681_v43 = vsel %vm1680_vm6, %v1648_v37, %v4068_v9  ;;  %v5421_v9 = vld [vmem:[#allocation39_spill] sm:$0xff] }
 0x235   : > { %v1714_v21 = vsel %vm1713_vm8, %v1681_v43, %v1262_v30  ;;  %v1550_v30 = vsel %vm344_vm0, %v5422_v13, %v5421_v9  ;;  %v5425_v43 = vld [vmem:[#allocation22_spill] sm:$0xff]  ;;  %v5426_v13 = vld [vmem:[#allocation57_spill] sm:$0xff] }
 0x236   : > { %v1264_v23 = vpop.permute.xlu0 %1263  ;;  %1493 = vrot.lane.b32.xlu1 %v5419_v51, %s2918_s13  ;;  %v1583_v37 = vsel %vm1581_vm3, %v1550_v30, %v5423_v17  ;;  %2739 = vmatmul.msk.f32.vlgmr.msra.gmra.mxu3 %vm344_vm0, %v5425_v43  ;;  %v5428_v30 = vld [vmem:[#allocation78_spill] sm:$0xff]  ;;  %v5431_v43 = vld [vmem:[#allocation21_spill] sm:$0xff] }
 0x238   : > { %v1358_v4 = vpop.permute.xlu1 %1357  ;;  %1303 = vrot.lane.b32.xlu2 %v5420_v33, %s2917_s12 }
 0x239   : > { %v1747_v39 = vsel %vm1746_vm9, %v1714_v21, %v1358_v4  ;;  %v2886_v4 = vld [vmem:[#allocation2 + $0xc8] sm:$0xff] }
 0x23a   : > { %v1780_v14 = vsel %vm1779_vm10, %v1747_v39, %v1454_v57  ;;  %v1390_v46 = vpop.permute.xlu2 %1389  ;;  %v1616_v57 = vsel %vm1614_vm4, %v1583_v37, %v3823_v19  ;;  %v5429_v37 = vld [vmem:[#allocation102_spill] sm:$0xff] }
 0x23b   : > { %2689 = vmatmul.msk.f32.vlgmr.msra.gmra.mxu0 %vm1817_vm11, %v1780_v14  ;;  %v1649_v21 = vsel %vm1647_vm5, %v1616_v57, %v3995_v56  ;;  %v5427_v56 = vld [vmem:[#allocation41_spill] sm:$0xff]  ;;  %v5430_v57 = vld [vmem:[#allocation7_spill] sm:$0xff] }
 0x23c   : > { %1469 = vrot.lane.b32.xlu0 %v3381_v35, %s2918_s13  ;;  %v5424_v35 = vld [vmem:[#allocation5_spill] sm:$0xff]  ;;  %v1682_v39 = vsel %vm1680_vm6, %v1649_v21, %v4115_v26  ;;  %v1551_v17 = vsel %vm344_vm0, %v5428_v30, %v5427_v56  ;;  %v5433_v30 = vld [vmem:[#allocation4_spill] sm:$0xff] }
 0x23d   : > { %2722 = vmatmul.msk.f32.vlgmr.msra.gmra.mxu1 %vm344_vm0, %v5424_v35  ;;  %v1715_v14 = vsel %vm1713_vm8, %v1682_v39, %v1264_v23  ;;  %v1584_v35 = vsel %vm1581_vm3, %v1551_v17, %v5429_v37  ;;  %v2887_v21 = vld [vmem:[#allocation2 + $0x190] sm:$0xff]  ;;  %v5436_v37 = vld [vmem:[#allocation23_spill] sm:$0xff] }
 0x23e   : > { %v1266_v28 = vpop.permute.xlu0 %1265  ;;  %1373 = vrot.lane.b32.xlu1 %v2886_v4, %s2919_s14  ;;  %2740 = vmatmul.msk.f32.gmra.mxu3 %vm344_vm0, %v5431_v43 }
 0x240   : > { %v1360_v9 = vpop.permute.xlu1 %1359  ;;  %1495 = vrot.lane.b32.xlu2 %v5426_v13, %s2918_s13 }
 0x241   : > { %v1748_v6 = vsel %vm1746_vm9, %v1715_v14, %v1360_v9 }
 0x242   : > { %v1781_v19 = vsel %vm1779_vm10, %v1748_v6, %v1456_v12  ;;  %v4278_v26 = vpop.permute.xlu2 %1199  ;;  %v2888_v6 = vld [vmem:[#allocation2 + $0xd0] sm:$0xff] }
 0x243   : > { %2690 = vmatmul.msk.f32.gmra.mxu0 %vm1817_vm11, %v1781_v19 }
 0x244   : > { %1279 = vrot.lane.b32.xlu0 %v5405_v50, %s2917_s12  ;;  %v1617_v50 = vsel %vm1614_vm4, %v1584_v35, %v3861_v36  ;;  %v5432_v36 = vld [vmem:[#allocation125_spill] sm:$0xff]  ;;  %v5437_v35 = vld [vmem:[#allocation124_spill] sm:$0xff] }
 0x245   : > { %2723 = vmatmul.msk.f32.gmra.mxu1 %vm344_vm0, %v5430_v57  ;;  %v1650_v12 = vsel %vm1647_vm5, %v1617_v50, %v3955_v63 }
 0x246   : > { %v1268_v23 = vpop.permute.xlu0 %1267  ;;  %1399 = vrot.lane.b32.xlu1 %v2887_v21, %s2919_s14  ;;  %v1683_v4 = vsel %vm1680_vm6, %v1650_v12, %v4133_v47  ;;  %v5434_v47 = vld [vmem:[#allocation70_spill] sm:$0xff]  ;;  %2741 = vmatmul.msk.f32.gmra.mxu3 %vm344_vm0, %v5436_v37  ;;  %v2889_v21 = vld [vmem:[#allocation2 + $0x1a8] sm:$0xff] }
 0x247   : > { %v1716_v39 = vsel %vm1713_vm8, %v1683_v4, %v1266_v28  ;;  %v5435_v28 = vld [vmem:[#allocation95_spill] sm:$0xff]  ;;  %v5438_v4 = vld [vmem:[#allocation65_spill] sm:$0xff]  ;;  %v5442_v37 = vld [vmem:[#allocation8_spill] sm:$0xff] }
 0x248   : > { %v1362_v14 = vpop.permute.xlu1 %1361  ;;  %1375 = vrot.lane.b32.xlu2 %v2888_v6, %s2919_s14  ;;  %v1565_v17 = vsel %vm344_vm0, %v5435_v28, %v5434_v47  ;;  %v5439_v6 = vld [vmem:[#allocation6_spill] sm:$0xff]  ;;  %v2890_v47 = vld [vmem:[#allocation2 + $0xe8] sm:$0xff] }
 0x249   : > { %v1749_v9 = vsel %vm1746_vm9, %v1716_v39, %v1362_v14  ;;  %v1598_v57 = vsel %vm1581_vm3, %v1565_v17, %v5437_v35  ;;  %v5441_v17 = vld [vmem:[#allocation35_spill] sm:$0xff] }
 0x24a   : > { %v1782_v63 = vsel %vm1779_vm10, %v1749_v9, %v4201_v2  ;;  %v1462_v19 = vpop.permute.xlu2 %1461  ;;  %v1631_v2 = vsel %vm1614_vm4, %v1598_v57, %v3883_v34  ;;  %v5444_v57 = vld [vmem:[#allocation24_spill] sm:$0xff] }
 0x24b   : > { %2691 = vmatmul.msk.f32.gmra.mxu0 %vm1817_vm11, %v1782_v63  ;;  %v1664_v50 = vsel %vm1647_vm5, %v1631_v2, %v4051_v55  ;;  %v1717_v55 = vsel %vm1713_vm8, %v4091_v18, %v1268_v23  ;;  %v5440_v63 = vld [vmem:[#allocation25_spill] sm:$0xff] }
 0x24c   : > { %1305 = vrot.lane.b32.xlu0 %v5432_v36, %s2917_s12 }
 0x24d   : > { %2724 = vmatmul.msk.f32.gmra.mxu1 %vm344_vm0, %v5433_v30 }
 0x24e   : > { %v1294_v56 = vpop.permute.xlu0 %1293  ;;  %1209 = vrot.lane.b32.xlu1 %v5419_v51, %s2916_s11  ;;  %2742 = vmatmul.msk.f32.gmra.mxu3 %vm344_vm0, %v5440_v63 }
 0x250   : > { %v1198_v43 = vpop.permute.xlu1 %1197  ;;  %1401 = vrot.lane.b32.xlu2 %v2889_v21, %s2919_s14 }
 0x251   : > { %v1697_v12 = vsel %vm1680_vm6, %v1664_v50, %v1198_v43 }
 0x252   : > { %v1730_v39 = vsel %vm1713_vm8, %v1697_v12, %v1294_v56  ;;  %v4321_v14 = vpop.permute.xlu2 %1271  ;;  %v2891_v12 = vld [vmem:[#allocation2 + $0x1b0] sm:$0xff] }
 0x253   : > { %v1763_v9 = vsel %vm1746_vm9, %v1730_v39, %v1390_v46  ;;  %v1750_v46 = vsel %vm1746_vm9, %v1717_v55, %v4226_v20  ;;  %v5443_v20 = vld [vmem:[#allocation98_spill] sm:$0xff] }
 0x254   : > { %1497 = vrot.lane.b32.xlu0 %v5438_v4, %s2918_s13 }
 0x255   : > { %2725 = vmatmul.msk.f32.gmra.mxu1 %vm344_vm0, %v5439_v6 }
 0x256   : > { %v1486_v51 = vpop.permute.xlu0 %1485  ;;  %1471 = vrot.lane.b32.xlu1 %v3384_v10, %s2918_s13  ;;  %v1553_v10 = vsel %vm344_vm0, %v3547_v29, %v5441_v17  ;;  %2743 = vmatmul.msk.f32.gmra.mxu3 %vm344_vm0, %v5444_v57  ;;  %v5453_v17 = vld [vmem:[#allocation121_spill] sm:$0xff] }
 0x257   : > { %v1796_v34 = vsel %vm1779_vm10, %v1763_v9, %v1486_v51  ;;  %v1586_v35 = vsel %vm1581_vm3, %v1553_v10, %v5443_v20  ;;  %v5447_v51 = vld [vmem:[#allocation120_spill] sm:$0xff]  ;;  %v5449_v9 = vld [vmem:[#allocation107_spill] sm:$0xff] }
 0x258   : > { %2705 = vmatmul.msk.f32.vlgmr.msra.gmra.mxu2 %vm1817_vm11, %v1796_v34  ;;  %v1460_v56 = vpop.permute.xlu1 %1459  ;;  %1211 = vrot.lane.b32.xlu2 %v5426_v13, %s2916_s11  ;;  %v1619_v13 = vsel %vm1614_vm4, %v1586_v35, %v3835_v38  ;;  %v5455_v35 = vld [vmem:[#allocation110_spill] sm:$0xff] }
 0x259   : > { %v1783_v30 = vsel %vm1779_vm10, %v1750_v46, %v1460_v56  ;;  %v1652_v2 = vsel %vm1647_vm5, %v1619_v13, %v4007_v15  ;;  %v5445_v15 = vld [vmem:[#allocation10_spill] sm:$0xff]  ;;  %v5456_v13 = vld [vmem:[#allocation11_spill] sm:$0xff] }
 0x25a   : > { %2692 = vmatmul.msk.f32.gmra.mxu0 %vm1817_vm11, %v1783_v30  ;;  %v4341_v18 = vpop.permute.xlu2 %1297  ;;  %v1685_v29 = vsel %vm1680_vm6, %v1652_v2, %v4126_v53  ;;  %v5446_v53 = vld [vmem:[#allocation26_spill] sm:$0xff] }
 0x25c   : > { %1377 = vrot.lane.b32.xlu0 %v2890_v47, %s2919_s14  ;;  %v5450_v47 = vld [vmem:[#allocation9_spill] sm:$0xff] }
 0x25d   : > { %2726 = vmatmul.msk.f32.gmra.mxu1 %vm344_vm0, %v5442_v37 }
 0x25e   : > { %v1366_v23 = vpop.permute.xlu0 %1365  ;;  %1281 = vrot.lane.b32.xlu1 %v5412_v58, %s2917_s12  ;;  %2744 = vmatmul.msk.f32.gmra.mxu3 %vm344_vm0, %v5446_v53 }
 0x260   : > { %v1270_v50 = vpop.permute.xlu1 %1269  ;;  %1473 = vrot.lane.b32.xlu2 %v3418_v8, %s2918_s13  ;;  %v5448_v8 = vld [vmem:[#allocation48_spill] sm:$0xff] }
 0x261   : > { %v1718_v43 = vsel %vm1713_vm8, %v1685_v29, %v1270_v50  ;;  %v1566_v34 = vsel %vm344_vm0, %v5449_v9, %v5448_v8  ;;  %v5457_v29 = vld [vmem:[#allocation27_spill] sm:$0xff]  ;;  %v2892_v50 = vld [vmem:[#allocation2 + $0xf0] sm:$0xff] }
 0x262   : > { %v1751_v38 = vsel %vm1746_vm9, %v1718_v43, %v1366_v23  ;;  %v1490_v58 = vpop.permute.xlu2 %1489 }
 0x263   : > { %v1784_v21 = vsel %vm1779_vm10, %v1751_v38, %v1462_v19  ;;  %v1599_v19 = vsel %vm1581_vm3, %v1566_v34, %v3802_v32  ;;  %v5458_v38 = vld [vmem:[#allocation67_spill] sm:$0xff] }
 0x264   : > { %1403 = vrot.lane.b32.xlu0 %v2891_v12, %s2919_s14  ;;  %2693 = vmatmul.msk.f32.gmra.mxu0 %vm1817_vm11, %v1784_v21  ;;  %v1632_v55 = vsel %vm1614_vm4, %v1599_v19, %v3921_v61  ;;  %v5459_v21 = vld [vmem:[#allocation100_spill] sm:$0xff]  ;;  %v5462_v19 = vld [vmem:[#allocation13_spill] sm:$0xff] }
 0x265   : > { %2727 = vmatmul.msk.f32.gmra.mxu1 %vm344_vm0, %v5445_v15  ;;  %v1665_v63 = vsel %vm1647_vm5, %v1632_v55, %v4013_v49  ;;  %v5460_v15 = vld [vmem:[#allocation63_spill] sm:$0xff]  ;;  %v5463_v55 = vld [vmem:[#allocation29_spill] sm:$0xff] }
 0x266   : > { %v1392_v39 = vpop.permute.xlu0 %1391  ;;  %1307 = vrot.lane.b32.xlu1 %v5447_v51, %s2917_s12  ;;  %v1698_v30 = vsel %vm1680_vm6, %v1665_v63, %v4278_v26  ;;  %v5454_v26 = vld [vmem:[#allocation36_spill] sm:$0xff] }
 0x267   : > { %v1554_v10 = vsel %vm344_vm0, %v3590_v5, %v5454_v26  ;;  %v2893_v63 = vld [vmem:[#allocation2 + $0x1c8] sm:$0xff]  ;;  %v5467_v26 = vld [vmem:[#allocation31_spill] sm:$0xff] }
 0x268   : > { %v1296_v6 = vpop.permute.xlu1 %1295  ;;  %1283 = vrot.lane.b32.xlu2 %v5397_v11, %s2917_s12  ;;  %v5451_v11 = vld [vmem:[#allocation28_spill] sm:$0xff]  ;;  %v1587_v57 = vsel %vm1581_vm3, %v1554_v10, %v5455_v35 }
 0x269   : > { %v1731_v32 = vsel %vm1713_vm8, %v1698_v30, %v1296_v6  ;;  %2745 = vmatmul.msk.f32.gmra.mxu3 %vm344_vm0, %v5451_v11  ;;  %v1620_v2 = vsel %vm1614_vm4, %v1587_v57, %v3873_v42  ;;  %v1567_v42 = vsel %vm344_vm0, %v5459_v21, %v5458_v38 }
 0x26a   : > { %v4386_v56 = vpop.permute.xlu2 %1369  ;;  %v1764_v61 = vsel %vm1746_vm9, %v1731_v32, %v1392_v39  ;;  %v2894_v32 = vld [vmem:[#allocation2 + $0x108] sm:$0xff] }
 0x26c   : > { %1213 = vrot.lane.b32.xlu0 %v5438_v4, %s2916_s11  ;;  %v5452_v4 = vld [vmem:[#allocation62_spill] sm:$0xff] }
 0x26d   : > { %2728 = vmatmul.msk.f32.gmra.mxu1 %vm344_vm0, %v5450_v47 }
 0x26e   : > { %v1202_v46 = vpop.permute.xlu0 %1201  ;;  %1499 = vrot.lane.b32.xlu1 %v5452_v4, %s2918_s13 }
 0x270   : > { %v1488_v49 = vpop.permute.xlu1 %1487  ;;  %1309 = vrot.lane.b32.xlu2 %v5453_v17, %s2917_s12 }
 0x271   : > { %v1797_v23 = vsel %vm1779_vm10, %v1764_v61, %v1488_v49  ;;  %2746 = vmatmul.msk.f32.gmra.mxu3 %vm344_vm0, %v5457_v29  ;;  %v5464_v61 = vld [vmem:[#allocation12_spill] sm:$0xff]  ;;  %v5465_v49 = vld [vmem:[#allocation75_spill] sm:$0xff] }
 0x272   : > { %2706 = vmatmul.msk.f32.gmra.mxu2 %vm1817_vm11, %v1797_v23  ;;  %v1396_v37 = vpop.permute.xlu2 %1395 }
 0x274   : > { %1475 = vrot.lane.b32.xlu0 %v3403_v22, %s2918_s13  ;;  %v1653_v22 = vsel %vm1647_vm5, %v1620_v2, %v3967_v3  ;;  %v5461_v3 = vld [vmem:[#allocation111_spill] sm:$0xff]  ;;  %v5469_v2 = vld [vmem:[#allocation85_spill] sm:$0xff] }
 0x275   : > { %2729 = vmatmul.msk.f32.gmra.mxu1 %vm344_vm0, %v5456_v13  ;;  %v1686_v5 = vsel %vm1680_vm6, %v1653_v22, %v4165_v16  ;;  %v1600_v53 = vsel %vm1581_vm3, %v1567_v42, %v5461_v3  ;;  %v5471_v42 = vld [vmem:[#allocation14_spill] sm:$0xff]  ;;  %v2896_v3 = vld [vmem:[#allocation2 + $0x110] sm:$0xff] }
 0x276   : > { %v1464_v20 = vpop.permute.xlu0 %1463  ;;  %1379 = vrot.lane.b32.xlu1 %v2892_v50, %s2919_s14  ;;  %v1719_v43 = vsel %vm1713_vm8, %v1686_v5, %v4321_v14  ;;  %v1633_v14 = vsel %vm1614_vm4, %v1600_v53, %v3937_v62 }
 0x277   : > { %v1666_v6 = vsel %vm1647_vm5, %v1633_v14, %v4047_v41  ;;  %v5473_v14 = vld [vmem:[#allocation52_spill] sm:$0xff] }
 0x278   : > { %v1368_v12 = vpop.permute.xlu1 %1367  ;;  %1501 = vrot.lane.b32.xlu2 %v5460_v15, %s2918_s13 }
 0x279   : > { %v1752_v39 = vsel %vm1746_vm9, %v1719_v43, %v1368_v12  ;;  %2747 = vmatmul.msk.f32.gmra.mxu3 %vm344_vm0, %v5463_v55  ;;  %v5477_v55 = vld [vmem:[#allocation61_spill] sm:$0xff] }
 0x27a   : > { %v1785_v16 = vsel %vm1779_vm10, %v1752_v39, %v1464_v20  ;;  %v4436_v8 = vpop.permute.xlu2 %1205  ;;  %v5468_v20 = vld [vmem:[#allocation43_spill] sm:$0xff]  ;;  %v5472_v39 = vld [vmem:[#allocation30_spill] sm:$0xff] }
 0x27b   : > { %2694 = vmatmul.msk.f32.gmra.mxu0 %vm1817_vm11, %v1785_v16  ;;  %v1555_v35 = vsel %vm344_vm0, %v3570_v0, %v5468_v20  ;;  %v5485_v20 = vld [vmem:[#allocation148_spill] sm:$0xff] }
 0x27c   : > { %1285 = vrot.lane.b32.xlu0 %v5435_v28, %s2917_s12  ;;  %v1699_v28 = vsel %vm1680_vm6, %v1666_v6, %v1202_v46  ;;  %v1588_v29 = vsel %vm1581_vm3, %v1555_v35, %v5469_v2 }
 0x27d   : > { %2730 = vmatmul.msk.f32.gmra.mxu1 %vm344_vm0, %v5462_v19  ;;  %v1732_v62 = vsel %vm1713_vm8, %v1699_v28, %v4341_v18  ;;  %v5466_v18 = vld [vmem:[#allocation101_spill] sm:$0xff]  ;;  %v5476_v19 = vld [vmem:[#allocation32_spill] sm:$0xff] }
 0x27e   : > { %v1274_v34 = vpop.permute.xlu0 %1273  ;;  %1405 = vrot.lane.b32.xlu1 %v2893_v63, %s2919_s14  ;;  %v1568_v23 = vsel %vm344_vm0, %v5466_v18, %v5465_v49  ;;  %v5482_v49 = vld [vmem:[#allocation54_spill] sm:$0xff] }
 0x27f   : > { %v1601_v10 = vsel %vm1581_vm3, %v1568_v23, %v3792_v7  ;;  %v2895_v7 = vld [vmem:[#allocation2 + $0x1d0] sm:$0xff] }
 0x280   : > { %v1394_v30 = vpop.permute.xlu1 %1393  ;;  %1381 = vrot.lane.b32.xlu2 %v2894_v32, %s2919_s14  ;;  %v5483_v23 = vld [vmem:[#allocation113_spill] sm:$0xff] }
 0x281   : > { %v1765_v47 = vsel %vm1746_vm9, %v1732_v62, %v1394_v30  ;;  %2748 = vmatmul.msk.f32.gmra.mxu3 %vm344_vm0, %v5467_v26  ;;  %v5478_v30 = vld [vmem:[#allocation47_spill] sm:$0xff]  ;;  %v1569_v26 = vsel %vm344_vm0, %v5483_v23, %v5482_v49  ;;  %v5505_v49 = vld [vmem:[#allocation165_spill] sm:$0xff] }
 0x282   : > { %v1798_v41 = vsel %vm1779_vm10, %v1765_v47, %v1490_v58  ;;  %v1468_v46 = vpop.permute.xlu2 %1467  ;;  %v1634_v58 = vsel %vm1614_vm4, %v1601_v10, %v3895_v40  ;;  %v1621_v40 = vsel %vm1614_vm4, %v1588_v29, %v3889_v45  ;;  %v2897_v47 = vld [vmem:[#allocation2 + $0x1e8] sm:$0xff] }
 0x283   : > { %2707 = vmatmul.msk.f32.gmra.mxu2 %vm1817_vm11, %v1798_v41  ;;  %v1667_v57 = vsel %vm1647_vm5, %v1634_v58, %v4063_v48  ;;  %v1654_v48 = vsel %vm1647_vm5, %v1621_v40, %v4003_v27  ;;  %v5488_v40 = vld [vmem:[#allocation103_spill] sm:$0xff] }
 0x284   : > { %1311 = vrot.lane.b32.xlu0 %v3795_v31, %s2917_s12  ;;  %v1687_v12 = vsel %vm1680_vm6, %v1654_v48, %v4101_v25 }
 0x285   : > { %2731 = vmatmul.msk.f32.gmra.mxu1 %vm344_vm0, %v5464_v61  ;;  %v1720_v45 = vsel %vm1713_vm8, %v1687_v12, %v1274_v34  ;;  %v5474_v34 = vld [vmem:[#allocation16_spill] sm:$0xff]  ;;  %v5481_v61 = vld [vmem:[#allocation126_spill] sm:$0xff] }
 0x286   : > { %v1300_v11 = vpop.permute.xlu0 %1299  ;;  %1215 = vrot.lane.b32.xlu1 %v5452_v4, %s2916_s11  ;;  %v5470_v4 = vld [vmem:[#allocation71_spill] sm:$0xff]  ;;  %v5492_v12 = vld [vmem:[#allocation38_spill] sm:$0xff] }
 0x288   : > { %v1204_v13 = vpop.permute.xlu1 %1203  ;;  %1407 = vrot.lane.b32.xlu2 %v2895_v7, %s2919_s14  ;;  %v5487_v7 = vld [vmem:[#allocation17_spill] sm:$0xff] }
 0x289   : > { %v1700_v22 = vsel %vm1680_vm6, %v1667_v57, %v1204_v13  ;;  %2749 = vmatmul.msk.f32.gmra.mxu3 %vm344_vm0, %v5472_v39  ;;  %v5486_v57 = vld [vmem:[#allocation160_spill] sm:$0xff] }
 0x28a   : > { %v1733_v0 = vsel %vm1713_vm8, %v1700_v22, %v1300_v11  ;;  %v4483_v50 = vpop.permute.xlu2 %1277  ;;  %v5480_v11 = vld [vmem:[#allocation33_spill] sm:$0xff] }
 0x28b   : > { %v1766_v43 = vsel %vm1746_vm9, %v1733_v0, %v1396_v37  ;;  %v1753_v37 = vsel %vm1746_vm9, %v1720_v45, %v4386_v56  ;;  %v5475_v56 = vld [vmem:[#allocation106_spill] sm:$0xff] }
 0x28c   : > { %1503 = vrot.lane.b32.xlu0 %v5470_v4, %s2918_s13 }
 0x28d   : > { %2732 = vmatmul.msk.f32.gmra.mxu1 %vm344_vm0, %v5471_v42 }
 0x28e   : > { %v1492_v5 = vpop.permute.xlu0 %1491  ;;  %1477 = vrot.lane.b32.xlu1 %v3406_v44, %s2918_s13  ;;  %v1556_v44 = vsel %vm344_vm0, %v3573_v1, %v5473_v14  ;;  %v5497_v14 = vld [vmem:[#allocation104_spill] sm:$0xff] }
 0x28f   : > { %v1799_v38 = vsel %vm1779_vm10, %v1766_v43, %v1492_v5  ;;  %v1589_v6 = vsel %vm1581_vm3, %v1556_v44, %v5475_v56  ;;  %v5490_v43 = vld [vmem:[#allocation127_spill] sm:$0xff]  ;;  %v5498_v44 = vld [vmem:[#allocation156_spill] sm:$0xff] }
 0x290   : > { %2708 = vmatmul.msk.f32.gmra.mxu2 %vm1817_vm11, %v1799_v38  ;;  %v1466_v27 = vpop.permute.xlu1 %1465  ;;  %1217 = vrot.lane.b32.xlu2 %v5460_v15, %s2916_s11  ;;  %v1622_v15 = vsel %vm1614_vm4, %v1589_v6, %v3847_v24  ;;  %v5493_v38 = vld [vmem:[#allocation87_spill] sm:$0xff]  ;;  %v2898_v56 = vld [vmem:[#allocation2 + $0x128] sm:$0xff] }
 0x291   : > { %v1786_v25 = vsel %vm1779_vm10, %v1753_v37, %v1466_v27  ;;  %2750 = vmatmul.msk.f32.gmra.mxu3 %vm344_vm0, %v5476_v19  ;;  %v1655_v28 = vsel %vm1647_vm5, %v1622_v15, %v4018_v60  ;;  %v5479_v60 = vld [vmem:[#allocation15_spill] sm:$0xff]  ;;  %v1557_v42 = vsel %vm344_vm0, %v5493_v38, %v5492_v12  ;;  %v5494_v27 = vld [vmem:[#allocation116_spill] sm:$0xff]  ;;  %v5510_v12 = vld [vmem:[#allocation109_spill] sm:$0xff] }
 0x292   : > { %2695 = vmatmul.msk.f32.gmra.mxu0 %vm1817_vm11, %v1786_v25  ;;  %v4504_v53 = vpop.permute.xlu2 %1303  ;;  %v1688_v1 = vsel %vm1680_vm6, %v1655_v28, %v5477_v55  ;;  %v1590_v37 = vsel %vm1581_vm3, %v1557_v42, %v5494_v27  ;;  %v5495_v25 = vld [vmem:[#allocation19_spill] sm:$0xff]  ;;  %v5500_v55 = vld [vmem:[#allocation73_spill] sm:$0xff]  ;;  %v5513_v27 = vld [vmem:[#allocation82_spill] sm:$0xff] }
 0x293   : > { %v5499_v6 = vld [vmem:[#allocation59_spill] sm:$0xff] }
 0x294   : > { %1383 = vrot.lane.b32.xlu0 %v2896_v3, %s2919_s14  ;;  %v5496_v3 = vld [vmem:[#allocation141_spill] sm:$0xff] }
 0x295   : > { %2733 = vmatmul.msk.f32.gmra.mxu1 %vm344_vm0, %v5474_v34 }
 0x296   : > { %v1372_v16 = vpop.permute.xlu0 %1371  ;;  %1287 = vrot.lane.b32.xlu1 %v5449_v9, %s2917_s12 }
 0x298   : > { %v1276_v63 = vpop.permute.xlu1 %1275  ;;  %1479 = vrot.lane.b32.xlu2 %v5478_v30, %s2918_s13  ;;  %v5502_v30 = vld [vmem:[#allocation69_spill] sm:$0xff] }
 0x299   : > { %v1721_v62 = vsel %vm1713_vm8, %v1688_v1, %v1276_v63  ;;  %2751 = vmatmul.msk.f32.gmra.mxu3 %vm344_vm0, %v5480_v11  ;;  %v5501_v1 = vld [vmem:[#allocation108_spill] sm:$0xff] }
 0x29a   : > { %v1754_v24 = vsel %vm1746_vm9, %v1721_v62, %v1372_v16  ;;  %v4529_v9 = vpop.permute.xlu2 %1495  ;;  %v1623_v16 = vsel %vm1614_vm4, %v1590_v37, %v5496_v3  ;;  %v1570_v63 = vsel %vm344_vm0, %v5501_v1, %v5500_v55 }
 0x29b   : > { %v1787_v32 = vsel %vm1779_vm10, %v1754_v24, %v1468_v46  ;;  %v5484_v46 = vld [vmem:[#allocation133_spill] sm:$0xff]  ;;  %v1656_v34 = vsel %vm1647_vm5, %v1623_v16, %v5498_v44 }
 0x29c   : > { %1409 = vrot.lane.b32.xlu0 %v2897_v47, %s2919_s14  ;;  %2696 = vmatmul.msk.f32.gmra.mxu0 %vm1817_vm11, %v1787_v32  ;;  %v1602_v58 = vsel %vm1581_vm3, %v1569_v26, %v5484_v46  ;;  %v1689_v19 = vsel %vm1680_vm6, %v1656_v34, %v5499_v6  ;;  %v5503_v47 = vld [vmem:[#allocation117_spill] sm:$0xff]  ;;  %v5506_v26 = vld [vmem:[#allocation18_spill] sm:$0xff] }
 0x29d   : > { %2734 = vmatmul.msk.f32.gmra.mxu1 %vm344_vm0, %v5479_v60  ;;  %v1635_v35 = vsel %vm1614_vm4, %v1602_v58, %v5485_v20  ;;  %v1722_v15 = vsel %vm1713_vm8, %v1689_v19, %v4483_v50  ;;  %v1603_v24 = vsel %vm1581_vm3, %v1570_v63, %v5503_v47  ;;  %v5516_v34 = vld [vmem:[#allocation46_spill] sm:$0xff]  ;;  %v5517_v47 = vld [vmem:[#allocation143_spill] sm:$0xff] }
 0x29e   : > { %v1398_v41 = vpop.permute.xlu0 %1397  ;;  %1313 = vrot.lane.b32.xlu1 %v5481_v61, %s2917_s12  ;;  %v1668_v13 = vsel %vm1647_vm5, %v1635_v35, %v5486_v57  ;;  %v2900_v57 = vld [vmem:[#allocation2 + $0x130] sm:$0xff] }
 0x29f   : > { %v1701_v22 = vsel %vm1680_vm6, %v1668_v13, %v4436_v8  ;;  %v5491_v8 = vld [vmem:[#allocation44_spill] sm:$0xff]  ;;  %v5507_v13 = vld [vmem:[#allocation130_spill] sm:$0xff] }
 0x2a0   : > { %v1302_v10 = vpop.permute.xlu1 %1301  ;;  %1289 = vrot.lane.b32.xlu2 %v5459_v21, %s2917_s12 }
 0x2a1   : > { %v1734_v21 = vsel %vm1713_vm8, %v1701_v22, %v1302_v10  ;;  %2752 = vmatmul.msk.f32.gmra.mxu3 %vm344_vm0, %v5488_v40  ;;  %v2899_v10 = vld [vmem:[#allocation2 + $0x1f0] sm:$0xff] }
 0x2a2   : > { %v4551_v2 = vpop.permute.xlu2 %1375  ;;  %v1767_v0 = vsel %vm1746_vm9, %v1734_v21, %v1398_v41  ;;  %v5504_v41 = vld [vmem:[#allocation151_spill] sm:$0xff] }
 0x2a3   : > { %v1636_v50 = vsel %vm1614_vm4, %v1603_v24, %v5504_v41 }
 0x2a4   : > { %1219 = vrot.lane.b32.xlu0 %v5470_v4, %s2916_s11  ;;  %v5489_v4 = vld [vmem:[#allocation68_spill] sm:$0xff]  ;;  %v1669_v23 = vsel %vm1647_vm5, %v1636_v50, %v5505_v49  ;;  %v5518_v49 = vld [vmem:[#allocation159_spill] sm:$0xff] }
 0x2a5   : > { %2735 = vmatmul.msk.f32.gmra.mxu1 %vm344_vm0, %v5487_v7 }
 0x2a6   : > { %v1208_v29 = vpop.permute.xlu0 %1207  ;;  %1505 = vrot.lane.b32.xlu1 %v5489_v4, %s2918_s13 }
 0x2a8   : > { %v1494_v48 = vpop.permute.xlu1 %1493  ;;  %1315 = vrot.lane.b32.xlu2 %v5490_v43, %s2917_s12 }
 0x2a9   : > { %v1800_v5 = vsel %vm1779_vm10, %v1767_v0, %v1494_v48  ;;  %2753 = vmatmul.msk.f32.gmra.mxu3 %vm344_vm0, %v5497_v14  ;;  %v4622_v0 = vld [vmem:[#allocation2 + $0x210] sm:$0xff]  ;;  %v5515_v14 = vld [vmem:[#allocation91_spill] sm:$0xff] }
 0x2aa   : > { %2709 = vmatmul.msk.f32.gmra.mxu2 %vm1817_vm11, %v1800_v5  ;;  %v4572_v45 = vpop.permute.xlu2 %1401  ;;  %v763_v48 = vrot.slane %v4622_v0, 1  ;;  %v5508_v5 = vld [vmem:[#allocation20_spill] sm:$0xff] }
 0x2ac   : > { %1481 = vrot.lane.b32.xlu0 %v5491_v8, %s2918_s13  ;;  %v5509_v8 = vld [vmem:[#allocation79_spill] sm:$0xff] }
 0x2ad   : > { %2736 = vmatmul.msk.f32.gmra.mxu1 %vm344_vm0, %v5495_v25  ;;  %v1571_v38 = vsel %vm344_vm0, %v5510_v12, %v5509_v8  ;;  %v5514_v25 = vld [vmem:[#allocation144_spill] sm:$0xff] }
 0x2ae   : > { %v1470_v39 = vpop.permute.xlu0 %1469  ;;  %1385 = vrot.lane.b32.xlu1 %v2898_v56, %s2919_s14 }
 0x2b0   : > { %v1374_v28 = vpop.permute.xlu1 %1373  ;;  %1507 = vrot.lane.b32.xlu2 %v5502_v30, %s2918_s13 }
 0x2b1   : > { %v1755_v62 = vsel %vm1746_vm9, %v1722_v15, %v1374_v28 }
 0x2b2   : > { %v1788_v32 = vsel %vm1779_vm10, %v1755_v62, %v1470_v39  ;;  %v4603_v60 = vpop.permute.xlu2 %1211  ;;  %v5512_v39 = vld [vmem:[#allocation49_spill] sm:$0xff] }
 0x2b3   : > { %2697 = vmatmul.msk.f32.gmra.mxu0 %vm1817_vm11, %v1788_v32  ;;  %v1558_v37 = vsel %vm344_vm0, %v5513_v27, %v5512_v39 }
 0x2b4   : > { %1291 = vrot.lane.b32.xlu0 %v5466_v18, %s2917_s12  ;;  %v1702_v18 = vsel %vm1680_vm6, %v1669_v23, %v1208_v29  ;;  %v1591_v44 = vsel %vm1581_vm3, %v1558_v37, %v5515_v14 }
 0x2b5   : > { %2737 = vmatmul.msk.f32.gmra.mxu1 %vm344_vm0, %v5506_v26  ;;  %v1735_v58 = vsel %vm1713_vm8, %v1702_v18, %v4504_v53  ;;  %v2901_v53 = vld [vmem:[#allocation2 + $0x208] sm:$0xff]  ;;  %v1624_v24 = vsel %vm1614_vm4, %v1591_v44, %v5517_v47 }
 0x2b6   : > { %v1280_v11 = vpop.permute.xlu0 %1279  ;;  %1411 = vrot.lane.b32.xlu1 %v2899_v10, %s2919_s14  ;;  %v762_v40 = vrot.slane %v2901_v53, 1  ;;  %v1657_v23 = vsel %vm1647_vm5, %v1624_v24, %v5518_v49 }
 0x2b8   : > { %v1935_v46 = vpop.f32.mrf.mxu0  ;;  %v1400_v20 = vpop.permute.xlu1 %1399  ;;  %1387 = vrot.lane.b32.xlu2 %v2900_v57, %s2919_s14  ;;  %v4643_v16 = vsel %vm672_vm1, %v762_v40, %v763_v48  ;;  %v491_v40 = vld [vmem:[#allocation2 + $0x220] sm:$0xff] }
 0x2b9   : > { %v1768_v35 = vsel %vm1746_vm9, %v1735_v58, %v1400_v20  ;;  %v2132_v6 = vmul.f32 %v1935_v46, %v1935_v46  ;;  %v5519_v58 = vld [vmem:[#allocation168_spill] sm:$0xff]  ;;  %v770_v27 = vrot.slane %v491_v40, 7 }
 0x2ba   : > { %v2320_v22 = vpop.f32.mrf.mxu1  ;;  %v1801_v29 = vsel %vm1779_vm10, %v1768_v35, %v4529_v9  ;;  %v4620_v7 = vpop.permute.xlu2 %1473  ;;  %v5511_v9 = vld [vmem:[#allocation132_spill] sm:$0xff]  ;;  %v1690_v20 = vsel %vm1680_vm6, %v1657_v23, %v5519_v58 }
 0x2bb   : > { %2710 = vmatmul.msk.f32.gmra.mxu2 %vm1817_vm11, %v1801_v29  ;;  %v1604_v42 = vsel %vm1581_vm3, %v1571_v38, %v5511_v9  ;;  %v2453_v15 = vmul.f32 %v2320_v22, %v2320_v22  ;;  %v5521_v38 = vld [vmem:[#allocation129_spill] sm:$0xff] }
 0x2bc   : > { %1317 = vrot.lane.b32.xlu0 %v5507_v13, %s2917_s12  ;;  %v1637_v3 = vsel %vm1614_vm4, %v1604_v42, %v5514_v25  ;;  %v1723_v13 = vsel %vm1713_vm8, %v1690_v20, %v1280_v11  ;;  %v5522_v25 = vld [vmem:[#allocation58_spill] sm:$0xff] }
 0x2bd   : > { %2738 = vmatmul.msk.f32.gmra.mxu1 %vm344_vm0, %v5508_v5  ;;  %v1670_v56 = vsel %vm1647_vm5, %v1637_v3, %v5516_v34  ;;  %v5523_v3 = vld [vmem:[#allocation83_spill] sm:$0xff]  ;;  %v490_v34 = vld [vmem:[#allocation2 + $0x218] sm:$0xff] }
 0x2be   : > { %v1306_v21 = vpop.permute.xlu0 %1305  ;;  %1221 = vrot.lane.b32.xlu1 %v5489_v4, %s2916_s11  ;;  %v1559_v14 = vsel %vm344_vm0, %v5523_v3, %v5522_v25 }
 0x2c0   : > { %v1938_v4 = vpop.f32.mrf.mxu0  ;;  %v1210_v19 = vpop.permute.xlu1 %1209  ;;  %1413 = vrot.lane.b32.xlu2 %v2901_v53, %s2919_s14  ;;  %v1756_v53 = vsel %vm1746_vm9, %v1723_v13, %v4551_v2  ;;  %v5528_v13 = vld [vmem:[#allocation60_spill] sm:$0xff] }
 0x2c1   : > { %v2761_v28 = vpack.c.bf16 %v1938_v4, %v1935_v46  ;;  %v2095_v55 = vadd.f32 %v1938_v4, %v1935_v46  ;;  %v2133_v1 = vmul.f32 %v1938_v4, %v1938_v4  ;;  %v1703_v63 = vsel %vm1680_vm6, %v1670_v56, %v1210_v19  ;;  %v5525_v19 = vld [vmem:[#allocation140_spill] sm:$0xff] }
 0x2c2   : > { %v2323_v62 = vpop.f32.mrf.mxu1  ;;  %v1736_v32 = vsel %vm1713_vm8, %v1703_v63, %v1306_v21  ;;  %v4664_v18 = vpop.permute.xlu2 %1283 }
 0x2c3   : > { %v2416_v41 = vadd.f32 %v2323_v62, %v2320_v22  ;;  %v2454_v50 = vmul.f32 %v2323_v62, %v2323_v62  ;;  %2762 = vst [vmem:[%s4652_s9] sm:$0xff] %v2761_v28   ;;  %v2164_v26 = vadd.f32 %v2133_v1, %v2132_v6  ;;  %v1769_v46 = vsel %vm1746_vm9, %v1736_v32, %v4572_v45  ;;  %v5520_v22 = vld [vmem:[#allocation45_spill] sm:$0xff]  ;;  %v4677_v45 = vld [vmem:[#allocation2 + $0x228] sm:$0xff]  ;;  %v5526_v28 = vld [vmem:[#allocation162_spill] sm:$0xff] }
 0x2c4   : > { %1509 = vrot.lane.b32.xlu0 %v4643_v16, %s2918_s13  ;;  %v771_v37 = vrot.slane %v4677_v45, 7  ;;  %v5524_v6 = vld [vmem:[#allocation112_spill] sm:$0xff]  ;;  %v765_v1 = vrot.slane %v490_v34, 1  ;;  %v5527_v62 = vld [vmem:[#allocation105_spill] sm:$0xff]  ;;  %v776_v20 = vrot.slane %v4677_v45, 1 }
 0x2c5   : > { %v2485_v57 = vadd.f32 %v2454_v50, %v2453_v15  ;;  %v1592_v4 = vsel %vm1581_vm3, %v1559_v14, %v5524_v6 }
 0x2c6   : > { %v1498_v10 = vpop.permute.xlu0 %1497  ;;  %1483 = vrot.lane.b32.xlu1 %v5520_v22, %s2918_s13  ;;  %v1625_v15 = vsel %vm1614_vm4, %v1592_v4, %v5525_v19  ;;  %v772_v63 = vsel %vm543_vm2, %v770_v27, %v771_v37  ;;  %v5532_v27 = vld [vmem:[#allocation163_spill] sm:$0xff] }
 0x2c7   : > { %v1802_v35 = vsel %vm1779_vm10, %v1769_v46, %v1498_v10  ;;  %v493_v46 = vld [vmem:[#allocation2 + $0x230] sm:$0xff] }
 0x2c8   : > { %2711 = vmatmul.msk.f32.gmra.mxu2 %vm1817_vm11, %v1802_v35  ;;  %v1472_v29 = vpop.permute.xlu1 %1471  ;;  %v1941_v21 = vpop.f32.mrf.mxu0  ;;  %1319 = vrot.lane.b32.xlu2 %v5521_v38, %s2917_s12  ;;  %v777_v58 = vrot.slane %v493_v46, 1  ;;  %v773_v4 = vrot.slane %v493_v46, 7 }
 0x2c9   : > { %v2096_v5 = vadd.f32 %v2095_v55, %v1941_v21  ;;  %v2134_v8 = vmul.f32 %v1941_v21, %v1941_v21  ;;  %v1789_v12 = vsel %vm1779_vm10, %v1756_v53, %v1472_v29  ;;  %v1658_v55 = vsel %vm1647_vm5, %v1625_v15, %v5526_v28 }
 0x2ca   : > { %v2326_v11 = vpop.f32.mrf.mxu1  ;;  %2698 = vmatmul.msk.f32.gmra.mxu0 %vm1817_vm11, %v1789_v12  ;;  %v4689_v44 = vpop.permute.xlu2 %1309  ;;  %v1691_v47 = vsel %vm1680_vm6, %v1658_v55, %v5527_v62  ;;  %v5530_v12 = vld [vmem:[#allocation135_spill] sm:$0xff] }
 0x2cb   : > { %v2417_v9 = vadd.f32 %v2416_v41, %v2326_v11  ;;  %v2455_v42 = vmul.f32 %v2326_v11, %v2326_v11  ;;  %v2165_v39 = vadd.f32 %v2164_v26, %v2134_v8  ;;  %v766_v26 = vsel %vm672_vm1, %v763_v48, %v765_v1  ;;  %v494_v8 = vld [vmem:[#allocation2 + $0x238] sm:$0xff] }
 0x2cc   : > { %1415 = vrot.lane.b32.xlu0 %v4622_v0, %s2919_s14  ;;  %v5529_v0 = vld [vmem:[#allocation119_spill] sm:$0xff]  ;;  %v779_v25 = vrot.slane %v494_v8, 1 }
 0x2cd   : > { %v2486_v56 = vadd.f32 %v2485_v57, %v2455_v42  ;;  %v778_v57 = vsel %vm672_vm1, %v776_v20, %v777_v58  ;;  %v1572_v48 = vsel %vm344_vm0, %v5529_v0, %v5528_v13  ;;  %v5537_v20 = vld [vmem:[#allocation158_spill] sm:$0xff] }
 0x2ce   : > { %v1378_v2 = vpop.permute.xlu0 %1377  ;;  %1223 = vrot.lane.b32.xlu1 %v5502_v30, %s2916_s11  ;;  %v1605_v38 = vsel %vm1581_vm3, %v1572_v48, %v5530_v12  ;;  %v5539_v48 = vld [vmem:[#allocation77_spill] sm:$0xff] }
 0x2d0   : > { %v1282_v24 = vpop.permute.xlu1 %1281  ;;  %1225 = vrot.lane.b32.xlu2 %v4643_v16, %s2916_s11 }
 0x2d1   : > { %v1724_v32 = vsel %vm1713_vm8, %v1691_v47, %v1282_v24  ;;  %v5533_v24 = vld [vmem:[#allocation40_spill] sm:$0xff] }
 0x2d2   : > { %v2329_v41 = vpop.f32.mrf.mxu1  ;;  %v1757_v30 = vsel %vm1746_vm9, %v1724_v32, %v1378_v2  ;;  %v4717_v35 = vpop.permute.xlu2 %1501  ;;  %v5534_v32 = vld [vmem:[#allocation93_spill] sm:$0xff] }
 0x2d3   : > { %v2418_v50 = vadd.f32 %v2417_v9, %v2329_v41  ;;  %v2456_v49 = vmul.f32 %v2329_v41, %v2329_v41  ;;  %v1790_v23 = vsel %vm1779_vm10, %v1757_v30, %v4620_v7  ;;  %v5531_v9 = vld [vmem:[#allocation150_spill] sm:$0xff]  ;;  %v1560_v41 = vsel %vm344_vm0, %v5534_v32, %v5533_v24 }
 0x2d4   : > { %1321 = vrot.lane.b32.xlu0 %v772_v63, %s2917_s12  ;;  %2699 = vmatmul.msk.f32.gmra.mxu0 %vm1817_vm11, %v1790_v23  ;;  %v1638_v42 = vsel %vm1614_vm4, %v1605_v38, %v5531_v9  ;;  %v774_v30 = vsel %vm543_vm2, %v771_v37, %v773_v4  ;;  %v5535_v23 = vld [vmem:[#allocation122_spill] sm:$0xff]  ;;  %v4769_v37 = vpop.f32.mrf.mxu3  ;;  %v5541_v38 = vld [vmem:[#allocation153_spill] sm:$0xff]  ;;  %v5543_v4 = vld [vmem:[#allocation84_spill] sm:$0xff] }
 0x2d5   : > { %v2487_v16 = vadd.f32 %v2486_v56, %v2456_v49 }
 0x2d6   : > { %v1404_v10 = vpop.permute.xlu0 %1403  ;;  %1511 = vrot.lane.b32.xlu1 %v766_v26, %s2918_s13 }
 0x2d7   : > { %v1944_v7 = vpop.f32.mrf.mxu0 }
 0x2d8   : > { %v2766_v22 = vpack.c.bf16 %v1944_v7, %v1941_v21  ;;  %v2097_v29 = vadd.f32 %v2096_v5, %v1944_v7  ;;  %v2135_v53 = vmul.f32 %v1944_v7, %v1944_v7  ;;  %v1308_v40 = vpop.permute.xlu1 %1307  ;;  %1513 = vrot.lane.b32.xlu2 %v778_v57, %s2918_s13  ;;  %v1671_v21 = vsel %vm1647_vm5, %v1638_v42, %v5532_v27  ;;  %v5538_v7 = vld [vmem:[#allocation89_spill] sm:$0xff]  ;;  %v5542_v42 = vld [vmem:[#allocation166_spill] sm:$0xff] }
 0x2d9   : > { %v1704_v34 = vsel %vm1680_vm6, %v1671_v21, %v4603_v60 }
 0x2da   : > { %v2332_v11 = vpop.f32.mrf.mxu1  ;;  %2838 = vst [vmem:[%s4652_s9 + $0x8] sm:$0xff] %v2766_v22   ;;  %v2166_v2 = vadd.f32 %v2165_v39, %v2135_v53  ;;  %v1737_v56 = vsel %vm1713_vm8, %v1704_v34, %v1308_v40  ;;  %v780_v39 = vsel %vm672_vm1, %v777_v58, %v779_v25  ;;  %v4739_v15 = vpop.permute.xlu2 %1381  ;;  %v1573_v22 = vsel %vm344_vm0, %v5413_v54, %v5539_v48  ;;  %v5540_v40 = vld [vmem:[#allocation123_spill] sm:$0xff] }
 0x2db   : > { %v2419_v3 = vadd.f32 %v2418_v50, %v2332_v11  ;;  %v2457_v14 = vmul.f32 %v2332_v11, %v2332_v11  ;;  %v1770_v19 = vsel %vm1746_vm9, %v1737_v56, %v1404_v10  ;;  %v1606_v8 = vsel %vm1581_vm3, %v1573_v22, %v5540_v40  ;;  %v4787_v54 = vpop.f32.mrf.mxu2  ;;  %v5551_v40 = vld [vmem:[#allocation51_spill] sm:$0xff] }
 0x2dc   : > { %1227 = vrot.lane.b32.xlu0 %v766_v26, %s2916_s11  ;;  %v1593_v26 = vsel %vm1581_vm3, %v1560_v41, %v5535_v23  ;;  %v1639_v11 = vsel %vm1614_vm4, %v1606_v8, %v5541_v38  ;;  %v4790_v21 = vpop.f32.mrf.mxu3 }
 0x2dd   : > { %v2488_v6 = vadd.f32 %v2487_v16, %v2457_v14 }
 0x2de   : > { %v1214_v5 = vpop.permute.xlu0 %1213  ;;  %1417 = vrot.lane.b32.xlu1 %v4677_v45, %s2919_s14 }
 0x2e0   : > { %v1500_v28 = vpop.permute.xlu1 %1499  ;;  %1419 = vrot.lane.b32.xlu2 %v493_v46, %s2919_s14  ;;  %v5536_v46 = vld [vmem:[#allocation142_spill] sm:$0xff] }
 0x2e1   : > { %v4741_v55 = vpop.f32.mrf.mxu0  ;;  %v1803_v1 = vsel %vm1779_vm10, %v1770_v19, %v1500_v28  ;;  %v1626_v58 = vsel %vm1614_vm4, %v1593_v26, %v5536_v46 }
 0x2e2   : > { %v2335_v60 = vpop.f32.mrf.mxu1  ;;  %v2098_v63 = vadd.f32 %v2097_v29, %v4741_v55  ;;  %v2136_v62 = vmul.f32 %v4741_v55, %v4741_v55  ;;  %2712 = vmatmul.msk.f32.gmra.mxu2 %vm1817_vm11, %v1803_v1  ;;  %v1659_v57 = vsel %vm1647_vm5, %v1626_v58, %v5537_v20  ;;  %v1408_v9 = vpop.permute.xlu2 %1407 }
 0x2e3   : > { %v4750_v47 = vadd.f32 %v2419_v3, %v2335_v60  ;;  %v2458_v49 = vmul.f32 %v2335_v60, %v2335_v60  ;;  %v1692_v45 = vsel %vm1680_vm6, %v1659_v57, %v5538_v7  ;;  %v5545_v60 = vld [vmem:[#allocation55_spill] sm:$0xff]  ;;  %v5549_v57 = vld [vmem:[#allocation145_spill] sm:$0xff] }
 0x2e4   : > { %1515 = vrot.lane.b32.xlu0 %v780_v39, %s2918_s13  ;;  %v2167_v10 = vadd.f32 %v2166_v2, %v2136_v62  ;;  %v1725_v13 = vsel %vm1713_vm8, %v1692_v45, %v4664_v18  ;;  %v1672_v2 = vsel %vm1647_vm5, %v1639_v11, %v5542_v42  ;;  %v5546_v62 = vld [vmem:[#allocation146_spill] sm:$0xff]  ;;  %v4816_v32 = vpop.f32.mrf.mxu3 }
 0x2e5   : > { %v4762_v16 = vadd.f32 %v2488_v6, %v2458_v49  ;;  %v1705_v27 = vsel %vm1680_vm6, %v1672_v2, %v1214_v5  ;;  %v1574_v5 = vsel %vm344_vm0, %v5420_v33, %v5543_v4  ;;  %v5547_v33 = vld [vmem:[#allocation97_spill] sm:$0xff] }
 0x2e6   : > { %v1476_v50 = vpop.permute.xlu0 %1475  ;;  %1323 = vrot.lane.b32.xlu1 %v774_v30, %s2917_s12  ;;  %v1738_v25 = vsel %vm1713_vm8, %v1705_v27, %v4689_v44  ;;  %v5544_v44 = vld [vmem:[#allocation134_spill] sm:$0xff]  ;;  %v5548_v30 = vld [vmem:[#allocation80_spill] sm:$0xff]  ;;  %s308_s12 = scalar_lea.vmem %s5094_s6, %s5579_s25 }
 0x2e7   : > { %v1607_v28 = vsel %vm1581_vm3, %v1574_v5, %v5544_v44 }
 0x2e8   : > { %v1380_v0 = vpop.permute.xlu1 %1379  ;;  %v1640_v24 = vsel %vm1614_vm4, %v1607_v28, %v5546_v62 }
 0x2e9   : > { %v1758_v29 = vsel %vm1746_vm9, %v1725_v13, %v1380_v0  ;;  %v5550_v13 = vld [vmem:[#allocation161_spill] sm:$0xff] }
 0x2ea   : > { %v4777_v53 = vpop.f32.mrf.mxu1  ;;  %v1791_v12 = vsel %vm1779_vm10, %v1758_v29, %v1476_v50  ;;  %v4803_v39 = vpop.permute.xlu2 %1217  ;;  %v1673_v50 = vsel %vm1647_vm5, %v1640_v24, %v5548_v30  ;;  %v5554_v30 = vld [vmem:[#allocation137_spill] sm:$0xff] }
 0x2eb   : > { %2700 = vmatmul.msk.f32.gmra.mxu0 %vm1817_vm11, %v1791_v12 }
 0x2ec   : > { %v4837_v38 = vpop.f32.mrf.mxu3 }
 0x2ee   : > { %v1286_v18 = vpop.permute.xlu0 %1285 }
 0x2f0   : > { %v1406_v3 = vpop.permute.xlu1 %1405 }
 0x2f1   : > { %v1771_v14 = vsel %vm1746_vm9, %v1738_v25, %v1406_v3 }
 0x2f2   : > { %v4795_v34 = vpop.f32.mrf.mxu1  ;;  %v1804_v56 = vsel %vm1779_vm10, %v1771_v14, %v4717_v35  ;;  %v1561_v35 = vsel %vm344_vm0, %v5416_v59, %v5545_v60  ;;  %v1480_v12 = vpop.permute.xlu2 %1479  ;;  %v5552_v14 = vld [vmem:[#allocation64_spill] sm:$0xff] }
 0x2f3   : > { %2713 = vmatmul.msk.f32.gmra.mxu2 %vm1817_vm11, %v1804_v56  ;;  %v1594_v41 = vsel %vm1581_vm3, %v1561_v35, %v5547_v33  ;;  %v2459_v35 = vmul.f32 %v4777_v53, %v4777_v53 }
 0x2f4   : > { %v1627_v7 = vsel %vm1614_vm4, %v1594_v41, %v5549_v57  ;;  %v4843_v27 = vpop.f32.mrf.mxu3  ;;  %v5556_v57 = vld [vmem:[#allocation164_spill] sm:$0xff] }
 0x2f5   : > { %v4805_v19 = vpop.f32.mrf.mxu2  ;;  %v1660_v0 = vsel %vm1647_vm5, %v1627_v7, %v5550_v13 }
 0x2f6   : > { %v1312_v6 = vpop.permute.xlu0 %1311  ;;  %v2801_v1 = vpack.c.bf16 %v4805_v19, %v4787_v54  ;;  %v1693_v8 = vsel %vm1680_vm6, %v1660_v0, %v5551_v40  ;;  %v2490_v0 = vadd.f32 %v4762_v16, %v2459_v35 }
 0x2f8   : > { %2845 = vst [vmem:[%s4652_s9 + $0x40] sm:$0xff] %v2801_v1   ;;  %v1216_v49 = vpop.permute.xlu1 %1215  ;;  %v1950_v23 = vpop.f32.mrf.mxu0  ;;  %v5553_v1 = vld [vmem:[#allocation66_spill] sm:$0xff] }
 0x2f9   : > { %v1706_v26 = vsel %vm1680_vm6, %v1673_v50, %v1216_v49  ;;  %v2771_v46 = vpack.c.bf16 %v1950_v23, %v4741_v55  ;;  %v2099_v59 = vadd.f32 %v2098_v63, %v1950_v23  ;;  %v2137_v58 = vmul.f32 %v1950_v23, %v1950_v23 }
 0x2fa   : > { %v2344_v20 = vpop.f32.mrf.mxu1  ;;  %v1739_v45 = vsel %vm1713_vm8, %v1706_v26, %v1312_v6  ;;  %v1726_v63 = vsel %vm1713_vm8, %v1693_v8, %v1286_v18  ;;  %v1290_v3 = vpop.permute.xlu2 %1289  ;;  %v1575_v60 = vsel %vm344_vm0, %v5432_v36, %v5553_v1  ;;  %v5555_v26 = vld [vmem:[#allocation152_spill] sm:$0xff]  ;;  %v2421_v36 = vadd.f32 %v4750_v47, %v4777_v53 }
 0x2fb   : > { %2839 = vst [vmem:[%s4652_s9 + $0x10] sm:$0xff] %v2771_v46   ;;  %v2168_v48 = vadd.f32 %v2167_v10, %v2137_v58  ;;  %v1772_v29 = vsel %vm1746_vm9, %v1739_v45, %v1408_v9  ;;  %v1759_v42 = vsel %vm1746_vm9, %v1726_v63, %v4739_v15  ;;  %v1608_v50 = vsel %vm1581_vm3, %v1575_v60, %v5554_v30 }
 0x2fc   : > { %v4852_v28 = vpop.f32.mrf.mxu3  ;;  %v1641_v46 = vsel %vm1614_vm4, %v1608_v50, %v5555_v26  ;;  %v2422_v40 = vadd.f32 %v2421_v36, %v4795_v34 }
 0x2fe   : > { %v1504_v22 = vpop.permute.xlu0 %1503  ;;  %v2423_v16 = vadd.f32 %v2422_v40, %v2344_v20 }
 0x2ff   : > { %v1805_v55 = vsel %vm1779_vm10, %v1772_v29, %v1504_v22  ;;  %v2460_v22 = vmul.f32 %v4795_v34, %v4795_v34 }
 0x300   : > { %2714 = vmatmul.msk.f32.gmra.mxu2 %vm1817_vm11, %v1805_v55  ;;  %v1478_v11 = vpop.permute.xlu1 %1477  ;;  %v2461_v55 = vmul.f32 %v2344_v20, %v2344_v20 }
 0x301   : > { %v1792_v10 = vsel %vm1779_vm10, %v1759_v42, %v1478_v11  ;;  %v2491_v53 = vadd.f32 %v2490_v0, %v2460_v22 }
 0x302   : > { %v2347_v2 = vpop.f32.mrf.mxu1  ;;  %2701 = vmatmul.msk.f32.gmra.mxu0 %vm1817_vm11, %v1792_v10  ;;  %v1316_v7 = vpop.permute.xlu2 %1315 }
 0x303   : > { %v2492_v34 = vadd.f32 %v2491_v53, %v2461_v55 }
 0x304   : > { %v4879_v47 = vpop.f32.mrf.mxu3 }
 0x306   : > { %v1384_v9 = vpop.permute.xlu0 %1383  ;;  %v4845_v25 = vpop.f32.mrf.mxu2 }
 0x308   : > { %v1288_v18 = vpop.permute.xlu1 %1287 }
 0x309   : > { %v1727_v56 = vsel %vm1713_vm8, %v5552_v14, %v1288_v18  ;;  %v2462_v14 = vmul.f32 %v2347_v2, %v2347_v2 }
 0x30a   : > { %v2350_v6 = vpop.f32.mrf.mxu1  ;;  %v1760_v4 = vsel %vm1746_vm9, %v1727_v56, %v1384_v9  ;;  %v1508_v56 = vpop.permute.xlu2 %1507 }
 0x30b   : > { %v1793_v15 = vsel %vm1779_vm10, %v1760_v4, %v1480_v12  ;;  %v2424_v4 = vadd.f32 %v2423_v16, %v2347_v2  ;;  %v2493_v60 = vadd.f32 %v2492_v34, %v2462_v14  ;;  %v2463_v20 = vmul.f32 %v2350_v6, %v2350_v6  ;;  %v5562_v16 = vld [vmem:[#allocation136_spill] sm:$0xff]  ;;  %v5564_v14 = vld [vmem:[#allocation50_spill] sm:$0xff] }
 0x30c   : > { %2702 = vmatmul.msk.f32.gmra.mxu0 %vm1817_vm11, %v1793_v15  ;;  %v4885_v15 = vpop.f32.mrf.mxu3 }
 0x30d   : > { %v2425_v50 = vadd.f32 %v2424_v4, %v2350_v6  ;;  %v2494_v36 = vadd.f32 %v2493_v60, %v2463_v20 }
 0x30e   : > { %v1410_v5 = vpop.permute.xlu0 %1409 }
 0x30f   : > { %v1953_v44 = vpop.f32.mrf.mxu0 }
 0x310   : > { %v2100_v62 = vadd.f32 %v2099_v59, %v1953_v44  ;;  %v2138_v24 = vmul.f32 %v1953_v44, %v1953_v44  ;;  %v1314_v33 = vpop.permute.xlu1 %1313  ;;  %v1674_v59 = vsel %vm1647_vm5, %v1641_v46, %v5556_v57 }
 0x311   : > { %v1707_v13 = vsel %vm1680_vm6, %v1674_v59, %v4803_v39 }
 0x312   : > { %v2353_v23 = vpop.f32.mrf.mxu1  ;;  %v2169_v58 = vadd.f32 %v2168_v48, %v2138_v24  ;;  %v1740_v29 = vsel %vm1713_vm8, %v1707_v13, %v1314_v33  ;;  %v5558_v33 = vld [vmem:[#allocation128_spill] sm:$0xff]  ;;  %v1388_v59 = vpop.permute.xlu2 %1387 }
 0x313   : > { %v4859_v41 = vpop.f32.mrf.mxu2  ;;  %v1773_v48 = vsel %vm1746_vm9, %v1740_v29, %v1410_v5  ;;  %v1728_v5 = vsel %vm1713_vm8, %v4218_v52, %v1290_v3  ;;  %v5560_v3 = vld [vmem:[#allocation74_spill] sm:$0xff]  ;;  %v2426_v57 = vadd.f32 %v2425_v50, %v2353_v23 }
 0x314   : > { %v2806_v49 = vpack.c.bf16 %v4859_v41, %v4845_v25  ;;  %v4902_v13 = vpop.f32.mrf.mxu3 }
 0x316   : > { %2846 = vst [vmem:[%s4652_s9 + $0x48] sm:$0xff] %v2806_v49   ;;  %v1220_v45 = vpop.permute.xlu0 %1219  ;;  %v5559_v49 = vld [vmem:[#allocation155_spill] sm:$0xff] }
 0x318   : > { %v1506_v8 = vpop.permute.xlu1 %1505 }
 0x319   : > { %v1956_v63 = vpop.f32.mrf.mxu0  ;;  %v1806_v39 = vsel %vm1779_vm10, %v1773_v48, %v1506_v8 }
 0x31a   : > { %v2356_v12 = vpop.f32.mrf.mxu1  ;;  %v2776_v11 = vpack.c.bf16 %v1956_v63, %v1953_v44  ;;  %v2101_v42 = vadd.f32 %v2100_v62, %v1956_v63  ;;  %v2139_v10 = vmul.f32 %v1956_v63, %v1956_v63  ;;  %2715 = vmatmul.msk.f32.gmra.mxu2 %vm1817_vm11, %v1806_v39  ;;  %v5557_v44 = vld [vmem:[#allocation81_spill] sm:$0xff]  ;;  %v1414_v60 = vpop.permute.xlu2 %1413 }
 0x31b   : > { %v1576_v35 = vsel %vm344_vm0, %v5447_v51, %v5557_v44  ;;  %v2464_v51 = vmul.f32 %v2353_v23, %v2353_v23  ;;  %v2465_v29 = vmul.f32 %v2356_v12, %v2356_v12  ;;  %v2427_v8 = vadd.f32 %v2426_v57, %v2356_v12  ;;  %v5561_v23 = vld [vmem:[#allocation90_spill] sm:$0xff] }
 0x31c   : > { %2840 = vst [vmem:[%s4652_s9 + $0x18] sm:$0xff] %v2776_v11   ;;  %v2170_v18 = vadd.f32 %v2169_v58, %v2139_v10  ;;  %v1609_v30 = vsel %vm1581_vm3, %v1576_v35, %v5558_v33  ;;  %v1577_v39 = vsel %vm344_vm0, %v5453_v17, %v5561_v23  ;;  %v5563_v10 = vld [vmem:[#allocation147_spill] sm:$0xff]  ;;  %v4915_v34 = vpop.f32.mrf.mxu3 }
 0x31d   : > { %v1642_v26 = vsel %vm1614_vm4, %v1609_v30, %v5559_v49  ;;  %v2495_v22 = vadd.f32 %v2494_v36, %v2464_v51 }
 0x31e   : > { %v1482_v9 = vpop.permute.xlu0 %1481  ;;  %v1675_v46 = vsel %vm1647_vm5, %v1642_v26, %v5560_v3  ;;  %v5565_v26 = vld [vmem:[#allocation94_spill] sm:$0xff] }
 0x31f   : > { %v1708_v58 = vsel %vm1680_vm6, %v1675_v46, %v1220_v45  ;;  %v2496_v63 = vadd.f32 %v2495_v22, %v2465_v29  ;;  %v2470_v22 = vmul.f32 %v4769_v37, %v4769_v37 }
 0x320   : > { %v1386_v1 = vpop.permute.xlu1 %1385  ;;  %v1741_v0 = vsel %vm1713_vm8, %v1708_v58, %v1316_v7  ;;  %v1610_v7 = vsel %vm1581_vm3, %v1577_v39, %v5562_v16  ;;  %v2472_v39 = vmul.f32 %v4816_v32, %v4816_v32 }
 0x321   : > { %v1761_v62 = vsel %vm1746_vm9, %v1728_v5, %v1386_v1 }
 0x322   : > { %v2359_v24 = vpop.f32.mrf.mxu1  ;;  %v1794_v2 = vsel %vm1779_vm10, %v1761_v62, %v1482_v9  ;;  %v1643_v9 = vsel %vm1614_vm4, %v1610_v7, %v5563_v10  ;;  %v5568_v10 = vld [vmem:[#allocation154_spill] sm:$0xff] }
 0x323   : > { %2703 = vmatmul.msk.f32.gmra.mxu0 %vm1817_vm11, %v1794_v2  ;;  %v2466_v45 = vmul.f32 %v2359_v24, %v2359_v24  ;;  %v2428_v11 = vadd.f32 %v2427_v8, %v2359_v24  ;;  %v1676_v12 = vsel %vm1647_vm5, %v1643_v9, %v5564_v14 }
 0x324   : > { %v4937_v51 = vpop.f32.mrf.mxu3 }
 0x325   : > { %v2497_v5 = vadd.f32 %v2496_v63, %v2466_v45  ;;  %v5567_v45 = vld [vmem:[#allocation139_spill] sm:$0xff] }
 0x326   : > { %v1292_v52 = vpop.permute.xlu0 %1291 }
 0x327   : > { %v1729_v3 = vsel %vm1713_vm8, %v5565_v26, %v1292_v52 }
 0x328   : > { %v1412_v6 = vpop.permute.xlu1 %1411 }
 0x329   : > { %v1774_v40 = vsel %vm1746_vm9, %v1741_v0, %v1412_v6 }
 0x32a   : > { %v2362_v53 = vpop.f32.mrf.mxu1  ;;  %v1807_v48 = vsel %vm1779_vm10, %v1774_v40, %v1508_v56  ;;  %v1320_v40 = vpop.permute.xlu2 %1319 }
 0x32b   : > { %2716 = vmatmul.msk.f32.gmra.mxu2 %vm1817_vm11, %v1807_v48  ;;  %v2467_v1 = vmul.f32 %v2362_v53, %v2362_v53  ;;  %v2429_v24 = vadd.f32 %v2428_v11, %v2362_v53  ;;  %v2471_v53 = vmul.f32 %v4790_v21, %v4790_v21 }
 0x32c   : > { %v4961_v14 = vpop.f32.mrf.mxu3 }
 0x32d   : > { %v2498_v50 = vadd.f32 %v2497_v5, %v2467_v1  ;;  %v4934_v46 = vpop.f32.mrf.mxu2 }
 0x32e   : > { %v1318_v55 = vpop.permute.xlu0 %1317 }
 0x330   : > { %v1222_v56 = vpop.permute.xlu1 %1221  ;;  %v4919_v4 = vpop.f32.mrf.mxu0 }
 0x331   : > { %v1709_v17 = vsel %vm1680_vm6, %v1676_v12, %v1222_v56  ;;  %v4923_v20 = vadd.f32 %v2101_v42, %v4919_v4  ;;  %v2140_v44 = vmul.f32 %v4919_v4, %v4919_v4  ;;  %v2473_v56 = vmul.f32 %v4837_v38, %v4837_v38 }
 0x332   : > { %v2365_v35 = vpop.f32.mrf.mxu1  ;;  %v1742_v62 = vsel %vm1713_vm8, %v1709_v17, %v1318_v55  ;;  %v5566_v55 = vld [vmem:[#allocation72_spill] sm:$0xff]  ;;  %v2474_v17 = vmul.f32 %v4843_v27, %v4843_v27 }
 0x333   : > { %v4928_v33 = vadd.f32 %v2170_v18, %v2140_v44  ;;  %v1775_v2 = vsel %vm1746_vm9, %v1742_v62, %v1414_v60  ;;  %v2468_v49 = vmul.f32 %v2365_v35, %v2365_v35  ;;  %v2430_v36 = vadd.f32 %v2429_v24, %v2365_v35 }
 0x334   : > { %v1762_v18 = vsel %vm1746_vm9, %v1729_v3, %v1388_v59  ;;  %v1578_v63 = vsel %vm344_vm0, %v3795_v31, %v5566_v55  ;;  %v5569_v31 = vld [vmem:[#allocation53_spill] sm:$0xff]  ;;  %v2475_v62 = vmul.f32 %v4852_v28, %v4852_v28 }
 0x335   : > { %v2499_v57 = vadd.f32 %v2498_v50, %v2468_v49  ;;  %v1611_v23 = vsel %vm1581_vm3, %v1578_v63, %v5567_v45  ;;  %v2476_v49 = vmul.f32 %v4879_v47, %v4879_v47 }
 0x336   : > { %v1510_v30 = vpop.permute.xlu0 %1509 }
 0x337   : > { %v1808_v42 = vsel %vm1779_vm10, %v1775_v2, %v1510_v30 }
 0x338   : > { %2717 = vmatmul.msk.f32.gmra.mxu2 %vm1817_vm11, %v1808_v42  ;;  %v1484_v58 = vpop.permute.xlu1 %1483 }
 0x339   : > { %v1795_v0 = vsel %vm1779_vm10, %v1762_v18, %v1484_v58  ;;  %v2407_v58 = vpop.f32.mrf.mxu3 }
 0x33a   : > { %v2368_v6 = vpop.f32.mrf.mxu1  ;;  %2704 = vmatmul.msk.f32.gmra.mxu0 %vm1817_vm11, %v1795_v0 }
 0x33b   : > { %v2431_v52 = vadd.f32 %v2430_v36, %v2368_v6  ;;  %v2469_v29 = vmul.f32 %v2368_v6, %v2368_v6 }
 0x33d   : > { %v2432_v8 = vadd.f32 %v2431_v52, %v4769_v37  ;;  %v2500_v59 = vadd.f32 %v2499_v57, %v2469_v29  ;;  %v1644_v37 = vsel %vm1614_vm4, %v1611_v23, %v5568_v10  ;;  %v2478_v29 = vmul.f32 %v4902_v13, %v4902_v13  ;;  %v5573_v23 = vld [vmem:[#allocation167_spill] sm:$0xff] }
 0x33e   : > { %v1416_v48 = vpop.permute.xlu0 %1415  ;;  %v4954_v16 = vpop.f32.mrf.mxu2  ;;  %v1677_v12 = vsel %vm1647_vm5, %v1644_v37, %v5569_v31 }
 0x33f   : > { %v2433_v7 = vadd.f32 %v2432_v8, %v4790_v21  ;;  %v2501_v11 = vadd.f32 %v2500_v59, %v2470_v22  ;;  %v2811_v9 = vpack.c.bf16 %v4954_v16, %v4934_v46 }
 0x340   : > { %v1224_v5 = vpop.permute.xlu1 %1223 }
 0x341   : > { %v2434_v1 = vadd.f32 %v2433_v7, %v4816_v32  ;;  %v2502_v60 = vadd.f32 %v2501_v11, %v2471_v53  ;;  %2847 = vst [vmem:[%s4652_s9 + $0x50] sm:$0xff] %v2811_v9   ;;  %v1710_v21 = vsel %vm1680_vm6, %v1677_v12, %v1224_v5  ;;  %v1226_v32 = vpop.permute.xlu2 %1225  ;;  %v5570_v53 = vld [vmem:[#allocation86_spill] sm:$0xff]  ;;  %v2410_v37 = vpop.f32.mrf.mxu3  ;;  %v2481_v12 = vmul.f32 %v4961_v14, %v4961_v14 }
 0x342   : > { %v1743_v24 = vsel %vm1713_vm8, %v1710_v21, %v1320_v40 }
 0x343   : > { %v2435_v44 = vadd.f32 %v2434_v1, %v4837_v38  ;;  %v2503_v35 = vadd.f32 %v2502_v60, %v2472_v39  ;;  %v2477_v38 = vmul.f32 %v4885_v15, %v4885_v15  ;;  %v1776_v42 = vsel %vm1746_vm9, %v1743_v24, %v1416_v48  ;;  %v5571_v48 = vld [vmem:[#allocation131_spill] sm:$0xff] }
 0x344   : > { %v2482_v60 = vmul.f32 %v2407_v58, %v2407_v58 }
 0x345   : > { %v2436_v2 = vadd.f32 %v2435_v44, %v4843_v27  ;;  %v2504_v50 = vadd.f32 %v2503_v35, %v2473_v56 }
 0x346   : > { %v1322_v30 = vpop.permute.xlu0 %1321 }
 0x347   : > { %v2437_v26 = vadd.f32 %v2436_v2, %v4852_v28  ;;  %v2505_v3 = vadd.f32 %v2504_v50, %v2474_v17  ;;  %v1962_v36 = vpop.f32.mrf.mxu0  ;;  %v2483_v50 = vmul.f32 %v2410_v37, %v2410_v37 }
 0x348   : > { %v2781_v18 = vpack.c.bf16 %v1962_v36, %v4919_v4  ;;  %v2103_v27 = vadd.f32 %v4923_v20, %v1962_v36  ;;  %v2141_v57 = vmul.f32 %v1962_v36, %v1962_v36  ;;  %v1512_v0 = vpop.permute.xlu1 %1511  ;;  %v1579_v4 = vsel %vm344_vm0, %v5481_v61, %v5570_v53 }
 0x349   : > { %v2506_v6 = vadd.f32 %v2505_v3, %v2475_v62  ;;  %v1809_v22 = vsel %vm1779_vm10, %v1776_v42, %v1512_v0  ;;  %v2438_v52 = vadd.f32 %v2437_v26, %v4879_v47  ;;  %v1612_v8 = vsel %vm1581_vm3, %v1579_v4, %v5571_v48  ;;  %v1514_v63 = vpop.permute.xlu2 %1513  ;;  %v5574_v62 = vld [vmem:[#allocation96_spill] sm:$0xff]  ;;  %v5576_v26 = vld [vmem:[#allocation149_spill] sm:$0xff] }
 0x34a   : > { %2841 = vst [vmem:[%s4652_s9 + $0x20] sm:$0xff] %v2781_v18   ;;  %v2172_v28 = vadd.f32 %v4928_v33, %v2141_v57  ;;  %2718 = vmatmul.msk.f32.gmra.mxu2 %vm1817_vm11, %v1809_v22  ;;  %v2479_v47 = vmul.f32 %v4915_v34, %v4915_v34  ;;  %v5572_v33 = vld [vmem:[#allocation157_spill] sm:$0xff]  ;;  %v2480_v61 = vmul.f32 %v4937_v51, %v4937_v51 }
 0x34b   : > { %v2507_v40 = vadd.f32 %v2506_v6, %v2476_v49  ;;  %v2439_v20 = vadd.f32 %v2438_v52, %v4885_v15  ;;  %v1645_v55 = vsel %vm1614_vm4, %v1612_v8, %v5572_v33  ;;  %v1580_v24 = vsel %vm344_vm0, %v5490_v43, %v5574_v62  ;;  %v5577_v42 = vld [vmem:[#allocation169_spill] sm:$0xff] }
 0x34c   : > { %v1678_v39 = vsel %vm1647_vm5, %v1645_v55, %v5573_v23 }
 0x34d   : > { %v2508_v59 = vadd.f32 %v2507_v40, %v2477_v38  ;;  %v2440_v45 = vadd.f32 %v2439_v20, %v4902_v13  ;;  %v1711_v11 = vsel %vm1680_vm6, %v1678_v39, %v1226_v32  ;;  %v5575_v32 = vld [vmem:[#allocation138_spill] sm:$0xff]  ;;  %v5031_v20 = vpop.f32.mrf.mxu2 }
 0x34e   : > { %v1228_v7 = vpop.permute.xlu0 %1227  ;;  %v1744_v9 = vsel %vm1713_vm8, %v1711_v11, %v1322_v30 }
 0x34f   : > { %v2509_v15 = vadd.f32 %v2508_v59, %v2478_v29  ;;  %v2441_v10 = vadd.f32 %v2440_v45, %v4915_v34 }
 0x350   : > { %v1418_v31 = vpop.permute.xlu1 %1417 }
 0x351   : > { %v2510_v13 = vadd.f32 %v2509_v15, %v2479_v47  ;;  %v1777_v56 = vsel %vm1746_vm9, %v1744_v9, %v1418_v31  ;;  %v1965_v5 = vpop.f32.mrf.mxu0  ;;  %v2442_v1 = vadd.f32 %v2441_v10, %v4937_v51  ;;  %v1613_v51 = vsel %vm1581_vm3, %v1580_v24, %v5575_v32  ;;  %v1420_v18 = vpop.permute.xlu2 %1419 }
 0x352   : > { %v2104_v21 = vadd.f32 %v2103_v27, %v1965_v5  ;;  %v2142_v17 = vmul.f32 %v1965_v5, %v1965_v5  ;;  %v1810_v44 = vsel %vm1779_vm10, %v1777_v56, %v1514_v63  ;;  %v1646_v3 = vsel %vm1614_vm4, %v1613_v51, %v5576_v26  ;;  %v2413_v27 = vpop.f32.mrf.mxu3 }
 0x353   : > { %v2511_v35 = vadd.f32 %v2510_v13, %v2480_v61  ;;  %2719 = vmatmul.msk.f32.gmra.mxu2 %vm1817_vm11, %v1810_v44  ;;  %v2443_v34 = vadd.f32 %v2442_v1, %v4961_v14  ;;  %v1679_v36 = vsel %vm1647_vm5, %v1646_v3, %v5577_v42  ;;  %v2484_v22 = vmul.f32 %v2413_v27, %v2413_v27 }
 0x354   : > { %v2173_v30 = vadd.f32 %v2172_v28, %v2142_v17  ;;  %v1712_v57 = vsel %vm1680_vm6, %v1679_v36, %v1228_v7  ;;  %v2148_v42 = vmul.f32 %v4787_v54, %v4787_v54 }
 0x355   : > { %v2512_v2 = vadd.f32 %v2511_v35, %v2481_v12  ;;  %v2444_v49 = vadd.f32 %v2443_v34, %v2407_v58 }
 0x356   : > { %v1516_v0 = vpop.permute.xlu0 %1515 }
 0x357   : > { %v2513_v38 = vadd.f32 %v2512_v2, %v2482_v60  ;;  %v2445_v14 = vadd.f32 %v2444_v49, %v2410_v37 }
 0x358   : > { %v1324_v43 = vpop.permute.xlu1 %1323 }
 0x359   : > { %v2514_v6 = vadd.f32 %v2513_v38, %v2483_v50  ;;  %v1745_v52 = vsel %vm1713_vm8, %v1712_v57, %v1324_v43  ;;  %v2446_v58 = vadd.f32 %v2445_v14, %v2413_v27  ;;  %v2149_v14 = vmul.f32 %v4805_v19, %v4805_v19 }
 0x35a   : > { %v1778_v28 = vsel %vm1746_vm9, %v1745_v52, %v1420_v18  ;;  %v2150_v43 = vmul.f32 %v4845_v25, %v4845_v25 }
 0x35b   : > { %v2515_v29 = vadd.f32 %v2514_v6, %v2484_v22  ;;  %v1811_v40 = vsel %vm1779_vm10, %v1778_v28, %v1516_v0  ;;  %v2447_v53 = vrot.slane %v2446_v58, 4  ;;  %v2151_v22 = vmul.f32 %v4859_v41, %v4859_v41 }
 0x35c   : > { %2720 = vmatmul.msk.f32.gmra.mxu2 %vm1817_vm11, %v1811_v40 }
 0x35d   : > { %v2516_v4 = vrot.slane %v2515_v29, 4  ;;  %v2448_v48 = vadd.f32 %v2447_v53, %v2446_v58 }
 0x35f   : > { %v2517_v8 = vadd.f32 %v2516_v4, %v2515_v29  ;;  %v2449_v47 = vrot.slane %v2448_v48, 2  ;;  %v2154_v4 = vmul.f32 %v5031_v20, %v5031_v20 }
 0x361   : > { %v2518_v59 = vrot.slane %v2517_v8, 2  ;;  %v2450_v33 = vadd.f32 %v2449_v47, %v2448_v48 }
 0x363   : > { %v2519_v55 = vadd.f32 %v2518_v59, %v2517_v8  ;;  %v2451_v63 = vrot.slane %v2450_v33, 1 }
 0x365   : > { %v2520_v45 = vrot.slane %v2519_v55, 1  ;;  %v5037_v23 = vpop.f32.mrf.mxu2  ;;  %v2452_v39 = vadd.f32 %v2451_v63, %v2450_v33 }
 0x366   : > { %v2816_v7 = vpack.c.bf16 %v5037_v23, %v5031_v20  ;;  %v2155_v8 = vmul.f32 %v5037_v23, %v5037_v23 }
 0x367   : > { %v2521_v61 = vadd.f32 %v2520_v45, %v2519_v55  ;;  %2522 = vst [vmem:[%s308_s12] sm:$0x1] %v2452_v39 }
 0x368   : > { %2848 = vst [vmem:[%s4652_s9 + $0x58] sm:$0xff] %v2816_v7   ;;  %v1968_v15 = vpop.f32.mrf.mxu0 }
 0x369   : > { %v2786_v11 = vpack.c.bf16 %v1968_v15, %v1965_v5  ;;  %v2105_v10 = vadd.f32 %v2104_v21, %v1968_v15  ;;  %v2143_v37 = vmul.f32 %v1968_v15, %v1968_v15  ;;  %2523 = vst [vmem:[%s311_s15] sm:$0x1] %v2521_v61 }
 0x36b   : > { %2842 = vst [vmem:[%s4652_s9 + $0x28] sm:$0xff] %v2786_v11   ;;  %v2174_v9 = vadd.f32 %v2173_v30, %v2143_v37 }
 0x376   : > { %v2007_v31 = vpop.f32.mrf.mxu2 }
 0x377   : > { %v2156_v59 = vmul.f32 %v2007_v31, %v2007_v31 }
 0x37f   : > { %v1971_v13 = vpop.f32.mrf.mxu0 }
 0x380   : > { %v2144_v5 = vmul.f32 %v1971_v13, %v1971_v13  ;;  %v2106_v21 = vadd.f32 %v2105_v10, %v1971_v13 }
 0x382   : > { %v2175_v24 = vadd.f32 %v2174_v9, %v2144_v5 }
 0x383   : > { %v2010_v12 = vpop.f32.mrf.mxu2 }
 0x384   : > { %v2821_v56 = vpack.c.bf16 %v2010_v12, %v2007_v31  ;;  %v2157_v63 = vmul.f32 %v2010_v12, %v2010_v12 }
 0x386   : > { %2849 = vst [vmem:[%s4652_s9 + $0x60] sm:$0xff] %v2821_v56  }
 0x389   : > { %v1974_v1 = vpop.f32.mrf.mxu0 }
 0x38a   : > { %v2791_v60 = vpack.c.bf16 %v1974_v1, %v1971_v13  ;;  %v2145_v62 = vmul.f32 %v1974_v1, %v1974_v1  ;;  %v2107_v2 = vadd.f32 %v2106_v21, %v1974_v1 }
 0x38c   : > { %2843 = vst [vmem:[%s4652_s9 + $0x30] sm:$0xff] %v2791_v60   ;;  %v2176_v50 = vadd.f32 %v2175_v24, %v2145_v62 }
 0x39d   : > { %v2013_v17 = vpop.f32.mrf.mxu2 }
 0x39e   : > { %v2158_v7 = vmul.f32 %v2013_v17, %v2013_v17 }
 0x3a0   : > { %v1977_v35 = vpop.f32.mrf.mxu0 }
 0x3a1   : > { %v2146_v30 = vmul.f32 %v1977_v35, %v1977_v35  ;;  %v2108_v32 = vadd.f32 %v2107_v2, %v1977_v35 }
 0x3a3   : > { %v2177_v49 = vadd.f32 %v2176_v50, %v2146_v30 }
 0x3ae   : > { %v2016_v44 = vpop.f32.mrf.mxu2 }
 0x3af   : > { %v2826_v34 = vpack.c.bf16 %v2016_v44, %v2013_v17 }
 0x3b1   : > { %2850 = vst [vmem:[%s4652_s9 + $0x68] sm:$0xff] %v2826_v34  }
 0x3b7   : > { %v1980_v51 = vpop.f32.mrf.mxu0 }
 0x3b8   : > { %v2796_v26 = vpack.c.bf16 %v1980_v51, %v1977_v35  ;;  %v2109_v3 = vadd.f32 %v2108_v32, %v1980_v51  ;;  %v2147_v38 = vmul.f32 %v1980_v51, %v1980_v51 }
 0x3ba   : > { %2844 = vst [vmem:[%s4652_s9 + $0x38] sm:$0xff] %v2796_v26   ;;  %v2110_v36 = vadd.f32 %v2109_v3, %v4787_v54  ;;  %v2178_v18 = vadd.f32 %v2177_v49, %v2147_v38  ;;  %v2152_v54 = vmul.f32 %v4934_v46, %v4934_v46 }
 0x3bc   : > { %v2111_v27 = vadd.f32 %v2110_v36, %v4805_v19  ;;  %v2179_v57 = vadd.f32 %v2178_v18, %v2148_v42  ;;  %v2153_v19 = vmul.f32 %v4954_v16, %v4954_v16 }
 0x3be   : > { %v2112_v0 = vadd.f32 %v2111_v27, %v4845_v25  ;;  %v2180_v6 = vadd.f32 %v2179_v57, %v2149_v14  ;;  %v2019_v25 = vpop.f32.mrf.mxu2 }
 0x3c0   : > { %v2113_v52 = vadd.f32 %v2112_v0, %v4859_v41  ;;  %v2181_v58 = vadd.f32 %v2180_v6, %v2150_v43 }
 0x3c2   : > { %v2114_v28 = vadd.f32 %v2113_v52, %v4934_v46  ;;  %v2182_v29 = vadd.f32 %v2181_v58, %v2151_v22 }
 0x3c4   : > { %v2115_v40 = vadd.f32 %v2114_v28, %v4954_v16  ;;  %v2183_v53 = vadd.f32 %v2182_v29, %v2152_v54 }
 0x3c6   : > { %v2184_v48 = vadd.f32 %v2183_v53, %v2153_v19  ;;  %v2116_v41 = vadd.f32 %v2115_v40, %v5031_v20  ;;  %v2159_v20 = vmul.f32 %v2016_v44, %v2016_v44 }
 0x3c8   : > { %v2117_v46 = vadd.f32 %v2116_v41, %v5037_v23  ;;  %v2185_v47 = vadd.f32 %v2184_v48, %v2154_v4  ;;  %v2160_v23 = vmul.f32 %v2019_v25, %v2019_v25 }
 0x3ca   : > { %v2118_v33 = vadd.f32 %v2117_v46, %v2007_v31  ;;  %v2186_v55 = vadd.f32 %v2185_v47, %v2155_v8 }
 0x3cc   : > { %v2119_v16 = vadd.f32 %v2118_v33, %v2010_v12  ;;  %v2187_v45 = vadd.f32 %v2186_v55, %v2156_v59 }
 0x3cd   : > { %v2022_v39 = vpop.f32.mrf.mxu2 }
 0x3ce   : > { %v2120_v61 = vadd.f32 %v2119_v16, %v2013_v17  ;;  %v2188_v15 = vadd.f32 %v2187_v45, %v2157_v63  ;;  %v2831_v11 = vpack.c.bf16 %v2022_v39, %v2019_v25  ;;  %v2161_v60 = vmul.f32 %v2022_v39, %v2022_v39 }
 0x3d0   : > { %v2189_v10 = vadd.f32 %v2188_v15, %v2158_v7  ;;  %2851 = vst [vmem:[%s4652_s9 + $0x70] sm:$0xff] %v2831_v11   ;;  %v2121_v37 = vadd.f32 %v2120_v61, %v2016_v44 }
 0x3d2   : > { %v2190_v9 = vadd.f32 %v2189_v10, %v2159_v20  ;;  %v2122_v13 = vadd.f32 %v2121_v37, %v2019_v25 }
 0x3d4   : > { %v2191_v1 = vadd.f32 %v2190_v9, %v2160_v23  ;;  %v2123_v31 = vadd.f32 %v2122_v13, %v2022_v39 }
 0x3d6   : > { %v2025_v56 = vpop.f32.mrf.mxu2  ;;  %v2192_v35 = vadd.f32 %v2191_v1, %v2161_v60 }
 0x3d7   : > { %v2162_v12 = vmul.f32 %v2025_v56, %v2025_v56  ;;  %v2124_v34 = vadd.f32 %v2123_v31, %v2025_v56 }
 0x3d9   : > { %v2193_v17 = vadd.f32 %v2192_v35, %v2162_v12 }
 0x3df   : > { %v2028_v5 = vpop.f32.mrf.mxu2 }
 0x3e0   : > { %v2836_v21 = vpack.c.bf16 %v2028_v5, %v2025_v56  ;;  %v2125_v62 = vadd.f32 %v2124_v34, %v2028_v5  ;;  %v2163_v24 = vmul.f32 %v2028_v5, %v2028_v5 }
 0x3e2   : > { %2852 = vst [vmem:[%s4652_s9 + $0x78] sm:$0xff] %v2836_v21   ;;  %v2126_v44 = vrot.slane %v2125_v62, 4  ;;  %v2194_v2 = vadd.f32 %v2193_v17, %v2163_v24 }
 0x3e4   : > { %v2127_v30 = vadd.f32 %v2126_v44, %v2125_v62  ;;  %v2195_v50 = vrot.slane %v2194_v2, 4 }
 0x3e6   : > { %v2128_v32 = vrot.slane %v2127_v30, 2  ;;  %v2196_v51 = vadd.f32 %v2195_v50, %v2194_v2 }
 0x3e8   : > { %v2129_v49 = vadd.f32 %v2128_v32, %v2127_v30  ;;  %v2197_v26 = vrot.slane %v2196_v51, 2 }
 0x3ea   : > { %v2130_v3 = vrot.slane %v2129_v49, 1  ;;  %v2198_v38 = vadd.f32 %v2197_v26, %v2196_v51 }
 0x3ec   : > { %v2131_v42 = vadd.f32 %v2130_v3, %v2129_v49  ;;  %v2199_v36 = vrot.slane %v2198_v38, 1 }
 0x3ee   : > { %v2200_v18 = vadd.f32 %v2199_v36, %v2198_v38  ;;  %2201 = vst [vmem:[%s302_s18] sm:$0x1] %v2131_v42 }
 0x3f0   : > { %2202 = vst [vmem:[%s305_s21] sm:$0x1] %v2200_v18 }
 0x3f1 PF: > { %s18_s24 = sadd.s32 1, %s2909_s24  }
 0x3f2   : > { %p15_p4 = scmp.ge.s32.totalorder %s18_s24, 4  }
 0x3f4   :  { %17 = sbr.rel (!%p15_p4) target bundleno = 1 (0x1), region = 112 }

// kernel: residual_block.4
= control target key start
LH: loop header
LB: loop body
LE: loop exit
PB: predicated region body
PF: predicated region fallthrough
CT: control target
= control target key end

     0   :  { %s5552_s21 = smov 0   ;;  %s6876_s0 = inlined_call_operand.vmem [shape: bf16[2,256,128], index: 0, kind: input, shape index: {}]   ;;  %s6877_s1 = inlined_call_operand.vmem [shape: f32[1,128], index: 1, kind: input, shape index: {}]   ;;  %s6878_s2 = inlined_call_operand.vmem [shape: f32[1,128], index: 2, kind: input, shape index: {}]   ;;  %s6879_s3 = inlined_call_operand.vmem [shape: bf16[1152,128], index: 3, kind: input, shape index: {}]   ;;  %s6880_s4 = inlined_call_operand.vmem [shape: bf16[2,256,128], index: 4, kind: output, shape index: {0}]   ;;  %s6881_s5 = inlined_call_operand.vmem [shape: f32[2,1,128], index: 5, kind: output, shape index: {1}]   ;;  %s6882_s6 = inlined_call_operand.vmem [shape: f32[2,1,128], index: 6, kind: output, shape index: {2}]  }
   0x1 LB: > { %s4184_s22 = sadd.s32 4294967295, %s5514_s21   ;;  %p4188_p0 = scmp.ge.s32.totalorder %s5514_s21, 1  ;;  %s5514_s21 = sphi %s5552_s21, %s17_s21  }
   0x2   : > { %p217_p1 = scmp.lt.s32.totalorder %s5514_s21, 3 }
   0x4   : > { %p218_p2 = pnand %p4188_p0, %p217_p1 }
   0x6   : > { %221 = sbr.rel (%p218_p2) target bundleno = 936 (0x3a8), region = 36 }
   0xb   : > { %v5230_v0 = vld [vmem:[%s6879_s3 + $0x38] sm:$0xff]  ;;  %p253_p3 = scmp.lt.s32.totalorder %s4184_s22, 1  ;;  %v5516_v1 = vmov 0   ;;  %v5229_v2 = vld [vmem:[%s6879_s3 + $0x30] sm:$0xff]  ;;  %v5580_v3 = vld [vmem:[%s6877_s1] ss:$0 sm:$0xff] }
   0xc   : > { %451 = vst [vmem:[#allocation2 + $0x40] sm:$0xf] %v5516_v1  ;;  %5469 = vmatpush.bf16.msra.mxu1 %v5230_v0  ;;  %5470 = vmatpush.bf16.msra.mxu2 %v5230_v0  ;;  %v5228_v4 = vld [vmem:[%s6879_s3 + $0x28] sm:$0xff]  ;;  %v5591_v8 = vld [vmem:[%s6878_s2] ss:$0 sm:$0xff]  ;;  %v5226_v16 = vld [vmem:[%s6879_s3 + $0x18] sm:$0xff] }
   0xd   : > { %s7008_s22 = smov (!%p253_p3, %s4184_s22), 1  ;;  %5471 = vmatpush.bf16.msra.mxu3 %v5230_v0  ;;  %3106 = vmatpush.bf16.msra.mxu0 %v5230_v0  ;;  %438 = vst [vmem:[#allocation2] sm:$0xf] %v5516_v1  ;;  %v5227_v11 = vld [vmem:[%s6879_s3 + $0x20] sm:$0xff]  ;;  %v5225_v19 = vld [vmem:[%s6879_s3 + $0x10] sm:$0xff]  ;;  %v5224_v21 = vld [vmem:[%s6879_s3 + $0x8] sm:$0xff] }
   0xe   : > { %s5077_s27 = sshll.u32 %s7008_s22, 7  ;;  %439 = vst [vmem:[#allocation2 + $0x4] sm:$0xf] %v5516_v1  ;;  %vm620_vm0 = vsmask.f32 256  ;;  %v5223_v27 = vld [vmem:[%s6879_s3] sm:$0xff]  ;;  %s265_s24 = scalar_lea.vmem %s6881_s5, %s7008_s22 }
   0xf   : > { %s5575_s30 = scalar_lea.vmem %s6876_s0, %s5077_s27  ;;  %440 = vst [vmem:[#allocation2 + $0x8] sm:$0xf] %v5516_v1  ;;  %vm621_vm1 = vsmask.f32 4368  ;;  %v5246_v62 = vld [vmem:[%s6879_s3 + $0xb8] sm:$0xff]  ;;  %s6767_s20 = scalar_lea.vmem %s6880_s4, %s5077_s27 }
  0x10   : > { %5472 = vmatpush.bf16.msra.mxu1 %v5229_v2  ;;  %5473 = vmatpush.bf16.msra.mxu2 %v5229_v2  ;;  %v5441_v5 = vld [vmem:[%s5575_s30 + $0x18] sm:$0xff]   ;;  %441 = vst [vmem:[#allocation2 + $0xc] sm:$0xf] %v5516_v1  ;;  %vm5643_vm2 = vmor %vm620_vm0, %vm621_vm1  ;;  %vm1007_vm3 = vsmask.f32 3328  ;;  %s268_s28 = scalar_lea.vmem %s6882_s6, %s7008_s22 }
  0x11   : > { %5474 = vmatpush.bf16.msra.mxu3 %v5229_v2  ;;  %3107 = vmatpush.bf16.msra.mxu0 %v5229_v2  ;;  %v5309_v6 = vunpack.c.l.bf16 %v5441_v5  ;;  %v5310_v7 = vunpack.c.h.bf16 %v5441_v5  ;;  %443 = vst [vmem:[#allocation2 + $0x110] sm:$0xf] %v5516_v1  ;;  %v5445_v39 = vld [vmem:[%s5575_s30 + $0x38] sm:$0xff]   ;;  %vm1008_vm4 = vsmask.f32 7440 }
  0x12   : > { %444 = vst [vmem:[#allocation2 + $0x114] sm:$0xf] %v5516_v1  ;;  %v5325_v40 = vunpack.c.l.bf16 %v5445_v39  ;;  %v5326_v42 = vunpack.c.h.bf16 %v5445_v39  ;;  %v5449_v45 = vld [vmem:[%s5575_s30 + $0x58] sm:$0xff]   ;;  %vm6252_vm5 = vmor %vm1007_vm3, %vm1008_vm4 }
  0x13   : > { %v344_v9 = vmul.f32 %v5580_v3, %v5309_v6  ;;  %v345_v10 = vmul.f32 %v5580_v3, %v5310_v7  ;;  %445 = vst [vmem:[#allocation2 + $0x118] sm:$0xf] %v5516_v1  ;;  %v564_v20 = vld [vmem:[#allocation2 + $0x40] sm:$0xf]  ;;  %v5341_v48 = vunpack.c.l.bf16 %v5449_v45  ;;  %v5342_v49 = vunpack.c.h.bf16 %v5449_v45 }
  0x14   : > { %5475 = vmatpush.bf16.msra.mxu1 %v5228_v4  ;;  %5476 = vmatpush.bf16.msra.mxu2 %v5228_v4  ;;  %446 = vst [vmem:[#allocation2 + $0x11c] sm:$0xf] %v5516_v1  ;;  %v712_v22 = vshrl.u32 %v564_v20, 16  ;;  %v352_v46 = vmul.f32 %v5580_v3, %v5325_v40  ;;  %v353_v47 = vmul.f32 %v5580_v3, %v5326_v42 }
  0x15   : > { %5477 = vmatpush.bf16.msra.mxu3 %v5228_v4  ;;  %3108 = vmatpush.bf16.msra.mxu0 %v5228_v4  ;;  %v380_v12 = vadd.f32 %v5591_v8, %v344_v9  ;;  %v381_v13 = vadd.f32 %v5591_v8, %v345_v10  ;;  %448 = vst [vmem:[#allocation2 + $0x10] sm:$0xf] %v5516_v1 }
  0x16   : > { %449 = vst [vmem:[#allocation2 + $0x20] sm:$0xf] %v5516_v1  ;;  %v4197_v30 = vrot.slane %v712_v22, 11  ;;  %v388_v50 = vadd.f32 %v5591_v8, %v352_v46  ;;  %v389_v51 = vadd.f32 %v5591_v8, %v353_v47  ;;  %v360_v52 = vmul.f32 %v5580_v3, %v5341_v48  ;;  %v5262_v22 = vld [vmem:[%s6879_s3 + $0x138] sm:$0xff] }
  0x17   : > { %v412_v14 = vmax.f32 %v380_v12, 0.0  ;;  %v413_v15 = vmax.f32 %v381_v13, 0.0  ;;  %450 = vst [vmem:[#allocation2 + $0x30] sm:$0xf] %v5516_v1  ;;  %v361_v53 = vmul.f32 %v5580_v3, %v5342_v49 }
  0x18   : > { %5478 = vmatpush.bf16.msra.mxu1 %v5227_v11  ;;  %5479 = vmatpush.bf16.msra.mxu2 %v5227_v11  ;;  %452 = vst [vmem:[#allocation2 + $0x50] sm:$0xf] %v5516_v1  ;;  %v420_v54 = vmax.f32 %v388_v50, 0.0  ;;  %v421_v55 = vmax.f32 %v389_v51, 0.0  ;;  %v396_v56 = vadd.f32 %v5591_v8, %v360_v52  ;;  %v5450_v50 = vld [vmem:[%s5575_s30 + $0x60] sm:$0xff]  }
  0x19   : > { %5480 = vmatpush.bf16.msra.mxu3 %v5227_v11  ;;  %3109 = vmatpush.bf16.msra.mxu0 %v5227_v11  ;;  %v489_v17 = vpack.c.bf16 %v412_v14, %v412_v14  ;;  %v490_v18 = vpack.c.bf16 %v413_v15, %v413_v15  ;;  %453 = vst [vmem:[#allocation2 + $0x60] sm:$0xf] %v5516_v1  ;;  %v5711_v14 = vld [vmem:[#allocation2 + $0x4] sm:$0xf] }
  0x1a   : > { %454 = vst [vmem:[#allocation2 + $0x70] sm:$0xf] %v5516_v1  ;;  %v397_v57 = vadd.f32 %v5591_v8, %v361_v53  ;;  %v497_v58 = vpack.c.bf16 %v420_v54, %v420_v54  ;;  %v498_v59 = vpack.c.bf16 %v421_v55, %v421_v55  ;;  %v428_v60 = vmax.f32 %v396_v56, 0.0 }
  0x1b   : > { %522 = vst [vmem:[#allocation2 + $0x44] sm:$0xf] %v489_v17  ;;  %v5238_v17 = vld [vmem:[%s6879_s3 + $0x78] sm:$0xff] }
  0x1c   : > { %5481 = vmatpush.bf16.msra.mxu1 %v5226_v16  ;;  %5482 = vmatpush.bf16.msra.mxu2 %v5226_v16  ;;  %523 = vst [vmem:[#allocation2 + $0x48] sm:$0xf] %v490_v18  ;;  %v429_v61 = vmax.f32 %v397_v57, 0.0  ;;  %v505_v63 = vpack.c.bf16 %v428_v60, %v428_v60  ;;  %v5245_v18 = vld [vmem:[%s6879_s3 + $0xb0] sm:$0xff] }
  0x1d   : > { %5483 = vmatpush.bf16.msra.mxu3 %v5226_v16  ;;  %3110 = vmatpush.bf16.msra.mxu0 %v5226_v16  ;;  %455 = vst [vmem:[#allocation2 + $0x80] sm:$0xf] %v5516_v1  ;;  %v5254_v16 = vld [vmem:[%s6879_s3 + $0xf8] sm:$0xff] }
  0x1e   : > { %456 = vst [vmem:[#allocation2 + $0x90] sm:$0xf] %v5516_v1  ;;  %v506_v2 = vpack.c.bf16 %v429_v61, %v429_v61  ;;  %v632_v61 = vshll.u32 %v5711_v14, 16 }
  0x1f   : > { %457 = vst [vmem:[#allocation2 + $0xa0] sm:$0xf] %v5516_v1 }
  0x20   : > { %5484 = vmatpush.bf16.msra.mxu1 %v5225_v19  ;;  %5485 = vmatpush.bf16.msra.mxu2 %v5225_v19  ;;  %458 = vst [vmem:[#allocation2 + $0xb0] sm:$0xf] %v5516_v1 }
  0x21   : > { %5486 = vmatpush.bf16.msra.mxu3 %v5225_v19  ;;  %3111 = vmatpush.bf16.msra.mxu0 %v5225_v19  ;;  %459 = vst [vmem:[#allocation2 + $0xc0] sm:$0xf] %v5516_v1 }
  0x22   : > { %v5624_v23 = vld [vmem:[#allocation2 + $0x44] sm:$0xf]  ;;  %460 = vst [vmem:[#allocation2 + $0xd0] sm:$0xf] %v5516_v1 }
  0x23   : > { %v5627_v24 = vld [vmem:[#allocation2 + $0x48] sm:$0xf]  ;;  %v6930_v25 = vshrl.u32 %v5624_v23, 16  ;;  %v6929_v26 = vshll.u32 %v5624_v23, 16  ;;  %461 = vst [vmem:[#allocation2 + $0xe0] sm:$0xf] %v5516_v1 }
  0x24   : > { %5487 = vmatpush.bf16.msra.mxu1 %v5224_v21  ;;  %5488 = vmatpush.bf16.msra.mxu2 %v5224_v21  ;;  %v6915_v28 = vshrl.u32 %v5627_v24, 16  ;;  %v6916_v29 = vshll.u32 %v5627_v24, 16  ;;  %462 = vst [vmem:[#allocation2 + $0xf0] sm:$0xf] %v5516_v1  ;;  %v580_v0 = vld [vmem:[#allocation2 + $0x80] sm:$0xf] }
  0x25   : > { %5489 = vmatpush.bf16.msra.mxu3 %v5224_v21  ;;  %3112 = vmatpush.bf16.msra.mxu0 %v5224_v21  ;;  %v719_v31 = vrot.slane %v6930_v25, 7  ;;  %463 = vst [vmem:[#allocation2 + $0x100] sm:$0xf] %v5516_v1  ;;  %v800_v4 = vshrl.u32 %v580_v0, 16 }
  0x26   : > { %v728_v33 = vrot.slane %v6915_v28, 7  ;;  %466 = vst [vmem:[#allocation2 + $0x1c] sm:$0xf] %v5516_v1 }
  0x27   : > { %v722_v34 = vor.u32 %v6929_v26, %v719_v31  ;;  %v724_v35 = vrot.slane %v719_v31, 4  ;;  %467 = vst [vmem:[#allocation2 + $0x2c] sm:$0xf] %v5516_v1  ;;  %v4201_v12 = vrot.slane %v800_v4, 11 }
  0x28   : > { %5490 = vmatpush.bf16.msra.mxu1 %v5223_v27  ;;  %5491 = vmatpush.bf16.msra.mxu2 %v5223_v27  ;;  %v731_v36 = vor.u32 %v6916_v29, %v728_v33  ;;  %468 = vst [vmem:[#allocation2 + $0x3c] sm:$0xf] %v5516_v1  ;;  %v5737_v33 = vld [vmem:[#allocation2 + $0x8] sm:$0xf] }
  0x29   : > { %5492 = vmatpush.bf16.msra.mxu3 %v5223_v27  ;;  %3113 = vmatpush.bf16.msra.mxu0 %v5223_v27  ;;  %v723_v37 = vsel %vm5643_vm2, %v4197_v30, %v722_v34  ;;  %469 = vst [vmem:[#allocation2 + $0x4c] sm:$0xf] %v5516_v1  ;;  %v5442_v27 = vld [vmem:[%s5575_s30 + $0x20] sm:$0xff]   ;;  %v5253_v34 = vld [vmem:[%s6879_s3 + $0xf0] sm:$0xff]  ;;  %v638_v54 = vshrl.u32 %v5737_v33, 16 }
  0x2a   : > { %v732_v38 = vsel %vm5643_vm2, %v724_v35, %v731_v36  ;;  %1354 = vst [vmem:[#allocation3 + $0x120] sm:$0xf] %v723_v37  ;;  %v5237_v35 = vld [vmem:[%s6879_s3 + $0x70] sm:$0xff]  ;;  %v5313_v47 = vunpack.c.l.bf16 %v5442_v27  ;;  %v5314_v49 = vunpack.c.h.bf16 %v5442_v27 }
  0x2b   : > { %1355 = vst [vmem:[#allocation3 + $0x144] sm:$0xf] %v732_v38 }
  0x2c   : > { %470 = vst [vmem:[#allocation2 + $0x5c] sm:$0xf] %v5516_v1  ;;  %3284 = vmatpush.bf16.msrb.mxu2 %v5246_v62  ;;  %3195 = vmatpush.bf16.msrb.mxu1 %v5238_v17  ;;  %v346_v62 = vmul.f32 %v5580_v3, %v5313_v47  ;;  %v347_v4 = vmul.f32 %v5580_v3, %v5314_v49 }
  0x2d   : > { %471 = vst [vmem:[#allocation2 + $0x6c] sm:$0xf] %v5516_v1  ;;  %3373 = vmatpush.bf16.msrb.mxu3 %v5254_v16  ;;  %3462 = vmatpush.bf16.msrb.mxu0 %v5262_v22 }
  0x2e   : > { %472 = vst [vmem:[#allocation2 + $0x7c] sm:$0xf] %v5516_v1  ;;  %v382_v22 = vadd.f32 %v5591_v8, %v346_v62 }
  0x2f   : > { %473 = vst [vmem:[#allocation2 + $0x8c] sm:$0xf] %v5516_v1 }
  0x30   : > { %474 = vst [vmem:[#allocation2 + $0x9c] sm:$0xf] %v5516_v1  ;;  %3285 = vmatpush.bf16.msrb.mxu2 %v5245_v18  ;;  %3196 = vmatpush.bf16.msrb.mxu1 %v5237_v35  ;;  %v383_v35 = vadd.f32 %v5591_v8, %v347_v4 }
  0x31   : > { %v4357_v41 = vld [vmem:[#allocation3 + $0x120] sm:$0xf]  ;;  %475 = vst [vmem:[#allocation2 + $0xac] sm:$0xf] %v5516_v1  ;;  %3374 = vmatpush.bf16.msrb.mxu3 %v5253_v34 }
  0x32   : > { %v5119_v43 = vld [vmem:[#allocation3 + $0x140] sm:$0xf0]  ;;  %476 = vst [vmem:[#allocation2 + $0xbc] sm:$0xf] %v5516_v1 }
  0x33   : > { %v4358_v44 = vor.u32 %v5119_v43, %v4357_v41  ;;  %477 = vst [vmem:[#allocation2 + $0xcc] sm:$0xf] %v5516_v1  ;;  %v629_v43 = vshrl.u32 %v5711_v14, 16 }
  0x34   : > { %478 = vst [vmem:[#allocation2 + $0xdc] sm:$0xf] %v5516_v1 }
  0x35   : > { %3134 = vmatmul.bf16.vlgmr.msra.gmra.mxu1 %v4358_v44  ;;  %479 = vst [vmem:[#allocation2 + $0xec] sm:$0xf] %v5516_v1  ;;  %v5446_v44 = vld [vmem:[%s5575_s30 + $0x40] sm:$0xff]   ;;  %v631_v57 = vrot.slane %v629_v43, 7 }
  0x36   : > { %480 = vst [vmem:[#allocation2 + $0xfc] sm:$0xf] %v5516_v1  ;;  %v5329_v55 = vunpack.c.l.bf16 %v5446_v44 }
  0x37   : > { %481 = vst [vmem:[#allocation2 + $0x10c] sm:$0xf] %v5516_v1  ;;  %v634_v34 = vor.u32 %v632_v61, %v631_v57 }
  0x38   : > { %1386 = vst [vmem:[#allocation3 + $0x124] sm:$0xf] %v5624_v23  ;;  %v354_v16 = vmul.f32 %v5580_v3, %v5329_v55  ;;  %v415_v55 = vmax.f32 %v383_v35, 0.0  ;;  %v584_v35 = vld [vmem:[#allocation2 + $0x90] sm:$0xf] }
  0x39   : > { %1387 = vst [vmem:[#allocation3 + $0x148] sm:$0xf] %v5627_v24 }
  0x3a   : > { %1448 = vst [vmem:[#allocation3 + $0xe4] sm:$0xf] %v723_v37  ;;  %v492_v4 = vpack.c.bf16 %v415_v55, %v415_v55 }
  0x3b   : > { %1449 = vst [vmem:[#allocation3 + $0x108] sm:$0xf] %v732_v38 }
  0x3c   : > { %1480 = vst [vmem:[#allocation3 + $0xe8] sm:$0xf] %v5624_v23 }
  0x3d   : > { %1481 = vst [vmem:[#allocation3 + $0x10c] sm:$0xf] %v5627_v24 }
  0x3e   : > { %1542 = vst [vmem:[#allocation3 + $0xa8] sm:$0xf] %v723_v37 }
  0x3f   : > { %1543 = vst [vmem:[#allocation3 + $0xcc] sm:$0xf] %v732_v38 }
  0x40   : > { %1574 = vst [vmem:[#allocation3 + $0xac] sm:$0xf] %v5624_v23 }
  0x41   : > { %1575 = vst [vmem:[#allocation3 + $0xd0] sm:$0xf] %v5627_v24 }
  0x42   : > { %530 = vst [vmem:[#allocation2 + $0x84] sm:$0xf] %v497_v58  ;;  %v5330_v58 = vunpack.c.h.bf16 %v5446_v44 }
  0x43   : > { %531 = vst [vmem:[#allocation2 + $0x88] sm:$0xf] %v498_v59  ;;  %v5296_v59 = vld [vmem:[%s5575_s30] sm:$0xff]  }
  0x44   : > { %447 = vst [vmem:[#allocation2] sm:$0xf] %v5516_v1  ;;  %v5297_v17 = vunpack.c.l.bf16 %v5296_v59 }
  0x45   : > { %464 = vst [vmem:[#allocation2 + $0x110] sm:$0xf] %v5516_v1 }
  0x46   : > { %465 = vst [vmem:[#allocation2 + $0xc] sm:$0xf] %v5516_v1 }
  0x47   : > { %482 = vst [vmem:[#allocation2 + $0x11c] sm:$0xf] %v5516_v1  ;;  %v596_v1 = vld [vmem:[#allocation2 + $0xc0] sm:$0xf] }
  0x48   : > { %538 = vst [vmem:[#allocation2 + $0xc4] sm:$0xf] %v505_v63  ;;  %v888_v21 = vshrl.u32 %v596_v1, 16  ;;  %v5345_v63 = vunpack.c.l.bf16 %v5450_v50  ;;  %v5346_v1 = vunpack.c.h.bf16 %v5450_v50  ;;  %v414_v50 = vmax.f32 %v382_v22, 0.0 }
  0x49   : > { %v5698_v5 = vld [vmem:[#allocation2 + $0x84] sm:$0xf]  ;;  %539 = vst [vmem:[#allocation2 + $0xc8] sm:$0xf] %v506_v2 }
  0x4a   : > { %v5700_v6 = vld [vmem:[#allocation2 + $0x88] sm:$0xf]  ;;  %v6905_v7 = vshrl.u32 %v5698_v5, 16  ;;  %v6906_v9 = vshll.u32 %v5698_v5, 16  ;;  %1394 = vst [vmem:[#allocation3 + $0x244] sm:$0xf] %v5698_v5  ;;  %v362_v27 = vmul.f32 %v5580_v3, %v5345_v63 }
  0x4b   : > { %v6901_v10 = vshrl.u32 %v5700_v6, 16  ;;  %v6904_v11 = vshll.u32 %v5700_v6, 16  ;;  %1395 = vst [vmem:[#allocation3 + $0x268] sm:$0xf] %v5700_v6  ;;  %v4205_v45 = vrot.slane %v888_v21, 11 }
  0x4c   : > { %v807_v13 = vrot.slane %v6905_v7, 7  ;;  %1488 = vst [vmem:[#allocation3 + $0x208] sm:$0xf] %v5698_v5  ;;  %v548_v53 = vld [vmem:[#allocation2] sm:$0xf] }
  0x4d   : > { %v816_v15 = vrot.slane %v6901_v10, 7  ;;  %1489 = vst [vmem:[#allocation3 + $0x22c] sm:$0xf] %v5700_v6  ;;  %v624_v2 = vshrl.u32 %v548_v53, 16 }
  0x4e   : > { %v810_v19 = vor.u32 %v6906_v9, %v807_v13  ;;  %v812_v20 = vrot.slane %v807_v13, 4  ;;  %1582 = vst [vmem:[#allocation3 + $0x1cc] sm:$0xf] %v5698_v5  ;;  %v640_v13 = vrot.slane %v638_v54, 7 }
  0x4f   : > { %v819_v30 = vor.u32 %v6904_v11, %v816_v15  ;;  %1583 = vst [vmem:[#allocation3 + $0x1f0] sm:$0xf] %v5700_v6  ;;  %v5735_v31 = vld [vmem:[#allocation2 + $0xc4] sm:$0xf]  ;;  %v641_v15 = vshll.u32 %v5737_v33, 16 }
  0x50   : > { %v811_v36 = vsel %vm5643_vm2, %v4201_v12, %v810_v19  ;;  %v5747_v37 = vld [vmem:[#allocation2 + $0xc8] sm:$0xf]  ;;  %v6889_v38 = vshrl.u32 %v5735_v31, 16  ;;  %v6890_v39 = vshll.u32 %v5735_v31, 16  ;;  %1402 = vst [vmem:[#allocation3 + $0x364] sm:$0xf] %v5735_v31  ;;  %v355_v19 = vmul.f32 %v5580_v3, %v5330_v58 }
  0x51   : > { %v820_v40 = vsel %vm5643_vm2, %v812_v20, %v819_v30  ;;  %1362 = vst [vmem:[#allocation3 + $0x240] sm:$0xf] %v811_v36  ;;  %v6887_v41 = vshrl.u32 %v5747_v37, 16  ;;  %v6888_v42 = vshll.u32 %v5747_v37, 16  ;;  %v5298_v20 = vunpack.c.h.bf16 %v5296_v59 }
  0x52   : > { %1363 = vst [vmem:[#allocation3 + $0x264] sm:$0xf] %v820_v40  ;;  %v895_v46 = vrot.slane %v6889_v38, 7  ;;  %v4193_v30 = vrot.slane %v624_v2, 11  ;;  %v643_v44 = vor.u32 %v641_v15, %v640_v13  ;;  %v391_v47 = vadd.f32 %v5591_v8, %v355_v19 }
  0x53   : > { %1456 = vst [vmem:[#allocation3 + $0x204] sm:$0xf] %v811_v36  ;;  %v904_v48 = vrot.slane %v6887_v41, 7 }
  0x54   : > { %1457 = vst [vmem:[#allocation3 + $0x228] sm:$0xf] %v820_v40  ;;  %v898_v51 = vor.u32 %v6890_v39, %v895_v46  ;;  %v900_v52 = vrot.slane %v895_v46, 4  ;;  %v338_v46 = vmul.f32 %v5580_v3, %v5297_v17  ;;  %v635_v53 = vsel %vm5643_vm2, %v4193_v30, %v634_v34 }
  0x55   : > { %1550 = vst [vmem:[#allocation3 + $0x1c8] sm:$0xf] %v811_v36  ;;  %v907_v56 = vor.u32 %v6888_v42, %v904_v48  ;;  %v363_v36 = vmul.f32 %v5580_v3, %v5346_v1  ;;  %v339_v48 = vmul.f32 %v5580_v3, %v5298_v20  ;;  %v423_v62 = vmax.f32 %v391_v47, 0.0 }
  0x56   : > { %1551 = vst [vmem:[#allocation3 + $0x1ec] sm:$0xf] %v820_v40  ;;  %v899_v60 = vsel %vm5643_vm2, %v4205_v45, %v898_v51  ;;  %v636_v40 = vrot.slane %v631_v57, 4  ;;  %v390_v45 = vadd.f32 %v5591_v8, %v354_v16  ;;  %v398_v51 = vadd.f32 %v5591_v8, %v362_v27 }
  0x57   : > { %v908_v0 = vsel %vm5643_vm2, %v900_v52, %v907_v56  ;;  %1370 = vst [vmem:[#allocation3 + $0x360] sm:$0xf] %v899_v60  ;;  %v399_v56 = vadd.f32 %v5591_v8, %v363_v36  ;;  %v375_v63 = vadd.f32 %v5591_v8, %v339_v48  ;;  %v500_v16 = vpack.c.bf16 %v423_v62, %v423_v62 }
  0x58   : > { %v4501_v12 = vld [vmem:[#allocation3 + $0x240] sm:$0xf]  ;;  %1371 = vst [vmem:[#allocation3 + $0x384] sm:$0xf] %v908_v0  ;;  %v644_v58 = vsel %vm5643_vm2, %v636_v40, %v643_v44  ;;  %v422_v59 = vmax.f32 %v390_v45, 0.0  ;;  %v430_v2 = vmax.f32 %v398_v51, 0.0 }
  0x59   : > { %v5155_v18 = vld [vmem:[#allocation3 + $0x260] sm:$0xf0]  ;;  %1403 = vst [vmem:[#allocation3 + $0x388] sm:$0xf] %v5747_v37  ;;  %v431_v1 = vmax.f32 %v399_v56, 0.0  ;;  %v407_v17 = vmax.f32 %v375_v63, 0.0 }
  0x5a   : > { %v4502_v21 = vor.u32 %v5155_v18, %v4501_v12  ;;  %1464 = vst [vmem:[#allocation3 + $0x324] sm:$0xf] %v899_v60  ;;  %v499_v12 = vpack.c.bf16 %v422_v59, %v422_v59  ;;  %v568_v18 = vld [vmem:[#allocation2 + $0x50] sm:$0xf]  ;;  %v507_v19 = vpack.c.bf16 %v430_v2, %v430_v2  ;;  %v822_v45 = vshrl.u32 %v584_v35, 16 }
  0x5b   : > { %1465 = vst [vmem:[#allocation3 + $0x348] sm:$0xf] %v908_v0  ;;  %v508_v20 = vpack.c.bf16 %v431_v1, %v431_v1  ;;  %v734_v27 = vshrl.u32 %v568_v18, 16  ;;  %v484_v30 = vpack.c.bf16 %v407_v17, %v407_v17 }
  0x5c   : > { %3154 = vmatmul.bf16.vlgmr.msra.gmra.mxu2 %v4502_v21  ;;  %1496 = vst [vmem:[#allocation3 + $0x328] sm:$0xf] %v5735_v31  ;;  %v4202_v1 = vrot.slane %v822_v45, 11 }
  0x5d   : > { %1497 = vst [vmem:[#allocation3 + $0x34c] sm:$0xf] %v5747_v37  ;;  %v4198_v44 = vrot.slane %v734_v27, 11  ;;  %v600_v27 = vld [vmem:[#allocation2 + $0xd0] sm:$0xf] }
  0x5e   : > { %v4645_v49 = vld [vmem:[#allocation3 + $0x360] sm:$0xf]  ;;  %1558 = vst [vmem:[#allocation3 + $0x2e8] sm:$0xf] %v899_v60  ;;  %v374_v60 = vadd.f32 %v5591_v8, %v338_v46  ;;  %v910_v35 = vshrl.u32 %v600_v27, 16 }
  0x5f   : > { %v5191_v52 = vld [vmem:[#allocation3 + $0x380] sm:$0xf0]  ;;  %1559 = vst [vmem:[#allocation3 + $0x30c] sm:$0xf] %v908_v0  ;;  %v491_v0 = vpack.c.bf16 %v414_v50, %v414_v50 }
  0x60   : > { %v4646_v57 = vor.u32 %v5191_v52, %v4645_v49  ;;  %1590 = vst [vmem:[#allocation3 + $0x2ec] sm:$0xf] %v5735_v31  ;;  %v406_v13 = vmax.f32 %v374_v60, 0.0 }
  0x61   : > { %1591 = vst [vmem:[#allocation3 + $0x310] sm:$0xf] %v5747_v37 }
  0x62   : > { %3174 = vmatmul.bf16.vlgmr.msra.gmra.mxu3 %v4646_v57  ;;  %1346 = vst [vmem:[#allocation3] sm:$0xf] %v635_v53  ;;  %v483_v21 = vpack.c.bf16 %v406_v13, %v406_v13 }
  0x63   : > { %1347 = vst [vmem:[#allocation3 + $0x24] sm:$0xf] %v644_v58 }
  0x64   : > { %1378 = vst [vmem:[#allocation3 + $0x4] sm:$0xf] %v5711_v14 }
  0x65   : > { %1379 = vst [vmem:[#allocation3 + $0x28] sm:$0xf] %v5737_v33 }
  0x66   : > { %524 = vst [vmem:[#allocation2 + $0x54] sm:$0xf] %v491_v0 }
  0x67   : > { %525 = vst [vmem:[#allocation2 + $0x58] sm:$0xf] %v492_v4 }
  0x68   : > { %532 = vst [vmem:[#allocation2 + $0x94] sm:$0xf] %v499_v12 }
  0x69   : > { %v4213_v22 = vld [vmem:[#allocation3] sm:$0xf]  ;;  %533 = vst [vmem:[#allocation2 + $0x98] sm:$0xf] %v500_v16  ;;  %v5244_v16 = vld [vmem:[%s6879_s3 + $0xa8] sm:$0xff] }
  0x6a   : > { %v5083_v34 = vld [vmem:[#allocation3 + $0x20] sm:$0xf0]  ;;  %540 = vst [vmem:[#allocation2 + $0xd4] sm:$0xf] %v507_v19  ;;  %3286 = vmatpush.bf16.msrb.mxu2 %v5244_v16 }
  0x6b   : > { %v4214_v36 = vor.u32 %v5083_v34, %v4213_v22  ;;  %541 = vst [vmem:[#allocation2 + $0xd8] sm:$0xf] %v508_v20  ;;  %v5251_v16 = vld [vmem:[%s6879_s3 + $0xe0] sm:$0xff] }
  0x6c   : > { %516 = vst [vmem:[#allocation2 + $0x14] sm:$0xf] %v483_v21 }
  0x6d   : > { %3114 = vmatmul.bf16.vlgmr.msra.gmra.mxu0 %v4214_v36  ;;  %v5810_v40 = vld [vmem:[#allocation2 + $0x54] sm:$0xf]  ;;  %517 = vst [vmem:[#allocation2 + $0x18] sm:$0xf] %v484_v30 }
  0x6e   : > { %v5812_v46 = vld [vmem:[#allocation2 + $0x58] sm:$0xf]  ;;  %v6914_v47 = vshrl.u32 %v5810_v40, 16  ;;  %v6913_v48 = vshll.u32 %v5810_v40, 16  ;;  %1388 = vst [vmem:[#allocation3 + $0x16c] sm:$0xf] %v5810_v40 }
  0x6f   : > { %v6911_v49 = vshrl.u32 %v5812_v46, 16  ;;  %v6912_v50 = vshll.u32 %v5812_v46, 16  ;;  %1389 = vst [vmem:[#allocation3 + $0x190] sm:$0xf] %v5812_v46  ;;  %v5820_v51 = vld [vmem:[#allocation2 + $0x94] sm:$0xf] }
  0x70   : > { %v741_v52 = vrot.slane %v6914_v47, 7  ;;  %1482 = vst [vmem:[#allocation3 + $0x130] sm:$0xf] %v5810_v40  ;;  %v5825_v53 = vld [vmem:[#allocation2 + $0x98] sm:$0xf]  ;;  %v6893_v55 = vshrl.u32 %v5820_v51, 16 }
  0x71   : > { %v750_v56 = vrot.slane %v6911_v49, 7  ;;  %1483 = vst [vmem:[#allocation3 + $0x154] sm:$0xf] %v5812_v46  ;;  %v6900_v57 = vshll.u32 %v5820_v51, 16  ;;  %v6891_v58 = vshrl.u32 %v5825_v53, 16  ;;  %v6892_v59 = vshll.u32 %v5825_v53, 16 }
  0x72   : > { %v744_v60 = vor.u32 %v6913_v48, %v741_v52  ;;  %v746_v62 = vrot.slane %v741_v52, 4  ;;  %1576 = vst [vmem:[#allocation3 + $0xf4] sm:$0xf] %v5810_v40  ;;  %v829_v63 = vrot.slane %v6893_v55, 7  ;;  %v5849_v13 = vld [vmem:[#allocation2 + $0xd4] sm:$0xf] }
  0x73   : > { %v753_v0 = vor.u32 %v6912_v50, %v750_v56  ;;  %1577 = vst [vmem:[#allocation3 + $0x118] sm:$0xf] %v5812_v46  ;;  %v838_v2 = vrot.slane %v6891_v58, 7  ;;  %v5858_v20 = vld [vmem:[#allocation2 + $0xd8] sm:$0xf]  ;;  %v6885_v21 = vshrl.u32 %v5849_v13, 16 }
  0x74   : > { %v745_v4 = vsel %vm5643_vm2, %v4198_v44, %v744_v60  ;;  %v832_v12 = vor.u32 %v6900_v57, %v829_v63  ;;  %1396 = vst [vmem:[#allocation3 + $0x28c] sm:$0xf] %v5820_v51  ;;  %v834_v18 = vrot.slane %v829_v63, 4  ;;  %v6883_v30 = vshrl.u32 %v5858_v20, 16  ;;  %v5261_v63 = vld [vmem:[%s6879_s3 + $0x130] sm:$0xff] }
  0x75   : > { %v754_v17 = vsel %vm5643_vm2, %v746_v62, %v753_v0  ;;  %1356 = vst [vmem:[#allocation3 + $0x168] sm:$0xf] %v745_v4  ;;  %v841_v19 = vor.u32 %v6892_v59, %v838_v2  ;;  %v917_v36 = vrot.slane %v6885_v21, 7  ;;  %v6886_v44 = vshll.u32 %v5849_v13, 16  ;;  %v5252_v62 = vld [vmem:[%s6879_s3 + $0xe8] sm:$0xff]  ;;  %3463 = vmatpush.bf16.msrb.mxu0 %v5261_v63 }
  0x76   : > { %1357 = vst [vmem:[#allocation3 + $0x18c] sm:$0xf] %v754_v17  ;;  %v833_v22 = vsel %vm5643_vm2, %v4202_v1, %v832_v12  ;;  %v926_v52 = vrot.slane %v6883_v30, 7  ;;  %v6884_v56 = vshll.u32 %v5858_v20, 16  ;;  %v5236_v2 = vld [vmem:[%s6879_s3 + $0x68] sm:$0xff]  ;;  %v4206_v1 = vrot.slane %v910_v35, 11  ;;  %3375 = vmatpush.bf16.msrb.mxu3 %v5252_v62 }
  0x77   : > { %1450 = vst [vmem:[#allocation3 + $0x12c] sm:$0xf] %v745_v4  ;;  %v842_v34 = vsel %vm5643_vm2, %v834_v18, %v841_v19  ;;  %v920_v12 = vor.u32 %v6886_v44, %v917_v36  ;;  %v922_v18 = vrot.slane %v917_v36, 4  ;;  %v5896_v27 = vld [vmem:[#allocation2 + $0x14] sm:$0xf]  ;;  %3197 = vmatpush.bf16.msrb.mxu1 %v5236_v2  ;;  %v5443_v63 = vld [vmem:[%s5575_s30 + $0x28] sm:$0xff]  }
  0x78   : > { %1451 = vst [vmem:[#allocation3 + $0x150] sm:$0xf] %v754_v17  ;;  %v929_v19 = vor.u32 %v6884_v56, %v926_v52  ;;  %v5899_v35 = vld [vmem:[#allocation2 + $0x18] sm:$0xf]  ;;  %v651_v62 = vshrl.u32 %v5896_v27, 16  ;;  %v5439_v30 = vld [vmem:[%s5575_s30 + $0x8] sm:$0xff]  }
  0x79   : > { %1544 = vst [vmem:[#allocation3 + $0xf0] sm:$0xf] %v745_v4  ;;  %v5243_v4 = vld [vmem:[%s6879_s3 + $0xa0] sm:$0xff]  ;;  %v921_v52 = vsel %vm5643_vm2, %v4206_v1, %v920_v12  ;;  %v5317_v1 = vunpack.c.l.bf16 %v5443_v63  ;;  %v5301_v39 = vunpack.c.l.bf16 %v5439_v30 }
  0x7a   : > { %1545 = vst [vmem:[#allocation3 + $0x114] sm:$0xf] %v754_v17  ;;  %v5260_v17 = vld [vmem:[%s6879_s3 + $0x128] sm:$0xff]  ;;  %3287 = vmatpush.bf16.msrb.mxu2 %v5243_v4  ;;  %3376 = vmatpush.bf16.msrb.mxu3 %v5251_v16  ;;  %v930_v2 = vsel %vm5643_vm2, %v922_v18, %v929_v19  ;;  %v552_v4 = vld [vmem:[#allocation2 + $0x10] sm:$0xf]  ;;  %v653_v16 = vrot.slane %v651_v62, 7 }
  0x7b   : > { %1364 = vst [vmem:[#allocation3 + $0x288] sm:$0xf] %v833_v22  ;;  %3464 = vmatpush.bf16.msrb.mxu0 %v5260_v17  ;;  %v646_v12 = vshrl.u32 %v552_v4, 16  ;;  %v654_v17 = vshll.u32 %v5896_v27, 16  ;;  %v5451_v18 = vld [vmem:[%s5575_s30 + $0x68] sm:$0xff]   ;;  %v348_v4 = vmul.f32 %v5580_v3, %v5317_v1 }
  0x7c   : > { %v4393_v45 = vld [vmem:[#allocation3 + $0x168] sm:$0xf]  ;;  %1365 = vst [vmem:[#allocation3 + $0x2ac] sm:$0xf] %v842_v34  ;;  %v5349_v56 = vunpack.c.l.bf16 %v5451_v18  ;;  %v5350_v41 = vunpack.c.h.bf16 %v5451_v18  ;;  %v658_v42 = vrot.slane %v653_v16, 4 }
  0x7d   : > { %v5128_v60 = vld [vmem:[#allocation3 + $0x188] sm:$0xf0]  ;;  %1397 = vst [vmem:[#allocation3 + $0x2b0] sm:$0xf] %v5825_v53  ;;  %v4194_v21 = vrot.slane %v646_v12, 11  ;;  %v5302_v12 = vunpack.c.h.bf16 %v5439_v30 }
  0x7e   : > { %v4394_v0 = vor.u32 %v5128_v60, %v4393_v45  ;;  %1458 = vst [vmem:[#allocation3 + $0x24c] sm:$0xf] %v833_v22  ;;  %v5235_v45 = vld [vmem:[%s6879_s3 + $0x60] sm:$0xff]  ;;  %v364_v18 = vmul.f32 %v5580_v3, %v5349_v56 }
  0x7f   : > { %1459 = vst [vmem:[#allocation3 + $0x270] sm:$0xf] %v842_v34  ;;  %3198 = vmatpush.bf16.msrb.mxu1 %v5235_v45  ;;  %v663_v45 = vshll.u32 %v5899_v35, 16 }
  0x80   : > { %3139 = vmatmul.bf16.gmra.mxu1 %v4394_v0  ;;  %1490 = vst [vmem:[#allocation3 + $0x250] sm:$0xf] %v5820_v51 }
  0x81   : > { %1491 = vst [vmem:[#allocation3 + $0x274] sm:$0xf] %v5825_v53 }
  0x82   : > { %v4537_v60 = vld [vmem:[#allocation3 + $0x288] sm:$0xf]  ;;  %1552 = vst [vmem:[#allocation3 + $0x210] sm:$0xf] %v833_v22  ;;  %v660_v22 = vshrl.u32 %v5899_v35, 16 }
  0x83   : > { %v5164_v36 = vld [vmem:[#allocation3 + $0x2a8] sm:$0xf0]  ;;  %1553 = vst [vmem:[#allocation3 + $0x234] sm:$0xf] %v842_v34 }
  0x84   : > { %v4538_v0 = vor.u32 %v5164_v36, %v4537_v60  ;;  %1584 = vst [vmem:[#allocation3 + $0x214] sm:$0xf] %v5820_v51  ;;  %v5447_v34 = vld [vmem:[%s5575_s30 + $0x48] sm:$0xff]   ;;  %v5318_v60 = vunpack.c.h.bf16 %v5443_v63  ;;  %v662_v19 = vrot.slane %v660_v22, 7  ;;  %v656_v63 = vor.u32 %v654_v17, %v653_v16 }
  0x85   : > { %1585 = vst [vmem:[#allocation3 + $0x238] sm:$0xf] %v5825_v53  ;;  %v5333_v36 = vunpack.c.l.bf16 %v5447_v34 }
  0x86   : > { %3159 = vmatmul.bf16.gmra.mxu2 %v4538_v0  ;;  %1372 = vst [vmem:[#allocation3 + $0x3a8] sm:$0xf] %v921_v52  ;;  %v5334_v0 = vunpack.c.h.bf16 %v5447_v34  ;;  %v349_v44 = vmul.f32 %v5580_v3, %v5318_v60  ;;  %v665_v38 = vor.u32 %v663_v45, %v662_v19  ;;  %v384_v60 = vadd.f32 %v5591_v8, %v348_v4 }
  0x87   : > { %1373 = vst [vmem:[#allocation3 + $0x3cc] sm:$0xf] %v930_v2  ;;  %v356_v34 = vmul.f32 %v5580_v3, %v5333_v36  ;;  %v657_v16 = vsel %vm5643_vm2, %v4194_v21, %v656_v63  ;;  %v365_v36 = vmul.f32 %v5580_v3, %v5350_v41  ;;  %v400_v41 = vadd.f32 %v5591_v8, %v364_v18 }
  0x88   : > { %1404 = vst [vmem:[#allocation3 + $0x3ac] sm:$0xf] %v5849_v13  ;;  %v357_v1 = vmul.f32 %v5580_v3, %v5334_v0  ;;  %v385_v19 = vadd.f32 %v5591_v8, %v349_v44  ;;  %v666_v30 = vsel %vm5643_vm2, %v658_v42, %v665_v38  ;;  %v340_v0 = vmul.f32 %v5580_v3, %v5301_v39 }
  0x89   : > { %1405 = vst [vmem:[#allocation3 + $0x3d0] sm:$0xf] %v5858_v20  ;;  %v416_v21 = vmax.f32 %v384_v60, 0.0  ;;  %v401_v56 = vadd.f32 %v5591_v8, %v365_v36 }
  0x8a   : > { %1466 = vst [vmem:[#allocation3 + $0x36c] sm:$0xf] %v921_v52  ;;  %v417_v44 = vmax.f32 %v385_v19, 0.0  ;;  %v376_v42 = vadd.f32 %v5591_v8, %v340_v0 }
  0x8b   : > { %1467 = vst [vmem:[#allocation3 + $0x390] sm:$0xf] %v930_v2  ;;  %v433_v63 = vmax.f32 %v401_v56, 0.0 }
  0x8c   : > { %1498 = vst [vmem:[#allocation3 + $0x370] sm:$0xf] %v5849_v13  ;;  %v494_v4 = vpack.c.bf16 %v417_v44, %v417_v44 }
  0x8d   : > { %v4681_v58 = vld [vmem:[#allocation3 + $0x3a8] sm:$0xf]  ;;  %1499 = vst [vmem:[#allocation3 + $0x394] sm:$0xf] %v5858_v20 }
  0x8e   : > { %v5200_v59 = vld [vmem:[#allocation3 + $0x3c8] sm:$0xf0]  ;;  %1560 = vst [vmem:[#allocation3 + $0x330] sm:$0xf] %v921_v52  ;;  %v392_v52 = vadd.f32 %v5591_v8, %v356_v34 }
  0x8f   : > { %v4682_v55 = vor.u32 %v5200_v59, %v4681_v58  ;;  %1561 = vst [vmem:[#allocation3 + $0x354] sm:$0xf] %v930_v2  ;;  %v393_v58 = vadd.f32 %v5591_v8, %v357_v1  ;;  %v341_v59 = vmul.f32 %v5580_v3, %v5302_v12  ;;  %v493_v2 = vpack.c.bf16 %v416_v21, %v416_v21 }
  0x90   : > { %1592 = vst [vmem:[#allocation3 + $0x334] sm:$0xf] %v5849_v13  ;;  %v424_v38 = vmax.f32 %v392_v52, 0.0  ;;  %v432_v3 = vmax.f32 %v400_v41, 0.0  ;;  %v408_v1 = vmax.f32 %v376_v42, 0.0 }
  0x91   : > { %3179 = vmatmul.bf16.gmra.mxu3 %v4682_v55  ;;  %1593 = vst [vmem:[#allocation3 + $0x358] sm:$0xf] %v5858_v20  ;;  %v425_v39 = vmax.f32 %v393_v58, 0.0  ;;  %v377_v55 = vadd.f32 %v5591_v8, %v341_v59  ;;  %v572_v8 = vld [vmem:[#allocation2 + $0x60] sm:$0xf] }
  0x92   : > { %1348 = vst [vmem:[#allocation3 + $0x48] sm:$0xf] %v657_v16  ;;  %v501_v34 = vpack.c.bf16 %v424_v38, %v424_v38  ;;  %v509_v19 = vpack.c.bf16 %v432_v3, %v432_v3  ;;  %v485_v52 = vpack.c.bf16 %v408_v1, %v408_v1  ;;  %v756_v0 = vshrl.u32 %v572_v8, 16  ;;  %v588_v59 = vld [vmem:[#allocation2 + $0xa0] sm:$0xf] }
  0x93   : > { %1349 = vst [vmem:[#allocation3 + $0x6c] sm:$0xf] %v666_v30  ;;  %v502_v60 = vpack.c.bf16 %v425_v39, %v425_v39  ;;  %v409_v18 = vmax.f32 %v377_v55, 0.0  ;;  %v844_v44 = vshrl.u32 %v588_v59, 16  ;;  %v5242_v59 = vld [vmem:[%s6879_s3 + $0x98] sm:$0xff] }
  0x94   : > { %1442 = vst [vmem:[#allocation3 + $0xc] sm:$0xf] %v657_v16  ;;  %v4199_v41 = vrot.slane %v756_v0, 11  ;;  %3288 = vmatpush.bf16.msrb.mxu2 %v5242_v59 }
  0x95   : > { %1443 = vst [vmem:[#allocation3 + $0x30] sm:$0xf] %v666_v30  ;;  %v510_v30 = vpack.c.bf16 %v433_v63, %v433_v63  ;;  %v486_v58 = vpack.c.bf16 %v409_v18, %v409_v18 }
  0x96   : > { %1380 = vst [vmem:[#allocation3 + $0x4c] sm:$0xf] %v5896_v27 }
  0x97   : > { %1381 = vst [vmem:[#allocation3 + $0x70] sm:$0xf] %v5899_v35 }
  0x98   : > { %1474 = vst [vmem:[#allocation3 + $0x10] sm:$0xf] %v5896_v27 }
  0x99   : > { %v4249_v12 = vld [vmem:[#allocation3 + $0x48] sm:$0xf]  ;;  %1475 = vst [vmem:[#allocation3 + $0x34] sm:$0xf] %v5899_v35 }
  0x9a   : > { %v5092_v16 = vld [vmem:[#allocation3 + $0x68] sm:$0xf0]  ;;  %526 = vst [vmem:[#allocation2 + $0x64] sm:$0xf] %v493_v2 }
  0x9b   : > { %v4250_v36 = vor.u32 %v5092_v16, %v4249_v12  ;;  %527 = vst [vmem:[#allocation2 + $0x68] sm:$0xf] %v494_v4 }
  0x9c   : > { %534 = vst [vmem:[#allocation2 + $0xa4] sm:$0xf] %v501_v34 }
  0x9d   : > { %3119 = vmatmul.bf16.gmra.mxu0 %v4250_v36  ;;  %535 = vst [vmem:[#allocation2 + $0xa8] sm:$0xf] %v502_v60 }
  0x9e   : > { %542 = vst [vmem:[#allocation2 + $0xe4] sm:$0xf] %v509_v19 }
  0x9f   : > { %543 = vst [vmem:[#allocation2 + $0xe8] sm:$0xf] %v510_v30 }
  0xa0   : > { %518 = vst [vmem:[#allocation2 + $0x24] sm:$0xf] %v485_v52  ;;  %v4203_v52 = vrot.slane %v844_v44, 11 }
  0xa1   : > { %v5956_v21 = vld [vmem:[#allocation2 + $0x64] sm:$0xf]  ;;  %519 = vst [vmem:[#allocation2 + $0x28] sm:$0xf] %v486_v58 }
  0xa2   : > { %v5958_v56 = vld [vmem:[#allocation2 + $0x68] sm:$0xf]  ;;  %v6910_v38 = vshrl.u32 %v5956_v21, 16  ;;  %v6909_v42 = vshll.u32 %v5956_v21, 16  ;;  %1390 = vst [vmem:[#allocation3 + $0x1b4] sm:$0xf] %v5956_v21 }
  0xa3   : > { %v6907_v39 = vshrl.u32 %v5958_v56, 16  ;;  %v6908_v55 = vshll.u32 %v5958_v56, 16  ;;  %1391 = vst [vmem:[#allocation3 + $0x1d8] sm:$0xf] %v5958_v56  ;;  %v5966_v2 = vld [vmem:[#allocation2 + $0xa4] sm:$0xf] }
  0xa4   : > { %v763_v3 = vrot.slane %v6910_v38, 7  ;;  %1484 = vst [vmem:[#allocation3 + $0x178] sm:$0xf] %v5956_v21  ;;  %v5971_v4 = vld [vmem:[#allocation2 + $0xa8] sm:$0xf]  ;;  %v6895_v63 = vshrl.u32 %v5966_v2, 16 }
  0xa5   : > { %v772_v34 = vrot.slane %v6907_v39, 7  ;;  %1485 = vst [vmem:[#allocation3 + $0x19c] sm:$0xf] %v5958_v56  ;;  %v6896_v1 = vshll.u32 %v5966_v2, 16  ;;  %v6894_v12 = vshrl.u32 %v5971_v4, 16  ;;  %v6897_v60 = vshll.u32 %v5971_v4, 16 }
  0xa6   : > { %v766_v18 = vor.u32 %v6909_v42, %v763_v3  ;;  %v768_v16 = vrot.slane %v763_v3, 4  ;;  %1578 = vst [vmem:[#allocation3 + $0x13c] sm:$0xf] %v5956_v21  ;;  %v851_v8 = vrot.slane %v6895_v63, 7  ;;  %v5995_v58 = vld [vmem:[#allocation2 + $0xe4] sm:$0xf] }
  0xa7   : > { %v775_v19 = vor.u32 %v6908_v55, %v772_v34  ;;  %1579 = vst [vmem:[#allocation3 + $0x160] sm:$0xf] %v5958_v56  ;;  %v860_v36 = vrot.slane %v6894_v12, 7  ;;  %v6004_v44 = vld [vmem:[#allocation2 + $0xe8] sm:$0xf]  ;;  %v5440_v42 = vld [vmem:[%s5575_s30 + $0x10] sm:$0xff]  }
  0xa8   : > { %v767_v30 = vsel %vm5643_vm2, %v4199_v41, %v766_v18  ;;  %v854_v0 = vor.u32 %v6896_v1, %v851_v8  ;;  %1398 = vst [vmem:[#allocation3 + $0x2d4] sm:$0xf] %v5966_v2  ;;  %v856_v34 = vrot.slane %v851_v8, 4  ;;  %v6899_v18 = vshrl.u32 %v5995_v58, 16  ;;  %v604_v63 = vld [vmem:[#allocation2 + $0xe0] sm:$0xf] }
  0xa9   : > { %v776_v3 = vsel %vm5643_vm2, %v768_v16, %v775_v19  ;;  %1358 = vst [vmem:[#allocation3 + $0x1b0] sm:$0xf] %v767_v30  ;;  %v863_v41 = vor.u32 %v6897_v60, %v860_v36  ;;  %v6898_v1 = vshrl.u32 %v6004_v44, 16  ;;  %v932_v8 = vshrl.u32 %v604_v63, 16  ;;  %v5259_v63 = vld [vmem:[%s6879_s3 + $0x120] sm:$0xff] }
  0xaa   : > { %1359 = vst [vmem:[#allocation3 + $0x1d4] sm:$0xf] %v776_v3  ;;  %v855_v12 = vsel %vm5643_vm2, %v4203_v52, %v854_v0  ;;  %v939_v19 = vrot.slane %v6899_v18, 7  ;;  %v6902_v36 = vshll.u32 %v5995_v58, 16  ;;  %v6903_v0 = vshll.u32 %v6004_v44, 16  ;;  %3465 = vmatpush.bf16.msrb.mxu0 %v5259_v63  ;;  %v5233_v63 = vld [vmem:[%s6879_s3 + $0x50] sm:$0xff] }
  0xab   : > { %1452 = vst [vmem:[#allocation3 + $0x174] sm:$0xf] %v767_v30  ;;  %v864_v16 = vsel %vm5643_vm2, %v856_v34, %v863_v41  ;;  %v948_v52 = vrot.slane %v6898_v1, 7  ;;  %v5234_v34 = vld [vmem:[%s6879_s3 + $0x58] sm:$0xff]  ;;  %v5241_v41 = vld [vmem:[%s6879_s3 + $0x90] sm:$0xff]  ;;  %v4207_v1 = vrot.slane %v932_v8, 11 }
  0xac   : > { %1453 = vst [vmem:[#allocation3 + $0x198] sm:$0xf] %v776_v3  ;;  %v942_v18 = vor.u32 %v6902_v36, %v939_v19  ;;  %v944_v57 = vrot.slane %v939_v19, 4  ;;  %v6042_v10 = vld [vmem:[#allocation2 + $0x24] sm:$0xf]  ;;  %3289 = vmatpush.bf16.msrb.mxu2 %v5241_v41  ;;  %3199 = vmatpush.bf16.msrb.mxu1 %v5234_v34 }
  0xad   : > { %1546 = vst [vmem:[#allocation3 + $0x138] sm:$0xf] %v767_v30  ;;  %v5250_v30 = vld [vmem:[%s6879_s3 + $0xd8] sm:$0xff]  ;;  %v951_v8 = vor.u32 %v6903_v0, %v948_v52  ;;  %v673_v52 = vshrl.u32 %v6042_v10, 16  ;;  %v556_v0 = vld [vmem:[#allocation2 + $0x20] sm:$0xf] }
  0xae   : > { %1547 = vst [vmem:[#allocation3 + $0x15c] sm:$0xf] %v776_v3  ;;  %3377 = vmatpush.bf16.msrb.mxu3 %v5250_v30  ;;  %v6045_v30 = vld [vmem:[#allocation2 + $0x28] sm:$0xf]  ;;  %v943_v19 = vsel %vm5643_vm2, %v4207_v1, %v942_v18  ;;  %v668_v1 = vshrl.u32 %v556_v0, 16 }
  0xaf   : > { %1366 = vst [vmem:[#allocation3 + $0x2d0] sm:$0xf] %v855_v12  ;;  %v952_v34 = vsel %vm5643_vm2, %v944_v57, %v951_v8  ;;  %v675_v18 = vrot.slane %v673_v52, 7 }
  0xb0   : > { %v4429_v59 = vld [vmem:[#allocation3 + $0x1b0] sm:$0xf]  ;;  %1367 = vst [vmem:[#allocation3 + $0x2f4] sm:$0xf] %v864_v16  ;;  %3200 = vmatpush.bf16.msrb.mxu1 %v5233_v63  ;;  %v4195_v0 = vrot.slane %v668_v1, 11 }
  0xb1   : > { %v5137_v60 = vld [vmem:[#allocation3 + $0x1d0] sm:$0xf0]  ;;  %1399 = vst [vmem:[#allocation3 + $0x2f8] sm:$0xf] %v5971_v4  ;;  %v680_v11 = vrot.slane %v675_v18, 4 }
  0xb2   : > { %v4430_v3 = vor.u32 %v5137_v60, %v4429_v59  ;;  %1460 = vst [vmem:[#allocation3 + $0x294] sm:$0xf] %v855_v12  ;;  %v5249_v60 = vld [vmem:[%s6879_s3 + $0xd0] sm:$0xff]  ;;  %v5258_v59 = vld [vmem:[%s6879_s3 + $0x118] sm:$0xff]  ;;  %v5504_v1 = vld [vmem:[%s6877_s1] ss:$0 sm:$0xff] }
  0xb3   : > { %1461 = vst [vmem:[#allocation3 + $0x2b8] sm:$0xf] %v864_v16  ;;  %3378 = vmatpush.bf16.msrb.mxu3 %v5249_v60  ;;  %3466 = vmatpush.bf16.msrb.mxu0 %v5258_v59  ;;  %v685_v60 = vshll.u32 %v6045_v30, 16  ;;  %v5448_v59 = vld [vmem:[%s5575_s30 + $0x50] sm:$0xff]  }
  0xb4   : > { %3144 = vmatmul.bf16.gmra.mxu1 %v4430_v3  ;;  %1492 = vst [vmem:[#allocation3 + $0x298] sm:$0xf] %v5966_v2  ;;  %v5337_v9 = vunpack.c.l.bf16 %v5448_v59  ;;  %v5338_v55 = vunpack.c.h.bf16 %v5448_v59 }
  0xb5   : > { %1493 = vst [vmem:[#allocation3 + $0x2bc] sm:$0xf] %v5971_v4 }
  0xb6   : > { %v4573_v36 = vld [vmem:[#allocation3 + $0x2d0] sm:$0xf]  ;;  %1554 = vst [vmem:[#allocation3 + $0x258] sm:$0xf] %v855_v12  ;;  %v682_v12 = vshrl.u32 %v6045_v30, 16  ;;  %v358_v47 = vmul.f32 %v5504_v1, %v5337_v9  ;;  %v359_v28 = vmul.f32 %v5504_v1, %v5338_v55 }
  0xb7   : > { %v5173_v3 = vld [vmem:[#allocation3 + $0x2f0] sm:$0xf0]  ;;  %1555 = vst [vmem:[#allocation3 + $0x27c] sm:$0xf] %v864_v16  ;;  %v676_v16 = vshll.u32 %v6042_v10, 16 }
  0xb8   : > { %v4574_v41 = vor.u32 %v5173_v3, %v4573_v36  ;;  %1586 = vst [vmem:[#allocation3 + $0x25c] sm:$0xf] %v5966_v2  ;;  %v5444_v36 = vld [vmem:[%s5575_s30 + $0x30] sm:$0xff]   ;;  %v684_v57 = vrot.slane %v682_v12, 7 }
  0xb9   : > { %1587 = vst [vmem:[#allocation3 + $0x280] sm:$0xf] %v5971_v4  ;;  %v5321_v8 = vunpack.c.l.bf16 %v5444_v36  ;;  %v678_v63 = vor.u32 %v676_v16, %v675_v18  ;;  %v5322_v3 = vunpack.c.h.bf16 %v5444_v36 }
  0xba   : > { %3164 = vmatmul.bf16.gmra.mxu2 %v4574_v41  ;;  %1374 = vst [vmem:[#allocation3 + $0x3f0] sm:$0xf] %v943_v19  ;;  %v5452_v41 = vld [vmem:[%s5575_s30 + $0x70] sm:$0xff]   ;;  %v687_v7 = vor.u32 %v685_v60, %v684_v57 }
  0xbb   : > { %1375 = vst [vmem:[#allocation3 + $0x414] sm:$0xf] %v952_v34  ;;  %v350_v36 = vmul.f32 %v5504_v1, %v5321_v8  ;;  %v5353_v49 = vunpack.c.l.bf16 %v5452_v41  ;;  %v679_v18 = vsel %vm5643_vm2, %v4195_v0, %v678_v63  ;;  %v351_v57 = vmul.f32 %v5504_v1, %v5322_v3 }
  0xbc   : > { %1406 = vst [vmem:[#allocation3 + $0x3f4] sm:$0xf] %v5995_v58  ;;  %v5354_v48 = vunpack.c.h.bf16 %v5452_v41  ;;  %v688_v59 = vsel %vm5643_vm2, %v680_v11, %v687_v7  ;;  %v5306_v8 = vunpack.c.h.bf16 %v5440_v42 }
  0xbd   : > { %1407 = vst [vmem:[#allocation3 + $0x418] sm:$0xf] %v6004_v44 }
  0xbe   : > { %1468 = vst [vmem:[#allocation3 + $0x3b4] sm:$0xf] %v943_v19  ;;  %v367_v63 = vmul.f32 %v5504_v1, %v5354_v48  ;;  %v343_v11 = vmul.f32 %v5504_v1, %v5306_v8 }
  0xbf   : > { %1469 = vst [vmem:[#allocation3 + $0x3d8] sm:$0xf] %v952_v34 }
  0xc0   : > { %1500 = vst [vmem:[#allocation3 + $0x3b8] sm:$0xf] %v5995_v58 }
  0xc1   : > { %v4717_v39 = vld [vmem:[#allocation3 + $0x3f0] sm:$0xf]  ;;  %1501 = vst [vmem:[#allocation3 + $0x3dc] sm:$0xf] %v6004_v44 }
  0xc2   : > { %v5209_v38 = vld [vmem:[#allocation3 + $0x410] sm:$0xf0]  ;;  %1562 = vst [vmem:[#allocation3 + $0x378] sm:$0xf] %v943_v19  ;;  %v5305_v19 = vunpack.c.l.bf16 %v5440_v42 }
  0xc3   : > { %v4718_v50 = vor.u32 %v5209_v38, %v4717_v39  ;;  %1563 = vst [vmem:[#allocation3 + $0x39c] sm:$0xf] %v952_v34  ;;  %v5505_v38 = vld [vmem:[%s6878_s2] ss:$0 sm:$0xff]  ;;  %v366_v34 = vmul.f32 %v5504_v1, %v5353_v49 }
  0xc4   : > { %1594 = vst [vmem:[#allocation3 + $0x37c] sm:$0xf] %v5995_v58  ;;  %v386_v39 = vadd.f32 %v5505_v38, %v350_v36  ;;  %v387_v0 = vadd.f32 %v5505_v38, %v351_v57  ;;  %v394_v3 = vadd.f32 %v5505_v38, %v358_v47  ;;  %v342_v7 = vmul.f32 %v5504_v1, %v5305_v19 }
  0xc5   : > { %3184 = vmatmul.bf16.gmra.mxu3 %v4718_v50  ;;  %1595 = vst [vmem:[#allocation3 + $0x3a0] sm:$0xf] %v6004_v44  ;;  %v395_v9 = vadd.f32 %v5505_v38, %v359_v28  ;;  %v402_v42 = vadd.f32 %v5505_v38, %v366_v34  ;;  %v403_v41 = vadd.f32 %v5505_v38, %v367_v63 }
  0xc6   : > { %1350 = vst [vmem:[#allocation3 + $0x90] sm:$0xf] %v679_v18  ;;  %v418_v50 = vmax.f32 %v386_v39, 0.0  ;;  %v419_v55 = vmax.f32 %v387_v0, 0.0  ;;  %v426_v36 = vmax.f32 %v394_v3, 0.0  ;;  %v378_v49 = vadd.f32 %v5505_v38, %v342_v7 }
  0xc7   : > { %1351 = vst [vmem:[#allocation3 + $0xb4] sm:$0xf] %v688_v59  ;;  %v427_v48 = vmax.f32 %v395_v9, 0.0  ;;  %v379_v57 = vadd.f32 %v5505_v38, %v343_v11  ;;  %v434_v1 = vmax.f32 %v402_v42, 0.0  ;;  %v435_v39 = vmax.f32 %v403_v41, 0.0 }
  0xc8   : > { %1538 = vst [vmem:[#allocation3 + $0x18] sm:$0xf] %v679_v18  ;;  %v495_v28 = vpack.c.bf16 %v418_v50, %v418_v50  ;;  %v496_v8 = vpack.c.bf16 %v419_v55, %v419_v55  ;;  %v503_v34 = vpack.c.bf16 %v426_v36, %v426_v36  ;;  %v576_v38 = vld [vmem:[#allocation2 + $0x70] sm:$0xf] }
  0xc9   : > { %1539 = vst [vmem:[#allocation3 + $0x3c] sm:$0xf] %v688_v59  ;;  %v411_v0 = vmax.f32 %v379_v57, 0.0  ;;  %v511_v63 = vpack.c.bf16 %v434_v1, %v434_v1  ;;  %v512_v3 = vpack.c.bf16 %v435_v39, %v435_v39  ;;  %v778_v7 = vshrl.u32 %v576_v38, 16  ;;  %v592_v11 = vld [vmem:[#allocation2 + $0xb0] sm:$0xf] }
  0xca   : > { %1382 = vst [vmem:[#allocation3 + $0x94] sm:$0xf] %v6042_v10  ;;  %v866_v55 = vshrl.u32 %v592_v11, 16 }
  0xcb   : > { %1383 = vst [vmem:[#allocation3 + $0xb8] sm:$0xf] %v6045_v30  ;;  %v488_v9 = vpack.c.bf16 %v411_v0, %v411_v0  ;;  %v4200_v42 = vrot.slane %v778_v7, 11 }
  0xcc   : > { %1444 = vst [vmem:[#allocation3 + $0x54] sm:$0xf] %v679_v18  ;;  %v410_v18 = vmax.f32 %v378_v49, 0.0  ;;  %v4204_v7 = vrot.slane %v866_v55, 11 }
  0xcd   : > { %v4285_v29 = vld [vmem:[#allocation3 + $0x90] sm:$0xf]  ;;  %1445 = vst [vmem:[#allocation3 + $0x78] sm:$0xf] %v688_v59  ;;  %v504_v59 = vpack.c.bf16 %v427_v48, %v427_v48 }
  0xce   : > { %v5101_v47 = vld [vmem:[#allocation3 + $0xb0] sm:$0xf0]  ;;  %1476 = vst [vmem:[#allocation3 + $0x58] sm:$0xf] %v6042_v10 }
  0xcf   : > { %v4286_v19 = vor.u32 %v5101_v47, %v4285_v29  ;;  %1477 = vst [vmem:[#allocation3 + $0x7c] sm:$0xf] %v6045_v30  ;;  %v487_v29 = vpack.c.bf16 %v410_v18, %v410_v18 }
  0xd0   : > { %1570 = vst [vmem:[#allocation3 + $0x1c] sm:$0xf] %v6042_v10 }
  0xd1   : > { %3124 = vmatmul.bf16.gmra.mxu0 %v4286_v19  ;;  %1571 = vst [vmem:[#allocation3 + $0x40] sm:$0xf] %v6045_v30 }
  0xd2   : > { %528 = vst [vmem:[#allocation2 + $0x74] sm:$0xf] %v495_v28 }
  0xd3   : > { %529 = vst [vmem:[#allocation2 + $0x78] sm:$0xf] %v496_v8 }
  0xd4   : > { %536 = vst [vmem:[#allocation2 + $0xb4] sm:$0xf] %v503_v34 }
  0xd5   : > { %537 = vst [vmem:[#allocation2 + $0xb8] sm:$0xf] %v504_v59 }
  0xd6   : > { %544 = vst [vmem:[#allocation2 + $0xf4] sm:$0xf] %v511_v63 }
  0xd7   : > { %545 = vst [vmem:[#allocation2 + $0xf8] sm:$0xf] %v512_v3 }
  0xd8   : > { %520 = vst [vmem:[#allocation2 + $0x34] sm:$0xf] %v487_v29 }
  0xd9   : > { %v6094_v50 = vld [vmem:[#allocation2 + $0x74] sm:$0xf]  ;;  %521 = vst [vmem:[#allocation2 + $0x38] sm:$0xf] %v488_v9 }
  0xda   : > { %v6096_v41 = vld [vmem:[#allocation2 + $0x78] sm:$0xf]  ;;  %v6928_v36 = vshrl.u32 %v6094_v50, 16  ;;  %v6925_v49 = vshll.u32 %v6094_v50, 16  ;;  %1392 = vst [vmem:[#allocation3 + $0x1fc] sm:$0xf] %v6094_v50 }
  0xdb   : > { %v6920_v48 = vshrl.u32 %v6096_v41, 16  ;;  %v6924_v57 = vshll.u32 %v6096_v41, 16  ;;  %1393 = vst [vmem:[#allocation3 + $0x220] sm:$0xf] %v6096_v41  ;;  %v6104_v47 = vld [vmem:[#allocation2 + $0xb4] sm:$0xf] }
  0xdc   : > { %v785_v28 = vrot.slane %v6928_v36, 7  ;;  %1486 = vst [vmem:[#allocation3 + $0x1c0] sm:$0xf] %v6094_v50  ;;  %v6109_v1 = vld [vmem:[#allocation2 + $0xb8] sm:$0xf]  ;;  %v6918_v19 = vshrl.u32 %v6104_v47, 16 }
  0xdd   : > { %v794_v8 = vrot.slane %v6920_v48, 7  ;;  %1487 = vst [vmem:[#allocation3 + $0x1e4] sm:$0xf] %v6096_v41  ;;  %v6919_v39 = vshll.u32 %v6104_v47, 16  ;;  %v6917_v34 = vshrl.u32 %v6109_v1, 16  ;;  %v6921_v18 = vshll.u32 %v6109_v1, 16 }
  0xde   : > { %v788_v59 = vor.u32 %v6925_v49, %v785_v28  ;;  %v790_v0 = vrot.slane %v785_v28, 4  ;;  %1580 = vst [vmem:[#allocation3 + $0x184] sm:$0xf] %v6094_v50  ;;  %v873_v38 = vrot.slane %v6918_v19, 7  ;;  %v6133_v11 = vld [vmem:[#allocation2 + $0xf4] sm:$0xf] }
  0xdf   : > { %v797_v63 = vor.u32 %v6924_v57, %v794_v8  ;;  %1581 = vst [vmem:[#allocation3 + $0x1a8] sm:$0xf] %v6096_v41  ;;  %v882_v3 = vrot.slane %v6917_v34, 7  ;;  %v5240_v28 = vld [vmem:[%s6879_s3 + $0x88] sm:$0xff]  ;;  %v6142_v55 = vld [vmem:[#allocation2 + $0xf8] sm:$0xf] }
  0xe0   : > { %v789_v29 = vsel %vm5643_vm2, %v4200_v42, %v788_v59  ;;  %v876_v9 = vor.u32 %v6919_v39, %v873_v38  ;;  %1400 = vst [vmem:[#allocation3 + $0x31c] sm:$0xf] %v6104_v47  ;;  %v878_v34 = vrot.slane %v873_v38, 4  ;;  %3290 = vmatpush.bf16.msrb.mxu2 %v5240_v28  ;;  %v6923_v59 = vshrl.u32 %v6133_v11, 16  ;;  %v608_v39 = vld [vmem:[#allocation2 + $0xf0] sm:$0xf] }
  0xe1   : > { %v798_v8 = vsel %vm5643_vm2, %v790_v0, %v797_v63  ;;  %1360 = vst [vmem:[#allocation3 + $0x1f8] sm:$0xf] %v789_v29  ;;  %v885_v42 = vor.u32 %v6921_v18, %v882_v3  ;;  %v6922_v48 = vshrl.u32 %v6142_v55, 16  ;;  %v954_v38 = vshrl.u32 %v608_v39, 16  ;;  %v5257_v39 = vld [vmem:[%s6879_s3 + $0x110] sm:$0xff] }
  0xe2   : > { %1361 = vst [vmem:[#allocation3 + $0x21c] sm:$0xf] %v798_v8  ;;  %v877_v19 = vsel %vm5643_vm2, %v4204_v7, %v876_v9  ;;  %v961_v63 = vrot.slane %v6923_v59, 7  ;;  %v6926_v3 = vshll.u32 %v6133_v11, 16  ;;  %v6927_v9 = vshll.u32 %v6142_v55, 16  ;;  %3467 = vmatpush.bf16.msrb.mxu0 %v5257_v39  ;;  %v5231_v39 = vld [vmem:[%s6879_s3 + $0x40] sm:$0xff] }
  0xe3   : > { %1454 = vst [vmem:[#allocation3 + $0x1bc] sm:$0xf] %v789_v29  ;;  %v886_v0 = vsel %vm5643_vm2, %v878_v34, %v885_v42  ;;  %v970_v7 = vrot.slane %v6922_v48, 7  ;;  %v5248_v34 = vld [vmem:[%s6879_s3 + $0xc8] sm:$0xff]  ;;  %v5239_v42 = vld [vmem:[%s6879_s3 + $0x80] sm:$0xff]  ;;  %v4208_v48 = vrot.slane %v954_v38, 11 }
  0xe4   : > { %1455 = vst [vmem:[#allocation3 + $0x1e0] sm:$0xf] %v798_v8  ;;  %v964_v59 = vor.u32 %v6926_v3, %v961_v63  ;;  %3379 = vmatpush.bf16.msrb.mxu3 %v5248_v34  ;;  %v966_v57 = vrot.slane %v961_v63, 4  ;;  %v6180_v49 = vld [vmem:[#allocation2 + $0x34] sm:$0xf]  ;;  %3291 = vmatpush.bf16.msrb.mxu2 %v5239_v42  ;;  %v5255_v42 = vld [vmem:[%s6879_s3 + $0x100] sm:$0xff] }
  0xe5   : > { %1548 = vst [vmem:[#allocation3 + $0x180] sm:$0xf] %v789_v29  ;;  %v973_v38 = vor.u32 %v6927_v9, %v970_v7  ;;  %v6183_v34 = vld [vmem:[#allocation2 + $0x38] sm:$0xf]  ;;  %v695_v7 = vshrl.u32 %v6180_v49, 16 }
  0xe6   : > { %1549 = vst [vmem:[#allocation3 + $0x1a4] sm:$0xf] %v798_v8  ;;  %v5232_v8 = vld [vmem:[%s6879_s3 + $0x48] sm:$0xff]  ;;  %v965_v63 = vsel %vm5643_vm2, %v4208_v48, %v964_v59 }
  0xe7   : > { %1368 = vst [vmem:[#allocation3 + $0x318] sm:$0xf] %v877_v19  ;;  %3201 = vmatpush.bf16.msrb.mxu1 %v5232_v8  ;;  %v974_v9 = vsel %vm5643_vm2, %v966_v57, %v973_v38  ;;  %v697_v59 = vrot.slane %v695_v7, 7  ;;  %v4215_v38 = vld [vmem:[#allocation3 + $0x24] sm:$0xf0] }
  0xe8   : > { %v4465_v28 = vld [vmem:[#allocation3 + $0x1f8] sm:$0xf]  ;;  %1369 = vst [vmem:[#allocation3 + $0x33c] sm:$0xf] %v886_v0 }
  0xe9   : > { %v5146_v18 = vld [vmem:[#allocation3 + $0x218] sm:$0xf0]  ;;  %1401 = vst [vmem:[#allocation3 + $0x340] sm:$0xf] %v6109_v1 }
  0xea   : > { %v4466_v29 = vor.u32 %v5146_v18, %v4465_v28  ;;  %1462 = vst [vmem:[#allocation3 + $0x2dc] sm:$0xf] %v877_v19  ;;  %v5247_v18 = vld [vmem:[%s6879_s3 + $0xc0] sm:$0xff]  ;;  %v5256_v28 = vld [vmem:[%s6879_s3 + $0x108] sm:$0xff] }
  0xeb   : > { %1463 = vst [vmem:[#allocation3 + $0x300] sm:$0xf] %v886_v0  ;;  %3380 = vmatpush.bf16.msrb.mxu3 %v5247_v18  ;;  %3468 = vmatpush.bf16.msrb.mxu0 %v5256_v28  ;;  %v6932_v18 = vshll.u32 %v6183_v34, 16  ;;  %v5079_v28 = vld [vmem:[#allocation3 + $0x4] sm:$0xf] }
  0xec   : > { %3149 = vmatmul.bf16.gmra.mxu1 %v4466_v29  ;;  %1494 = vst [vmem:[#allocation3 + $0x2e0] sm:$0xf] %v6104_v47  ;;  %v4218_v26 = vor.u32 %v5079_v28, %v4215_v38  ;;  %v6233_v38 = vrot.slane %v641_v15, 5  ;;  %v1025_v15 = vrot.slane %v654_v17, 5 }
  0xed   : > { %1495 = vst [vmem:[#allocation3 + $0x304] sm:$0xf] %v6109_v1  ;;  %3202 = vmatpush.bf16.msrb.mxu1 %v5231_v39  ;;  %v5278_v39 = vld [vmem:[%s6879_s3 + $0x1b8] sm:$0xff] }
  0xee   : > { %v4609_v3 = vld [vmem:[#allocation3 + $0x318] sm:$0xf]  ;;  %1556 = vst [vmem:[#allocation3 + $0x2a0] sm:$0xf] %v877_v19  ;;  %v560_v19 = vld [vmem:[#allocation2 + $0x30] sm:$0xf]  ;;  %3640 = vmatpush.bf16.msra.mxu2 %v5278_v39 }
  0xef   : > { %v5182_v29 = vld [vmem:[#allocation3 + $0x338] sm:$0xf0]  ;;  %1557 = vst [vmem:[#allocation3 + $0x2c4] sm:$0xf] %v886_v0  ;;  %v6931_v0 = vshrl.u32 %v6183_v34, 16  ;;  %v690_v48 = vshrl.u32 %v560_v19, 16  ;;  %3469 = vmatpush.bf16.msrb.mxu0 %v5255_v42 }
  0xf0   : > { %v4610_v8 = vor.u32 %v5182_v29, %v4609_v3  ;;  %1588 = vst [vmem:[#allocation3 + $0x2a4] sm:$0xf] %v6104_v47  ;;  %v698_v3 = vshll.u32 %v6180_v49, 16  ;;  %v702_v19 = vrot.slane %v697_v59, 4  ;;  %v5270_v39 = vld [vmem:[%s6879_s3 + $0x178] sm:$0xff] }
  0xf1   : > { %1589 = vst [vmem:[#allocation3 + $0x2c8] sm:$0xf] %v6109_v1  ;;  %v706_v57 = vrot.slane %v6931_v0, 7  ;;  %v4196_v29 = vrot.slane %v690_v48, 11  ;;  %v5286_v48 = vld [vmem:[%s6879_s3 + $0x1f8] sm:$0xff]  ;;  %3551 = vmatpush.bf16.msra.mxu1 %v5270_v39 }
  0xf2   : > { %3169 = vmatmul.bf16.gmra.mxu2 %v4610_v8  ;;  %1376 = vst [vmem:[#allocation3 + $0x438] sm:$0xf] %v965_v63  ;;  %v700_v42 = vor.u32 %v698_v3, %v697_v59  ;;  %v1011_v8 = vrot.slane %v632_v61, 5  ;;  %v1010_v61 = vrot.slane %v629_v43, 4  ;;  %v5294_v59 = vld [vmem:[%s6879_s3 + $0x238] sm:$0xff]  ;;  %3729 = vmatpush.bf16.msra.mxu3 %v5286_v48  ;;  %v1024_v43 = vrot.slane %v651_v62, 4 }
  0xf3   : > { %1377 = vst [vmem:[#allocation3 + $0x45c] sm:$0xf] %v974_v9  ;;  %v709_v36 = vor.u32 %v6932_v18, %v706_v57  ;;  %v1016_v18 = vrot.slane %v638_v54, 4  ;;  %3818 = vmatpush.bf16.msra.mxu0 %v5294_v59  ;;  %v1028_v54 = vrot.slane %v663_v45, 5  ;;  %v4251_v48 = vld [vmem:[#allocation3 + $0x6c] sm:$0xf0] }
  0xf4   : > { %1408 = vst [vmem:[#allocation3 + $0x43c] sm:$0xf] %v6133_v11  ;;  %v701_v28 = vsel %vm5643_vm2, %v4196_v29, %v700_v42  ;;  %v1012_v33 = vor.u32 %v1011_v8, %v1010_v61  ;;  %v1026_v27 = vor.u32 %v1025_v15, %v1024_v43  ;;  %v4223_v29 = vld [vmem:[#allocation3 + $0x2c] sm:$0xf0]  ;;  %v5088_v42 = vld [vmem:[#allocation3 + $0x4c] sm:$0xf] }
  0xf5   : > { %1409 = vst [vmem:[#allocation3 + $0x460] sm:$0xf] %v6142_v55  ;;  %v710_v14 = vsel %vm5643_vm2, %v702_v19, %v709_v36  ;;  %v1030_v36 = vrot.slane %v660_v22, 4  ;;  %v559_v15 = vld [vmem:[#allocation2 + $0x2c] sm:$0xf] }
  0xf6   : > { %1470 = vst [vmem:[#allocation3 + $0x3fc] sm:$0xf] %v965_v63  ;;  %v1013_v62 = vrot.slane %v1012_v33, 4  ;;  %v1027_v8 = vrot.slane %v1026_v27, 4  ;;  %v1038_v33 = vrot.slane %v673_v52, 4 }
  0xf7   : > { %1471 = vst [vmem:[#allocation3 + $0x420] sm:$0xf] %v974_v9  ;;  %v1031_v17 = vor.u32 %v1030_v36, %v1028_v54  ;;  %v1039_v36 = vrot.slane %v676_v16, 5 }
  0xf8   : > { %1502 = vst [vmem:[#allocation3 + $0x400] sm:$0xf] %v6133_v11  ;;  %v1015_v61 = vsel %vm6252_vm5, %v1013_v62, %v6233_v38  ;;  %v1029_v52 = vsel %vm6252_vm5, %v1027_v8, %v1028_v54  ;;  %v5277_v8 = vld [vmem:[%s6879_s3 + $0x1b0] sm:$0xff] }
  0xf9   : > { %v4753_v25 = vld [vmem:[#allocation3 + $0x438] sm:$0xf]  ;;  %1503 = vst [vmem:[#allocation3 + $0x424] sm:$0xf] %v6142_v55  ;;  %v1032_v59 = vrot.slane %v1031_v17, 4  ;;  %3641 = vmatpush.bf16.msra.mxu2 %v5277_v8  ;;  %v6944_v8 = vshll.u32 %v5627_v24, 16 }
  0xfa   : > { %v5218_v0 = vld [vmem:[#allocation3 + $0x458] sm:$0xf0]  ;;  %1564 = vst [vmem:[#allocation3 + $0x3c0] sm:$0xf] %v965_v63  ;;  %v4229_v17 = vld [vmem:[#allocation3 + $0x10] sm:$0xf] }
  0xfb   : > { %v4754_v57 = vor.u32 %v5218_v0, %v4753_v25  ;;  %1565 = vst [vmem:[#allocation3 + $0x3e4] sm:$0xf] %v974_v9  ;;  %v551_v25 = vld [vmem:[#allocation2 + $0xc] sm:$0xf]  ;;  %v555_v63 = vld [vmem:[#allocation2 + $0x1c] sm:$0xf] }
  0xfc   : > { %1596 = vst [vmem:[#allocation3 + $0x3c4] sm:$0xf] %v6133_v11  ;;  %3203 = vmatmul.bf16.vlgmr.msrb.gmra.mxu1 %v4218_v26  ;;  %v1017_v26 = vor.u32 %v1016_v18, %v6233_v38  ;;  %v1020_v9 = vshll.u32 %v551_v25, 16  ;;  %v1034_v0 = vshll.u32 %v555_v63, 16  ;;  %v5080_v18 = vld [vmem:[#allocation3 + $0xc] sm:$0xf]  ;;  %v1040_v63 = vor.u32 %v1039_v36, %v1038_v33 }
  0xfd   : > { %3189 = vmatmul.bf16.gmra.mxu3 %v4754_v57  ;;  %1597 = vst [vmem:[#allocation3 + $0x3e8] sm:$0xf] %v6142_v55  ;;  %v1042_v38 = vrot.slane %v685_v60, 5 }
  0xfe   : > { %1352 = vst [vmem:[#allocation3 + $0xd8] sm:$0xf] %v701_v28  ;;  %v1018_v22 = vrot.slane %v1017_v26, 4  ;;  %v1022_v45 = vrot.slane %v1020_v9, 5  ;;  %v1036_v57 = vrot.slane %v1034_v0, 5  ;;  %v1044_v26 = vrot.slane %v682_v12, 4 }
  0xff   : > { %1353 = vst [vmem:[#allocation3 + $0xfc] sm:$0xf] %v710_v14  ;;  %v4226_v9 = vor.u32 %v5080_v18, %v4223_v29  ;;  %v1041_v60 = vrot.slane %v1040_v63, 4  ;;  %v5097_v18 = vld [vmem:[#allocation3 + $0x94] sm:$0xf] }
 0x100   : > { %1384 = vst [vmem:[#allocation3 + $0xdc] sm:$0xf] %v6180_v49  ;;  %v1023_v43 = vsel %vm6252_vm5, %v1018_v22, %v1022_v45  ;;  %v1037_v10 = vsel %vm6252_vm5, %v1032_v59, %v1036_v57  ;;  %v1045_v16 = vor.u32 %v1044_v26, %v1042_v38  ;;  %v5085_v22 = vld [vmem:[#allocation3 + $0x30] sm:$0xf0]  ;;  %v563_v59 = vld [vmem:[#allocation2 + $0x3c] sm:$0xf] }
 0x101   : > { %1385 = vst [vmem:[#allocation3 + $0x100] sm:$0xf] %v6183_v34  ;;  %v1043_v12 = vsel %vm6252_vm5, %v1041_v60, %v1042_v38  ;;  %v4230_v29 = vor.u32 %v5085_v22, %v4229_v17  ;;  %v6940_v57 = vshll.u32 %v6183_v34, 16  ;;  %v4265_v60 = vld [vmem:[#allocation3 + $0x58] sm:$0xf]  ;;  %v6942_v22 = vshrl.u32 %v5624_v23, 16 }
 0x102   : > { %1446 = vst [vmem:[#allocation3 + $0x9c] sm:$0xf] %v701_v28  ;;  %v1046_v30 = vrot.slane %v1045_v16, 4 }
 0x103   : > { %1447 = vst [vmem:[#allocation3 + $0xc0] sm:$0xf] %v710_v14 }
 0x104   : > { %1478 = vst [vmem:[#allocation3 + $0xa0] sm:$0xf] %v6180_v49 }
 0x105   : > { %v4321_v19 = vld [vmem:[#allocation3 + $0xd8] sm:$0xf]  ;;  %1479 = vst [vmem:[#allocation3 + $0xc4] sm:$0xf] %v6183_v34 }
 0x106   : > { %v5110_v39 = vld [vmem:[#allocation3 + $0xf8] sm:$0xf0]  ;;  %1540 = vst [vmem:[#allocation3 + $0x60] sm:$0xf] %v701_v28  ;;  %v4254_v28 = vor.u32 %v5088_v42, %v4251_v48  ;;  %v4287_v42 = vld [vmem:[#allocation3 + $0xb4] sm:$0xf0] }
 0x107   : > { %v4322_v25 = vor.u32 %v5110_v39, %v4321_v19  ;;  %1541 = vst [vmem:[#allocation3 + $0x84] sm:$0xf] %v710_v14  ;;  %v1048_v14 = vshll.u32 %v559_v15, 16  ;;  %v5089_v19 = vld [vmem:[#allocation3 + $0x54] sm:$0xf]  ;;  %v1052_v39 = vrot.slane %v695_v7, 4  ;;  %v4290_v33 = vor.u32 %v5097_v18, %v4287_v42 }
 0x108   : > { %1572 = vst [vmem:[#allocation3 + $0x64] sm:$0xf] %v6180_v49  ;;  %v4259_v48 = vld [vmem:[#allocation3 + $0x74] sm:$0xf0]  ;;  %v5285_v7 = vld [vmem:[%s6879_s3 + $0x1f0] sm:$0xff]  ;;  %v6943_v18 = vshll.u32 %v5624_v23, 16 }
 0x109   : > { %3129 = vmatmul.bf16.gmra.mxu0 %v4322_v25  ;;  %1573 = vst [vmem:[#allocation3 + $0x88] sm:$0xf] %v6183_v34  ;;  %v1050_v27 = vrot.slane %v1048_v14, 5  ;;  %v1056_v25 = vrot.slane %v6940_v57, 5  ;;  %v4262_v38 = vor.u32 %v5089_v19, %v4259_v48  ;;  %v5269_v49 = vld [vmem:[%s6879_s3 + $0x170] sm:$0xff]  ;;  %3730 = vmatpush.bf16.msra.mxu3 %v5285_v7  ;;  %v1070_v19 = vrot.slane %v6944_v8, 5  ;;  %v6317_v7 = vpop.f32.mrf.mxu1 }
 0x10a   : > { %1410 = vst [vmem:[#allocation3 + $0x8] sm:$0xf] %v1015_v61  ;;  %v1053_v61 = vrot.slane %v698_v3, 5  ;;  %v5293_v3 = vld [vmem:[%s6879_s3 + $0x230] sm:$0xff]  ;;  %3552 = vmatpush.bf16.msra.mxu1 %v5269_v49  ;;  %v5098_v17 = vld [vmem:[#allocation3 + $0x9c] sm:$0xf] }
 0x10b   : > { %1411 = vst [vmem:[#allocation3 + $0x2c] sm:$0xf] %v1023_v43  ;;  %v1051_v54 = vsel %vm6252_vm5, %v1046_v30, %v1050_v27  ;;  %v6941_v43 = vshrl.u32 %v6183_v34, 16  ;;  %3819 = vmatpush.bf16.msra.mxu0 %v5293_v3  ;;  %v5094_v30 = vld [vmem:[#allocation3 + $0x78] sm:$0xf0]  ;;  %v6945_v48 = vshrl.u32 %v5627_v24, 16 }
 0x10c   : > { %3208 = vmatmul.bf16.gmra.mxu1 %v4254_v28  ;;  %1412 = vst [vmem:[#allocation3 + $0x50] sm:$0xf] %v1029_v52  ;;  %v1054_v36 = vor.u32 %v1053_v61, %v1052_v39  ;;  %v1062_v28 = vshll.u32 %v563_v59, 16  ;;  %v567_v42 = vld [vmem:[#allocation2 + $0x4c] sm:$0xf] }
 0x10d   : > { %3381 = vmatmul.bf16.vlgmr.msrb.gmra.mxu3 %v4226_v9  ;;  %1413 = vst [vmem:[#allocation3 + $0x74] sm:$0xf] %v1037_v10  ;;  %v1058_v15 = vrot.slane %v6941_v43, 4  ;;  %v1072_v39 = vrot.slane %v6945_v48, 4  ;;  %v1076_v57 = vshll.u32 %v567_v42, 16  ;;  %v5284_v42 = vld [vmem:[%s6879_s3 + $0x1e8] sm:$0xff] }
 0x10e   : > { %1506 = vst [vmem:[#allocation3 + $0x14] sm:$0xf] %v1029_v52  ;;  %v1055_v34 = vrot.slane %v1054_v36, 4  ;;  %v1064_v14 = vrot.slane %v1062_v28, 5  ;;  %v4301_v3 = vld [vmem:[#allocation3 + $0xa0] sm:$0xf]  ;;  %3731 = vmatpush.bf16.msra.mxu3 %v5284_v42 }
 0x10f   : > { %1507 = vst [vmem:[#allocation3 + $0x38] sm:$0xf] %v1037_v10  ;;  %v1059_v26 = vor.u32 %v1058_v15, %v1056_v25  ;;  %v1073_v43 = vor.u32 %v1072_v39, %v1070_v19  ;;  %v5292_v8 = vld [vmem:[%s6879_s3 + $0x228] sm:$0xff] }
 0x110   : > { %1414 = vst [vmem:[#allocation3 + $0x98] sm:$0xf] %v1043_v12  ;;  %v1057_v52 = vsel %vm6252_vm5, %v1055_v34, %v1056_v25  ;;  %v5107_v34 = vld [vmem:[#allocation3 + $0xe4] sm:$0xf]  ;;  %3820 = vmatpush.bf16.msra.mxu0 %v5292_v8 }
 0x111   : > { %v4221_v62 = vld [vmem:[#allocation3 + $0x8] sm:$0xf]  ;;  %1415 = vst [vmem:[#allocation3 + $0xbc] sm:$0xf] %v1051_v54  ;;  %v1060_v9 = vrot.slane %v1059_v26, 4  ;;  %v1074_v36 = vrot.slane %v1073_v43, 4 }
 0x112   : > { %v5084_v0 = vld [vmem:[#allocation3 + $0x28] sm:$0xf0]  ;;  %1602 = vst [vmem:[#allocation3 + $0x20] sm:$0xf] %v1043_v12  ;;  %v5103_v26 = vld [vmem:[#allocation3 + $0xc0] sm:$0xf0] }
 0x113   : > { %v4222_v45 = vor.u32 %v5084_v0, %v4221_v62  ;;  %1603 = vst [vmem:[#allocation3 + $0x44] sm:$0xf] %v1051_v54  ;;  %v1065_v63 = vsel %vm6252_vm5, %v1060_v9, %v1064_v14  ;;  %v4257_v10 = vld [vmem:[#allocation3 + $0x50] sm:$0xf]  ;;  %v4323_v62 = vld [vmem:[#allocation3 + $0xfc] sm:$0xf0]  ;;  %v4302_v14 = vor.u32 %v5103_v26, %v4301_v3 }
 0x114   : > { %1508 = vst [vmem:[#allocation3 + $0x5c] sm:$0xf] %v1043_v12  ;;  %v5093_v16 = vld [vmem:[#allocation3 + $0x70] sm:$0xf0]  ;;  %v4266_v12 = vor.u32 %v5094_v30, %v4265_v60  ;;  %v4295_v0 = vld [vmem:[#allocation3 + $0xbc] sm:$0xf0] }
 0x115   : > { %3292 = vmatmul.bf16.vlgmr.msrb.gmra.mxu2 %v4222_v45  ;;  %1509 = vst [vmem:[#allocation3 + $0x80] sm:$0xf] %v1051_v54  ;;  %v4258_v27 = vor.u32 %v5093_v16, %v4257_v10  ;;  %v5106_v54 = vld [vmem:[#allocation3 + $0xdc] sm:$0xf]  ;;  %v1066_v45 = vrot.slane %v6942_v22, 4  ;;  %v4298_v25 = vor.u32 %v5098_v17, %v4295_v0  ;;  %v6946_v16 = vshrl.u32 %v5810_v40, 16 }
 0x116   : > { %1416 = vst [vmem:[#allocation3 + $0xe0] sm:$0xf] %v1057_v52  ;;  %v4326_v61 = vor.u32 %v5106_v54, %v4323_v62  ;;  %v5115_v9 = vld [vmem:[#allocation3 + $0x124] sm:$0xf]  ;;  %v4331_v10 = vld [vmem:[#allocation3 + $0x104] sm:$0xf0] }
 0x117   : > { %1417 = vst [vmem:[#allocation3 + $0x104] sm:$0xf] %v1065_v63  ;;  %v4293_v24 = vld [vmem:[#allocation3 + $0x98] sm:$0xf]  ;;  %v6947_v60 = vshll.u32 %v5810_v40, 16  ;;  %v6949_v17 = vshrl.u32 %v5812_v46, 16 }
 0x118   : > { %1510 = vst [vmem:[#allocation3 + $0xa4] sm:$0xf] %v1057_v52  ;;  %v571_v62 = vld [vmem:[#allocation2 + $0x5c] sm:$0xf]  ;;  %v5268_v40 = vld [vmem:[%s6879_s3 + $0x168] sm:$0xff] }
 0x119   : > { %3470 = vmatmul.bf16.vlgmr.msrb.gmra.mxu0 %v4230_v29  ;;  %1511 = vst [vmem:[#allocation3 + $0xc8] sm:$0xf] %v1065_v63  ;;  %v1067_v29 = vrot.slane %v6943_v18, 5  ;;  %v1081_v30 = vrot.slane %v6947_v60, 5  ;;  %v1086_v0 = vrot.slane %v6949_v17, 4  ;;  %v1090_v18 = vshll.u32 %v571_v62, 16  ;;  %3553 = vmatpush.bf16.msra.mxu1 %v5268_v40 }
 0x11a   : > { %1604 = vst [vmem:[#allocation3 + $0x68] sm:$0xf] %v1057_v52  ;;  %v4359_v52 = vld [vmem:[#allocation3 + $0x144] sm:$0xf0]  ;;  %v5116_v3 = vld [vmem:[#allocation3 + $0x12c] sm:$0xf] }
 0x11b   : > { %1605 = vst [vmem:[#allocation3 + $0x8c] sm:$0xf] %v1065_v63  ;;  %v1068_v59 = vor.u32 %v1067_v29, %v1066_v45  ;;  %v5276_v63 = vld [vmem:[%s6879_s3 + $0x1a8] sm:$0xff]  ;;  %v4362_v22 = vor.u32 %v5115_v9, %v4359_v52  ;;  %v4334_v29 = vor.u32 %v5107_v34, %v4331_v10  ;;  %v1092_v39 = vrot.slane %v1090_v18, 5  ;;  %v4367_v26 = vld [vmem:[#allocation3 + $0x14c] sm:$0xf0] }
 0x11c   : > { %3213 = vmatmul.bf16.gmra.mxu1 %v4290_v33  ;;  %v1078_v33 = vrot.slane %v1076_v57, 5  ;;  %3642 = vmatpush.bf16.msra.mxu2 %v5276_v63  ;;  %v6950_v34 = vshrl.u32 %v5956_v21, 16  ;;  %v6951_v9 = vshll.u32 %v5956_v21, 16  ;;  %v575_v63 = vld [vmem:[#allocation2 + $0x6c] sm:$0xf]  ;;  %v6952_v10 = vshll.u32 %v5958_v56, 16 }
 0x11d   : > { %3386 = vmatmul.bf16.gmra.mxu3 %v4262_v38  ;;  %v1069_v15 = vrot.slane %v1068_v59, 4  ;;  %v5102_v38 = vld [vmem:[#allocation3 + $0xb8] sm:$0xf0]  ;;  %v1104_v62 = vshll.u32 %v575_v63, 16  ;;  %v4370_v17 = vor.u32 %v5116_v3, %v4367_v26  ;;  %v6956_v26 = vshll.u32 %v6094_v50, 16 }
 0x11e   : > { %v1079_v28 = vsel %vm6252_vm5, %v1074_v36, %v1078_v33  ;;  %v4294_v49 = vor.u32 %v5102_v38, %v4293_v24  ;;  %v5111_v43 = vld [vmem:[#allocation3 + $0x100] sm:$0xf0]  ;;  %v4337_v33 = vld [vmem:[#allocation3 + $0xe8] sm:$0xf]  ;;  %v5112_v36 = vld [vmem:[#allocation3 + $0x108] sm:$0xf0] }
 0x11f   : > { %v1071_v23 = vsel %vm6252_vm5, %v1069_v15, %v1070_v19  ;;  %1419 = vst [vmem:[#allocation3 + $0x14c] sm:$0xf] %v1079_v28  ;;  %v4338_v24 = vor.u32 %v5112_v36, %v4337_v33  ;;  %v5124_v38 = vld [vmem:[#allocation3 + $0x16c] sm:$0xf]  ;;  %v1095_v52 = vrot.slane %v6951_v9, 5  ;;  %v1106_v21 = vrot.slane %v1104_v62, 5 }
 0x120   : > { %1418 = vst [vmem:[#allocation3 + $0x128] sm:$0xf] %v1071_v23  ;;  %v5133_v33 = vld [vmem:[#allocation3 + $0x1b4] sm:$0xf]  ;;  %v4431_v36 = vld [vmem:[#allocation3 + $0x1d4] sm:$0xf0] }
 0x121   : > { %1512 = vst [vmem:[#allocation3 + $0xec] sm:$0xf] %v1071_v23  ;;  %v6958_v63 = vshrl.u32 %v6096_v41, 16  ;;  %v5267_v62 = vld [vmem:[%s6879_s3 + $0x160] sm:$0xff] }
 0x122   : > { %1513 = vst [vmem:[#allocation3 + $0x110] sm:$0xf] %v1079_v28  ;;  %3554 = vmatpush.bf16.msra.mxu1 %v5267_v62 }
 0x123   : > { %1606 = vst [vmem:[#allocation3 + $0xb0] sm:$0xf] %v1071_v23 }
 0x124   : > { %1607 = vst [vmem:[#allocation3 + $0xd4] sm:$0xf] %v1079_v28  ;;  %v6347_v28 = vpop.f32.mrf.mxu3 }
 0x125   : > { %3297 = vmatmul.bf16.gmra.mxu2 %v4258_v27  ;;  %v1080_v27 = vrot.slane %v6946_v16, 4  ;;  %v1098_v16 = vrot.slane %v6952_v10, 5  ;;  %v1114_v10 = vrot.slane %v6958_v63, 4  ;;  %v6963_v63 = vshll.u32 %v5700_v6, 16 }
 0x126   : > { %v5120_v8 = vld [vmem:[#allocation3 + $0x148] sm:$0xf0] }
 0x127   : > { %v1082_v45 = vor.u32 %v1081_v30, %v1080_v27  ;;  %v6953_v27 = vshrl.u32 %v5958_v56, 16  ;;  %v6357_v30 = vpop.f32.mrf.mxu2  ;;  %v4365_v40 = vld [vmem:[#allocation3 + $0x128] sm:$0xf] }
 0x129   : > { %3475 = vmatmul.bf16.gmra.mxu0 %v4266_v12  ;;  %v6948_v12 = vshll.u32 %v5812_v46, 16  ;;  %v6339_v46 = vpop.f32.mrf.mxu1  ;;  %v1083_v48 = vrot.slane %v1082_v45, 4  ;;  %v1100_v60 = vrot.slane %v6953_v27, 4  ;;  %v4434_v27 = vor.u32 %v5133_v33, %v4431_v36 }
 0x12a   : > { %v6961_v36 = vshll.u32 %v5698_v5, 16 }
 0x12b   : > { %v1084_v54 = vrot.slane %v6948_v12, 5 }
 0x12c   : > { %3218 = vmatmul.bf16.gmra.mxu1 %v4326_v61 }
 0x12d   : > { %3391 = vmatmul.bf16.gmra.mxu3 %v4298_v25  ;;  %v1087_v19 = vor.u32 %v1086_v0, %v1084_v54  ;;  %v1085_v59 = vsel %vm6252_vm5, %v1083_v48, %v1084_v54  ;;  %v4329_v25 = vld [vmem:[#allocation3 + $0xe0] sm:$0xf]  ;;  %v1101_v0 = vor.u32 %v1100_v60, %v1098_v16  ;;  %v4366_v48 = vor.u32 %v5120_v8, %v4365_v40 }
 0x12e   : > { %1420 = vst [vmem:[#allocation3 + $0x170] sm:$0xf] %v1085_v59  ;;  %v4330_v15 = vor.u32 %v5111_v43, %v4329_v25  ;;  %v5125_v25 = vld [vmem:[#allocation3 + $0x174] sm:$0xf] }
 0x12f   : > { %v1088_v61 = vrot.slane %v1087_v19, 4  ;;  %1514 = vst [vmem:[#allocation3 + $0x134] sm:$0xf] %v1085_v59  ;;  %v6367_v19 = vpop.f32.mrf.mxu3 }
 0x130   : > { %1608 = vst [vmem:[#allocation3 + $0xf8] sm:$0xf] %v1085_v59  ;;  %v6369_v59 = vpop.f32.mrf.mxu2 }
 0x131   : > { %v1093_v57 = vsel %vm6252_vm5, %v1088_v61, %v1092_v39  ;;  %v6345_v23 = vpop.f32.mrf.mxu1  ;;  %6954 = vst [vmem:[#allocation4_spill] sm:$0xff] %v6367_v19  ;;  %v4373_v39 = vld [vmem:[#allocation3 + $0x130] sm:$0xf]  ;;  %v5121_v61 = vld [vmem:[#allocation3 + $0x150] sm:$0xf0] }
 0x132   : > { %1421 = vst [vmem:[#allocation3 + $0x194] sm:$0xf] %v1093_v57  ;;  %v4374_v43 = vor.u32 %v5121_v61, %v4373_v39 }
 0x133   : > { %1515 = vst [vmem:[#allocation3 + $0x158] sm:$0xf] %v1093_v57 }
 0x134   : > { %1609 = vst [vmem:[#allocation3 + $0x11c] sm:$0xf] %v1093_v57 }
 0x135   : > { %3302 = vmatmul.bf16.gmra.mxu2 %v4294_v49  ;;  %v4395_v49 = vld [vmem:[#allocation3 + $0x18c] sm:$0xf0] }
 0x136   : > { %v4398_v12 = vor.u32 %v5124_v38, %v4395_v49  ;;  %v4403_v38 = vld [vmem:[#allocation3 + $0x194] sm:$0xf0]  ;;  %v6955_v49 = vshrl.u32 %v6094_v50, 16  ;;  %v5283_v50 = vld [vmem:[%s6879_s3 + $0x1e0] sm:$0xff]  ;;  %v4401_v8 = vld [vmem:[#allocation3 + $0x170] sm:$0xf] }
 0x137   : > { %3732 = vmatpush.bf16.msra.mxu3 %v5283_v50 }
 0x138   : > { %v1108_v3 = vrot.slane %v6955_v49, 4  ;;  %v5142_v49 = vld [vmem:[#allocation3 + $0x1fc] sm:$0xf] }
 0x139   : > { %3480 = vmatmul.bf16.gmra.mxu0 %v4302_v14  ;;  %v1094_v14 = vrot.slane %v6950_v34, 4  ;;  %v6361_v18 = vpop.f32.mrf.mxu1  ;;  %v1109_v34 = vrot.slane %v6956_v26, 5 }
 0x13b   : > { %v1096_v54 = vor.u32 %v1095_v52, %v1094_v14  ;;  %v6957_v14 = vshll.u32 %v6096_v41, 16  ;;  %v579_v52 = vld [vmem:[#allocation2 + $0x7c] sm:$0xf]  ;;  %v1110_v60 = vor.u32 %v1109_v34, %v1108_v3  ;;  %v5291_v41 = vld [vmem:[%s6879_s3 + $0x220] sm:$0xff] }
 0x13c   : > { %3223 = vmatmul.bf16.gmra.mxu1 %v4362_v22  ;;  %v6359_v22 = vpop.f32.mrf.mxu0  ;;  %3821 = vmatpush.bf16.msra.mxu0 %v5291_v41  ;;  %v4467_v3 = vld [vmem:[#allocation3 + $0x21c] sm:$0xf0]  ;;  %v5134_v34 = vld [vmem:[#allocation3 + $0x1bc] sm:$0xf] }
 0x13d   : > { %3396 = vmatmul.bf16.gmra.mxu3 %v4334_v29  ;;  %v1097_v45 = vrot.slane %v1096_v54, 4  ;;  %v1102_v29 = vrot.slane %v1101_v0, 4  ;;  %v1112_v9 = vrot.slane %v6957_v14, 5  ;;  %v4406_v54 = vor.u32 %v5125_v25, %v4403_v38  ;;  %v4409_v25 = vld [vmem:[#allocation3 + $0x178] sm:$0xf] }
 0x13e   : > { %v1111_v0 = vrot.slane %v1110_v60, 4  ;;  %v4439_v14 = vld [vmem:[#allocation3 + $0x1dc] sm:$0xf0]  ;;  %v6964_v60 = vshrl.u32 %v5700_v6, 16  ;;  %v4470_v50 = vor.u32 %v5142_v49, %v4467_v3  ;;  %v5139_v49 = vld [vmem:[#allocation3 + $0x1e0] sm:$0xf0] }
 0x13f   : > { %v1099_v56 = vsel %vm6252_vm5, %v1097_v45, %v1098_v16  ;;  %v1107_v42 = vsel %vm6252_vm5, %v1102_v29, %v1106_v21  ;;  %v6386_v16 = vpop.f32.mrf.mxu3  ;;  %v6397_v29 = vpop.f32.mrf.mxu2  ;;  %v6966_v3 = vshll.u32 %v5820_v51, 16 }
 0x140   : > { %1422 = vst [vmem:[#allocation3 + $0x1b8] sm:$0xf] %v1099_v56 }
 0x141   : > { %1423 = vst [vmem:[#allocation3 + $0x1dc] sm:$0xf] %v1107_v42 }
 0x142   : > { %1516 = vst [vmem:[#allocation3 + $0x17c] sm:$0xf] %v1099_v56 }
 0x143   : > { %1517 = vst [vmem:[#allocation3 + $0x1a0] sm:$0xf] %v1107_v42 }
 0x144   : > { %1610 = vst [vmem:[#allocation3 + $0x140] sm:$0xf] %v1099_v56  ;;  %v6371_v57 = vpop.f32.mrf.mxu0  ;;  %v1113_v56 = vsel %vm6252_vm5, %v1111_v0, %v1112_v9 }
 0x145   : > { %3307 = vmatmul.bf16.gmra.mxu2 %v4330_v15  ;;  %1611 = vst [vmem:[#allocation3 + $0x164] sm:$0xf] %v1107_v42  ;;  %v6373_v15 = vpop.f32.mrf.mxu1 }
 0x146   : > { %6959 = vst [vmem:[#allocation5_spill] sm:$0xff] %v6386_v16 }
 0x147   : > { %1424 = vst [vmem:[#allocation3 + $0x200] sm:$0xf] %v1113_v56  ;;  %v6407_v33 = vpop.f32.mrf.mxu3  ;;  %v6411_v26 = vpop.f32.mrf.mxu2 }
 0x148   : > { %1518 = vst [vmem:[#allocation3 + $0x1c4] sm:$0xf] %v1113_v56 }
 0x149   : > { %3485 = vmatmul.bf16.gmra.mxu0 %v4338_v24  ;;  %v5275_v24 = vld [vmem:[%s6879_s3 + $0x1a0] sm:$0xff]  ;;  %1612 = vst [vmem:[#allocation3 + $0x188] sm:$0xf] %v1113_v56 }
 0x14a   : > { %3643 = vmatpush.bf16.msra.mxu2 %v5275_v24  ;;  %6960 = vst [vmem:[#allocation6_spill] sm:$0xff] %v6407_v33  ;;  %v1123_v24 = vrot.slane %v6961_v36, 5 }
 0x14c   : > { %3228 = vmatmul.bf16.gmra.mxu1 %v4398_v12  ;;  %v1118_v12 = vshll.u32 %v579_v52, 16  ;;  %v6403_v40 = vpop.f32.mrf.mxu0 }
 0x14d   : > { %3401 = vmatmul.bf16.gmra.mxu3 %v4370_v17  ;;  %v1115_v17 = vor.u32 %v1114_v10, %v1112_v9  ;;  %v6405_v39 = vpop.f32.mrf.mxu1  ;;  %v6962_v9 = vshrl.u32 %v5698_v5, 16  ;;  %v1126_v10 = vrot.slane %v6963_v63, 5 }
 0x14e   : > { %v1120_v45 = vrot.slane %v1118_v12, 5  ;;  %v1128_v12 = vrot.slane %v6964_v60, 4  ;;  %v5274_v60 = vld [vmem:[%s6879_s3 + $0x198] sm:$0xff] }
 0x14f   : > { %v1116_v21 = vrot.slane %v1115_v17, 4  ;;  %v1122_v52 = vrot.slane %v6962_v9, 4  ;;  %v4442_v17 = vor.u32 %v5134_v34, %v4439_v14  ;;  %v1137_v34 = vrot.slane %v6966_v3, 5  ;;  %v5151_v9 = vld [vmem:[#allocation3 + $0x244] sm:$0xf]  ;;  %3644 = vmatpush.bf16.msra.mxu2 %v5274_v60  ;;  %v5266_v3 = vld [vmem:[%s6879_s3 + $0x158] sm:$0xff] }
 0x150   : > { %3555 = vmatpush.bf16.msra.mxu1 %v5266_v3 }
 0x151   : > { %v1121_v42 = vsel %vm6252_vm5, %v1116_v21, %v1120_v45  ;;  %v1124_v62 = vor.u32 %v1123_v24, %v1122_v52  ;;  %v1129_v45 = vor.u32 %v1128_v12, %v1126_v10  ;;  %v4503_v52 = vld [vmem:[#allocation3 + $0x264] sm:$0xf0]  ;;  %v6968_v12 = vshrl.u32 %v5820_v51, 16 }
 0x152   : > { %1425 = vst [vmem:[#allocation3 + $0x224] sm:$0xf] %v1121_v42 }
 0x153   : > { %1519 = vst [vmem:[#allocation3 + $0x1e8] sm:$0xf] %v1121_v42  ;;  %v1125_v21 = vrot.slane %v1124_v62, 4  ;;  %v1130_v56 = vrot.slane %v1129_v45, 4  ;;  %v587_v62 = vld [vmem:[#allocation2 + $0x9c] sm:$0xf] }
 0x154   : > { %1613 = vst [vmem:[#allocation3 + $0x1ac] sm:$0xf] %v1121_v42  ;;  %v6423_v42 = vpop.f32.mrf.mxu3  ;;  %v6970_v45 = vshrl.u32 %v5825_v53, 16 }
 0x155   : > { %3312 = vmatmul.bf16.gmra.mxu2 %v4366_v48  ;;  %v5129_v48 = vld [vmem:[#allocation3 + $0x190] sm:$0xf0]  ;;  %6965 = vst [vmem:[#allocation7_spill] sm:$0xff] %v6423_v42  ;;  %v1127_v6 = vsel %vm6252_vm5, %v1125_v21, %v1126_v10  ;;  %v5143_v10 = vld [vmem:[#allocation3 + $0x204] sm:$0xf] }
 0x156   : > { %v4402_v61 = vor.u32 %v5129_v48, %v4401_v8  ;;  %1426 = vst [vmem:[#allocation3 + $0x248] sm:$0xf] %v1127_v6  ;;  %v4437_v48 = vld [vmem:[#allocation3 + $0x1b8] sm:$0xf]  ;;  %v1142_v21 = vrot.slane %v6970_v45, 4 }
 0x157   : > { %1520 = vst [vmem:[#allocation3 + $0x20c] sm:$0xf] %v1127_v6 }
 0x158   : > { %1614 = vst [vmem:[#allocation3 + $0x1d0] sm:$0xf] %v1127_v6  ;;  %v1146_v6 = vshll.u32 %v587_v62, 16  ;;  %v4481_v62 = vld [vmem:[#allocation3 + $0x208] sm:$0xf] }
 0x159   : > { %3490 = vmatmul.bf16.gmra.mxu0 %v4374_v43  ;;  %v5130_v43 = vld [vmem:[#allocation3 + $0x198] sm:$0xf0] }
 0x15a   : > { %v4410_v38 = vor.u32 %v5130_v43, %v4409_v25  ;;  %v6429_v25 = vpop.f32.mrf.mxu2 }
 0x15c   : > { %3233 = vmatmul.bf16.gmra.mxu1 %v4434_v27  ;;  %v583_v27 = vld [vmem:[#allocation2 + $0x8c] sm:$0xf]  ;;  %v6437_v63 = vpop.f32.mrf.mxu3 }
 0x15d   : > { %3406 = vmatmul.bf16.gmra.mxu3 %v4406_v54  ;;  %v6419_v54 = vpop.f32.mrf.mxu0  ;;  %v1132_v41 = vshll.u32 %v583_v27, 16  ;;  %6967 = vst [vmem:[#allocation8_spill] sm:$0xff] %v6437_v63  ;;  %v4475_v27 = vld [vmem:[#allocation3 + $0x224] sm:$0xf0] }
 0x15f   : > { %v1134_v5 = vrot.slane %v1132_v41, 5  ;;  %v6969_v41 = vshll.u32 %v5825_v53, 16  ;;  %v1148_v53 = vrot.slane %v1146_v6, 5  ;;  %v4539_v6 = vld [vmem:[#allocation3 + $0x2ac] sm:$0xf0] }
 0x161   : > { %v1135_v8 = vsel %vm6252_vm5, %v1130_v56, %v1134_v5  ;;  %v4506_v5 = vor.u32 %v5151_v9, %v4503_v52  ;;  %v4473_v52 = vld [vmem:[#allocation3 + $0x200] sm:$0xf] }
 0x162   : > { %1427 = vst [vmem:[#allocation3 + $0x26c] sm:$0xf] %v1135_v8 }
 0x163   : > { %1521 = vst [vmem:[#allocation3 + $0x230] sm:$0xf] %v1135_v8 }
 0x164   : > { %1615 = vst [vmem:[#allocation3 + $0x1f4] sm:$0xf] %v1135_v8  ;;  %v4478_v8 = vor.u32 %v5143_v10, %v4475_v27  ;;  %v5147_v10 = vld [vmem:[#allocation3 + $0x220] sm:$0xf0]  ;;  %v5290_v27 = vld [vmem:[%s6879_s3 + $0x218] sm:$0xff] }
 0x165   : > { %3317 = vmatmul.bf16.gmra.mxu2 %v4402_v61  ;;  %v5138_v61 = vld [vmem:[#allocation3 + $0x1d8] sm:$0xf0]  ;;  %v6433_v24 = vpop.f32.mrf.mxu0  ;;  %3822 = vmatpush.bf16.msra.mxu0 %v5290_v27 }
 0x166   : > { %v4438_v43 = vor.u32 %v5138_v61, %v4437_v48  ;;  %v5282_v61 = vld [vmem:[%s6879_s3 + $0x1d8] sm:$0xff] }
 0x167   : > { %3733 = vmatpush.bf16.msra.mxu3 %v5282_v61  ;;  %v4511_v61 = vld [vmem:[#allocation3 + $0x26c] sm:$0xf0] }
 0x169   : > { %3495 = vmatmul.bf16.gmra.mxu0 %v4410_v38  ;;  %v6421_v0 = vpop.f32.mrf.mxu1  ;;  %v4445_v38 = vld [vmem:[#allocation3 + $0x1c0] sm:$0xf] }
 0x16a   : > { %v4446_v14 = vor.u32 %v5139_v49, %v4445_v38 }
 0x16c   : > { %3238 = vmatmul.bf16.gmra.mxu1 %v4470_v50  ;;  %v1136_v50 = vrot.slane %v6968_v12, 4  ;;  %v4474_v12 = vor.u32 %v5147_v10, %v4473_v52 }
 0x16d   : > { %3411 = vmatmul.bf16.gmra.mxu3 %v4442_v17  ;;  %v1140_v17 = vrot.slane %v6969_v41, 5  ;;  %v5148_v41 = vld [vmem:[#allocation3 + $0x228] sm:$0xf0] }
 0x16e   : > { %v1138_v56 = vor.u32 %v1137_v34, %v1136_v50 }
 0x16f   : > { %v1143_v51 = vor.u32 %v1142_v21, %v1140_v17 }
 0x170   : > { %v1139_v49 = vrot.slane %v1138_v56, 4  ;;  %v5160_v56 = vld [vmem:[#allocation3 + $0x28c] sm:$0xf] }
 0x171   : > { %v6431_v36 = vpop.f32.mrf.mxu1  ;;  %v1144_v34 = vrot.slane %v1143_v51, 4  ;;  %v6973_v51 = vshrl.u32 %v5966_v2, 16  ;;  %v4542_v10 = vor.u32 %v5160_v56, %v4539_v6  ;;  %v4509_v6 = vld [vmem:[#allocation3 + $0x248] sm:$0xf] }
 0x172   : > { %v1141_v9 = vsel %vm6252_vm5, %v1139_v49, %v1140_v17  ;;  %v6972_v17 = vshll.u32 %v5966_v2, 16 }
 0x173   : > { %1428 = vst [vmem:[#allocation3 + $0x290] sm:$0xf] %v1141_v9  ;;  %v1150_v49 = vrot.slane %v6973_v51, 4 }
 0x174   : > { %1522 = vst [vmem:[#allocation3 + $0x254] sm:$0xf] %v1141_v9  ;;  %v1151_v45 = vrot.slane %v6972_v17, 5 }
 0x175   : > { %3322 = vmatmul.bf16.gmra.mxu2 %v4438_v43  ;;  %v6451_v43 = vpop.f32.mrf.mxu2  ;;  %1616 = vst [vmem:[#allocation3 + $0x218] sm:$0xf] %v1141_v9  ;;  %v6975_v9 = vshrl.u32 %v5971_v4, 16 }
 0x176   : > { %v1152_v27 = vor.u32 %v1151_v45, %v1150_v49 }
 0x177   : > { %v1156_v52 = vrot.slane %v6975_v9, 4 }
 0x178   : > { %v1153_v2 = vrot.slane %v1152_v27, 4 }
 0x179   : > { %3500 = vmatmul.bf16.gmra.mxu0 %v4446_v14  ;;  %v3204_v48 = vpop.f32.mrf.mxu1  ;;  %v6459_v14 = vpop.f32.mrf.mxu0 }
 0x17a   : > { %v6454_v38 = vadd.f32 %v3204_v48, %v6359_v22  ;;  %v1149_v22 = vsel %vm6252_vm5, %v1144_v34, %v1148_v53  ;;  %v5152_v48 = vld [vmem:[#allocation3 + $0x24c] sm:$0xf]  ;;  %v6974_v53 = vshll.u32 %v5971_v4, 16 }
 0x17b   : > { %1429 = vst [vmem:[#allocation3 + $0x2b4] sm:$0xf] %v1149_v22  ;;  %v591_v34 = vld [vmem:[#allocation2 + $0xac] sm:$0xf] }
 0x17c   : > { %3243 = vmatmul.bf16.gmra.mxu1 %v4506_v5  ;;  %1523 = vst [vmem:[#allocation3 + $0x278] sm:$0xf] %v1149_v22  ;;  %v4482_v5 = vor.u32 %v5148_v41, %v4481_v62  ;;  %v1154_v3 = vrot.slane %v6974_v53, 5  ;;  %v4514_v62 = vor.u32 %v5152_v48, %v4511_v61  ;;  %v5156_v48 = vld [vmem:[#allocation3 + $0x268] sm:$0xf0] }
 0x17d   : > { %3416 = vmatmul.bf16.gmra.mxu3 %v4478_v8  ;;  %1617 = vst [vmem:[#allocation3 + $0x23c] sm:$0xf] %v1149_v22  ;;  %v6474_v21 = vpop.f32.mrf.mxu2  ;;  %v4510_v61 = vor.u32 %v5156_v48, %v4509_v6  ;;  %v4517_v53 = vld [vmem:[#allocation3 + $0x250] sm:$0xf]  ;;  %v6980_v6 = vshrl.u32 %v6109_v1, 16 }
 0x17e   : > { %v1157_v17 = vor.u32 %v1156_v52, %v1154_v3  ;;  %v1155_v4 = vsel %vm6252_vm5, %v1153_v2, %v1154_v3  ;;  %v5157_v3 = vld [vmem:[#allocation3 + $0x270] sm:$0xf0] }
 0x17f   : > { %1430 = vst [vmem:[#allocation3 + $0x2d8] sm:$0xf] %v1155_v4  ;;  %v4518_v9 = vor.u32 %v5157_v3, %v4517_v53  ;;  %v5169_v52 = vld [vmem:[#allocation3 + $0x2d4] sm:$0xf]  ;;  %v1170_v48 = vrot.slane %v6980_v6, 4 }
 0x180   : > { %v6468_v60 = vpop.f32.mrf.mxu3  ;;  %v1158_v63 = vrot.slane %v1157_v17, 4  ;;  %1524 = vst [vmem:[#allocation3 + $0x29c] sm:$0xf] %v1155_v4  ;;  %v6978_v17 = vshrl.u32 %v6104_v47, 16 }
 0x181   : > { %6971 = vst [vmem:[#allocation9_spill] sm:$0xff] %v6468_v60  ;;  %v6470_v50 = vpop.f32.mrf.mxu1 }
 0x182   : > { %1618 = vst [vmem:[#allocation3 + $0x260] sm:$0xf] %v1155_v4  ;;  %v1164_v2 = vrot.slane %v6978_v17, 4  ;;  %v6979_v4 = vshll.u32 %v6109_v1, 16 }
 0x185   : > { %3327 = vmatmul.bf16.gmra.mxu2 %v4474_v12  ;;  %v1160_v12 = vshll.u32 %v591_v34, 16 }
 0x186   : > { %v6476_v8 = vpop.f32.mrf.mxu0 }
 0x187   : > { %v1162_v51 = vrot.slane %v1160_v12, 5  ;;  %v5161_v12 = vld [vmem:[#allocation3 + $0x294] sm:$0xf] }
 0x188   : > { %v6484_v22 = vpop.f32.mrf.mxu3 }
 0x189   : > { %6976 = vst [vmem:[#allocation10_spill] sm:$0xff] %v6484_v22  ;;  %3505 = vmatmul.bf16.gmra.mxu0 %v4482_v5  ;;  %v3209_v41 = vpop.f32.mrf.mxu1  ;;  %v1163_v56 = vsel %vm6252_vm5, %v1158_v63, %v1162_v51  ;;  %v6495_v5 = vpop.f32.mrf.mxu2  ;;  %v6977_v63 = vshll.u32 %v6104_v47, 16  ;;  %v595_v51 = vld [vmem:[#allocation2 + $0xbc] sm:$0xf]  ;;  %v5281_v47 = vld [vmem:[%s6879_s3 + $0x1d0] sm:$0xff] }
 0x18a   : > { %v6487_v60 = vadd.f32 %v3209_v41, %v6403_v40  ;;  %1431 = vst [vmem:[#allocation3 + $0x2fc] sm:$0xf] %v1163_v56  ;;  %v5273_v41 = vld [vmem:[%s6879_s3 + $0x190] sm:$0xff]  ;;  %v1174_v22 = vshll.u32 %v595_v51, 16  ;;  %3734 = vmatpush.bf16.msra.mxu3 %v5281_v47 }
 0x18b   : > { %1525 = vst [vmem:[#allocation3 + $0x2c0] sm:$0xf] %v1163_v56  ;;  %v1165_v34 = vrot.slane %v6977_v63, 5  ;;  %3645 = vmatpush.bf16.msra.mxu2 %v5273_v41 }
 0x18c   : > { %3248 = vmatmul.bf16.gmra.mxu1 %v4542_v10  ;;  %1619 = vst [vmem:[#allocation3 + $0x284] sm:$0xf] %v1163_v56  ;;  %v4575_v10 = vld [vmem:[#allocation3 + $0x2f4] sm:$0xf0]  ;;  %v1168_v56 = vrot.slane %v6979_v4, 5  ;;  %v1176_v6 = vrot.slane %v1174_v22, 5 }
 0x18d   : > { %3421 = vmatmul.bf16.gmra.mxu3 %v4514_v62  ;;  %v4547_v62 = vld [vmem:[#allocation3 + $0x2b4] sm:$0xf0]  ;;  %v4578_v3 = vor.u32 %v5169_v52, %v4575_v10  ;;  %v1166_v63 = vor.u32 %v1165_v34, %v1164_v2  ;;  %v5265_v34 = vld [vmem:[%s6879_s3 + $0x150] sm:$0xff]  ;;  %v3207_v10 = vadd.f32 %v6470_v50, %v6371_v57  ;;  %v5178_v50 = vld [vmem:[#allocation3 + $0x31c] sm:$0xf] }
 0x18e   : > { %v6493_v45 = vpop.f32.mrf.mxu0  ;;  %v4550_v33 = vor.u32 %v5161_v12, %v4547_v62  ;;  %v1171_v17 = vor.u32 %v1170_v48, %v1168_v56  ;;  %v4545_v52 = vld [vmem:[#allocation3 + $0x290] sm:$0xf]  ;;  %3556 = vmatpush.bf16.msra.mxu1 %v5265_v34  ;;  %v5165_v22 = vld [vmem:[#allocation3 + $0x2b0] sm:$0xf0]  ;;  %v6981_v48 = vshll.u32 %v5735_v31, 16 }
 0x18f   : > { %v1167_v1 = vrot.slane %v1166_v63, 4  ;;  %v4546_v41 = vor.u32 %v5165_v22, %v4545_v52 }
 0x190   : > { %v3382_v40 = vpop.f32.mrf.mxu3 }
 0x191   : > { %v6497_v49 = vpop.f32.mrf.mxu1 }
 0x195   : > { %3332 = vmatmul.bf16.gmra.mxu2 %v4510_v61 }
 0x196   : > { %v3471_v27 = vpop.f32.mrf.mxu0 }
 0x198   : > { %v3293_v61 = vpop.f32.mrf.mxu2  ;;  %v3384_v53 = vpop.f32.mrf.mxu3 }
 0x199   : > { %3510 = vmatmul.bf16.gmra.mxu0 %v4518_v9  ;;  %v3294_v42 = vadd.f32 %v3293_v61, %v6454_v38  ;;  %v3214_v16 = vpop.f32.mrf.mxu1  ;;  %v1172_v9 = vrot.slane %v1171_v17, 4  ;;  %v1169_v38 = vsel %vm6252_vm5, %v1167_v1, %v1168_v56  ;;  %v1179_v61 = vrot.slane %v6981_v48, 5  ;;  %v5170_v17 = vld [vmem:[#allocation3 + $0x2dc] sm:$0xf]  ;;  %v4583_v1 = vld [vmem:[#allocation3 + $0x2fc] sm:$0xf0] }
 0x19a   : > { %v6515_v4 = vadd.f32 %v3214_v16, %v6433_v24  ;;  %1432 = vst [vmem:[#allocation3 + $0x320] sm:$0xf] %v1169_v38 }
 0x19b   : > { %v3383_v19 = vadd.f32 %v3382_v40, %v3294_v42  ;;  %v1177_v16 = vsel %vm6252_vm5, %v1172_v9, %v1176_v6  ;;  %v5289_v40 = vld [vmem:[%s6879_s3 + $0x210] sm:$0xff]  ;;  %1526 = vst [vmem:[#allocation3 + $0x2e4] sm:$0xf] %v1169_v38  ;;  %v6982_v6 = vshrl.u32 %v5735_v31, 16 }
 0x19c   : > { %3253 = vmatmul.bf16.gmra.mxu1 %v4578_v3  ;;  %1433 = vst [vmem:[#allocation3 + $0x344] sm:$0xf] %v1177_v16  ;;  %3823 = vmatpush.bf16.msra.mxu0 %v5289_v40  ;;  %v4611_v3 = vld [vmem:[#allocation3 + $0x33c] sm:$0xf0] }
 0x19d   : > { %3426 = vmatmul.bf16.gmra.mxu3 %v4550_v33  ;;  %v6524_v24 = vadd.f32 %v3471_v27, %v3383_v19  ;;  %1527 = vst [vmem:[#allocation3 + $0x308] sm:$0xf] %v1177_v16  ;;  %v4553_v19 = vld [vmem:[#allocation3 + $0x298] sm:$0xf]  ;;  %v5166_v27 = vld [vmem:[#allocation3 + $0x2b8] sm:$0xf0]  ;;  %v4614_v40 = vor.u32 %v5178_v50, %v4611_v3 }
 0x19e   : > { %v3473_v42 = vpop.f32.mrf.mxu0  ;;  %1620 = vst [vmem:[#allocation3 + $0x2a8] sm:$0xf] %v1169_v38  ;;  %v4554_v57 = vor.u32 %v5166_v27, %v4553_v19  ;;  %v1178_v34 = vrot.slane %v6982_v6, 4  ;;  %v599_v38 = vld [vmem:[#allocation2 + $0xcc] sm:$0xf] }
 0x19f   : > { %1621 = vst [vmem:[#allocation3 + $0x2cc] sm:$0xf] %v1177_v16  ;;  %v4581_v50 = vld [vmem:[#allocation3 + $0x2d8] sm:$0xf]  ;;  %v5174_v3 = vld [vmem:[#allocation3 + $0x2f8] sm:$0xf0] }
 0x1a0   : > { %v3295_v12 = vpop.f32.mrf.mxu2  ;;  %v3387_v33 = vpop.f32.mrf.mxu3  ;;  %v4582_v6 = vor.u32 %v5174_v3, %v4581_v50 }
 0x1a1   : > { %v3296_v62 = vadd.f32 %v3295_v12, %v3207_v10  ;;  %v3216_v2 = vpop.f32.mrf.mxu1  ;;  %v1180_v10 = vor.u32 %v1179_v61, %v1178_v34  ;;  %v1188_v12 = vshll.u32 %v599_v38, 16 }
 0x1a2   : > { %v6532_v51 = vadd.f32 %v3216_v2, %v6459_v14  ;;  %v6983_v14 = vshll.u32 %v5747_v37, 16 }
 0x1a3   : > { %v3385_v56 = vadd.f32 %v3384_v53, %v3296_v62  ;;  %v6984_v53 = vshrl.u32 %v5747_v37, 16  ;;  %v4586_v62 = vor.u32 %v5170_v17, %v4583_v1  ;;  %v1181_v19 = vrot.slane %v1180_v10, 4 }
 0x1a4   : > { %v1182_v9 = vrot.slane %v6983_v14, 5  ;;  %v1190_v27 = vrot.slane %v1188_v12, 5  ;;  %v4589_v14 = vld [vmem:[#allocation3 + $0x2e0] sm:$0xf]  ;;  %v5179_v12 = vld [vmem:[#allocation3 + $0x324] sm:$0xf] }
 0x1a5   : > { %3337 = vmatmul.bf16.gmra.mxu2 %v4546_v41  ;;  %v6536_v63 = vadd.f32 %v3473_v42, %v3385_v56  ;;  %v1184_v52 = vrot.slane %v6984_v53, 4  ;;  %v6985_v53 = vshll.u32 %v5849_v13, 16 }
 0x1a6   : > { %v3476_v47 = vpop.f32.mrf.mxu0  ;;  %v1183_v37 = vsel %vm6252_vm5, %v1181_v19, %v1182_v9 }
 0x1a7   : > { %v1185_v2 = vor.u32 %v1184_v52, %v1182_v9  ;;  %1434 = vst [vmem:[#allocation3 + $0x368] sm:$0xf] %v1183_v37  ;;  %v5175_v9 = vld [vmem:[#allocation3 + $0x300] sm:$0xf0]  ;;  %v1193_v52 = vrot.slane %v6985_v53, 5 }
 0x1a8   : > { %v3298_v16 = vpop.f32.mrf.mxu2  ;;  %v3389_v22 = vpop.f32.mrf.mxu3  ;;  %1528 = vst [vmem:[#allocation3 + $0x32c] sm:$0xf] %v1183_v37 }
 0x1a9   : > { %3515 = vmatmul.bf16.gmra.mxu0 %v4554_v57  ;;  %v3299_v42 = vadd.f32 %v3298_v16, %v6487_v60  ;;  %v3219_v41 = vpop.f32.mrf.mxu1  ;;  %v1186_v48 = vrot.slane %v1185_v2, 4  ;;  %1622 = vst [vmem:[#allocation3 + $0x2f0] sm:$0xf] %v1183_v37  ;;  %v4647_v16 = vld [vmem:[#allocation3 + $0x384] sm:$0xf0]  ;;  %v6987_v2 = vshll.u32 %v5858_v20, 16 }
 0x1aa   : > { %v6546_v31 = vadd.f32 %v3219_v41, %v6476_v8  ;;  %v3212_v8 = vadd.f32 %v6497_v49, %v6419_v54  ;;  %v4590_v54 = vor.u32 %v5175_v9, %v4589_v14  ;;  %v5187_v49 = vld [vmem:[#allocation3 + $0x364] sm:$0xf]  ;;  %v5264_v14 = vld [vmem:[%s6879_s3 + $0x148] sm:$0xff] }
 0x1ab   : > { %v3388_v56 = vadd.f32 %v3387_v33, %v3299_v42  ;;  %v1191_v61 = vsel %vm6252_vm5, %v1186_v48, %v1190_v27  ;;  %v4619_v42 = vld [vmem:[#allocation3 + $0x344] sm:$0xf0]  ;;  %v1196_v19 = vrot.slane %v6987_v2, 5  ;;  %v6988_v27 = vshrl.u32 %v5858_v20, 16  ;;  %3557 = vmatpush.bf16.msra.mxu1 %v5264_v14  ;;  %v5453_v2 = vld [vmem:[%s5575_s30 + $0x78] sm:$0xff]  }
 0x1ac   : > { %3258 = vmatmul.bf16.gmra.mxu1 %v4614_v40  ;;  %1435 = vst [vmem:[#allocation3 + $0x38c] sm:$0xf] %v1191_v61  ;;  %v6992_v14 = vshrl.u32 %v6004_v44, 16 }
 0x1ad   : > { %3431 = vmatmul.bf16.gmra.mxu3 %v4586_v62  ;;  %v6552_v60 = vadd.f32 %v3476_v47, %v3388_v56  ;;  %1529 = vst [vmem:[#allocation3 + $0x350] sm:$0xf] %v1191_v61  ;;  %v5272_v62 = vld [vmem:[%s6879_s3 + $0x188] sm:$0xff]  ;;  %v1198_v56 = vrot.slane %v6988_v27, 4 }
 0x1ae   : > { %v3478_v57 = vpop.f32.mrf.mxu0  ;;  %1623 = vst [vmem:[#allocation3 + $0x314] sm:$0xf] %v1191_v61  ;;  %v4650_v61 = vor.u32 %v5187_v49, %v4647_v16  ;;  %3646 = vmatpush.bf16.msra.mxu2 %v5272_v62  ;;  %v5288_v49 = vld [vmem:[%s6879_s3 + $0x208] sm:$0xff] }
 0x1af   : > { %3824 = vmatpush.bf16.msra.mxu0 %v5288_v49 }
 0x1b0   : > { %v3300_v33 = vpop.f32.mrf.mxu2  ;;  %v3392_v17 = vpop.f32.mrf.mxu3 }
 0x1b1   : > { %v3301_v1 = vadd.f32 %v3300_v33, %v3212_v8  ;;  %v3221_v34 = vpop.f32.mrf.mxu1  ;;  %v4622_v8 = vor.u32 %v5179_v12, %v4619_v42 }
 0x1b2   : > { %v6557_v47 = vadd.f32 %v3221_v34, %v6493_v45  ;;  %v6986_v45 = vshrl.u32 %v5849_v13, 16  ;;  %v5280_v13 = vld [vmem:[%s6879_s3 + $0x1c8] sm:$0xff] }
 0x1b3   : > { %v3390_v38 = vadd.f32 %v3389_v22, %v3301_v1  ;;  %v603_v22 = vld [vmem:[#allocation2 + $0xdc] sm:$0xf]  ;;  %v1199_v1 = vor.u32 %v1198_v56, %v1196_v19  ;;  %3735 = vmatpush.bf16.msra.mxu3 %v5280_v13  ;;  %v5357_v56 = vunpack.c.l.bf16 %v5453_v2  ;;  %v4655_v13 = vld [vmem:[#allocation3 + $0x38c] sm:$0xf0] }
 0x1b4   : > { %v1192_v41 = vrot.slane %v6986_v45, 4  ;;  %v1202_v50 = vshll.u32 %v603_v22, 16 }
 0x1b5   : > { %3342 = vmatmul.bf16.gmra.mxu2 %v4582_v6  ;;  %v6561_v40 = vadd.f32 %v3478_v57, %v3390_v38  ;;  %v1200_v9 = vrot.slane %v1199_v1, 4  ;;  %v4617_v38 = vld [vmem:[#allocation3 + $0x320] sm:$0xf]  ;;  %v6990_v1 = vshrl.u32 %v5995_v58, 16 }
 0x1b6   : > { %v3481_v10 = vpop.f32.mrf.mxu0  ;;  %v1194_v57 = vor.u32 %v1193_v52, %v1192_v41  ;;  %v1204_v20 = vrot.slane %v1202_v50, 5  ;;  %v5184_v41 = vld [vmem:[#allocation3 + $0x348] sm:$0xf0]  ;;  %v4683_v50 = vld [vmem:[#allocation3 + $0x3cc] sm:$0xf0] }
 0x1b8   : > { %v3303_v48 = vpop.f32.mrf.mxu2  ;;  %v3394_v37 = vpop.f32.mrf.mxu3  ;;  %v1195_v6 = vrot.slane %v1194_v57, 4  ;;  %v1205_v53 = vsel %vm6252_vm5, %v1200_v9, %v1204_v20  ;;  %v5196_v57 = vld [vmem:[#allocation3 + $0x3ac] sm:$0xf]  ;;  %v1212_v9 = vrot.slane %v6992_v14, 4 }
 0x1b9   : > { %3520 = vmatmul.bf16.gmra.mxu0 %v4590_v54  ;;  %v3304_v3 = vadd.f32 %v3303_v48, %v6515_v4  ;;  %v6573_v33 = vpop.f32.mrf.mxu1  ;;  %v5183_v54 = vld [vmem:[#allocation3 + $0x340] sm:$0xf0]  ;;  %1437 = vst [vmem:[#allocation3 + $0x3d4] sm:$0xf] %v1205_v53  ;;  %v5358_v48 = vunpack.c.h.bf16 %v5453_v2  ;;  %v4686_v49 = vor.u32 %v5196_v57, %v4683_v50  ;;  %v4653_v50 = vld [vmem:[#allocation3 + $0x368] sm:$0xf] }
 0x1ba   : > { %v1197_v4 = vsel %vm6252_vm5, %v1195_v6, %v1196_v19  ;;  %1531 = vst [vmem:[#allocation3 + $0x398] sm:$0xf] %v1205_v53  ;;  %v4618_v62 = vor.u32 %v5183_v54, %v4617_v38  ;;  %v6989_v19 = vshll.u32 %v5995_v58, 16  ;;  %v1206_v6 = vrot.slane %v6990_v1, 4 }
 0x1bb   : > { %v3393_v34 = vadd.f32 %v3392_v17, %v3304_v3  ;;  %1436 = vst [vmem:[#allocation3 + $0x3b0] sm:$0xf] %v1197_v4 }
 0x1bc   : > { %3263 = vmatmul.bf16.gmra.mxu1 %v4650_v61  ;;  %1530 = vst [vmem:[#allocation3 + $0x374] sm:$0xf] %v1197_v4  ;;  %v1207_v27 = vrot.slane %v6989_v19, 5 }
 0x1bd   : > { %3436 = vmatmul.bf16.gmra.mxu3 %v4622_v8  ;;  %v6585_v52 = vadd.f32 %v3481_v10, %v3393_v34  ;;  %1624 = vst [vmem:[#allocation3 + $0x338] sm:$0xf] %v1197_v4  ;;  %v4625_v10 = vld [vmem:[#allocation3 + $0x328] sm:$0xf]  ;;  %v5188_v8 = vld [vmem:[#allocation3 + $0x36c] sm:$0xf] }
 0x1be   : > { %v3483_v17 = vpop.f32.mrf.mxu0  ;;  %1625 = vst [vmem:[#allocation3 + $0x35c] sm:$0xf] %v1205_v53  ;;  %v4626_v61 = vor.u32 %v5184_v41, %v4625_v10  ;;  %v607_v34 = vld [vmem:[#allocation2 + $0xec] sm:$0xf]  ;;  %v5506_v4 = vld [vmem:[%s6877_s1] ss:$0 sm:$0xff] }
 0x1bf   : > { %v368_v38 = vmul.f32 %v5506_v4, %v5357_v56  ;;  %v369_v53 = vmul.f32 %v5506_v4, %v5358_v48  ;;  %v4661_v4 = vld [vmem:[#allocation3 + $0x370] sm:$0xf] }
 0x1c0   : > { %v3305_v16 = vpop.f32.mrf.mxu2  ;;  %v3397_v12 = vpop.f32.mrf.mxu3 }
 0x1c1   : > { %v3306_v42 = vadd.f32 %v3305_v16, %v6532_v51  ;;  %v6591_v45 = vpop.f32.mrf.mxu1  ;;  %v1208_v16 = vor.u32 %v1207_v27, %v1206_v6 }
 0x1c3   : > { %v3395_v22 = vadd.f32 %v3394_v37, %v3306_v42  ;;  %v6991_v37 = vshll.u32 %v6004_v44, 16  ;;  %v1216_v42 = vshll.u32 %v607_v34, 16  ;;  %v5507_v44 = vld [vmem:[%s6878_s2] ss:$0 sm:$0xff]  ;;  %v1209_v2 = vrot.slane %v1208_v16, 4 }
 0x1c4   : > { %v405_v1 = vadd.f32 %v5507_v44, %v369_v53 }
 0x1c5   : > { %3347 = vmatmul.bf16.gmra.mxu2 %v4618_v62  ;;  %v6596_v3 = vadd.f32 %v3483_v17, %v3395_v22  ;;  %v1210_v20 = vrot.slane %v6991_v37, 5  ;;  %v4658_v62 = vor.u32 %v5188_v8, %v4655_v13  ;;  %v404_v22 = vadd.f32 %v5507_v44, %v368_v38  ;;  %v5192_v8 = vld [vmem:[#allocation3 + $0x388] sm:$0xf0]  ;;  %v5193_v38 = vld [vmem:[#allocation3 + $0x390] sm:$0xf0] }
 0x1c6   : > { %v3486_v51 = vpop.f32.mrf.mxu0  ;;  %v1218_v19 = vrot.slane %v1216_v42, 5  ;;  %v4662_v16 = vor.u32 %v5193_v38, %v4661_v4  ;;  %v5205_v42 = vld [vmem:[#allocation3 + $0x3f4] sm:$0xf]  ;;  %v4691_v44 = vld [vmem:[#allocation3 + $0x3d4] sm:$0xf0] }
 0x1c7   : > { %v1213_v41 = vor.u32 %v1212_v9, %v1210_v20  ;;  %v436_v57 = vmax.f32 %v404_v22, 0.0  ;;  %v1211_v27 = vsel %vm6252_vm5, %v1209_v2, %v1210_v20  ;;  %v4654_v20 = vor.u32 %v5192_v8, %v4653_v50  ;;  %v5271_v22 = vld [vmem:[%s6879_s3 + $0x180] sm:$0xff] }
 0x1c8   : > { %v3308_v17 = vpop.f32.mrf.mxu2  ;;  %v3399_v54 = vpop.f32.mrf.mxu3  ;;  %1438 = vst [vmem:[#allocation3 + $0x3f8] sm:$0xf] %v1211_v27  ;;  %3647 = vmatpush.bf16.msra.mxu2 %v5271_v22 }
 0x1c9   : > { %3525 = vmatmul.bf16.gmra.mxu0 %v4626_v61  ;;  %v3309_v58 = vadd.f32 %v3308_v17, %v6546_v31  ;;  %v6608_v10 = vpop.f32.mrf.mxu1  ;;  %v1214_v48 = vrot.slane %v1213_v41, 4  ;;  %1532 = vst [vmem:[#allocation3 + $0x3bc] sm:$0xf] %v1211_v27  ;;  %v513_v6 = vpack.c.bf16 %v436_v57, %v436_v57  ;;  %v5197_v41 = vld [vmem:[#allocation3 + $0x3b4] sm:$0xf]  ;;  %v6996_v57 = vshrl.u32 %v6142_v55, 16 }
 0x1ca   : > { %1626 = vst [vmem:[#allocation3 + $0x380] sm:$0xf] %v1211_v27 }
 0x1cb   : > { %v3398_v56 = vadd.f32 %v3397_v12, %v3309_v58  ;;  %v1219_v31 = vsel %vm6252_vm5, %v1214_v48, %v1218_v19  ;;  %v437_v12 = vmax.f32 %v405_v1, 0.0  ;;  %546 = vst [vmem:[#allocation2 + $0x104] sm:$0xf] %v513_v6  ;;  %v4719_v58 = vld [vmem:[#allocation3 + $0x414] sm:$0xf0]  ;;  %v3225_v19 = vadd.f32 %v6573_v33, %v6317_v7  ;;  %v5279_v7 = vld [vmem:[%s6879_s3 + $0x1c0] sm:$0xff] }
 0x1cc   : > { %3268 = vmatmul.bf16.gmra.mxu1 %v4686_v49  ;;  %1439 = vst [vmem:[#allocation3 + $0x41c] sm:$0xf] %v1219_v31  ;;  %v6995_v48 = vshll.u32 %v6142_v55, 16  ;;  %v1226_v27 = vrot.slane %v6996_v57, 4  ;;  %v4722_v50 = vor.u32 %v5205_v42, %v4719_v58  ;;  %v612_v6 = vld [vmem:[#allocation2 + $0x100] sm:$0xf]  ;;  %3736 = vmatpush.bf16.msra.mxu3 %v5279_v7 }
 0x1cd   : > { %3441 = vmatmul.bf16.gmra.mxu3 %v4658_v62  ;;  %v6617_v13 = vadd.f32 %v3486_v51, %v3398_v56  ;;  %1533 = vst [vmem:[#allocation3 + $0x3e0] sm:$0xf] %v1219_v31  ;;  %v514_v17 = vpack.c.bf16 %v437_v12, %v437_v12  ;;  %v6993_v51 = vshll.u32 %v6133_v11, 16  ;;  %v611_v56 = vld [vmem:[#allocation2 + $0xfc] sm:$0xf]  ;;  %v1267_v55 = vshrl.u32 %v612_v6, 16 }
 0x1ce   : > { %v3488_v61 = vpop.f32.mrf.mxu0  ;;  %1627 = vst [vmem:[#allocation3 + $0x3a4] sm:$0xf] %v1219_v31  ;;  %v1224_v1 = vrot.slane %v6995_v48, 5  ;;  %v1230_v12 = vshll.u32 %v611_v56, 16  ;;  %v3227_v48 = vadd.f32 %v6591_v45, %v6339_v46 }
 0x1cf   : > { %v1221_v49 = vrot.slane %v6993_v51, 5  ;;  %547 = vst [vmem:[#allocation2 + $0x108] sm:$0xf] %v514_v17  ;;  %v5263_v17 = vld [vmem:[%s6879_s3 + $0x140] sm:$0xff] }
 0x1d0   : > { %v3310_v37 = vpop.f32.mrf.mxu2  ;;  %v3402_v34 = vpop.f32.mrf.mxu3  ;;  %v1227_v33 = vor.u32 %v1226_v27, %v1224_v1  ;;  %v1232_v4 = vrot.slane %v1230_v12, 5  ;;  %3558 = vmatpush.bf16.msra.mxu1 %v5263_v17 }
 0x1d1   : > { %v3311_v14 = vadd.f32 %v3310_v37, %v6557_v47  ;;  %v6620_v9 = vpop.f32.mrf.mxu1  ;;  %v4694_v37 = vor.u32 %v5197_v41, %v4691_v44  ;;  %v4209_v44 = vrot.slane %v1267_v55, 11 }
 0x1d2   : > { %v6642_v38 = vld [vmem:[#allocation2 + $0x104] sm:$0xf]  ;;  %v1228_v51 = vrot.slane %v1227_v33, 4 }
 0x1d3   : > { %v3400_v53 = vadd.f32 %v3399_v54, %v3311_v14  ;;  %v6994_v54 = vshrl.u32 %v6133_v11, 16  ;;  %1504 = vst [vmem:[#allocation3 + $0x448] sm:$0xf] %v6642_v38  ;;  %v6935_v58 = vshll.u32 %v6642_v38, 16 }
 0x1d4   : > { %1598 = vst [vmem:[#allocation3 + $0x40c] sm:$0xf] %v6642_v38  ;;  %v1233_v41 = vsel %vm6252_vm5, %v1228_v51, %v1232_v4  ;;  %v4755_v4 = vld [vmem:[#allocation3 + $0x45c] sm:$0xf0] }
 0x1d5   : > { %3352 = vmatmul.bf16.gmra.mxu2 %v4654_v20  ;;  %v6624_v62 = vadd.f32 %v3488_v61, %v3400_v53  ;;  %v1220_v2 = vrot.slane %v6994_v54, 4  ;;  %1441 = vst [vmem:[#allocation3 + $0x464] sm:$0xf] %v1233_v41 }
 0x1d6   : > { %v3491_v47 = vpop.f32.mrf.mxu0  ;;  %v6662_v56 = vld [vmem:[#allocation2 + $0x108] sm:$0xf]  ;;  %1535 = vst [vmem:[#allocation3 + $0x428] sm:$0xf] %v1233_v41 }
 0x1d7   : > { %v1222_v8 = vor.u32 %v1221_v49, %v1220_v2  ;;  %v1272_v49 = vshrl.u32 %v6642_v38, 16  ;;  %v6933_v57 = vshrl.u32 %v6662_v56, 16  ;;  %1629 = vst [vmem:[#allocation3 + $0x3ec] sm:$0xf] %v1233_v41 }
 0x1d8   : > { %v3313_v31 = vpop.f32.mrf.mxu2  ;;  %v3404_v61 = vpop.f32.mrf.mxu3  ;;  %1505 = vst [vmem:[#allocation3 + $0x46c] sm:$0xf] %v6662_v56 }
 0x1d9   : > { %3530 = vmatmul.bf16.gmra.mxu0 %v4662_v16  ;;  %v3314_v11 = vadd.f32 %v3313_v31, %v3225_v19  ;;  %v6637_v14 = vpop.f32.mrf.mxu1  ;;  %v1223_v20 = vrot.slane %v1222_v8, 4  ;;  %v4689_v16 = vld [vmem:[#allocation3 + $0x3b0] sm:$0xf]  ;;  %v1274_v22 = vrot.slane %v1272_v49, 7  ;;  %v5287_v19 = vld [vmem:[%s6879_s3 + $0x200] sm:$0xff]  ;;  %v1283_v6 = vrot.slane %v6933_v57, 7 }
 0x1da   : > { %3825 = vmatpush.bf16.msra.mxu0 %v5287_v19  ;;  %1599 = vst [vmem:[#allocation3 + $0x430] sm:$0xf] %v6662_v56 }
 0x1db   : > { %v3403_v53 = vadd.f32 %v3402_v34, %v3314_v11  ;;  %v1225_v42 = vsel %vm6252_vm5, %v1223_v20, %v1224_v1  ;;  %v5201_v34 = vld [vmem:[#allocation3 + $0x3d0] sm:$0xf0]  ;;  %v1277_v1 = vor.u32 %v6935_v58, %v1274_v22  ;;  %v1279_v45 = vrot.slane %v1274_v22, 4  ;;  %v4697_v11 = vld [vmem:[#allocation3 + $0x3b8] sm:$0xf] }
 0x1dc   : > { %3273 = vmatmul.bf16.gmra.mxu1 %v4722_v50  ;;  %1440 = vst [vmem:[#allocation3 + $0x440] sm:$0xf] %v1225_v42  ;;  %v4690_v31 = vor.u32 %v5201_v34, %v4689_v16  ;;  %v5214_v20 = vld [vmem:[#allocation3 + $0x43c] sm:$0xf] }
 0x1dd   : > { %3446 = vmatmul.bf16.gmra.mxu3 %v4694_v37  ;;  %v6657_v54 = vadd.f32 %v3491_v47, %v3403_v53  ;;  %1534 = vst [vmem:[#allocation3 + $0x404] sm:$0xf] %v1225_v42  ;;  %v6934_v47 = vshll.u32 %v6662_v56, 16  ;;  %v1278_v46 = vsel %vm5643_vm2, %v4209_v44, %v1277_v1  ;;  %v5202_v37 = vld [vmem:[#allocation3 + $0x3d8] sm:$0xf0]  ;;  %v4758_v44 = vor.u32 %v5214_v20, %v4755_v4 }
 0x1de   : > { %v3493_v2 = vpop.f32.mrf.mxu0  ;;  %1628 = vst [vmem:[#allocation3 + $0x3c8] sm:$0xf] %v1225_v42  ;;  %v4698_v55 = vor.u32 %v5202_v37, %v4697_v11  ;;  %v5206_v16 = vld [vmem:[#allocation3 + $0x3fc] sm:$0xf]  ;;  %v4727_v42 = vld [vmem:[#allocation3 + $0x41c] sm:$0xf0] }
 0x1df   : > { %v1286_v33 = vor.u32 %v6934_v47, %v1283_v6  ;;  %1472 = vst [vmem:[#allocation3 + $0x444] sm:$0xf] %v1278_v46  ;;  %v4730_v19 = vor.u32 %v5206_v16, %v4727_v42  ;;  %v4733_v37 = vld [vmem:[#allocation3 + $0x400] sm:$0xf]  ;;  %v4231_v20 = vld [vmem:[#allocation3 + $0x34] sm:$0xf0] }
 0x1e0   : > { %v3315_v27 = vpop.f32.mrf.mxu2  ;;  %v3407_v50 = vpop.f32.mrf.mxu3  ;;  %1566 = vst [vmem:[#allocation3 + $0x408] sm:$0xf] %v1278_v46 }
 0x1e1   : > { %v3316_v8 = vadd.f32 %v3315_v27, %v3227_v48  ;;  %v6670_v12 = vpop.f32.mrf.mxu1  ;;  %v1287_v53 = vsel %vm5643_vm2, %v1279_v45, %v1286_v33 }
 0x1e2   : > { %1473 = vst [vmem:[#allocation3 + $0x468] sm:$0xf] %v1287_v53 }
 0x1e3   : > { %v3405_v7 = vadd.f32 %v3404_v61, %v3316_v8  ;;  %v3230_v61 = vadd.f32 %v6608_v10, %v6345_v23  ;;  %1567 = vst [vmem:[#allocation3 + $0x42c] sm:$0xf] %v1287_v53  ;;  %v5210_v8 = vld [vmem:[#allocation3 + $0x418] sm:$0xf0]  ;;  %v3232_v23 = vadd.f32 %v6620_v9, %v6361_v18  ;;  %v3235_v18 = vadd.f32 %v6637_v14, %v6373_v15 }
 0x1e5   : > { %3357 = vmatmul.bf16.gmra.mxu2 %v4690_v31  ;;  %v6681_v17 = vadd.f32 %v3493_v2, %v3405_v7  ;;  %v4725_v31 = vld [vmem:[#allocation3 + $0x3f8] sm:$0xf]  ;;  %v5211_v7 = vld [vmem:[#allocation3 + $0x420] sm:$0xf0] }
 0x1e6   : > { %v3496_v51 = vpop.f32.mrf.mxu0  ;;  %v4726_v6 = vor.u32 %v5210_v8, %v4725_v31  ;;  %v5219_v31 = vld [vmem:[#allocation3 + $0x460] sm:$0xf0]  ;;  %v3237_v8 = vadd.f32 %v6670_v12, %v6405_v39 }
 0x1e8   : > { %v3318_v34 = vpop.f32.mrf.mxu2  ;;  %v3409_v41 = vpop.f32.mrf.mxu3 }
 0x1e9   : > { %3535 = vmatmul.bf16.gmra.mxu0 %v4698_v55  ;;  %v3319_v22 = vadd.f32 %v3318_v34, %v3230_v61  ;;  %v3239_v48 = vpop.f32.mrf.mxu1  ;;  %v5081_v55 = vld [vmem:[#allocation3 + $0x14] sm:$0xf]  ;;  %v4763_v16 = vld [vmem:[#allocation3 + $0x464] sm:$0xf0] }
 0x1ea   : > { %v4234_v61 = vor.u32 %v5081_v55, %v4231_v20 }
 0x1eb   : > { %v3408_v2 = vadd.f32 %v3407_v50, %v3319_v22  ;;  %v4734_v50 = vor.u32 %v5211_v7, %v4733_v37  ;;  %v5220_v37 = vld [vmem:[#allocation3 + $0x468] sm:$0xf0] }
 0x1ec   : > { %3278 = vmatmul.bf16.gmra.mxu1 %v4758_v44 }
 0x1ed   : > { %3451 = vmatmul.bf16.gmra.mxu3 %v4730_v19  ;;  %v6686_v1 = vadd.f32 %v3496_v51, %v3408_v2  ;;  %v5215_v51 = vld [vmem:[#allocation3 + $0x444] sm:$0xf] }
 0x1ee   : > { %v3498_v27 = vpop.f32.mrf.mxu0  ;;  %v4766_v44 = vor.u32 %v5215_v51, %v4763_v16  ;;  %v4239_v51 = vld [vmem:[#allocation3 + $0x3c] sm:$0xf0]  ;;  %v3240_v16 = vadd.f32 %v3239_v48, %v6421_v0 }
 0x1f0   : > { %v3320_v10 = vpop.f32.mrf.mxu2  ;;  %v3412_v46 = vpop.f32.mrf.mxu3 }
 0x1f1   : > { %v3321_v45 = vadd.f32 %v3320_v10, %v3232_v23  ;;  %v3241_v11 = vpop.f32.mrf.mxu1 }
 0x1f3   : > { %v3410_v33 = vadd.f32 %v3409_v41, %v3321_v45 }
 0x1f5   : > { %3362 = vmatmul.bf16.gmra.mxu2 %v4726_v6  ;;  %v6690_v4 = vadd.f32 %v3498_v27, %v3410_v33  ;;  %v4761_v27 = vld [vmem:[#allocation3 + $0x440] sm:$0xf]  ;;  %v4769_v6 = vld [vmem:[#allocation3 + $0x448] sm:$0xf]  ;;  %v5090_v33 = vld [vmem:[#allocation3 + $0x5c] sm:$0xf] }
 0x1f6   : > { %v3501_v53 = vpop.f32.mrf.mxu0  ;;  %v4762_v10 = vor.u32 %v5219_v31, %v4761_v27  ;;  %v5086_v27 = vld [vmem:[#allocation3 + $0x38] sm:$0xf0]  ;;  %v3242_v31 = vadd.f32 %v3241_v11, %v6431_v36 }
 0x1f8   : > { %v3323_v9 = vpop.f32.mrf.mxu2  ;;  %v3414_v42 = vpop.f32.mrf.mxu3 }
 0x1f9   : > { %3540 = vmatmul.bf16.gmra.mxu0 %v4734_v50  ;;  %v3324_v34 = vadd.f32 %v3323_v9, %v3235_v18  ;;  %v3244_v22 = vpop.f32.mrf.mxu1  ;;  %v4267_v50 = vld [vmem:[#allocation3 + $0x7c] sm:$0xf0] }
 0x1fa   : > { %v4270_v18 = vor.u32 %v5090_v33, %v4267_v50 }
 0x1fb   : > { %v3413_v41 = vadd.f32 %v3412_v46, %v3324_v34  ;;  %v4770_v46 = vor.u32 %v5220_v37, %v4769_v6  ;;  %v5087_v6 = vld [vmem:[#allocation3 + $0x40] sm:$0xf0] }
 0x1fc   : > { %3559 = vmatmul.bf16.vlgmr.msra.gmra.mxu1 %v4234_v61 }
 0x1fd   : > { %3456 = vmatmul.bf16.gmra.mxu3 %v4766_v44  ;;  %v6694_v19 = vadd.f32 %v3501_v53, %v3413_v41  ;;  %v5082_v53 = vld [vmem:[#allocation3 + $0x1c] sm:$0xf] }
 0x1fe   : > { %v3503_v2 = vpop.f32.mrf.mxu0  ;;  %v4242_v61 = vor.u32 %v5082_v53, %v4239_v51  ;;  %v4275_v53 = vld [vmem:[#allocation3 + $0x84] sm:$0xf0]  ;;  %v3245_v51 = vadd.f32 %v3244_v22, %v6357_v30 }
 0x200   : > { %v3325_v23 = vpop.f32.mrf.mxu2  ;;  %v3417_v15 = vpop.f32.mrf.mxu3 }
 0x201   : > { %v3326_v14 = vadd.f32 %v3325_v23, %v3237_v8  ;;  %v3246_v45 = vpop.f32.mrf.mxu1 }
 0x203   : > { %v3415_v7 = vadd.f32 %v3414_v42, %v3326_v14 }
 0x205   : > { %3367 = vmatmul.bf16.gmra.mxu2 %v4762_v10  ;;  %v6698_v55 = vadd.f32 %v3503_v2, %v3415_v7  ;;  %v4237_v2 = vld [vmem:[#allocation3 + $0x18] sm:$0xf]  ;;  %v4245_v10 = vld [vmem:[#allocation3 + $0x20] sm:$0xf] }
 0x206   : > { %v3506_v20 = vpop.f32.mrf.mxu0  ;;  %v4238_v48 = vor.u32 %v5086_v27, %v4237_v2  ;;  %v4246_v7 = vor.u32 %v5087_v6, %v4245_v10  ;;  %v5095_v2 = vld [vmem:[#allocation3 + $0x80] sm:$0xf0]  ;;  %v3247_v27 = vadd.f32 %v3246_v45, %v6369_v59  ;;  %v5096_v10 = vld [vmem:[#allocation3 + $0x88] sm:$0xf0] }
 0x208   : > { %v3328_v39 = vpop.f32.mrf.mxu2  ;;  %v3419_v12 = vpop.f32.mrf.mxu3 }
 0x209   : > { %3545 = vmatmul.bf16.gmra.mxu0 %v4770_v46  ;;  %v3329_v9 = vadd.f32 %v3328_v39, %v3240_v16  ;;  %v3249_v34 = vpop.f32.mrf.mxu1  ;;  %v4303_v46 = vld [vmem:[#allocation3 + $0xc4] sm:$0xf0] }
 0x20b   : > { %v3418_v44 = vadd.f32 %v3417_v15, %v3329_v9  ;;  %v5099_v15 = vld [vmem:[#allocation3 + $0xa4] sm:$0xf] }
 0x20c   : > { %3564 = vmatmul.bf16.gmra.mxu1 %v4270_v18  ;;  %v4306_v16 = vor.u32 %v5099_v15, %v4303_v46 }
 0x20d   : > { %3737 = vmatmul.bf16.vlgmr.msra.gmra.mxu3 %v4242_v61  ;;  %v6701_v42 = vadd.f32 %v3506_v20, %v3418_v44  ;;  %v5091_v20 = vld [vmem:[#allocation3 + $0x64] sm:$0xf] }
 0x20e   : > { %v3508_v41 = vpop.f32.mrf.mxu0  ;;  %v4278_v18 = vor.u32 %v5091_v20, %v4275_v53  ;;  %v4311_v20 = vld [vmem:[#allocation3 + $0xcc] sm:$0xf0]  ;;  %v3250_v53 = vadd.f32 %v3249_v34, %v6397_v29 }
 0x210   : > { %v3330_v8 = vpop.f32.mrf.mxu2  ;;  %v3422_v23 = vpop.f32.mrf.mxu3 }
 0x211   : > { %v3331_v0 = vadd.f32 %v3330_v8, %v3242_v31  ;;  %v3251_v14 = vpop.f32.mrf.mxu1 }
 0x213   : > { %v3420_v37 = vadd.f32 %v3419_v12, %v3331_v0 }
 0x215   : > { %3648 = vmatmul.bf16.vlgmr.msra.gmra.mxu2 %v4238_v48  ;;  %v6704_v33 = vadd.f32 %v3508_v41, %v3420_v37  ;;  %v4273_v41 = vld [vmem:[#allocation3 + $0x60] sm:$0xf]  ;;  %v4281_v48 = vld [vmem:[#allocation3 + $0x68] sm:$0xf] }
 0x216   : > { %v3511_v50 = vpop.f32.mrf.mxu0  ;;  %v4274_v22 = vor.u32 %v5095_v2, %v4273_v41  ;;  %v4282_v37 = vor.u32 %v5096_v10, %v4281_v48  ;;  %v5104_v41 = vld [vmem:[#allocation3 + $0xc8] sm:$0xf0]  ;;  %v3252_v2 = vadd.f32 %v3251_v14, %v6411_v26  ;;  %v5105_v48 = vld [vmem:[#allocation3 + $0xd0] sm:$0xf0] }
 0x218   : > { %v3333_v36 = vpop.f32.mrf.mxu2  ;;  %v3424_v11 = vpop.f32.mrf.mxu3 }
 0x219   : > { %3826 = vmatmul.bf16.vlgmr.msra.gmra.mxu0 %v4246_v7  ;;  %v3334_v39 = vadd.f32 %v3333_v36, %v3245_v51  ;;  %v3254_v9 = vpop.f32.mrf.mxu1  ;;  %v4339_v7 = vld [vmem:[#allocation3 + $0x10c] sm:$0xf0] }
 0x21b   : > { %v3423_v61 = vadd.f32 %v3422_v23, %v3334_v39  ;;  %v5108_v23 = vld [vmem:[#allocation3 + $0xec] sm:$0xf] }
 0x21c   : > { %3569 = vmatmul.bf16.gmra.mxu1 %v4306_v16  ;;  %v4342_v51 = vor.u32 %v5108_v23, %v4339_v7 }
 0x21d   : > { %3742 = vmatmul.bf16.gmra.mxu3 %v4278_v18  ;;  %v6707_v12 = vadd.f32 %v3511_v50, %v3423_v61  ;;  %v5100_v50 = vld [vmem:[#allocation3 + $0xac] sm:$0xf] }
 0x21e   : > { %v3513_v44 = vpop.f32.mrf.mxu0  ;;  %v4314_v16 = vor.u32 %v5100_v50, %v4311_v20  ;;  %v4347_v50 = vld [vmem:[#allocation3 + $0x114] sm:$0xf0]  ;;  %v3255_v20 = vadd.f32 %v3254_v9, %v6429_v25 }
 0x220   : > { %v3335_v31 = vpop.f32.mrf.mxu2  ;;  %v3427_v8 = vpop.f32.mrf.mxu3 }
 0x221   : > { %v3336_v30 = vadd.f32 %v3335_v31, %v3247_v27  ;;  %v3256_v0 = vpop.f32.mrf.mxu1 }
 0x223   : > { %v3425_v6 = vadd.f32 %v3424_v11, %v3336_v30 }
 0x225   : > { %3653 = vmatmul.bf16.gmra.mxu2 %v4274_v22  ;;  %v6710_v15 = vadd.f32 %v3513_v44, %v3425_v6  ;;  %v4309_v44 = vld [vmem:[#allocation3 + $0xa8] sm:$0xf]  ;;  %v4317_v22 = vld [vmem:[#allocation3 + $0xb0] sm:$0xf] }
 0x226   : > { %v3516_v46 = vpop.f32.mrf.mxu0  ;;  %v4310_v34 = vor.u32 %v5104_v41, %v4309_v44  ;;  %v4318_v6 = vor.u32 %v5105_v48, %v4317_v22  ;;  %v5113_v44 = vld [vmem:[#allocation3 + $0x110] sm:$0xf0]  ;;  %v3257_v41 = vadd.f32 %v3256_v0, %v6451_v43  ;;  %v5114_v22 = vld [vmem:[#allocation3 + $0x118] sm:$0xf0] }
 0x228   : > { %v3338_v59 = vpop.f32.mrf.mxu2  ;;  %v3429_v45 = vpop.f32.mrf.mxu3 }
 0x229   : > { %3831 = vmatmul.bf16.gmra.mxu0 %v4282_v37  ;;  %v3339_v36 = vadd.f32 %v3338_v59, %v3250_v53  ;;  %v3259_v39 = vpop.f32.mrf.mxu1  ;;  %v4375_v37 = vld [vmem:[#allocation3 + $0x154] sm:$0xf0] }
 0x22b   : > { %v3428_v18 = vadd.f32 %v3427_v8, %v3339_v36  ;;  %v5117_v8 = vld [vmem:[#allocation3 + $0x134] sm:$0xf] }
 0x22c   : > { %3574 = vmatmul.bf16.gmra.mxu1 %v4342_v51  ;;  %v4378_v53 = vor.u32 %v5117_v8, %v4375_v37 }
 0x22d   : > { %3747 = vmatmul.bf16.gmra.mxu3 %v4314_v16  ;;  %v6713_v11 = vadd.f32 %v3516_v46, %v3428_v18  ;;  %v5109_v46 = vld [vmem:[#allocation3 + $0xf4] sm:$0xf] }
 0x22e   : > { %v3518_v61 = vpop.f32.mrf.mxu0  ;;  %v4350_v51 = vor.u32 %v5109_v46, %v4347_v50  ;;  %v4383_v46 = vld [vmem:[#allocation3 + $0x15c] sm:$0xf0]  ;;  %v3260_v50 = vadd.f32 %v3259_v39, %v6474_v21 }
 0x230   : > { %v3340_v27 = vpop.f32.mrf.mxu2  ;;  %v3432_v31 = vpop.f32.mrf.mxu3 }
 0x231   : > { %v3341_v29 = vadd.f32 %v3340_v27, %v3252_v2  ;;  %v3261_v30 = vpop.f32.mrf.mxu1 }
 0x233   : > { %v3430_v10 = vadd.f32 %v3429_v45, %v3341_v29 }
 0x235   : > { %3658 = vmatmul.bf16.gmra.mxu2 %v4310_v34  ;;  %v6716_v23 = vadd.f32 %v3518_v61, %v3430_v10  ;;  %v4345_v61 = vld [vmem:[#allocation3 + $0xf0] sm:$0xf]  ;;  %v4353_v34 = vld [vmem:[#allocation3 + $0xf8] sm:$0xf] }
 0x236   : > { %v3521_v7 = vpop.f32.mrf.mxu0  ;;  %v4346_v9 = vor.u32 %v5113_v44, %v4345_v61  ;;  %v4354_v10 = vor.u32 %v5114_v22, %v4353_v34  ;;  %v5122_v61 = vld [vmem:[#allocation3 + $0x158] sm:$0xf0]  ;;  %v3262_v44 = vadd.f32 %v3261_v30, %v6495_v5  ;;  %v5123_v34 = vld [vmem:[#allocation3 + $0x160] sm:$0xf0] }
 0x238   : > { %v3343_v26 = vpop.f32.mrf.mxu2  ;;  %v3434_v14 = vpop.f32.mrf.mxu3 }
 0x239   : > { %3836 = vmatmul.bf16.gmra.mxu0 %v4318_v6  ;;  %v3344_v59 = vadd.f32 %v3343_v26, %v3255_v20  ;;  %v3264_v36 = vpop.f32.mrf.mxu1  ;;  %v4411_v6 = vld [vmem:[#allocation3 + $0x19c] sm:$0xf0] }
 0x23b   : > { %v3433_v16 = vadd.f32 %v3432_v31, %v3344_v59  ;;  %v5126_v31 = vld [vmem:[#allocation3 + $0x17c] sm:$0xf] }
 0x23c   : > { %3579 = vmatmul.bf16.gmra.mxu1 %v4378_v53  ;;  %v4414_v20 = vor.u32 %v5126_v31, %v4411_v6 }
 0x23d   : > { %3752 = vmatmul.bf16.gmra.mxu3 %v4350_v51  ;;  %v6719_v45 = vadd.f32 %v3521_v7, %v3433_v16  ;;  %v5118_v7 = vld [vmem:[#allocation3 + $0x13c] sm:$0xf] }
 0x23e   : > { %v3523_v18 = vpop.f32.mrf.mxu0  ;;  %v4386_v53 = vor.u32 %v5118_v7, %v4383_v46  ;;  %v4419_v7 = vld [vmem:[#allocation3 + $0x1a4] sm:$0xf0]  ;;  %v3265_v46 = vadd.f32 %v3264_v36, %v6347_v28 }
 0x240   : > { %v3345_v2 = vpop.f32.mrf.mxu2  ;;  %v3437_v27 = vpop.f32.mrf.mxu3 }
 0x241   : > { %v3346_v25 = vadd.f32 %v3345_v2, %v3257_v41  ;;  %v3266_v29 = vpop.f32.mrf.mxu1 }
 0x243   : > { %v3435_v48 = vadd.f32 %v3434_v14, %v3346_v25 }
 0x245   : > { %3663 = vmatmul.bf16.gmra.mxu2 %v4346_v9  ;;  %v6722_v8 = vadd.f32 %v3523_v18, %v3435_v48  ;;  %v4381_v18 = vld [vmem:[#allocation3 + $0x138] sm:$0xf]  ;;  %v4389_v9 = vld [vmem:[#allocation3 + $0x140] sm:$0xf] }
 0x246   : > { %v3526_v37 = vpop.f32.mrf.mxu0  ;;  %v4382_v39 = vor.u32 %v5122_v61, %v4381_v18  ;;  %v4390_v48 = vor.u32 %v5123_v34, %v4389_v9  ;;  %v5131_v18 = vld [vmem:[#allocation3 + $0x1a0] sm:$0xf0]  ;;  %v4425_v9 = vld [vmem:[#allocation3 + $0x188] sm:$0xf]  ;;  %v5132_v34 = vld [vmem:[#allocation3 + $0x1a8] sm:$0xf0] }
 0x247   : > { %v6997_v61 = vld [vmem:[#allocation4_spill] sm:$0xff] }
 0x248   : > { %v3348_v43 = vpop.f32.mrf.mxu2  ;;  %v3439_v0 = vpop.f32.mrf.mxu3 }
 0x249   : > { %3841 = vmatmul.bf16.gmra.mxu0 %v4354_v10  ;;  %v3349_v26 = vadd.f32 %v3348_v43, %v3260_v50  ;;  %v3269_v59 = vpop.f32.mrf.mxu1  ;;  %v4447_v10 = vld [vmem:[#allocation3 + $0x1e4] sm:$0xf0] }
 0x24b   : > { %v3438_v51 = vadd.f32 %v3437_v27, %v3349_v26  ;;  %v5135_v27 = vld [vmem:[#allocation3 + $0x1c4] sm:$0xf] }
 0x24c   : > { %3584 = vmatmul.bf16.gmra.mxu1 %v4414_v20  ;;  %v4450_v50 = vor.u32 %v5135_v27, %v4447_v10  ;;  %v4483_v27 = vld [vmem:[#allocation3 + $0x22c] sm:$0xf0] }
 0x24d   : > { %3757 = vmatmul.bf16.gmra.mxu3 %v4386_v53  ;;  %v6725_v14 = vadd.f32 %v3526_v37, %v3438_v51  ;;  %v5127_v37 = vld [vmem:[#allocation3 + $0x184] sm:$0xf] }
 0x24e   : > { %v3528_v16 = vpop.f32.mrf.mxu0  ;;  %v4422_v20 = vor.u32 %v5127_v37, %v4419_v7  ;;  %v5136_v37 = vld [vmem:[#allocation3 + $0x1cc] sm:$0xf]  ;;  %v4455_v7 = vld [vmem:[#allocation3 + $0x1ec] sm:$0xf0] }
 0x250   : > { %v3350_v41 = vpop.f32.mrf.mxu2  ;;  %v3442_v2 = vpop.f32.mrf.mxu3 }
 0x251   : > { %v3351_v21 = vadd.f32 %v3350_v41, %v3262_v44  ;;  %v3271_v25 = vpop.f32.mrf.mxu1  ;;  %v3267_v44 = vadd.f32 %v3266_v29, %v6997_v61 }
 0x253   : > { %v3440_v22 = vadd.f32 %v3439_v0, %v3351_v21 }
 0x255   : > { %3668 = vmatmul.bf16.gmra.mxu2 %v4382_v39  ;;  %v6728_v31 = vadd.f32 %v3528_v16, %v3440_v22  ;;  %v4417_v16 = vld [vmem:[#allocation3 + $0x180] sm:$0xf] }
 0x256   : > { %v3531_v6 = vpop.f32.mrf.mxu0  ;;  %v4418_v36 = vor.u32 %v5131_v18, %v4417_v16 }
 0x258   : > { %v3353_v5 = vpop.f32.mrf.mxu2  ;;  %v3444_v30 = vpop.f32.mrf.mxu3 }
 0x259   : > { %3846 = vmatmul.bf16.gmra.mxu0 %v4390_v48  ;;  %v3354_v43 = vadd.f32 %v3353_v5, %v3265_v46  ;;  %v3274_v26 = vpop.f32.mrf.mxu1  ;;  %v4426_v48 = vor.u32 %v5132_v34, %v4425_v9  ;;  %v6998_v46 = vld [vmem:[#allocation5_spill] sm:$0xff] }
 0x25a   : > { %v3270_v5 = vadd.f32 %v3269_v59, %v6998_v46 }
 0x25b   : > { %v3443_v53 = vadd.f32 %v3442_v2, %v3354_v43  ;;  %v5144_v2 = vld [vmem:[#allocation3 + $0x20c] sm:$0xf] }
 0x25c   : > { %3589 = vmatmul.bf16.gmra.mxu1 %v4450_v50  ;;  %v4486_v43 = vor.u32 %v5144_v2, %v4483_v27  ;;  %v4461_v2 = vld [vmem:[#allocation3 + $0x1d0] sm:$0xf] }
 0x25d   : > { %3762 = vmatmul.bf16.gmra.mxu3 %v4422_v20  ;;  %v6731_v0 = vadd.f32 %v3531_v6, %v3443_v53  ;;  %v4458_v53 = vor.u32 %v5136_v37, %v4455_v7  ;;  %v4519_v7 = vld [vmem:[#allocation3 + $0x274] sm:$0xf0] }
 0x25e   : > { %v3533_v51 = vpop.f32.mrf.mxu0 }
 0x260   : > { %v3355_v41 = vpop.f32.mrf.mxu2  ;;  %v3447_v21 = vpop.f32.mrf.mxu3 }
 0x261   : > { %v3356_v28 = vadd.f32 %v3355_v41, %v3267_v44  ;;  %v3276_v39 = vpop.f32.mrf.mxu1  ;;  %v5140_v44 = vld [vmem:[#allocation3 + $0x1e8] sm:$0xf0]  ;;  %v6999_v41 = vld [vmem:[#allocation6_spill] sm:$0xff] }
 0x263   : > { %v3445_v22 = vadd.f32 %v3444_v30, %v3356_v28  ;;  %v3272_v28 = vadd.f32 %v3271_v25, %v6999_v41 }
 0x265   : > { %3673 = vmatmul.bf16.gmra.mxu2 %v4418_v36  ;;  %v6734_v10 = vadd.f32 %v3533_v51, %v3445_v22  ;;  %v4453_v51 = vld [vmem:[#allocation3 + $0x1c8] sm:$0xf] }
 0x266   : > { %v3536_v6 = vpop.f32.mrf.mxu0  ;;  %v4454_v34 = vor.u32 %v5140_v44, %v4453_v51 }
 0x268   : > { %v3358_v29 = vpop.f32.mrf.mxu2  ;;  %v3449_v50 = vpop.f32.mrf.mxu3 }
 0x269   : > { %3851 = vmatmul.bf16.gmra.mxu0 %v4426_v48  ;;  %v3359_v20 = vadd.f32 %v3358_v29, %v3270_v5  ;;  %v3279_v16 = vpop.f32.mrf.mxu1  ;;  %v5141_v48 = vld [vmem:[#allocation3 + $0x1f0] sm:$0xf0]  ;;  %v4491_v29 = vld [vmem:[#allocation3 + $0x234] sm:$0xf0] }
 0x26a   : > { %v4462_v37 = vor.u32 %v5141_v48, %v4461_v2  ;;  %v5145_v5 = vld [vmem:[#allocation3 + $0x214] sm:$0xf] }
 0x26b   : > { %v3448_v18 = vadd.f32 %v3447_v21, %v3359_v20  ;;  %v5153_v21 = vld [vmem:[#allocation3 + $0x254] sm:$0xf]  ;;  %v4494_v44 = vor.u32 %v5145_v5, %v4491_v29  ;;  %v4555_v29 = vld [vmem:[#allocation3 + $0x2bc] sm:$0xf0] }
 0x26c   : > { %3594 = vmatmul.bf16.gmra.mxu1 %v4486_v43  ;;  %v7000_v43 = vld [vmem:[#allocation7_spill] sm:$0xff] }
 0x26d   : > { %3767 = vmatmul.bf16.gmra.mxu3 %v4458_v53  ;;  %v6737_v30 = vadd.f32 %v3536_v6, %v3448_v18  ;;  %v3275_v20 = vadd.f32 %v3274_v26, %v7000_v43  ;;  %v4522_v18 = vor.u32 %v5153_v21, %v4519_v7  ;;  %v4497_v21 = vld [vmem:[#allocation3 + $0x218] sm:$0xf] }
 0x26e   : > { %v3538_v61 = vpop.f32.mrf.mxu0 }
 0x270   : > { %v3360_v36 = vpop.f32.mrf.mxu2  ;;  %v3452_v9 = vpop.f32.mrf.mxu3 }
 0x271   : > { %v3361_v59 = vadd.f32 %v3360_v36, %v3272_v28  ;;  %v3281_v22 = vpop.f32.mrf.mxu1 }
 0x273   : > { %v3450_v27 = vadd.f32 %v3449_v50, %v3361_v59  ;;  %v5149_v59 = vld [vmem:[#allocation3 + $0x230] sm:$0xf0] }
 0x275   : > { %3678 = vmatmul.bf16.gmra.mxu2 %v4454_v34  ;;  %v6740_v46 = vadd.f32 %v3538_v61, %v3450_v27  ;;  %v4489_v61 = vld [vmem:[#allocation3 + $0x210] sm:$0xf]  ;;  %v7001_v34 = vld [vmem:[#allocation8_spill] sm:$0xff] }
 0x276   : > { %v3541_v6 = vpop.f32.mrf.mxu0  ;;  %v3277_v2 = vadd.f32 %v3276_v39, %v7001_v34  ;;  %v4490_v43 = vor.u32 %v5149_v59, %v4489_v61 }
 0x278   : > { %v3363_v25 = vpop.f32.mrf.mxu2  ;;  %v3454_v53 = vpop.f32.mrf.mxu3 }
 0x279   : > { %3856 = vmatmul.bf16.gmra.mxu0 %v4462_v37  ;;  %v3364_v51 = vadd.f32 %v3363_v25, %v3275_v20  ;;  %v3560_v41 = vpop.f32.mrf.mxu1  ;;  %v5150_v37 = vld [vmem:[#allocation3 + $0x238] sm:$0xf0] }
 0x27a   : > { %v4498_v5 = vor.u32 %v5150_v37, %v4497_v21  ;;  %v5154_v25 = vld [vmem:[#allocation3 + $0x25c] sm:$0xf]  ;;  %v7003_v21 = vld [vmem:[#allocation10_spill] sm:$0xff] }
 0x27b   : > { %v3453_v28 = vadd.f32 %v3452_v9, %v3364_v51  ;;  %v5162_v9 = vld [vmem:[#allocation3 + $0x29c] sm:$0xf]  ;;  %v7002_v51 = vld [vmem:[#allocation9_spill] sm:$0xff]  ;;  %v3282_v37 = vadd.f32 %v3281_v22, %v7003_v21 }
 0x27c   : > { %3599 = vmatmul.bf16.gmra.mxu1 %v4522_v18  ;;  %v4527_v18 = vld [vmem:[#allocation3 + $0x27c] sm:$0xf0]  ;;  %v4558_v34 = vor.u32 %v5162_v9, %v4555_v29  ;;  %v5159_v9 = vld [vmem:[#allocation3 + $0x280] sm:$0xf0] }
 0x27d   : > { %3772 = vmatmul.bf16.gmra.mxu3 %v4494_v44  ;;  %v6743_v50 = vadd.f32 %v3541_v6, %v3453_v28  ;;  %v3280_v44 = vadd.f32 %v3279_v16, %v7002_v51  ;;  %v4530_v59 = vor.u32 %v5154_v25, %v4527_v18  ;;  %v5171_v25 = vld [vmem:[#allocation3 + $0x2e4] sm:$0xf]  ;;  %v4591_v18 = vld [vmem:[#allocation3 + $0x304] sm:$0xf0] }
 0x27e   : > { %v3543_v36 = vpop.f32.mrf.mxu0 }
 0x280   : > { %v3365_v48 = vpop.f32.mrf.mxu2  ;;  %v3457_v27 = vpop.f32.mrf.mxu3 }
 0x281   : > { %v3366_v26 = vadd.f32 %v3365_v48, %v3277_v2  ;;  %v3562_v57 = vpop.f32.mrf.mxu1 }
 0x283   : > { %v3455_v7 = vadd.f32 %v3454_v53, %v3366_v26 }
 0x285   : > { %3683 = vmatmul.bf16.gmra.mxu2 %v4490_v43  ;;  %v6746_v20 = vadd.f32 %v3543_v36, %v3455_v7  ;;  %v4525_v36 = vld [vmem:[#allocation3 + $0x258] sm:$0xf]  ;;  %v5158_v43 = vld [vmem:[#allocation3 + $0x278] sm:$0xf0] }
 0x286   : > { %v3546_v6 = vpop.f32.mrf.mxu0  ;;  %v4526_v51 = vor.u32 %v5158_v43, %v4525_v36 }
 0x288   : > { %v3368_v39 = vpop.f32.mrf.mxu2  ;;  %v3459_v28 = vpop.f32.mrf.mxu3 }
 0x289   : > { %3861 = vmatmul.bf16.gmra.mxu0 %v4498_v5  ;;  %v3369_v61 = vadd.f32 %v3368_v39, %v3280_v44  ;;  %v3565_v2 = vpop.f32.mrf.mxu1  ;;  %v4533_v5 = vld [vmem:[#allocation3 + $0x260] sm:$0xf]  ;;  %v5163_v39 = vld [vmem:[#allocation3 + $0x2a4] sm:$0xf] }
 0x28b   : > { %v3458_v48 = vadd.f32 %v3457_v27, %v3369_v61  ;;  %v4534_v27 = vor.u32 %v5159_v9, %v4533_v5 }
 0x28c   : > { %3604 = vmatmul.bf16.gmra.mxu1 %v4558_v34  ;;  %v4563_v34 = vld [vmem:[#allocation3 + $0x2c4] sm:$0xf0] }
 0x28d   : > { %3777 = vmatmul.bf16.gmra.mxu3 %v4530_v59  ;;  %v6749_v53 = vadd.f32 %v3546_v6, %v3458_v48  ;;  %v4594_v59 = vor.u32 %v5171_v25, %v4591_v18  ;;  %v3561_v48 = vadd.f32 %v3560_v41, %v6524_v24  ;;  %v4566_v36 = vor.u32 %v5163_v39, %v4563_v34  ;;  %v4569_v24 = vld [vmem:[#allocation3 + $0x2a8] sm:$0xf]  ;;  %v5168_v41 = vld [vmem:[#allocation3 + $0x2c8] sm:$0xf0] }
 0x28e   : > { %v3548_v26 = vpop.f32.mrf.mxu0  ;;  %v4570_v34 = vor.u32 %v5168_v41, %v4569_v24  ;;  %v4597_v24 = vld [vmem:[#allocation3 + $0x2e8] sm:$0xf]  ;;  %v5176_v41 = vld [vmem:[#allocation3 + $0x308] sm:$0xf0] }
 0x290   : > { %v3370_v7 = vpop.f32.mrf.mxu2  ;;  %v3738_v47 = vpop.f32.mrf.mxu3 }
 0x291   : > { %v3371_v16 = vadd.f32 %v3370_v7, %v3282_v37  ;;  %v6752_v58 = vpop.f32.mrf.mxu1  ;;  %v4561_v37 = vld [vmem:[#allocation3 + $0x2a0] sm:$0xf]  ;;  %v5167_v7 = vld [vmem:[#allocation3 + $0x2c0] sm:$0xf0] }
 0x293   : > { %v3460_v29 = vadd.f32 %v3459_v28, %v3371_v16  ;;  %v3563_v16 = vadd.f32 %v3562_v57, %v6536_v63  ;;  %v3566_v63 = vadd.f32 %v3565_v2, %v6552_v60 }
 0x295   : > { %3688 = vmatmul.bf16.gmra.mxu2 %v4526_v51  ;;  %v6754_v6 = vadd.f32 %v3548_v26, %v3460_v29  ;;  %v4562_v29 = vor.u32 %v5167_v7, %v4561_v37 }
 0x296   : > { %v3827_v44 = vpop.f32.mrf.mxu0 }
 0x298   : > { %v3649_v61 = vpop.f32.mrf.mxu2  ;;  %v3740_v22 = vpop.f32.mrf.mxu3 }
 0x299   : > { %3866 = vmatmul.bf16.gmra.mxu0 %v4534_v27  ;;  %v6757_v43 = vpop.f32.mrf.mxu1  ;;  %v3650_v21 = vadd.f32 %v3649_v61, %v3561_v48  ;;  %v5180_v61 = vld [vmem:[#allocation3 + $0x32c] sm:$0xf]  ;;  %v4599_v48 = vld [vmem:[#allocation3 + $0x30c] sm:$0xf0] }
 0x29b   : > { %v3739_v26 = vadd.f32 %v3738_v47, %v3650_v21  ;;  %v5172_v47 = vld [vmem:[#allocation3 + $0x2ec] sm:$0xf] }
 0x29c   : > { %3609 = vmatmul.bf16.gmra.mxu1 %v4594_v59  ;;  %v4627_v59 = vld [vmem:[#allocation3 + $0x34c] sm:$0xf0] }
 0x29d   : > { %3782 = vmatmul.bf16.gmra.mxu3 %v4566_v36  ;;  %v3828_v27 = vadd.f32 %v3827_v44, %v3739_v26  ;;  %v4630_v7 = vor.u32 %v5180_v61, %v4627_v59 }
 0x29e   : > { %v3829_v28 = vpop.f32.mrf.mxu0 }
 0x29f   : > { %v4008_v36 = vmul.f32 %v3828_v27, %v3828_v27 }
 0x2a0   : > { %v3651_v51 = vpop.f32.mrf.mxu2  ;;  %v3743_v5 = vpop.f32.mrf.mxu3 }
 0x2a1   : > { %v3652_v9 = vadd.f32 %v3651_v51, %v3563_v16  ;;  %v6760_v25 = vpop.f32.mrf.mxu1  ;;  %v4602_v51 = vor.u32 %v5172_v47, %v4599_v48  ;;  %v4605_v48 = vld [vmem:[#allocation3 + $0x2f0] sm:$0xf] }
 0x2a3   : > { %v3741_v18 = vadd.f32 %v3740_v22, %v3652_v9 }
 0x2a5   : > { %v3830_v39 = vadd.f32 %v3829_v28, %v3741_v18  ;;  %3693 = vmatmul.bf16.gmra.mxu2 %v4562_v29 }
 0x2a6   : > { %v3832_v57 = vpop.f32.mrf.mxu0 }
 0x2a7   : > { %v5362_v44 = vpack.c.bf16 %v3830_v39, %v3828_v27  ;;  %v3971_v22 = vadd.f32 %v3830_v39, %v3828_v27  ;;  %v4009_v21 = vmul.f32 %v3830_v39, %v3830_v39  ;;  %v3568_v39 = vadd.f32 %v6752_v58, %v6561_v40 }
 0x2a8   : > { %v3654_v28 = vpop.f32.mrf.mxu2  ;;  %v3745_v37 = vpop.f32.mrf.mxu3 }
 0x2a9   : > { %5363 = vst [vmem:[%s6767_s20] sm:$0xff] %v5362_v44   ;;  %v4040_v26 = vadd.f32 %v4009_v21, %v4008_v36  ;;  %3871 = vmatmul.bf16.gmra.mxu0 %v4570_v34  ;;  %v3655_v16 = vadd.f32 %v3654_v28, %v3566_v63  ;;  %v6771_v9 = vpop.f32.mrf.mxu1  ;;  %v4598_v63 = vor.u32 %v5176_v41, %v4597_v24  ;;  %v5189_v28 = vld [vmem:[#allocation3 + $0x374] sm:$0xf] }
 0x2ab   : > { %v3744_v29 = vadd.f32 %v3743_v5, %v3655_v16  ;;  %v5177_v5 = vld [vmem:[#allocation3 + $0x310] sm:$0xf0] }
 0x2ac   : > { %3614 = vmatmul.bf16.gmra.mxu1 %v4630_v7  ;;  %v4606_v21 = vor.u32 %v5177_v5, %v4605_v48  ;;  %v5181_v16 = vld [vmem:[#allocation3 + $0x334] sm:$0xf] }
 0x2ad   : > { %v3833_v60 = vadd.f32 %v3832_v57, %v3744_v29  ;;  %3787 = vmatmul.bf16.gmra.mxu3 %v4602_v51  ;;  %v4635_v51 = vld [vmem:[#allocation3 + $0x354] sm:$0xf0]  ;;  %v5185_v48 = vld [vmem:[#allocation3 + $0x350] sm:$0xf0] }
 0x2ae   : > { %v3834_v2 = vpop.f32.mrf.mxu0 }
 0x2af   : > { %v3972_v18 = vadd.f32 %v3971_v22, %v3833_v60  ;;  %v4010_v27 = vmul.f32 %v3833_v60, %v3833_v60  ;;  %v4663_v22 = vld [vmem:[#allocation3 + $0x394] sm:$0xf0] }
 0x2b0   : > { %v3656_v61 = vpop.f32.mrf.mxu2  ;;  %v3748_v59 = vpop.f32.mrf.mxu3 }
 0x2b1   : > { %v4041_v36 = vadd.f32 %v4040_v26, %v4010_v27  ;;  %v3657_v34 = vadd.f32 %v3656_v61, %v3568_v39  ;;  %v6775_v47 = vpop.f32.mrf.mxu1  ;;  %v3571_v26 = vadd.f32 %v6757_v43, %v6585_v52  ;;  %v4666_v27 = vor.u32 %v5189_v28, %v4663_v22 }
 0x2b2   : > { %v4638_v39 = vor.u32 %v5181_v16, %v4635_v51  ;;  %v3573_v52 = vadd.f32 %v6760_v25, %v6596_v3  ;;  %v4641_v16 = vld [vmem:[#allocation3 + $0x338] sm:$0xf]  ;;  %v5190_v25 = vld [vmem:[#allocation3 + $0x37c] sm:$0xf] }
 0x2b3   : > { %v3746_v44 = vadd.f32 %v3745_v37, %v3657_v34 }
 0x2b5   : > { %v3835_v57 = vadd.f32 %v3834_v2, %v3746_v44  ;;  %3698 = vmatmul.bf16.gmra.mxu2 %v4598_v63 }
 0x2b6   : > { %v3837_v7 = vpop.f32.mrf.mxu0 }
 0x2b7   : > { %v5367_v40 = vpack.c.bf16 %v3835_v57, %v3833_v60  ;;  %v3973_v58 = vadd.f32 %v3972_v18, %v3835_v57  ;;  %v4011_v29 = vmul.f32 %v3835_v57, %v3835_v57  ;;  %v4633_v18 = vld [vmem:[#allocation3 + $0x330] sm:$0xf] }
 0x2b8   : > { %v3659_v24 = vpop.f32.mrf.mxu2  ;;  %v3750_v41 = vpop.f32.mrf.mxu3  ;;  %v4634_v28 = vor.u32 %v5185_v48, %v4633_v18 }
 0x2b9   : > { %5454 = vst [vmem:[%s6767_s20 + $0x8] sm:$0xff] %v5367_v40   ;;  %v4042_v37 = vadd.f32 %v4041_v36, %v4011_v29  ;;  %3876 = vmatmul.bf16.gmra.mxu0 %v4606_v21  ;;  %v3660_v2 = vadd.f32 %v3659_v24, %v3571_v26  ;;  %v6780_v61 = vpop.f32.mrf.mxu1  ;;  %v4699_v40 = vld [vmem:[#allocation3 + $0x3dc] sm:$0xf0]  ;;  %v3576_v26 = vadd.f32 %v6771_v9, %v6617_v13  ;;  %v7006_v13 = vshrl.u32 %v6662_v56, 16 }
 0x2ba   : > { %v4671_v24 = vld [vmem:[#allocation3 + $0x39c] sm:$0xf0] }
 0x2bb   : > { %v3749_v34 = vadd.f32 %v3748_v59, %v3660_v2  ;;  %v5186_v59 = vld [vmem:[#allocation3 + $0x358] sm:$0xf0]  ;;  %v1296_v9 = vrot.slane %v7006_v13, 4  ;;  %v5199_v13 = vld [vmem:[#allocation3 + $0x3c4] sm:$0xf] }
 0x2bc   : > { %3619 = vmatmul.bf16.gmra.mxu1 %v4666_v27 }
 0x2bd   : > { %v3838_v63 = vadd.f32 %v3837_v7, %v3749_v34  ;;  %3792 = vmatmul.bf16.gmra.mxu3 %v4638_v39  ;;  %v5198_v7 = vld [vmem:[#allocation3 + $0x3bc] sm:$0xf] }
 0x2be   : > { %v3839_v60 = vpop.f32.mrf.mxu0  ;;  %v4702_v39 = vor.u32 %v5198_v7, %v4699_v40 }
 0x2bf   : > { %v3974_v5 = vadd.f32 %v3973_v58, %v3838_v63  ;;  %v4012_v44 = vmul.f32 %v3838_v63, %v3838_v63  ;;  %v4642_v58 = vor.u32 %v5186_v59, %v4641_v16 }
 0x2c0   : > { %v3661_v43 = vpop.f32.mrf.mxu2  ;;  %v3753_v57 = vpop.f32.mrf.mxu3 }
 0x2c1   : > { %v4043_v36 = vadd.f32 %v4042_v37, %v4012_v44  ;;  %v3662_v21 = vadd.f32 %v3661_v43, %v3573_v52  ;;  %v6784_v22 = vpop.f32.mrf.mxu1  ;;  %v7005_v44 = vshll.u32 %v6662_v56, 16 }
 0x2c3   : > { %v3751_v51 = vadd.f32 %v3750_v41, %v3662_v21  ;;  %v1290_v41 = vrot.slane %v1272_v49, 4  ;;  %v1294_v52 = vrot.slane %v7005_v44, 5  ;;  %v5195_v44 = vld [vmem:[#allocation3 + $0x3a0] sm:$0xf0] }
 0x2c5   : > { %v3840_v29 = vadd.f32 %v3839_v60, %v3751_v51  ;;  %3703 = vmatmul.bf16.gmra.mxu2 %v4634_v28  ;;  %v7004_v60 = vshll.u32 %v6642_v38, 16  ;;  %v615_v28 = vld [vmem:[#allocation2 + $0x10c] sm:$0xf]  ;;  %v1297_v59 = vor.u32 %v1296_v9, %v1294_v52 }
 0x2c6   : > { %v3842_v3 = vpop.f32.mrf.mxu0  ;;  %v1300_v49 = vshll.u32 %v615_v28, 16 }
 0x2c7   : > { %v5372_v27 = vpack.c.bf16 %v3840_v29, %v3838_v63  ;;  %v3975_v37 = vadd.f32 %v3974_v5, %v3840_v29  ;;  %v4013_v2 = vmul.f32 %v3840_v29, %v3840_v29  ;;  %v1291_v48 = vrot.slane %v7004_v60, 5  ;;  %v4669_v60 = vld [vmem:[#allocation3 + $0x378] sm:$0xf] }
 0x2c8   : > { %v3664_v34 = vpop.f32.mrf.mxu2  ;;  %v3755_v18 = vpop.f32.mrf.mxu3  ;;  %v4674_v5 = vor.u32 %v5190_v25, %v4671_v24  ;;  %v1298_v7 = vrot.slane %v1297_v59, 4  ;;  %v1302_v40 = vrot.slane %v1300_v49, 5  ;;  %v618_v59 = vld [vmem:[#allocation2 + $0x118] sm:$0xf] }
 0x2c9   : > { %5455 = vst [vmem:[%s6767_s20 + $0x10] sm:$0xff] %v5372_v27   ;;  %v4044_v43 = vadd.f32 %v4043_v36, %v4013_v2  ;;  %3881 = vmatmul.bf16.gmra.mxu0 %v4642_v58  ;;  %v3665_v63 = vadd.f32 %v3664_v34, %v3576_v26  ;;  %v6797_v21 = vpop.f32.mrf.mxu1  ;;  %v1292_v16 = vor.u32 %v1291_v48, %v1290_v41  ;;  %v5194_v27 = vld [vmem:[#allocation3 + $0x398] sm:$0xf0]  ;;  %v4677_v48 = vld [vmem:[#allocation3 + $0x380] sm:$0xf] }
 0x2ca   : > { %v1303_v58 = vsel %vm6252_vm5, %v1298_v7, %v1302_v40  ;;  %v4670_v34 = vor.u32 %v5194_v27, %v4669_v60  ;;  %v616_v7 = vld [vmem:[#allocation2 + $0x110] sm:$0xf]  ;;  %1601 = vst [vmem:[#allocation3 + $0x478] sm:$0xf] %v618_v59 }
 0x2cb   : > { %v3754_v51 = vadd.f32 %v3753_v57, %v3665_v63  ;;  %v1293_v38 = vrot.slane %v1292_v16, 4  ;;  %v3578_v57 = vadd.f32 %v6775_v47, %v6624_v62  ;;  %1631 = vst [vmem:[#allocation3 + $0x434] sm:$0xf] %v1303_v58  ;;  %v4678_v63 = vor.u32 %v5195_v44, %v4677_v48  ;;  %v5207_v62 = vld [vmem:[#allocation3 + $0x404] sm:$0xf] }
 0x2cc   : > { %3624 = vmatmul.bf16.gmra.mxu1 %v4702_v39  ;;  %1537 = vst [vmem:[#allocation3 + $0x470] sm:$0xf] %v1303_v58  ;;  %v4735_v47 = vld [vmem:[#allocation3 + $0x424] sm:$0xf0]  ;;  %v617_v16 = vld [vmem:[#allocation2 + $0x114] sm:$0xf] }
 0x2cd   : > { %v3843_v29 = vadd.f32 %v3842_v3, %v3754_v51  ;;  %3797 = vmatmul.bf16.gmra.mxu3 %v4674_v5  ;;  %v1295_v36 = vsel %vm6252_vm5, %v1293_v38, %v1294_v52  ;;  %v3581_v5 = vadd.f32 %v6780_v61, %v6657_v54  ;;  %v1307_v27 = vshrl.u32 %v616_v7, 16  ;;  %1600 = vst [vmem:[#allocation3 + $0x454] sm:$0xf] %v617_v16 }
 0x2ce   : > { %v3844_v56 = vpop.f32.mrf.mxu0  ;;  %1630 = vst [vmem:[#allocation3 + $0x410] sm:$0xf] %v1295_v36  ;;  %v1321_v58 = vshrl.u32 %v618_v59, 16 }
 0x2cf   : > { %v3976_v26 = vadd.f32 %v3975_v37, %v3843_v29  ;;  %v4014_v25 = vmul.f32 %v3843_v29, %v3843_v29  ;;  %1536 = vst [vmem:[#allocation3 + $0x44c] sm:$0xf] %v1295_v36  ;;  %v4707_v37 = vld [vmem:[#allocation3 + $0x3e4] sm:$0xf0]  ;;  %v1315_v36 = vshll.u32 %v617_v16, 16 }
 0x2d0   : > { %v3666_v24 = vpop.f32.mrf.mxu2  ;;  %v3758_v2 = vpop.f32.mrf.mxu3  ;;  %v4710_v28 = vor.u32 %v5199_v13, %v4707_v37 }
 0x2d1   : > { %v4045_v3 = vadd.f32 %v4044_v43, %v4014_v25  ;;  %v3667_v39 = vadd.f32 %v3666_v24, %v3578_v57  ;;  %v6805_v41 = vpop.f32.mrf.mxu1  ;;  %v1324_v24 = vshll.u32 %v618_v59, 16  ;;  %v1331_v13 = vrot.slane %v1315_v36, 5 }
 0x2d3   : > { %v3756_v52 = vadd.f32 %v3755_v18, %v3667_v39  ;;  %v1312_v18 = vshrl.u32 %v617_v16, 16  ;;  %v1323_v39 = vrot.slane %v1321_v58, 7 }
 0x2d5   : > { %v3845_v9 = vadd.f32 %v3844_v56, %v3756_v52  ;;  %3708 = vmatmul.bf16.gmra.mxu2 %v4670_v34  ;;  %v4738_v56 = vor.u32 %v5207_v62, %v4735_v47  ;;  %v1314_v57 = vrot.slane %v1312_v18, 7  ;;  %v1330_v34 = vrot.slane %v1312_v18, 4  ;;  %v4705_v47 = vld [vmem:[#allocation3 + $0x3c0] sm:$0xf] }
 0x2d6   : > { %v3847_v43 = vpop.f32.mrf.mxu0  ;;  %v1326_v37 = vor.u32 %v1324_v24, %v1323_v39  ;;  %v1336_v62 = vrot.slane %v1321_v58, 4 }
 0x2d7   : > { %v5377_v49 = vpack.c.bf16 %v3845_v9, %v3843_v29  ;;  %v3977_v51 = vadd.f32 %v3976_v26, %v3845_v9  ;;  %v4015_v38 = vmul.f32 %v3845_v9, %v3845_v9  ;;  %v619_v29 = vld [vmem:[#allocation2 + $0x11c] sm:$0xf]  ;;  %v4210_v26 = vrot.slane %v1307_v27, 11 }
 0x2d8   : > { %v3669_v40 = vpop.f32.mrf.mxu2  ;;  %v3760_v60 = vpop.f32.mrf.mxu3  ;;  %v1317_v44 = vor.u32 %v1315_v36, %v1314_v57  ;;  %v1319_v52 = vrot.slane %v1314_v57, 4  ;;  %v1334_v9 = vrot.slane %v1324_v24, 5  ;;  %v1332_v16 = vor.u32 %v1331_v13, %v1330_v34  ;;  %v4771_v34 = vld [vmem:[#allocation3 + $0x46c] sm:$0xf0] }
 0x2d9   : > { %5456 = vst [vmem:[%s6767_s20 + $0x18] sm:$0xff] %v5377_v49   ;;  %v4046_v25 = vadd.f32 %v4045_v3, %v4015_v38  ;;  %3886 = vmatmul.bf16.gmra.mxu0 %v4678_v63  ;;  %v3670_v54 = vadd.f32 %v3669_v40, %v3581_v5  ;;  %v6810_v61 = vpop.f32.mrf.mxu1  ;;  %v1340_v3 = vshll.u32 %v619_v29, 16  ;;  %v5203_v38 = vld [vmem:[#allocation3 + $0x3e0] sm:$0xf0]  ;;  %v4713_v29 = vld [vmem:[#allocation3 + $0x3c8] sm:$0xf] }
 0x2da   : > { %v1318_v5 = vsel %vm5643_vm2, %v4210_v26, %v1317_v44  ;;  %v1337_v59 = vor.u32 %v1336_v62, %v1334_v9  ;;  %v4706_v57 = vor.u32 %v5203_v38, %v4705_v47  ;;  %v5204_v26 = vld [vmem:[#allocation3 + $0x3e8] sm:$0xf0]  ;;  %v3586_v62 = vadd.f32 %v6797_v21, %v6686_v1 }
 0x2db   : > { %v3759_v48 = vadd.f32 %v3758_v2, %v3670_v54  ;;  %v1327_v2 = vsel %vm5643_vm2, %v1319_v52, %v1326_v37  ;;  %1568 = vst [vmem:[#allocation3 + $0x450] sm:$0xf] %v1318_v5  ;;  %v1342_v7 = vrot.slane %v1340_v3, 5  ;;  %v4714_v39 = vor.u32 %v5204_v26, %v4713_v29  ;;  %v5208_v44 = vld [vmem:[#allocation3 + $0x40c] sm:$0xf] }
 0x2dc   : > { %3629 = vmatmul.bf16.gmra.mxu1 %v4738_v56  ;;  %v3583_v56 = vadd.f32 %v6784_v22, %v6681_v17  ;;  %1569 = vst [vmem:[#allocation3 + $0x474] sm:$0xf] %v1327_v2  ;;  %v1338_v36 = vrot.slane %v1337_v59, 4  ;;  %v4743_v52 = vld [vmem:[#allocation3 + $0x42c] sm:$0xf0]  ;;  %v3588_v1 = vadd.f32 %v6805_v41, %v6690_v4  ;;  %v3591_v4 = vadd.f32 %v6810_v61, %v6694_v19 }
 0x2dd   : > { %v3848_v63 = vadd.f32 %v3847_v43, %v3759_v48  ;;  %3802 = vmatmul.bf16.gmra.mxu3 %v4710_v28  ;;  %v1333_v43 = vrot.slane %v1332_v16, 4  ;;  %v4746_v16 = vor.u32 %v5208_v44, %v4743_v52  ;;  %v4741_v59 = vld [vmem:[#allocation3 + $0x408] sm:$0xf] }
 0x2de   : > { %v3849_v49 = vpop.f32.mrf.mxu0 }
 0x2df   : > { %v3978_v18 = vadd.f32 %v3977_v51, %v3848_v63  ;;  %v4016_v40 = vmul.f32 %v3848_v63, %v3848_v63  ;;  %v1335_v32 = vsel %vm6252_vm5, %v1333_v43, %v1334_v9  ;;  %v1343_v51 = vsel %vm6252_vm5, %v1338_v36, %v1342_v7  ;;  %v5212_v7 = vld [vmem:[#allocation3 + $0x428] sm:$0xf0] }
 0x2e0   : > { %v3671_v28 = vpop.f32.mrf.mxu2  ;;  %v3763_v27 = vpop.f32.mrf.mxu3  ;;  %1632 = vst [vmem:[#allocation3 + $0x458] sm:$0xf] %v1335_v32  ;;  %v4742_v36 = vor.u32 %v5212_v7, %v4741_v59 }
 0x2e1   : > { %v4047_v58 = vadd.f32 %v4046_v25, %v4016_v40  ;;  %v3672_v54 = vadd.f32 %v3671_v28, %v3583_v56  ;;  %v6818_v24 = vpop.f32.mrf.mxu1  ;;  %1633 = vst [vmem:[#allocation3 + $0x47c] sm:$0xf] %v1343_v51  ;;  %v5216_v25 = vld [vmem:[#allocation3 + $0x44c] sm:$0xf]  ;;  %v5217_v51 = vld [vmem:[#allocation3 + $0x454] sm:$0xf] }
 0x2e2   : > { %v4774_v47 = vor.u32 %v5216_v25, %v4771_v34 }
 0x2e3   : > { %v3761_v17 = vadd.f32 %v3760_v60, %v3672_v54  ;;  %v4749_v54 = vld [vmem:[#allocation3 + $0x410] sm:$0xf] }
 0x2e5   : > { %v3850_v22 = vadd.f32 %v3849_v49, %v3761_v17  ;;  %3713 = vmatmul.bf16.gmra.mxu2 %v4706_v57  ;;  %v4779_v17 = vld [vmem:[#allocation3 + $0x474] sm:$0xf0] }
 0x2e6   : > { %v3852_v48 = vpop.f32.mrf.mxu0  ;;  %v4782_v52 = vor.u32 %v5217_v51, %v4779_v17 }
 0x2e7   : > { %v5382_v13 = vpack.c.bf16 %v3850_v22, %v3848_v63  ;;  %v3979_v37 = vadd.f32 %v3978_v18, %v3850_v22  ;;  %v4017_v9 = vmul.f32 %v3850_v22, %v3850_v22  ;;  %v4785_v59 = vld [vmem:[#allocation3 + $0x458] sm:$0xf] }
 0x2e8   : > { %v3674_v35 = vpop.f32.mrf.mxu2  ;;  %v3765_v3 = vpop.f32.mrf.mxu3  ;;  %v5222_v7 = vld [vmem:[#allocation3 + $0x478] sm:$0xf0] }
 0x2e9   : > { %5457 = vst [vmem:[%s6767_s20 + $0x20] sm:$0xff] %v5382_v13   ;;  %v4048_v60 = vadd.f32 %v4047_v58, %v4017_v9  ;;  %3891 = vmatmul.bf16.gmra.mxu0 %v4714_v39  ;;  %v3675_v5 = vadd.f32 %v3674_v35, %v3586_v62  ;;  %v6827_v49 = vpop.f32.mrf.mxu1  ;;  %v4777_v35 = vld [vmem:[#allocation3 + $0x450] sm:$0xf] }
 0x2eb   : > { %v3764_v38 = vadd.f32 %v3763_v27, %v3675_v5  ;;  %v5213_v27 = vld [vmem:[#allocation3 + $0x430] sm:$0xf0]  ;;  %v3593_v5 = vadd.f32 %v6818_v24, %v6698_v55  ;;  %v3596_v55 = vadd.f32 %v6827_v49, %v6701_v42 }
 0x2ec   : > { %3634 = vmatmul.bf16.gmra.mxu1 %v4774_v47  ;;  %v4750_v29 = vor.u32 %v5213_v27, %v4749_v54 }
 0x2ed   : > { %v3853_v2 = vadd.f32 %v3852_v48, %v3764_v38  ;;  %3807 = vmatmul.bf16.gmra.mxu3 %v4746_v16 }
 0x2ee   : > { %v3854_v63 = vpop.f32.mrf.mxu0 }
 0x2ef   : > { %v3980_v18 = vadd.f32 %v3979_v37, %v3853_v2  ;;  %v4018_v40 = vmul.f32 %v3853_v2, %v3853_v2 }
 0x2f0   : > { %v3676_v21 = vpop.f32.mrf.mxu2  ;;  %v3768_v56 = vpop.f32.mrf.mxu3 }
 0x2f1   : > { %v4049_v43 = vadd.f32 %v4048_v60, %v4018_v40  ;;  %v3677_v28 = vadd.f32 %v3676_v21, %v3588_v1  ;;  %v3597_v58 = vpop.f32.mrf.mxu1  ;;  %v4786_v1 = vor.u32 %v5222_v7, %v4785_v59 }
 0x2f3   : > { %v3766_v57 = vadd.f32 %v3765_v3, %v3677_v28  ;;  %v5221_v3 = vld [vmem:[#allocation3 + $0x470] sm:$0xf0] }
 0x2f5   : > { %v3855_v32 = vadd.f32 %v3854_v63, %v3766_v57  ;;  %3718 = vmatmul.bf16.gmra.mxu2 %v4742_v36 }
 0x2f6   : > { %v3857_v26 = vpop.f32.mrf.mxu0 }
 0x2f7   : > { %v5387_v22 = vpack.c.bf16 %v3855_v32, %v3853_v2  ;;  %v3981_v39 = vadd.f32 %v3980_v18, %v3855_v32  ;;  %v4019_v25 = vmul.f32 %v3855_v32, %v3855_v32  ;;  %v4778_v2 = vor.u32 %v5221_v3, %v4777_v35 }
 0x2f8   : > { %v3679_v41 = vpop.f32.mrf.mxu2  ;;  %v3770_v34 = vpop.f32.mrf.mxu3 }
 0x2f9   : > { %5458 = vst [vmem:[%s6767_s20 + $0x28] sm:$0xff] %v5387_v22   ;;  %v4050_v48 = vadd.f32 %v4049_v43, %v4019_v25  ;;  %3896 = vmatmul.bf16.gmra.mxu0 %v4750_v29  ;;  %v3680_v44 = vadd.f32 %v3679_v41, %v3591_v4  ;;  %v3600_v13 = vpop.f32.mrf.mxu1  ;;  %v3598_v22 = vadd.f32 %v3597_v58, %v6704_v33 }
 0x2fb   : > { %v3769_v37 = vadd.f32 %v3768_v56, %v3680_v44 }
 0x2fd   : > { %v3858_v9 = vadd.f32 %v3857_v26, %v3769_v37  ;;  %3812 = vmatmul.bf16.gmra.mxu3 %v4782_v52 }
 0x2fe   : > { %v3859_v62 = vpop.f32.mrf.mxu0 }
 0x2ff   : > { %v3982_v47 = vadd.f32 %v3981_v39, %v3858_v9  ;;  %v4020_v60 = vmul.f32 %v3858_v9, %v3858_v9 }
 0x300   : > { %v3681_v19 = vpop.f32.mrf.mxu2  ;;  %v3773_v61 = vpop.f32.mrf.mxu3 }
 0x301   : > { %v4051_v16 = vadd.f32 %v4050_v48, %v4020_v60  ;;  %v3682_v38 = vadd.f32 %v3681_v19, %v3593_v5  ;;  %v3602_v63 = vpop.f32.mrf.mxu1 }
 0x303   : > { %v3771_v18 = vadd.f32 %v3770_v34, %v3682_v38 }
 0x305   : > { %v3860_v40 = vadd.f32 %v3859_v62, %v3771_v18  ;;  %3723 = vmatmul.bf16.gmra.mxu2 %v4778_v2 }
 0x306   : > { %v3862_v21 = vpop.f32.mrf.mxu0 }
 0x307   : > { %v5392_v56 = vpack.c.bf16 %v3860_v40, %v3858_v9  ;;  %v3983_v43 = vadd.f32 %v3982_v47, %v3860_v40  ;;  %v4021_v28 = vmul.f32 %v3860_v40, %v3860_v40  ;;  %v3601_v9 = vadd.f32 %v3600_v13, %v6707_v12 }
 0x308   : > { %v3684_v24 = vpop.f32.mrf.mxu2  ;;  %v3775_v36 = vpop.f32.mrf.mxu3 }
 0x309   : > { %5459 = vst [vmem:[%s6767_s20 + $0x30] sm:$0xff] %v5392_v56   ;;  %v4052_v54 = vadd.f32 %v4051_v16, %v4021_v28  ;;  %3901 = vmatmul.bf16.gmra.mxu0 %v4786_v1  ;;  %v3685_v27 = vadd.f32 %v3684_v24, %v3596_v55  ;;  %v3605_v57 = vpop.f32.mrf.mxu1  ;;  %v3603_v16 = vadd.f32 %v3602_v63, %v6710_v15 }
 0x30a   : > { %v3606_v56 = vadd.f32 %v3605_v57, %v6713_v11 }
 0x30b   : > { %v3774_v32 = vadd.f32 %v3773_v61, %v3685_v27 }
 0x30d   : > { %v3863_v29 = vadd.f32 %v3862_v21, %v3774_v32 }
 0x30e   : > { %v3864_v26 = vpop.f32.mrf.mxu0 }
 0x30f   : > { %v3984_v51 = vadd.f32 %v3983_v43, %v3863_v29  ;;  %v4022_v17 = vmul.f32 %v3863_v29, %v3863_v29 }
 0x310   : > { %v3686_v39 = vpop.f32.mrf.mxu2  ;;  %v3778_v25 = vpop.f32.mrf.mxu3 }
 0x311   : > { %v4053_v4 = vadd.f32 %v4052_v54, %v4022_v17  ;;  %v3687_v41 = vadd.f32 %v3686_v39, %v3598_v22  ;;  %v3607_v49 = vpop.f32.mrf.mxu1 }
 0x313   : > { %v3776_v42 = vadd.f32 %v3775_v36, %v3687_v41 }
 0x315   : > { %v3865_v34 = vadd.f32 %v3864_v26, %v3776_v42 }
 0x316   : > { %v3867_v48 = vpop.f32.mrf.mxu0 }
 0x317   : > { %v5397_v44 = vpack.c.bf16 %v3865_v34, %v3863_v29  ;;  %v3985_v52 = vadd.f32 %v3984_v51, %v3865_v34  ;;  %v4023_v37 = vmul.f32 %v3865_v34, %v3865_v34  ;;  %v3608_v29 = vadd.f32 %v3607_v49, %v6716_v23 }
 0x318   : > { %v3689_v62 = vpop.f32.mrf.mxu2  ;;  %v3780_v35 = vpop.f32.mrf.mxu3 }
 0x319   : > { %5460 = vst [vmem:[%s6767_s20 + $0x38] sm:$0xff] %v5397_v44   ;;  %v4054_v3 = vadd.f32 %v4053_v4, %v4023_v37  ;;  %v3690_v47 = vadd.f32 %v3689_v62, %v3601_v9  ;;  %v3610_v58 = vpop.f32.mrf.mxu1 }
 0x31a   : > { %v3611_v34 = vadd.f32 %v3610_v58, %v6719_v45 }
 0x31b   : > { %v3779_v60 = vadd.f32 %v3778_v25, %v3690_v47 }
 0x31d   : > { %v3868_v33 = vadd.f32 %v3867_v48, %v3779_v60 }
 0x31e   : > { %v3869_v5 = vpop.f32.mrf.mxu0 }
 0x31f   : > { %v3986_v19 = vadd.f32 %v3985_v52, %v3868_v33  ;;  %v4024_v61 = vmul.f32 %v3868_v33, %v3868_v33 }
 0x320   : > { %v3691_v38 = vpop.f32.mrf.mxu2  ;;  %v3783_v2 = vpop.f32.mrf.mxu3 }
 0x321   : > { %v4055_v59 = vadd.f32 %v4054_v3, %v4024_v61  ;;  %v3692_v7 = vadd.f32 %v3691_v38, %v3603_v16  ;;  %v3612_v43 = vpop.f32.mrf.mxu1 }
 0x322   : > { %v3613_v47 = vadd.f32 %v3612_v43, %v6722_v8 }
 0x323   : > { %v3781_v18 = vadd.f32 %v3780_v35, %v3692_v7 }
 0x325   : > { %v3870_v12 = vadd.f32 %v3869_v5, %v3781_v18 }
 0x326   : > { %v3872_v13 = vpop.f32.mrf.mxu0 }
 0x327   : > { %v5402_v40 = vpack.c.bf16 %v3870_v12, %v3868_v33  ;;  %v3987_v1 = vadd.f32 %v3986_v19, %v3870_v12  ;;  %v4025_v21 = vmul.f32 %v3870_v12, %v3870_v12 }
 0x328   : > { %v3694_v28 = vpop.f32.mrf.mxu2  ;;  %v3785_v55 = vpop.f32.mrf.mxu3 }
 0x329   : > { %5461 = vst [vmem:[%s6767_s20 + $0x40] sm:$0xff] %v5402_v40   ;;  %v4056_v24 = vadd.f32 %v4055_v59, %v4025_v21  ;;  %v3695_v36 = vadd.f32 %v3694_v28, %v3606_v56  ;;  %v3615_v39 = vpop.f32.mrf.mxu1 }
 0x32a   : > { %v3616_v7 = vadd.f32 %v3615_v39, %v6725_v14 }
 0x32b   : > { %v3784_v54 = vadd.f32 %v3783_v2, %v3695_v36 }
 0x32d   : > { %v3873_v15 = vadd.f32 %v3872_v13, %v3784_v54 }
 0x32e   : > { %v3874_v63 = vpop.f32.mrf.mxu0 }
 0x32f   : > { %v3988_v27 = vadd.f32 %v3987_v1, %v3873_v15  ;;  %v4026_v32 = vmul.f32 %v3873_v15, %v3873_v15 }
 0x330   : > { %v3696_v26 = vpop.f32.mrf.mxu2  ;;  %v3788_v51 = vpop.f32.mrf.mxu3 }
 0x331   : > { %v4057_v17 = vadd.f32 %v4056_v24, %v4026_v32  ;;  %v3697_v22 = vadd.f32 %v3696_v26, %v3608_v29  ;;  %v3617_v23 = vpop.f32.mrf.mxu1 }
 0x332   : > { %v3618_v28 = vadd.f32 %v3617_v23, %v6728_v31 }
 0x333   : > { %v3786_v11 = vadd.f32 %v3785_v55, %v3697_v22 }
 0x335   : > { %v3875_v57 = vadd.f32 %v3874_v63, %v3786_v11 }
 0x336   : > { %v3877_v25 = vpop.f32.mrf.mxu0 }
 0x337   : > { %v5407_v4 = vpack.c.bf16 %v3875_v57, %v3873_v15  ;;  %v3989_v41 = vadd.f32 %v3988_v27, %v3875_v57  ;;  %v4027_v42 = vmul.f32 %v3875_v57, %v3875_v57 }
 0x338   : > { %v3699_v48 = vpop.f32.mrf.mxu2  ;;  %v3790_v44 = vpop.f32.mrf.mxu3 }
 0x339   : > { %5462 = vst [vmem:[%s6767_s20 + $0x48] sm:$0xff] %v5407_v4   ;;  %v4058_v52 = vadd.f32 %v4057_v17, %v4027_v42  ;;  %v3700_v37 = vadd.f32 %v3699_v48, %v3611_v34  ;;  %v3620_v58 = vpop.f32.mrf.mxu1 }
 0x33b   : > { %v3789_v9 = vadd.f32 %v3788_v51, %v3700_v37  ;;  %v3621_v51 = vadd.f32 %v3620_v58, %v6731_v0 }
 0x33d   : > { %v3878_v49 = vadd.f32 %v3877_v25, %v3789_v9 }
 0x33e   : > { %v3879_v62 = vpop.f32.mrf.mxu0 }
 0x33f   : > { %v3990_v35 = vadd.f32 %v3989_v41, %v3878_v49  ;;  %v4028_v3 = vmul.f32 %v3878_v49, %v3878_v49 }
 0x340   : > { %v3701_v60 = vpop.f32.mrf.mxu2  ;;  %v3793_v33 = vpop.f32.mrf.mxu3 }
 0x341   : > { %v4059_v5 = vadd.f32 %v4058_v52, %v4028_v3  ;;  %v3702_v19 = vadd.f32 %v3701_v60, %v3613_v47  ;;  %v3622_v55 = vpop.f32.mrf.mxu1 }
 0x342   : > { %v3623_v34 = vadd.f32 %v3622_v55, %v6734_v10 }
 0x343   : > { %v3791_v61 = vadd.f32 %v3790_v44, %v3702_v19 }
 0x345   : > { %v3880_v45 = vadd.f32 %v3879_v62, %v3791_v61 }
 0x346   : > { %v3882_v16 = vpop.f32.mrf.mxu0 }
 0x347   : > { %v5412_v38 = vpack.c.bf16 %v3880_v45, %v3878_v49  ;;  %v3991_v2 = vadd.f32 %v3990_v35, %v3880_v45  ;;  %v4029_v59 = vmul.f32 %v3880_v45, %v3880_v45 }
 0x348   : > { %v3704_v18 = vpop.f32.mrf.mxu2  ;;  %v3795_v12 = vpop.f32.mrf.mxu3 }
 0x349   : > { %5463 = vst [vmem:[%s6767_s20 + $0x50] sm:$0xff] %v5412_v38   ;;  %v4060_v13 = vadd.f32 %v4059_v5, %v4029_v59  ;;  %v3705_v40 = vadd.f32 %v3704_v18, %v3616_v7  ;;  %v3625_v57 = vpop.f32.mrf.mxu1 }
 0x34a   : > { %v3626_v47 = vadd.f32 %v3625_v57, %v6737_v30 }
 0x34b   : > { %v3794_v1 = vadd.f32 %v3793_v33, %v3705_v40 }
 0x34d   : > { %v3883_v8 = vadd.f32 %v3882_v16, %v3794_v1 }
 0x34e   : > { %v3884_v21 = vpop.f32.mrf.mxu0 }
 0x34f   : > { %v3992_v56 = vadd.f32 %v3991_v2, %v3883_v8  ;;  %v4030_v43 = vmul.f32 %v3883_v8, %v3883_v8 }
 0x350   : > { %v3706_v24 = vpop.f32.mrf.mxu2  ;;  %v3798_v36 = vpop.f32.mrf.mxu3 }
 0x351   : > { %v4061_v54 = vadd.f32 %v4060_v13, %v4030_v43  ;;  %v3707_v15 = vadd.f32 %v3706_v24, %v3618_v28  ;;  %v3627_v0 = vpop.f32.mrf.mxu1 }
 0x352   : > { %v3628_v2 = vadd.f32 %v3627_v0, %v6740_v46 }
 0x353   : > { %v3796_v63 = vadd.f32 %v3795_v12, %v3707_v15 }
 0x355   : > { %v3885_v14 = vadd.f32 %v3884_v21, %v3796_v63 }
 0x356   : > { %v3887_v27 = vpop.f32.mrf.mxu0 }
 0x357   : > { %v5417_v32 = vpack.c.bf16 %v3885_v14, %v3883_v8  ;;  %v3993_v29 = vadd.f32 %v3992_v56, %v3885_v14  ;;  %v4031_v26 = vmul.f32 %v3885_v14, %v3885_v14 }
 0x358   : > { %v3709_v17 = vpop.f32.mrf.mxu2  ;;  %v3800_v22 = vpop.f32.mrf.mxu3 }
 0x359   : > { %5464 = vst [vmem:[%s6767_s20 + $0x58] sm:$0xff] %v5417_v32   ;;  %v4062_v39 = vadd.f32 %v4061_v54, %v4031_v26  ;;  %v3710_v11 = vadd.f32 %v3709_v17, %v3621_v51  ;;  %v3630_v58 = vpop.f32.mrf.mxu1 }
 0x35a   : > { %v3631_v56 = vadd.f32 %v3630_v58, %v6743_v50 }
 0x35b   : > { %v3799_v31 = vadd.f32 %v3798_v36, %v3710_v11 }
 0x35d   : > { %v3888_v25 = vadd.f32 %v3887_v27, %v3799_v31 }
 0x35e   : > { %v3889_v4 = vpop.f32.mrf.mxu0 }
 0x35f   : > { %v3994_v41 = vadd.f32 %v3993_v29, %v3888_v25  ;;  %v4032_v42 = vmul.f32 %v3888_v25, %v3888_v25 }
 0x360   : > { %v3711_v48 = vpop.f32.mrf.mxu2  ;;  %v3803_v44 = vpop.f32.mrf.mxu3 }
 0x361   : > { %v4063_v52 = vadd.f32 %v4062_v39, %v4032_v42  ;;  %v3712_v37 = vadd.f32 %v3711_v48, %v3623_v34  ;;  %v3632_v28 = vpop.f32.mrf.mxu1 }
 0x362   : > { %v3633_v14 = vadd.f32 %v3632_v28, %v6746_v20 }
 0x363   : > { %v3801_v9 = vadd.f32 %v3800_v22, %v3712_v37 }
 0x365   : > { %v3890_v23 = vadd.f32 %v3889_v4, %v3801_v9 }
 0x366   : > { %v3892_v49 = vpop.f32.mrf.mxu0 }
 0x367   : > { %v5422_v62 = vpack.c.bf16 %v3890_v23, %v3888_v25  ;;  %v3995_v35 = vadd.f32 %v3994_v41, %v3890_v23  ;;  %v4033_v3 = vmul.f32 %v3890_v23, %v3890_v23 }
 0x368   : > { %v3714_v60 = vpop.f32.mrf.mxu2  ;;  %v3805_v19 = vpop.f32.mrf.mxu3 }
 0x369   : > { %5465 = vst [vmem:[%s6767_s20 + $0x60] sm:$0xff] %v5422_v62   ;;  %v4064_v33 = vadd.f32 %v4063_v52, %v4033_v3  ;;  %v3715_v5 = vadd.f32 %v3714_v60, %v3626_v47  ;;  %v3635_v51 = vpop.f32.mrf.mxu1 }
 0x36a   : > { %v3636_v57 = vadd.f32 %v3635_v51, %v6749_v53 }
 0x36b   : > { %v3804_v61 = vadd.f32 %v3803_v44, %v3715_v5 }
 0x36d   : > { %v3893_v10 = vadd.f32 %v3892_v49, %v3804_v61 }
 0x36e   : > { %v3894_v45 = vpop.f32.mrf.mxu0 }
 0x36f   : > { %v3996_v16 = vadd.f32 %v3995_v35, %v3893_v10  ;;  %v4034_v38 = vmul.f32 %v3893_v10, %v3893_v10 }
 0x370   : > { %v3716_v59 = vpop.f32.mrf.mxu2  ;;  %v3808_v13 = vpop.f32.mrf.mxu3 }
 0x371   : > { %v4065_v7 = vadd.f32 %v4064_v33, %v4034_v38  ;;  %v3717_v18 = vadd.f32 %v3716_v59, %v3628_v2  ;;  %v3637_v20 = vpop.f32.mrf.mxu1 }
 0x372   : > { %v3638_v37 = vadd.f32 %v3637_v20, %v6754_v6 }
 0x373   : > { %v3806_v12 = vadd.f32 %v3805_v19, %v3717_v18 }
 0x375   : > { %v3895_v30 = vadd.f32 %v3894_v45, %v3806_v12 }
 0x376   : > { %v3897_v40 = vpop.f32.mrf.mxu0 }
 0x377   : > { %v5427_v1 = vpack.c.bf16 %v3895_v30, %v3893_v10  ;;  %v3997_v8 = vadd.f32 %v3996_v16, %v3895_v30  ;;  %v4035_v21 = vmul.f32 %v3895_v30, %v3895_v30 }
 0x378   : > { %v3719_v43 = vpop.f32.mrf.mxu2  ;;  %v3810_v46 = vpop.f32.mrf.mxu3 }
 0x379   : > { %5466 = vst [vmem:[%s6767_s20 + $0x68] sm:$0xff] %v5427_v1   ;;  %v4066_v55 = vadd.f32 %v4065_v7, %v4035_v21  ;;  %v3720_v24 = vadd.f32 %v3719_v43, %v3631_v56 }
 0x37b   : > { %v3809_v36 = vadd.f32 %v3808_v13, %v3720_v24 }
 0x37d   : > { %v3898_v54 = vadd.f32 %v3897_v40, %v3809_v36 }
 0x37e   : > { %v3899_v27 = vpop.f32.mrf.mxu0 }
 0x37f   : > { %v3998_v15 = vadd.f32 %v3997_v8, %v3898_v54  ;;  %v4036_v63 = vmul.f32 %v3898_v54, %v3898_v54 }
 0x380   : > { %v3721_v32 = vpop.f32.mrf.mxu2  ;;  %v3813_v25 = vpop.f32.mrf.mxu3 }
 0x381   : > { %v4067_v29 = vadd.f32 %v4066_v55, %v4036_v63  ;;  %v3722_v26 = vadd.f32 %v3721_v32, %v3633_v14 }
 0x383   : > { %v3811_v17 = vadd.f32 %v3810_v46, %v3722_v26 }
 0x385   : > { %v3900_v50 = vadd.f32 %v3899_v27, %v3811_v17 }
 0x386   : > { %v3902_v42 = vpop.f32.mrf.mxu0 }
 0x387   : > { %v5432_v22 = vpack.c.bf16 %v3900_v50, %v3898_v54  ;;  %v3999_v39 = vadd.f32 %v3998_v15, %v3900_v50  ;;  %v4037_v11 = vmul.f32 %v3900_v50, %v3900_v50 }
 0x388   : > { %v3724_v31 = vpop.f32.mrf.mxu2  ;;  %v3815_v49 = vpop.f32.mrf.mxu3 }
 0x389   : > { %5467 = vst [vmem:[%s6767_s20 + $0x70] sm:$0xff] %v5432_v22   ;;  %v4068_v4 = vadd.f32 %v4067_v29, %v4037_v11  ;;  %v3725_v41 = vadd.f32 %v3724_v31, %v3636_v57 }
 0x38b   : > { %v3814_v34 = vadd.f32 %v3813_v25, %v3725_v41 }
 0x38d   : > { %v3903_v48 = vadd.f32 %v3902_v42, %v3814_v34 }
 0x38e   : > { %v3904_v53 = vpop.f32.mrf.mxu0 }
 0x38f   : > { %v4000_v44 = vadd.f32 %v3999_v39, %v3903_v48  ;;  %v4038_v52 = vmul.f32 %v3903_v48, %v3903_v48 }
 0x390   : > { %v3726_v9 = vpop.f32.mrf.mxu2 }
 0x391   : > { %v4069_v0 = vadd.f32 %v4068_v4, %v4038_v52  ;;  %v3727_v23 = vadd.f32 %v3726_v9, %v3638_v37 }
 0x393   : > { %v3816_v62 = vadd.f32 %v3815_v49, %v3727_v23 }
 0x395   : > { %v3905_v35 = vadd.f32 %v3904_v53, %v3816_v62 }
 0x397   : > { %v5437_v3 = vpack.c.bf16 %v3905_v35, %v3903_v48  ;;  %v4001_v47 = vadd.f32 %v4000_v44, %v3905_v35  ;;  %v4039_v60 = vmul.f32 %v3905_v35, %v3905_v35 }
 0x399   : > { %5468 = vst [vmem:[%s6767_s20 + $0x78] sm:$0xff] %v5437_v3   ;;  %v4002_v33 = vrot.slane %v4001_v47, 4  ;;  %v4070_v5 = vadd.f32 %v4069_v0, %v4039_v60 }
 0x39b   : > { %v4003_v19 = vadd.f32 %v4002_v33, %v4001_v47  ;;  %v4071_v61 = vrot.slane %v4070_v5, 4 }
 0x39d   : > { %v4004_v10 = vrot.slane %v4003_v19, 2  ;;  %v4072_v45 = vadd.f32 %v4071_v61, %v4070_v5 }
 0x39f   : > { %v4005_v6 = vadd.f32 %v4004_v10, %v4003_v19  ;;  %v4073_v58 = vrot.slane %v4072_v45, 2 }
 0x3a1   : > { %v4006_v16 = vrot.slane %v4005_v6, 1  ;;  %v4074_v38 = vadd.f32 %v4073_v58, %v4072_v45 }
 0x3a3   : > { %v4007_v2 = vadd.f32 %v4006_v16, %v4005_v6  ;;  %v4075_v59 = vrot.slane %v4074_v38, 1 }
 0x3a5   : > { %v4076_v7 = vadd.f32 %v4075_v59, %v4074_v38  ;;  %4077 = vst [vmem:[%s265_s24] sm:$0x1] %v4007_v2 }
 0x3a7   : > { %4078 = vst [vmem:[%s268_s28] sm:$0x1] %v4076_v7 }
 0x3a8 PF: > { %s17_s21 = sadd.s32 1, %s5514_s21  }
 0x3a9   : > { %p14_p4 = scmp.ge.s32.totalorder %s17_s21, 4  }
 0x3ab   :  { %16 = sbr.rel (!%p14_p4) target bundleno = 1 (0x1), region = 92 }

</bundles_post_ra>
